<compile_context>
chip_gen: v7x
topology: tpu7x:2x2x1
jax: 0.10.0
libtpu: 0.0.40
codegen_flags: <defaults>
</compile_context>

<pallas_src>
import jax
import jax.numpy as jnp
from jax.experimental import pallas as pl
from jax.experimental.pallas import tpu as pltpu

# ---------------- DMPNet configuration (defaults of the PyTorch module) ------
N_BASIS = 5                                   # N
T_STEPS = 10                                  # T
L_SUB = 10                                    # l
TAU = 1.0                                     # tau
A_X = 1.0
A_Z = 25.0                                    # a_z
DOF = 9                                       # len(state_index) = len(arange(7,16))
DT = TAU / (T_STEPS * L_SUB)                  # 0.01
TIME_STEPS = int(round(TAU / DT)) + 1         # 101
STATE_LO, STATE_HI = 7, 16                    # state_index = arange(7, 16)
VEL_LO, VEL_HI = 22, 31                       # vel_index   = arange(22, 31)
OUT_SIZE = N_BASIS * DOF + DOF                # 54

_VMEM = pl.BlockSpec(memory_space=pltpu.MemorySpace.VMEM)


# ------------------------------ fused Pallas kernel ---------------------------
def _dmpnet_kernel(x_ref, w0_ref, b0_ref, w1_ref, b1_ref,
                   wg_ref, bg_ref, wf_ref, bf_ref, out_ref):
    """MLP + DMP Euler integration, one launch.

    x   : (B, in)        network input (also provides y0 / dy0 slices)
    w0/b0, w1/b1         hidden layers (tanh)
    wg/bg : (H, 9)/(1,9) last-fc columns producing `goal` (x100 applied here)
    wf/bf : (H, 900)/(1,900) last-fc columns pre-contracted with the
            time-invariant normalized RBF basis (x100 folded in); column
            index = t*DOF + d, i.e. f_all[:, t*9:(t+1)*9] * (goal - y0) is the
            forcing term of step t.
    out : (B, T_STEPS*DOF)  a[b, k*9+d] = y[b,d] at step (k+1)*l - y at step k*l
    """
    x = x_ref[...]
    h = jnp.tanh(jnp.dot(x, w0_ref[...],
                         preferred_element_type=jnp.float32) + b0_ref[...])
    h = jnp.tanh(jnp.dot(h, w1_ref[...],
                         preferred_element_type=jnp.float32) + b1_ref[...])

    goal = (jnp.dot(h, wg_ref[...],
                    preferred_element_type=jnp.float32) + bg_ref[...]) * 100.0   # (B, 9)
    f_all = jnp.dot(h, wf_ref[...],
                    preferred_element_type=jnp.float32) + bf_ref[...]            # (B, 900)

    y0 = x[:, STATE_LO:STATE_HI]        # (B, 9)
    dy0 = x[:, VEL_LO:VEL_HI]           # (B, 9)
    gmy0 = goal - y0                    # loop invariant

    az_bz = A_Z * (A_Z * 0.25)          # a_z * b_z
    dt_tau = DT * TAU

    y = y0
    z = dy0 * TAU
    for k in range(T_STEPS):            # 10 chunks of l=10 unrolled Euler steps
        y_start = y
        for j in range(L_SUB):
            t = k * L_SUB + j
            fx = f_all[:, t * DOF:(t + 1) * DOF] * gmy0
            dz = az_bz * (goal - y) - A_Z * z + fx
            y, z = y + z * dt_tau, z + dz * dt_tau
        out_ref[:, k * DOF:(k + 1) * DOF] = y - y_start


# ------------------------------ JAX wrapper -----------------------------------
def dmp_net_forward(x, params, c, sigma2):
    """Pallas implementation of DMPNet.forward (goal_type='int_path')."""
    batch = x.shape[0]
    w0, b0, w1, b1, wl, bl = params
    hidden = wl.shape[0]

    # --- data-independent precompute (weights + constants only; hoistable) ---
    decay = 1.0 - A_X * DT                                   # x_{t+1} = x_t * decay
    t_idx = jnp.arange(TIME_STEPS - 1, dtype=jnp.float32)
    x_t = decay ** t_idx                                     # canonical system x_t
    psi = jnp.exp(-0.5 * (x_t[:, None] - c[None, :]) ** 2 / sigma2[None, :])  # (100, N)
    psi_n = psi * (x_t / jnp.sum(psi, axis=1))[:, None]      # psi * x / sum(psi)

    wg = wl[:, :DOF]                                         # goal columns
    bg = bl[:, :DOF]
    wlw = wl[:, DOF:].reshape(hidden, DOF, N_BASIS)          # basis-weight columns
    blw = bl[0, DOF:].reshape(DOF, N_BASIS)
    # Fold (x100 scale) and the normalized RBF contraction into the last layer:
    # WF[k, t*DOF+d] = 100 * sum_n wl[k, DOF+5d+n] * psi_n[t, n]
    wf = 100.0 * jnp.einsum('kdn,tn->ktd', wlw, psi_n).reshape(hidden, -1)  # (H, 900)
    bf = 100.0 * jnp.einsum('dn,tn->td', blw, psi_n).reshape(1, -1)         # (1, 900)

    out = pl.pallas_call(
        _dmpnet_kernel,
        out_shape=jax.ShapeDtypeStruct((batch, T_STEPS * DOF), jnp.float32),
        in_specs=[_VMEM] * 9,
        out_specs=_VMEM,
    )(x, w0, b0, w1, b1, wg, bg, wf, bf)

    # (B, T*DOF) -> (B, DOF, T)   (tiny: 720 B)
    return out.reshape(batch, T_STEPS, DOF).transpose(0, 2, 1)


# ------------------------- pure-JAX reference (for checking) ------------------
def reference_forward(x, params, c, sigma2):
    w0, b0, w1, b1, wl, bl = params
    h = jnp.tanh(x @ w0 + b0)
    h = jnp.tanh(h @ w1 + b1)
    out = (h @ wl + bl) * 100.0
    batch = x.shape[0]
    goal = out[:, :DOF].reshape(batch * DOF)
    w = out[:, DOF:DOF * (N_BASIS + 1)].reshape(batch * DOF, N_BASIS)
    y0 = x[:, STATE_LO:STATE_HI].reshape(batch * DOF)
    dy0 = x[:, VEL_LO:VEL_HI].reshape(batch * DOF)

    y = y0
    z = dy0 * TAU
    xp = 1.0
    b_z = A_Z / 4.0
    ys = [y0]
    for _ in range(TIME_STEPS - 1):
        psi = jnp.exp(-0.5 * (xp - c) ** 2 / sigma2)
        fx = (w @ psi) * xp * (goal - y0) / jnp.sum(psi)
        xp = xp + (-A_X * xp) * DT
        dz = A_Z * (b_z * (goal - y) - z) + fx
        dy = z * TAU
        dz = dz * TAU
        y = y + dy * DT
        z = z + dz * DT
        ys.append(y)
    yfull = jnp.stack(ys, axis=1)                                # (R, 101)
    yv = yfull.reshape(batch, DOF, -1)[:, :, ::L_SUB]
    return yv[:, :, 1:] - yv[:, :, :-1]


# ------------------------------ parameter init --------------------------------
def init_params(key, input_size, hidden_sizes):
    """Deterministic synthetic init (fanin-uniform hidden, bias=0.1; small last_fc)."""
    keys = jax.random.split(key, len(hidden_sizes) + 1)
    params = []
    in_size = input_size
    for i, h in enumerate(hidden_sizes):
        bound = 1.0 / jnp.sqrt(jnp.asarray(in_size, jnp.float32))
        w = jax.random.uniform(keys[i], (in_size, h), jnp.float32, -bound, bound)
        b = jnp.full((1, h), 0.1, jnp.float32)       # b_init_value = 0.1
        params += [w, b]
        in_size = h
    wl = 0.003 * jax.random.normal(keys[-1], (in_size, OUT_SIZE), jnp.float32)
    bl = jnp.zeros((1, OUT_SIZE), jnp.float32)
    params += [wl, bl]
    return tuple(params)


# ------------------------------------ main -------------------------------------
if __name__ == "__main__":
    key = jax.random.PRNGKey(0)
    kx, kp = jax.random.split(key)

    batch, input_size = 2, 32          # input must cover vel_index up to 30
    hidden_sizes = (32, 32)

    x = jax.random.normal(kx, (batch, input_size), jnp.float32)
    params = init_params(kp, input_size, hidden_sizes)

    # DMPParameters: c = exp(-a_x * linspace(0,1,N)); sigma2 = N^1.5 / c / a_x
    c = jnp.exp(-A_X * jnp.linspace(0.0, 1.0, N_BASIS)).astype(jnp.float32)
    sigma2 = (N_BASIS ** 1.5 / c / A_X).astype(jnp.float32)

    fwd = jax.jit(dmp_net_forward)
    a = fwd(x, params, c, sigma2)
    a = jax.block_until_ready(a)

    a_ref = reference_forward(x, params, c, sigma2)
    assert a.shape == (batch, DOF, T_STEPS), a.shape
    assert bool(jnp.allclose(a, a_ref, rtol=1e-2, atol=1e-2)), \
        float(jnp.max(jnp.abs(a - a_ref)))

    print("KERNEL_OK")
</pallas_src>

<mosaic_0001>
module attributes {stable_mosaic.version = 11 : i64} {
  func.func @_dmpnet_kernel(%arg0: memref<2x32xf32, #tpu.memory_space<vmem>>, %arg1: memref<32x32xf32, #tpu.memory_space<vmem>>, %arg2: memref<1x32xf32, #tpu.memory_space<vmem>>, %arg3: memref<32x32xf32, #tpu.memory_space<vmem>>, %arg4: memref<1x32xf32, #tpu.memory_space<vmem>>, %arg5: memref<32x9xf32, #tpu.memory_space<vmem>>, %arg6: memref<1x9xf32, #tpu.memory_space<vmem>>, %arg7: memref<32x900xf32, #tpu.memory_space<vmem>>, %arg8: memref<1x900xf32, #tpu.memory_space<vmem>>, %arg9: memref<2x90xf32, #tpu.memory_space<vmem>>) attributes {dimension_semantics = [], scalar_prefetch = 0 : i64, scratch_operands = 0 : i64, tpu.core_type = #tpu.core_type<tc>} {
    %c0 = arith.constant 0 : index
    %c0_0 = arith.constant 0 : index
    %0 = vector.load %arg0[%c0, %c0_0] : memref<2x32xf32, #tpu.memory_space<vmem>>, vector<2x32xf32>
    %c0_1 = arith.constant 0 : index
    %c0_2 = arith.constant 0 : index
    %1 = vector.load %arg1[%c0_1, %c0_2] : memref<32x32xf32, #tpu.memory_space<vmem>>, vector<32x32xf32>
    %cst = arith.constant dense<0.000000e+00> : vector<2x32xf32>
    %2 = tpu.matmul %0, %1, %cst {dimension_numbers = #tpu.dot_dimension_numbers<[1], [0], [0], [1], [0, 0, 1, 1], [], []>} : vector<2x32xf32>, vector<32x32xf32>, vector<2x32xf32> -> vector<2x32xf32>
    %c0_3 = arith.constant 0 : index
    %c0_4 = arith.constant 0 : index
    %3 = vector.load %arg2[%c0_3, %c0_4] : memref<1x32xf32, #tpu.memory_space<vmem>>, vector<1x32xf32>
    %4 = vector.broadcast %3 : vector<1x32xf32> to vector<2x32xf32>
    %5 = arith.addf %2, %4 : vector<2x32xf32>
    %6 = math.tanh %5 : vector<2x32xf32>
    %c0_5 = arith.constant 0 : index
    %c0_6 = arith.constant 0 : index
    %7 = vector.load %arg3[%c0_5, %c0_6] : memref<32x32xf32, #tpu.memory_space<vmem>>, vector<32x32xf32>
    %cst_7 = arith.constant dense<0.000000e+00> : vector<2x32xf32>
    %8 = tpu.matmul %6, %7, %cst_7 {dimension_numbers = #tpu.dot_dimension_numbers<[1], [0], [0], [1], [0, 0, 1, 1], [], []>} : vector<2x32xf32>, vector<32x32xf32>, vector<2x32xf32> -> vector<2x32xf32>
    %c0_8 = arith.constant 0 : index
    %c0_9 = arith.constant 0 : index
    %9 = vector.load %arg4[%c0_8, %c0_9] : memref<1x32xf32, #tpu.memory_space<vmem>>, vector<1x32xf32>
    %10 = vector.broadcast %9 : vector<1x32xf32> to vector<2x32xf32>
    %11 = arith.addf %8, %10 : vector<2x32xf32>
    %12 = math.tanh %11 : vector<2x32xf32>
    %c0_10 = arith.constant 0 : index
    %c0_11 = arith.constant 0 : index
    %13 = vector.load %arg5[%c0_10, %c0_11] : memref<32x9xf32, #tpu.memory_space<vmem>>, vector<32x9xf32>
    %cst_12 = arith.constant dense<0.000000e+00> : vector<2x9xf32>
    %14 = tpu.matmul %12, %13, %cst_12 {dimension_numbers = #tpu.dot_dimension_numbers<[1], [0], [0], [1], [0, 0, 1, 1], [], []>} : vector<2x32xf32>, vector<32x9xf32>, vector<2x9xf32> -> vector<2x9xf32>
    %c0_13 = arith.constant 0 : index
    %c0_14 = arith.constant 0 : index
    %15 = vector.load %arg6[%c0_13, %c0_14] : memref<1x9xf32, #tpu.memory_space<vmem>>, vector<1x9xf32>
    %16 = vector.broadcast %15 : vector<1x9xf32> to vector<2x9xf32>
    %17 = arith.addf %14, %16 : vector<2x9xf32>
    %cst_15 = arith.constant 1.000000e+02 : f32
    %18 = vector.broadcast %cst_15 : f32 to vector<2x9xf32>
    %19 = arith.mulf %17, %18 : vector<2x9xf32>
    %c0_16 = arith.constant 0 : index
    %c0_17 = arith.constant 0 : index
    %20 = vector.load %arg7[%c0_16, %c0_17] : memref<32x900xf32, #tpu.memory_space<vmem>>, vector<32x900xf32>
    %cst_18 = arith.constant dense<0.000000e+00> : vector<2x900xf32>
    %21 = tpu.matmul %12, %20, %cst_18 {dimension_numbers = #tpu.dot_dimension_numbers<[1], [0], [0], [1], [0, 0, 1, 1], [], []>} : vector<2x32xf32>, vector<32x900xf32>, vector<2x900xf32> -> vector<2x900xf32>
    %c0_19 = arith.constant 0 : index
    %c0_20 = arith.constant 0 : index
    %22 = vector.load %arg8[%c0_19, %c0_20] : memref<1x900xf32, #tpu.memory_space<vmem>>, vector<1x900xf32>
    %23 = vector.broadcast %22 : vector<1x900xf32> to vector<2x900xf32>
    %24 = arith.addf %21, %23 : vector<2x900xf32>
    %25 = vector.extract_strided_slice %0 {offsets = [0, 7], sizes = [2, 9], strides = [1, 1]} : vector<2x32xf32> to vector<2x9xf32>
    %26 = vector.extract_strided_slice %0 {offsets = [0, 22], sizes = [2, 9], strides = [1, 1]} : vector<2x32xf32> to vector<2x9xf32>
    %27 = arith.subf %19, %25 : vector<2x9xf32>
    %cst_21 = arith.constant 1.000000e+00 : f32
    %28 = vector.broadcast %cst_21 : f32 to vector<2x9xf32>
    %29 = arith.mulf %26, %28 : vector<2x9xf32>
    %30 = vector.extract_strided_slice %24 {offsets = [0, 0], sizes = [2, 9], strides = [1, 1]} : vector<2x900xf32> to vector<2x9xf32>
    %31 = arith.mulf %30, %27 : vector<2x9xf32>
    %32 = arith.subf %19, %25 : vector<2x9xf32>
    %cst_22 = arith.constant 1.562500e+02 : f32
    %33 = vector.broadcast %cst_22 : f32 to vector<2x9xf32>
    %34 = arith.mulf %33, %32 : vector<2x9xf32>
    %cst_23 = arith.constant 2.500000e+01 : f32
    %35 = vector.broadcast %cst_23 : f32 to vector<2x9xf32>
    %36 = arith.mulf %35, %29 : vector<2x9xf32>
    %37 = arith.subf %34, %36 : vector<2x9xf32>
    %38 = arith.addf %37, %31 : vector<2x9xf32>
    %cst_24 = arith.constant 0.00999999977 : f32
    %39 = vector.broadcast %cst_24 : f32 to vector<2x9xf32>
    %40 = arith.mulf %29, %39 : vector<2x9xf32>
    %41 = arith.addf %25, %40 : vector<2x9xf32>
    %cst_25 = arith.constant 0.00999999977 : f32
    %42 = vector.broadcast %cst_25 : f32 to vector<2x9xf32>
    %43 = arith.mulf %38, %42 : vector<2x9xf32>
    %44 = arith.addf %29, %43 : vector<2x9xf32>
    %45 = vector.extract_strided_slice %24 {offsets = [0, 9], sizes = [2, 9], strides = [1, 1]} : vector<2x900xf32> to vector<2x9xf32>
    %46 = arith.mulf %45, %27 : vector<2x9xf32>
    %47 = arith.subf %19, %41 : vector<2x9xf32>
    %cst_26 = arith.constant 1.562500e+02 : f32
    %48 = vector.broadcast %cst_26 : f32 to vector<2x9xf32>
    %49 = arith.mulf %48, %47 : vector<2x9xf32>
    %cst_27 = arith.constant 2.500000e+01 : f32
    %50 = vector.broadcast %cst_27 : f32 to vector<2x9xf32>
    %51 = arith.mulf %50, %44 : vector<2x9xf32>
    %52 = arith.subf %49, %51 : vector<2x9xf32>
    %53 = arith.addf %52, %46 : vector<2x9xf32>
    %cst_28 = arith.constant 0.00999999977 : f32
    %54 = vector.broadcast %cst_28 : f32 to vector<2x9xf32>
    %55 = arith.mulf %44, %54 : vector<2x9xf32>
    %56 = arith.addf %41, %55 : vector<2x9xf32>
    %cst_29 = arith.constant 0.00999999977 : f32
    %57 = vector.broadcast %cst_29 : f32 to vector<2x9xf32>
    %58 = arith.mulf %53, %57 : vector<2x9xf32>
    %59 = arith.addf %44, %58 : vector<2x9xf32>
    %60 = vector.extract_strided_slice %24 {offsets = [0, 18], sizes = [2, 9], strides = [1, 1]} : vector<2x900xf32> to vector<2x9xf32>
    %61 = arith.mulf %60, %27 : vector<2x9xf32>
    %62 = arith.subf %19, %56 : vector<2x9xf32>
    %cst_30 = arith.constant 1.562500e+02 : f32
    %63 = vector.broadcast %cst_30 : f32 to vector<2x9xf32>
    %64 = arith.mulf %63, %62 : vector<2x9xf32>
    %cst_31 = arith.constant 2.500000e+01 : f32
    %65 = vector.broadcast %cst_31 : f32 to vector<2x9xf32>
    %66 = arith.mulf %65, %59 : vector<2x9xf32>
    %67 = arith.subf %64, %66 : vector<2x9xf32>
    %68 = arith.addf %67, %61 : vector<2x9xf32>
    %cst_32 = arith.constant 0.00999999977 : f32
    %69 = vector.broadcast %cst_32 : f32 to vector<2x9xf32>
    %70 = arith.mulf %59, %69 : vector<2x9xf32>
    %71 = arith.addf %56, %70 : vector<2x9xf32>
    %cst_33 = arith.constant 0.00999999977 : f32
    %72 = vector.broadcast %cst_33 : f32 to vector<2x9xf32>
    %73 = arith.mulf %68, %72 : vector<2x9xf32>
    %74 = arith.addf %59, %73 : vector<2x9xf32>
    %75 = vector.extract_strided_slice %24 {offsets = [0, 27], sizes = [2, 9], strides = [1, 1]} : vector<2x900xf32> to vector<2x9xf32>
    %76 = arith.mulf %75, %27 : vector<2x9xf32>
    %77 = arith.subf %19, %71 : vector<2x9xf32>
    %cst_34 = arith.constant 1.562500e+02 : f32
    %78 = vector.broadcast %cst_34 : f32 to vector<2x9xf32>
    %79 = arith.mulf %78, %77 : vector<2x9xf32>
    %cst_35 = arith.constant 2.500000e+01 : f32
    %80 = vector.broadcast %cst_35 : f32 to vector<2x9xf32>
    %81 = arith.mulf %80, %74 : vector<2x9xf32>
    %82 = arith.subf %79, %81 : vector<2x9xf32>
    %83 = arith.addf %82, %76 : vector<2x9xf32>
    %cst_36 = arith.constant 0.00999999977 : f32
    %84 = vector.broadcast %cst_36 : f32 to vector<2x9xf32>
    %85 = arith.mulf %74, %84 : vector<2x9xf32>
    %86 = arith.addf %71, %85 : vector<2x9xf32>
    %cst_37 = arith.constant 0.00999999977 : f32
    %87 = vector.broadcast %cst_37 : f32 to vector<2x9xf32>
    %88 = arith.mulf %83, %87 : vector<2x9xf32>
    %89 = arith.addf %74, %88 : vector<2x9xf32>
    %90 = vector.extract_strided_slice %24 {offsets = [0, 36], sizes = [2, 9], strides = [1, 1]} : vector<2x900xf32> to vector<2x9xf32>
    %91 = arith.mulf %90, %27 : vector<2x9xf32>
    %92 = arith.subf %19, %86 : vector<2x9xf32>
    %cst_38 = arith.constant 1.562500e+02 : f32
    %93 = vector.broadcast %cst_38 : f32 to vector<2x9xf32>
    %94 = arith.mulf %93, %92 : vector<2x9xf32>
    %cst_39 = arith.constant 2.500000e+01 : f32
    %95 = vector.broadcast %cst_39 : f32 to vector<2x9xf32>
    %96 = arith.mulf %95, %89 : vector<2x9xf32>
    %97 = arith.subf %94, %96 : vector<2x9xf32>
    %98 = arith.addf %97, %91 : vector<2x9xf32>
    %cst_40 = arith.constant 0.00999999977 : f32
    %99 = vector.broadcast %cst_40 : f32 to vector<2x9xf32>
    %100 = arith.mulf %89, %99 : vector<2x9xf32>
    %101 = arith.addf %86, %100 : vector<2x9xf32>
    %cst_41 = arith.constant 0.00999999977 : f32
    %102 = vector.broadcast %cst_41 : f32 to vector<2x9xf32>
    %103 = arith.mulf %98, %102 : vector<2x9xf32>
    %104 = arith.addf %89, %103 : vector<2x9xf32>
    %105 = vector.extract_strided_slice %24 {offsets = [0, 45], sizes = [2, 9], strides = [1, 1]} : vector<2x900xf32> to vector<2x9xf32>
    %106 = arith.mulf %105, %27 : vector<2x9xf32>
    %107 = arith.subf %19, %101 : vector<2x9xf32>
    %cst_42 = arith.constant 1.562500e+02 : f32
    %108 = vector.broadcast %cst_42 : f32 to vector<2x9xf32>
    %109 = arith.mulf %108, %107 : vector<2x9xf32>
    %cst_43 = arith.constant 2.500000e+01 : f32
    %110 = vector.broadcast %cst_43 : f32 to vector<2x9xf32>
    %111 = arith.mulf %110, %104 : vector<2x9xf32>
    %112 = arith.subf %109, %111 : vector<2x9xf32>
    %113 = arith.addf %112, %106 : vector<2x9xf32>
    %cst_44 = arith.constant 0.00999999977 : f32
    %114 = vector.broadcast %cst_44 : f32 to vector<2x9xf32>
    %115 = arith.mulf %104, %114 : vector<2x9xf32>
    %116 = arith.addf %101, %115 : vector<2x9xf32>
    %cst_45 = arith.constant 0.00999999977 : f32
    %117 = vector.broadcast %cst_45 : f32 to vector<2x9xf32>
    %118 = arith.mulf %113, %117 : vector<2x9xf32>
    %119 = arith.addf %104, %118 : vector<2x9xf32>
    %120 = vector.extract_strided_slice %24 {offsets = [0, 54], sizes = [2, 9], strides = [1, 1]} : vector<2x900xf32> to vector<2x9xf32>
    %121 = arith.mulf %120, %27 : vector<2x9xf32>
    %122 = arith.subf %19, %116 : vector<2x9xf32>
    %cst_46 = arith.constant 1.562500e+02 : f32
    %123 = vector.broadcast %cst_46 : f32 to vector<2x9xf32>
    %124 = arith.mulf %123, %122 : vector<2x9xf32>
    %cst_47 = arith.constant 2.500000e+01 : f32
    %125 = vector.broadcast %cst_47 : f32 to vector<2x9xf32>
    %126 = arith.mulf %125, %119 : vector<2x9xf32>
    %127 = arith.subf %124, %126 : vector<2x9xf32>
    %128 = arith.addf %127, %121 : vector<2x9xf32>
    %cst_48 = arith.constant 0.00999999977 : f32
    %129 = vector.broadcast %cst_48 : f32 to vector<2x9xf32>
    %130 = arith.mulf %119, %129 : vector<2x9xf32>
    %131 = arith.addf %116, %130 : vector<2x9xf32>
    %cst_49 = arith.constant 0.00999999977 : f32
    %132 = vector.broadcast %cst_49 : f32 to vector<2x9xf32>
    %133 = arith.mulf %128, %132 : vector<2x9xf32>
    %134 = arith.addf %119, %133 : vector<2x9xf32>
    %135 = vector.extract_strided_slice %24 {offsets = [0, 63], sizes = [2, 9], strides = [1, 1]} : vector<2x900xf32> to vector<2x9xf32>
    %136 = arith.mulf %135, %27 : vector<2x9xf32>
    %137 = arith.subf %19, %131 : vector<2x9xf32>
    %cst_50 = arith.constant 1.562500e+02 : f32
    %138 = vector.broadcast %cst_50 : f32 to vector<2x9xf32>
    %139 = arith.mulf %138, %137 : vector<2x9xf32>
    %cst_51 = arith.constant 2.500000e+01 : f32
    %140 = vector.broadcast %cst_51 : f32 to vector<2x9xf32>
    %141 = arith.mulf %140, %134 : vector<2x9xf32>
    %142 = arith.subf %139, %141 : vector<2x9xf32>
    %143 = arith.addf %142, %136 : vector<2x9xf32>
    %cst_52 = arith.constant 0.00999999977 : f32
    %144 = vector.broadcast %cst_52 : f32 to vector<2x9xf32>
    %145 = arith.mulf %134, %144 : vector<2x9xf32>
    %146 = arith.addf %131, %145 : vector<2x9xf32>
    %cst_53 = arith.constant 0.00999999977 : f32
    %147 = vector.broadcast %cst_53 : f32 to vector<2x9xf32>
    %148 = arith.mulf %143, %147 : vector<2x9xf32>
    %149 = arith.addf %134, %148 : vector<2x9xf32>
    %150 = vector.extract_strided_slice %24 {offsets = [0, 72], sizes = [2, 9], strides = [1, 1]} : vector<2x900xf32> to vector<2x9xf32>
    %151 = arith.mulf %150, %27 : vector<2x9xf32>
    %152 = arith.subf %19, %146 : vector<2x9xf32>
    %cst_54 = arith.constant 1.562500e+02 : f32
    %153 = vector.broadcast %cst_54 : f32 to vector<2x9xf32>
    %154 = arith.mulf %153, %152 : vector<2x9xf32>
    %cst_55 = arith.constant 2.500000e+01 : f32
    %155 = vector.broadcast %cst_55 : f32 to vector<2x9xf32>
    %156 = arith.mulf %155, %149 : vector<2x9xf32>
    %157 = arith.subf %154, %156 : vector<2x9xf32>
    %158 = arith.addf %157, %151 : vector<2x9xf32>
    %cst_56 = arith.constant 0.00999999977 : f32
    %159 = vector.broadcast %cst_56 : f32 to vector<2x9xf32>
    %160 = arith.mulf %149, %159 : vector<2x9xf32>
    %161 = arith.addf %146, %160 : vector<2x9xf32>
    %cst_57 = arith.constant 0.00999999977 : f32
    %162 = vector.broadcast %cst_57 : f32 to vector<2x9xf32>
    %163 = arith.mulf %158, %162 : vector<2x9xf32>
    %164 = arith.addf %149, %163 : vector<2x9xf32>
    %165 = vector.extract_strided_slice %24 {offsets = [0, 81], sizes = [2, 9], strides = [1, 1]} : vector<2x900xf32> to vector<2x9xf32>
    %166 = arith.mulf %165, %27 : vector<2x9xf32>
    %167 = arith.subf %19, %161 : vector<2x9xf32>
    %cst_58 = arith.constant 1.562500e+02 : f32
    %168 = vector.broadcast %cst_58 : f32 to vector<2x9xf32>
    %169 = arith.mulf %168, %167 : vector<2x9xf32>
    %cst_59 = arith.constant 2.500000e+01 : f32
    %170 = vector.broadcast %cst_59 : f32 to vector<2x9xf32>
    %171 = arith.mulf %170, %164 : vector<2x9xf32>
    %172 = arith.subf %169, %171 : vector<2x9xf32>
    %173 = arith.addf %172, %166 : vector<2x9xf32>
    %cst_60 = arith.constant 0.00999999977 : f32
    %174 = vector.broadcast %cst_60 : f32 to vector<2x9xf32>
    %175 = arith.mulf %164, %174 : vector<2x9xf32>
    %176 = arith.addf %161, %175 : vector<2x9xf32>
    %cst_61 = arith.constant 0.00999999977 : f32
    %177 = vector.broadcast %cst_61 : f32 to vector<2x9xf32>
    %178 = arith.mulf %173, %177 : vector<2x9xf32>
    %179 = arith.addf %164, %178 : vector<2x9xf32>
    %180 = arith.subf %176, %25 : vector<2x9xf32>
    %c0_62 = arith.constant 0 : index
    %c0_63 = arith.constant 0 : index
    %181 = vector.load %arg9[%c0_62, %c0_63] : memref<2x90xf32, #tpu.memory_space<vmem>>, vector<2x9xf32>
    tpu.vector_store %arg9[%c0_62, %c0_63], %180 {strides = array<i32>} : memref<2x90xf32, #tpu.memory_space<vmem>>, vector<2x9xf32>,
    %182 = vector.extract_strided_slice %24 {offsets = [0, 90], sizes = [2, 9], strides = [1, 1]} : vector<2x900xf32> to vector<2x9xf32>
    %183 = arith.mulf %182, %27 : vector<2x9xf32>
    %184 = arith.subf %19, %176 : vector<2x9xf32>
    %cst_64 = arith.constant 1.562500e+02 : f32
    %185 = vector.broadcast %cst_64 : f32 to vector<2x9xf32>
    %186 = arith.mulf %185, %184 : vector<2x9xf32>
    %cst_65 = arith.constant 2.500000e+01 : f32
    %187 = vector.broadcast %cst_65 : f32 to vector<2x9xf32>
    %188 = arith.mulf %187, %179 : vector<2x9xf32>
    %189 = arith.subf %186, %188 : vector<2x9xf32>
    %190 = arith.addf %189, %183 : vector<2x9xf32>
    %cst_66 = arith.constant 0.00999999977 : f32
    %191 = vector.broadcast %cst_66 : f32 to vector<2x9xf32>
    %192 = arith.mulf %179, %191 : vector<2x9xf32>
    %193 = arith.addf %176, %192 : vector<2x9xf32>
    %cst_67 = arith.constant 0.00999999977 : f32
    %194 = vector.broadcast %cst_67 : f32 to vector<2x9xf32>
    %195 = arith.mulf %190, %194 : vector<2x9xf32>
    %196 = arith.addf %179, %195 : vector<2x9xf32>
    %197 = vector.extract_strided_slice %24 {offsets = [0, 99], sizes = [2, 9], strides = [1, 1]} : vector<2x900xf32> to vector<2x9xf32>
    %198 = arith.mulf %197, %27 : vector<2x9xf32>
    %199 = arith.subf %19, %193 : vector<2x9xf32>
    %cst_68 = arith.constant 1.562500e+02 : f32
    %200 = vector.broadcast %cst_68 : f32 to vector<2x9xf32>
    %201 = arith.mulf %200, %199 : vector<2x9xf32>
    %cst_69 = arith.constant 2.500000e+01 : f32
    %202 = vector.broadcast %cst_69 : f32 to vector<2x9xf32>
    %203 = arith.mulf %202, %196 : vector<2x9xf32>
    %204 = arith.subf %201, %203 : vector<2x9xf32>
    %205 = arith.addf %204, %198 : vector<2x9xf32>
    %cst_70 = arith.constant 0.00999999977 : f32
    %206 = vector.broadcast %cst_70 : f32 to vector<2x9xf32>
    %207 = arith.mulf %196, %206 : vector<2x9xf32>
    %208 = arith.addf %193, %207 : vector<2x9xf32>
    %cst_71 = arith.constant 0.00999999977 : f32
    %209 = vector.broadcast %cst_71 : f32 to vector<2x9xf32>
    %210 = arith.mulf %205, %209 : vector<2x9xf32>
    %211 = arith.addf %196, %210 : vector<2x9xf32>
    %212 = vector.extract_strided_slice %24 {offsets = [0, 108], sizes = [2, 9], strides = [1, 1]} : vector<2x900xf32> to vector<2x9xf32>
    %213 = arith.mulf %212, %27 : vector<2x9xf32>
    %214 = arith.subf %19, %208 : vector<2x9xf32>
    %cst_72 = arith.constant 1.562500e+02 : f32
    %215 = vector.broadcast %cst_72 : f32 to vector<2x9xf32>
    %216 = arith.mulf %215, %214 : vector<2x9xf32>
    %cst_73 = arith.constant 2.500000e+01 : f32
    %217 = vector.broadcast %cst_73 : f32 to vector<2x9xf32>
    %218 = arith.mulf %217, %211 : vector<2x9xf32>
    %219 = arith.subf %216, %218 : vector<2x9xf32>
    %220 = arith.addf %219, %213 : vector<2x9xf32>
    %cst_74 = arith.constant 0.00999999977 : f32
    %221 = vector.broadcast %cst_74 : f32 to vector<2x9xf32>
    %222 = arith.mulf %211, %221 : vector<2x9xf32>
    %223 = arith.addf %208, %222 : vector<2x9xf32>
    %cst_75 = arith.constant 0.00999999977 : f32
    %224 = vector.broadcast %cst_75 : f32 to vector<2x9xf32>
    %225 = arith.mulf %220, %224 : vector<2x9xf32>
    %226 = arith.addf %211, %225 : vector<2x9xf32>
    %227 = vector.extract_strided_slice %24 {offsets = [0, 117], sizes = [2, 9], strides = [1, 1]} : vector<2x900xf32> to vector<2x9xf32>
    %228 = arith.mulf %227, %27 : vector<2x9xf32>
    %229 = arith.subf %19, %223 : vector<2x9xf32>
    %cst_76 = arith.constant 1.562500e+02 : f32
    %230 = vector.broadcast %cst_76 : f32 to vector<2x9xf32>
    %231 = arith.mulf %230, %229 : vector<2x9xf32>
    %cst_77 = arith.constant 2.500000e+01 : f32
    %232 = vector.broadcast %cst_77 : f32 to vector<2x9xf32>
    %233 = arith.mulf %232, %226 : vector<2x9xf32>
    %234 = arith.subf %231, %233 : vector<2x9xf32>
    %235 = arith.addf %234, %228 : vector<2x9xf32>
    %cst_78 = arith.constant 0.00999999977 : f32
    %236 = vector.broadcast %cst_78 : f32 to vector<2x9xf32>
    %237 = arith.mulf %226, %236 : vector<2x9xf32>
    %238 = arith.addf %223, %237 : vector<2x9xf32>
    %cst_79 = arith.constant 0.00999999977 : f32
    %239 = vector.broadcast %cst_79 : f32 to vector<2x9xf32>
    %240 = arith.mulf %235, %239 : vector<2x9xf32>
    %241 = arith.addf %226, %240 : vector<2x9xf32>
    %242 = vector.extract_strided_slice %24 {offsets = [0, 126], sizes = [2, 9], strides = [1, 1]} : vector<2x900xf32> to vector<2x9xf32>
    %243 = arith.mulf %242, %27 : vector<2x9xf32>
    %244 = arith.subf %19, %238 : vector<2x9xf32>
    %cst_80 = arith.constant 1.562500e+02 : f32
    %245 = vector.broadcast %cst_80 : f32 to vector<2x9xf32>
    %246 = arith.mulf %245, %244 : vector<2x9xf32>
    %cst_81 = arith.constant 2.500000e+01 : f32
    %247 = vector.broadcast %cst_81 : f32 to vector<2x9xf32>
    %248 = arith.mulf %247, %241 : vector<2x9xf32>
    %249 = arith.subf %246, %248 : vector<2x9xf32>
    %250 = arith.addf %249, %243 : vector<2x9xf32>
    %cst_82 = arith.constant 0.00999999977 : f32
    %251 = vector.broadcast %cst_82 : f32 to vector<2x9xf32>
    %252 = arith.mulf %241, %251 : vector<2x9xf32>
    %253 = arith.addf %238, %252 : vector<2x9xf32>
    %cst_83 = arith.constant 0.00999999977 : f32
    %254 = vector.broadcast %cst_83 : f32 to vector<2x9xf32>
    %255 = arith.mulf %250, %254 : vector<2x9xf32>
    %256 = arith.addf %241, %255 : vector<2x9xf32>
    %257 = vector.extract_strided_slice %24 {offsets = [0, 135], sizes = [2, 9], strides = [1, 1]} : vector<2x900xf32> to vector<2x9xf32>
    %258 = arith.mulf %257, %27 : vector<2x9xf32>
    %259 = arith.subf %19, %253 : vector<2x9xf32>
    %cst_84 = arith.constant 1.562500e+02 : f32
    %260 = vector.broadcast %cst_84 : f32 to vector<2x9xf32>
    %261 = arith.mulf %260, %259 : vector<2x9xf32>
    %cst_85 = arith.constant 2.500000e+01 : f32
    %262 = vector.broadcast %cst_85 : f32 to vector<2x9xf32>
    %263 = arith.mulf %262, %256 : vector<2x9xf32>
    %264 = arith.subf %261, %263 : vector<2x9xf32>
    %265 = arith.addf %264, %258 : vector<2x9xf32>
    %cst_86 = arith.constant 0.00999999977 : f32
    %266 = vector.broadcast %cst_86 : f32 to vector<2x9xf32>
    %267 = arith.mulf %256, %266 : vector<2x9xf32>
    %268 = arith.addf %253, %267 : vector<2x9xf32>
    %cst_87 = arith.constant 0.00999999977 : f32
    %269 = vector.broadcast %cst_87 : f32 to vector<2x9xf32>
    %270 = arith.mulf %265, %269 : vector<2x9xf32>
    %271 = arith.addf %256, %270 : vector<2x9xf32>
    %272 = vector.extract_strided_slice %24 {offsets = [0, 144], sizes = [2, 9], strides = [1, 1]} : vector<2x900xf32> to vector<2x9xf32>
    %273 = arith.mulf %272, %27 : vector<2x9xf32>
    %274 = arith.subf %19, %268 : vector<2x9xf32>
    %cst_88 = arith.constant 1.562500e+02 : f32
    %275 = vector.broadcast %cst_88 : f32 to vector<2x9xf32>
    %276 = arith.mulf %275, %274 : vector<2x9xf32>
    %cst_89 = arith.constant 2.500000e+01 : f32
    %277 = vector.broadcast %cst_89 : f32 to vector<2x9xf32>
    %278 = arith.mulf %277, %271 : vector<2x9xf32>
    %279 = arith.subf %276, %278 : vector<2x9xf32>
    %280 = arith.addf %279, %273 : vector<2x9xf32>
    %cst_90 = arith.constant 0.00999999977 : f32
    %281 = vector.broadcast %cst_90 : f32 to vector<2x9xf32>
    %282 = arith.mulf %271, %281 : vector<2x9xf32>
    %283 = arith.addf %268, %282 : vector<2x9xf32>
    %cst_91 = arith.constant 0.00999999977 : f32
    %284 = vector.broadcast %cst_91 : f32 to vector<2x9xf32>
    %285 = arith.mulf %280, %284 : vector<2x9xf32>
    %286 = arith.addf %271, %285 : vector<2x9xf32>
    %287 = vector.extract_strided_slice %24 {offsets = [0, 153], sizes = [2, 9], strides = [1, 1]} : vector<2x900xf32> to vector<2x9xf32>
    %288 = arith.mulf %287, %27 : vector<2x9xf32>
    %289 = arith.subf %19, %283 : vector<2x9xf32>
    %cst_92 = arith.constant 1.562500e+02 : f32
    %290 = vector.broadcast %cst_92 : f32 to vector<2x9xf32>
    %291 = arith.mulf %290, %289 : vector<2x9xf32>
    %cst_93 = arith.constant 2.500000e+01 : f32
    %292 = vector.broadcast %cst_93 : f32 to vector<2x9xf32>
    %293 = arith.mulf %292, %286 : vector<2x9xf32>
    %294 = arith.subf %291, %293 : vector<2x9xf32>
    %295 = arith.addf %294, %288 : vector<2x9xf32>
    %cst_94 = arith.constant 0.00999999977 : f32
    %296 = vector.broadcast %cst_94 : f32 to vector<2x9xf32>
    %297 = arith.mulf %286, %296 : vector<2x9xf32>
    %298 = arith.addf %283, %297 : vector<2x9xf32>
    %cst_95 = arith.constant 0.00999999977 : f32
    %299 = vector.broadcast %cst_95 : f32 to vector<2x9xf32>
    %300 = arith.mulf %295, %299 : vector<2x9xf32>
    %301 = arith.addf %286, %300 : vector<2x9xf32>
    %302 = vector.extract_strided_slice %24 {offsets = [0, 162], sizes = [2, 9], strides = [1, 1]} : vector<2x900xf32> to vector<2x9xf32>
    %303 = arith.mulf %302, %27 : vector<2x9xf32>
    %304 = arith.subf %19, %298 : vector<2x9xf32>
    %cst_96 = arith.constant 1.562500e+02 : f32
    %305 = vector.broadcast %cst_96 : f32 to vector<2x9xf32>
    %306 = arith.mulf %305, %304 : vector<2x9xf32>
    %cst_97 = arith.constant 2.500000e+01 : f32
    %307 = vector.broadcast %cst_97 : f32 to vector<2x9xf32>
    %308 = arith.mulf %307, %301 : vector<2x9xf32>
    %309 = arith.subf %306, %308 : vector<2x9xf32>
    %310 = arith.addf %309, %303 : vector<2x9xf32>
    %cst_98 = arith.constant 0.00999999977 : f32
    %311 = vector.broadcast %cst_98 : f32 to vector<2x9xf32>
    %312 = arith.mulf %301, %311 : vector<2x9xf32>
    %313 = arith.addf %298, %312 : vector<2x9xf32>
    %cst_99 = arith.constant 0.00999999977 : f32
    %314 = vector.broadcast %cst_99 : f32 to vector<2x9xf32>
    %315 = arith.mulf %310, %314 : vector<2x9xf32>
    %316 = arith.addf %301, %315 : vector<2x9xf32>
    %317 = vector.extract_strided_slice %24 {offsets = [0, 171], sizes = [2, 9], strides = [1, 1]} : vector<2x900xf32> to vector<2x9xf32>
    %318 = arith.mulf %317, %27 : vector<2x9xf32>
    %319 = arith.subf %19, %313 : vector<2x9xf32>
    %cst_100 = arith.constant 1.562500e+02 : f32
    %320 = vector.broadcast %cst_100 : f32 to vector<2x9xf32>
    %321 = arith.mulf %320, %319 : vector<2x9xf32>
    %cst_101 = arith.constant 2.500000e+01 : f32
    %322 = vector.broadcast %cst_101 : f32 to vector<2x9xf32>
    %323 = arith.mulf %322, %316 : vector<2x9xf32>
    %324 = arith.subf %321, %323 : vector<2x9xf32>
    %325 = arith.addf %324, %318 : vector<2x9xf32>
    %cst_102 = arith.constant 0.00999999977 : f32
    %326 = vector.broadcast %cst_102 : f32 to vector<2x9xf32>
    %327 = arith.mulf %316, %326 : vector<2x9xf32>
    %328 = arith.addf %313, %327 : vector<2x9xf32>
    %cst_103 = arith.constant 0.00999999977 : f32
    %329 = vector.broadcast %cst_103 : f32 to vector<2x9xf32>
    %330 = arith.mulf %325, %329 : vector<2x9xf32>
    %331 = arith.addf %316, %330 : vector<2x9xf32>
    %332 = arith.subf %328, %176 : vector<2x9xf32>
    %c0_104 = arith.constant 0 : index
    %c9 = arith.constant 9 : index
    %333 = vector.load %arg9[%c0_104, %c9] : memref<2x90xf32, #tpu.memory_space<vmem>>, vector<2x9xf32>
    tpu.vector_store %arg9[%c0_104, %c9], %332 {strides = array<i32>} : memref<2x90xf32, #tpu.memory_space<vmem>>, vector<2x9xf32>,
    %334 = vector.extract_strided_slice %24 {offsets = [0, 180], sizes = [2, 9], strides = [1, 1]} : vector<2x900xf32> to vector<2x9xf32>
    %335 = arith.mulf %334, %27 : vector<2x9xf32>
    %336 = arith.subf %19, %328 : vector<2x9xf32>
    %cst_105 = arith.constant 1.562500e+02 : f32
    %337 = vector.broadcast %cst_105 : f32 to vector<2x9xf32>
    %338 = arith.mulf %337, %336 : vector<2x9xf32>
    %cst_106 = arith.constant 2.500000e+01 : f32
    %339 = vector.broadcast %cst_106 : f32 to vector<2x9xf32>
    %340 = arith.mulf %339, %331 : vector<2x9xf32>
    %341 = arith.subf %338, %340 : vector<2x9xf32>
    %342 = arith.addf %341, %335 : vector<2x9xf32>
    %cst_107 = arith.constant 0.00999999977 : f32
    %343 = vector.broadcast %cst_107 : f32 to vector<2x9xf32>
    %344 = arith.mulf %331, %343 : vector<2x9xf32>
    %345 = arith.addf %328, %344 : vector<2x9xf32>
    %cst_108 = arith.constant 0.00999999977 : f32
    %346 = vector.broadcast %cst_108 : f32 to vector<2x9xf32>
    %347 = arith.mulf %342, %346 : vector<2x9xf32>
    %348 = arith.addf %331, %347 : vector<2x9xf32>
    %349 = vector.extract_strided_slice %24 {offsets = [0, 189], sizes = [2, 9], strides = [1, 1]} : vector<2x900xf32> to vector<2x9xf32>
    %350 = arith.mulf %349, %27 : vector<2x9xf32>
    %351 = arith.subf %19, %345 : vector<2x9xf32>
    %cst_109 = arith.constant 1.562500e+02 : f32
    %352 = vector.broadcast %cst_109 : f32 to vector<2x9xf32>
    %353 = arith.mulf %352, %351 : vector<2x9xf32>
    %cst_110 = arith.constant 2.500000e+01 : f32
    %354 = vector.broadcast %cst_110 : f32 to vector<2x9xf32>
    %355 = arith.mulf %354, %348 : vector<2x9xf32>
    %356 = arith.subf %353, %355 : vector<2x9xf32>
    %357 = arith.addf %356, %350 : vector<2x9xf32>
    %cst_111 = arith.constant 0.00999999977 : f32
    %358 = vector.broadcast %cst_111 : f32 to vector<2x9xf32>
    %359 = arith.mulf %348, %358 : vector<2x9xf32>
    %360 = arith.addf %345, %359 : vector<2x9xf32>
    %cst_112 = arith.constant 0.00999999977 : f32
    %361 = vector.broadcast %cst_112 : f32 to vector<2x9xf32>
    %362 = arith.mulf %357, %361 : vector<2x9xf32>
    %363 = arith.addf %348, %362 : vector<2x9xf32>
    %364 = vector.extract_strided_slice %24 {offsets = [0, 198], sizes = [2, 9], strides = [1, 1]} : vector<2x900xf32> to vector<2x9xf32>
    %365 = arith.mulf %364, %27 : vector<2x9xf32>
    %366 = arith.subf %19, %360 : vector<2x9xf32>
    %cst_113 = arith.constant 1.562500e+02 : f32
    %367 = vector.broadcast %cst_113 : f32 to vector<2x9xf32>
    %368 = arith.mulf %367, %366 : vector<2x9xf32>
    %cst_114 = arith.constant 2.500000e+01 : f32
    %369 = vector.broadcast %cst_114 : f32 to vector<2x9xf32>
    %370 = arith.mulf %369, %363 : vector<2x9xf32>
    %371 = arith.subf %368, %370 : vector<2x9xf32>
    %372 = arith.addf %371, %365 : vector<2x9xf32>
    %cst_115 = arith.constant 0.00999999977 : f32
    %373 = vector.broadcast %cst_115 : f32 to vector<2x9xf32>
    %374 = arith.mulf %363, %373 : vector<2x9xf32>
    %375 = arith.addf %360, %374 : vector<2x9xf32>
    %cst_116 = arith.constant 0.00999999977 : f32
    %376 = vector.broadcast %cst_116 : f32 to vector<2x9xf32>
    %377 = arith.mulf %372, %376 : vector<2x9xf32>
    %378 = arith.addf %363, %377 : vector<2x9xf32>
    %379 = vector.extract_strided_slice %24 {offsets = [0, 207], sizes = [2, 9], strides = [1, 1]} : vector<2x900xf32> to vector<2x9xf32>
    %380 = arith.mulf %379, %27 : vector<2x9xf32>
    %381 = arith.subf %19, %375 : vector<2x9xf32>
    %cst_117 = arith.constant 1.562500e+02 : f32
    %382 = vector.broadcast %cst_117 : f32 to vector<2x9xf32>
    %383 = arith.mulf %382, %381 : vector<2x9xf32>
    %cst_118 = arith.constant 2.500000e+01 : f32
    %384 = vector.broadcast %cst_118 : f32 to vector<2x9xf32>
    %385 = arith.mulf %384, %378 : vector<2x9xf32>
    %386 = arith.subf %383, %385 : vector<2x9xf32>
    %387 = arith.addf %386, %380 : vector<2x9xf32>
    %cst_119 = arith.constant 0.00999999977 : f32
    %388 = vector.broadcast %cst_119 : f32 to vector<2x9xf32>
    %389 = arith.mulf %378, %388 : vector<2x9xf32>
    %390 = arith.addf %375, %389 : vector<2x9xf32>
    %cst_120 = arith.constant 0.00999999977 : f32
    %391 = vector.broadcast %cst_120 : f32 to vector<2x9xf32>
    %392 = arith.mulf %387, %391 : vector<2x9xf32>
    %393 = arith.addf %378, %392 : vector<2x9xf32>
    %394 = vector.extract_strided_slice %24 {offsets = [0, 216], sizes = [2, 9], strides = [1, 1]} : vector<2x900xf32> to vector<2x9xf32>
    %395 = arith.mulf %394, %27 : vector<2x9xf32>
    %396 = arith.subf %19, %390 : vector<2x9xf32>
    %cst_121 = arith.constant 1.562500e+02 : f32
    %397 = vector.broadcast %cst_121 : f32 to vector<2x9xf32>
    %398 = arith.mulf %397, %396 : vector<2x9xf32>
    %cst_122 = arith.constant 2.500000e+01 : f32
    %399 = vector.broadcast %cst_122 : f32 to vector<2x9xf32>
    %400 = arith.mulf %399, %393 : vector<2x9xf32>
    %401 = arith.subf %398, %400 : vector<2x9xf32>
    %402 = arith.addf %401, %395 : vector<2x9xf32>
    %cst_123 = arith.constant 0.00999999977 : f32
    %403 = vector.broadcast %cst_123 : f32 to vector<2x9xf32>
    %404 = arith.mulf %393, %403 : vector<2x9xf32>
    %405 = arith.addf %390, %404 : vector<2x9xf32>
    %cst_124 = arith.constant 0.00999999977 : f32
    %406 = vector.broadcast %cst_124 : f32 to vector<2x9xf32>
    %407 = arith.mulf %402, %406 : vector<2x9xf32>
    %408 = arith.addf %393, %407 : vector<2x9xf32>
    %409 = vector.extract_strided_slice %24 {offsets = [0, 225], sizes = [2, 9], strides = [1, 1]} : vector<2x900xf32> to vector<2x9xf32>
    %410 = arith.mulf %409, %27 : vector<2x9xf32>
    %411 = arith.subf %19, %405 : vector<2x9xf32>
    %cst_125 = arith.constant 1.562500e+02 : f32
    %412 = vector.broadcast %cst_125 : f32 to vector<2x9xf32>
    %413 = arith.mulf %412, %411 : vector<2x9xf32>
    %cst_126 = arith.constant 2.500000e+01 : f32
    %414 = vector.broadcast %cst_126 : f32 to vector<2x9xf32>
    %415 = arith.mulf %414, %408 : vector<2x9xf32>
    %416 = arith.subf %413, %415 : vector<2x9xf32>
    %417 = arith.addf %416, %410 : vector<2x9xf32>
    %cst_127 = arith.constant 0.00999999977 : f32
    %418 = vector.broadcast %cst_127 : f32 to vector<2x9xf32>
    %419 = arith.mulf %408, %418 : vector<2x9xf32>
    %420 = arith.addf %405, %419 : vector<2x9xf32>
    %cst_128 = arith.constant 0.00999999977 : f32
    %421 = vector.broadcast %cst_128 : f32 to vector<2x9xf32>
    %422 = arith.mulf %417, %421 : vector<2x9xf32>
    %423 = arith.addf %408, %422 : vector<2x9xf32>
    %424 = vector.extract_strided_slice %24 {offsets = [0, 234], sizes = [2, 9], strides = [1, 1]} : vector<2x900xf32> to vector<2x9xf32>
    %425 = arith.mulf %424, %27 : vector<2x9xf32>
    %426 = arith.subf %19, %420 : vector<2x9xf32>
    %cst_129 = arith.constant 1.562500e+02 : f32
    %427 = vector.broadcast %cst_129 : f32 to vector<2x9xf32>
    %428 = arith.mulf %427, %426 : vector<2x9xf32>
    %cst_130 = arith.constant 2.500000e+01 : f32
    %429 = vector.broadcast %cst_130 : f32 to vector<2x9xf32>
    %430 = arith.mulf %429, %423 : vector<2x9xf32>
    %431 = arith.subf %428, %430 : vector<2x9xf32>
    %432 = arith.addf %431, %425 : vector<2x9xf32>
    %cst_131 = arith.constant 0.00999999977 : f32
    %433 = vector.broadcast %cst_131 : f32 to vector<2x9xf32>
    %434 = arith.mulf %423, %433 : vector<2x9xf32>
    %435 = arith.addf %420, %434 : vector<2x9xf32>
    %cst_132 = arith.constant 0.00999999977 : f32
    %436 = vector.broadcast %cst_132 : f32 to vector<2x9xf32>
    %437 = arith.mulf %432, %436 : vector<2x9xf32>
    %438 = arith.addf %423, %437 : vector<2x9xf32>
    %439 = vector.extract_strided_slice %24 {offsets = [0, 243], sizes = [2, 9], strides = [1, 1]} : vector<2x900xf32> to vector<2x9xf32>
    %440 = arith.mulf %439, %27 : vector<2x9xf32>
    %441 = arith.subf %19, %435 : vector<2x9xf32>
    %cst_133 = arith.constant 1.562500e+02 : f32
    %442 = vector.broadcast %cst_133 : f32 to vector<2x9xf32>
    %443 = arith.mulf %442, %441 : vector<2x9xf32>
    %cst_134 = arith.constant 2.500000e+01 : f32
    %444 = vector.broadcast %cst_134 : f32 to vector<2x9xf32>
    %445 = arith.mulf %444, %438 : vector<2x9xf32>
    %446 = arith.subf %443, %445 : vector<2x9xf32>
    %447 = arith.addf %446, %440 : vector<2x9xf32>
    %cst_135 = arith.constant 0.00999999977 : f32
    %448 = vector.broadcast %cst_135 : f32 to vector<2x9xf32>
    %449 = arith.mulf %438, %448 : vector<2x9xf32>
    %450 = arith.addf %435, %449 : vector<2x9xf32>
    %cst_136 = arith.constant 0.00999999977 : f32
    %451 = vector.broadcast %cst_136 : f32 to vector<2x9xf32>
    %452 = arith.mulf %447, %451 : vector<2x9xf32>
    %453 = arith.addf %438, %452 : vector<2x9xf32>
    %454 = vector.extract_strided_slice %24 {offsets = [0, 252], sizes = [2, 9], strides = [1, 1]} : vector<2x900xf32> to vector<2x9xf32>
    %455 = arith.mulf %454, %27 : vector<2x9xf32>
    %456 = arith.subf %19, %450 : vector<2x9xf32>
    %cst_137 = arith.constant 1.562500e+02 : f32
    %457 = vector.broadcast %cst_137 : f32 to vector<2x9xf32>
    %458 = arith.mulf %457, %456 : vector<2x9xf32>
    %cst_138 = arith.constant 2.500000e+01 : f32
    %459 = vector.broadcast %cst_138 : f32 to vector<2x9xf32>
    %460 = arith.mulf %459, %453 : vector<2x9xf32>
    %461 = arith.subf %458, %460 : vector<2x9xf32>
    %462 = arith.addf %461, %455 : vector<2x9xf32>
    %cst_139 = arith.constant 0.00999999977 : f32
    %463 = vector.broadcast %cst_139 : f32 to vector<2x9xf32>
    %464 = arith.mulf %453, %463 : vector<2x9xf32>
    %465 = arith.addf %450, %464 : vector<2x9xf32>
    %cst_140 = arith.constant 0.00999999977 : f32
    %466 = vector.broadcast %cst_140 : f32 to vector<2x9xf32>
    %467 = arith.mulf %462, %466 : vector<2x9xf32>
    %468 = arith.addf %453, %467 : vector<2x9xf32>
    %469 = vector.extract_strided_slice %24 {offsets = [0, 261], sizes = [2, 9], strides = [1, 1]} : vector<2x900xf32> to vector<2x9xf32>
    %470 = arith.mulf %469, %27 : vector<2x9xf32>
    %471 = arith.subf %19, %465 : vector<2x9xf32>
    %cst_141 = arith.constant 1.562500e+02 : f32
    %472 = vector.broadcast %cst_141 : f32 to vector<2x9xf32>
    %473 = arith.mulf %472, %471 : vector<2x9xf32>
    %cst_142 = arith.constant 2.500000e+01 : f32
    %474 = vector.broadcast %cst_142 : f32 to vector<2x9xf32>
    %475 = arith.mulf %474, %468 : vector<2x9xf32>
    %476 = arith.subf %473, %475 : vector<2x9xf32>
    %477 = arith.addf %476, %470 : vector<2x9xf32>
    %cst_143 = arith.constant 0.00999999977 : f32
    %478 = vector.broadcast %cst_143 : f32 to vector<2x9xf32>
    %479 = arith.mulf %468, %478 : vector<2x9xf32>
    %480 = arith.addf %465, %479 : vector<2x9xf32>
    %cst_144 = arith.constant 0.00999999977 : f32
    %481 = vector.broadcast %cst_144 : f32 to vector<2x9xf32>
    %482 = arith.mulf %477, %481 : vector<2x9xf32>
    %483 = arith.addf %468, %482 : vector<2x9xf32>
    %484 = arith.subf %480, %328 : vector<2x9xf32>
    %c0_145 = arith.constant 0 : index
    %c18 = arith.constant 18 : index
    %485 = vector.load %arg9[%c0_145, %c18] : memref<2x90xf32, #tpu.memory_space<vmem>>, vector<2x9xf32>
    tpu.vector_store %arg9[%c0_145, %c18], %484 {strides = array<i32>} : memref<2x90xf32, #tpu.memory_space<vmem>>, vector<2x9xf32>,
    %486 = vector.extract_strided_slice %24 {offsets = [0, 270], sizes = [2, 9], strides = [1, 1]} : vector<2x900xf32> to vector<2x9xf32>
    %487 = arith.mulf %486, %27 : vector<2x9xf32>
    %488 = arith.subf %19, %480 : vector<2x9xf32>
    %cst_146 = arith.constant 1.562500e+02 : f32
    %489 = vector.broadcast %cst_146 : f32 to vector<2x9xf32>
    %490 = arith.mulf %489, %488 : vector<2x9xf32>
    %cst_147 = arith.constant 2.500000e+01 : f32
    %491 = vector.broadcast %cst_147 : f32 to vector<2x9xf32>
    %492 = arith.mulf %491, %483 : vector<2x9xf32>
    %493 = arith.subf %490, %492 : vector<2x9xf32>
    %494 = arith.addf %493, %487 : vector<2x9xf32>
    %cst_148 = arith.constant 0.00999999977 : f32
    %495 = vector.broadcast %cst_148 : f32 to vector<2x9xf32>
    %496 = arith.mulf %483, %495 : vector<2x9xf32>
    %497 = arith.addf %480, %496 : vector<2x9xf32>
    %cst_149 = arith.constant 0.00999999977 : f32
    %498 = vector.broadcast %cst_149 : f32 to vector<2x9xf32>
    %499 = arith.mulf %494, %498 : vector<2x9xf32>
    %500 = arith.addf %483, %499 : vector<2x9xf32>
    %501 = vector.extract_strided_slice %24 {offsets = [0, 279], sizes = [2, 9], strides = [1, 1]} : vector<2x900xf32> to vector<2x9xf32>
    %502 = arith.mulf %501, %27 : vector<2x9xf32>
    %503 = arith.subf %19, %497 : vector<2x9xf32>
    %cst_150 = arith.constant 1.562500e+02 : f32
    %504 = vector.broadcast %cst_150 : f32 to vector<2x9xf32>
    %505 = arith.mulf %504, %503 : vector<2x9xf32>
    %cst_151 = arith.constant 2.500000e+01 : f32
    %506 = vector.broadcast %cst_151 : f32 to vector<2x9xf32>
    %507 = arith.mulf %506, %500 : vector<2x9xf32>
    %508 = arith.subf %505, %507 : vector<2x9xf32>
    %509 = arith.addf %508, %502 : vector<2x9xf32>
    %cst_152 = arith.constant 0.00999999977 : f32
    %510 = vector.broadcast %cst_152 : f32 to vector<2x9xf32>
    %511 = arith.mulf %500, %510 : vector<2x9xf32>
    %512 = arith.addf %497, %511 : vector<2x9xf32>
    %cst_153 = arith.constant 0.00999999977 : f32
    %513 = vector.broadcast %cst_153 : f32 to vector<2x9xf32>
    %514 = arith.mulf %509, %513 : vector<2x9xf32>
    %515 = arith.addf %500, %514 : vector<2x9xf32>
    %516 = vector.extract_strided_slice %24 {offsets = [0, 288], sizes = [2, 9], strides = [1, 1]} : vector<2x900xf32> to vector<2x9xf32>
    %517 = arith.mulf %516, %27 : vector<2x9xf32>
    %518 = arith.subf %19, %512 : vector<2x9xf32>
    %cst_154 = arith.constant 1.562500e+02 : f32
    %519 = vector.broadcast %cst_154 : f32 to vector<2x9xf32>
    %520 = arith.mulf %519, %518 : vector<2x9xf32>
    %cst_155 = arith.constant 2.500000e+01 : f32
    %521 = vector.broadcast %cst_155 : f32 to vector<2x9xf32>
    %522 = arith.mulf %521, %515 : vector<2x9xf32>
    %523 = arith.subf %520, %522 : vector<2x9xf32>
    %524 = arith.addf %523, %517 : vector<2x9xf32>
    %cst_156 = arith.constant 0.00999999977 : f32
    %525 = vector.broadcast %cst_156 : f32 to vector<2x9xf32>
    %526 = arith.mulf %515, %525 : vector<2x9xf32>
    %527 = arith.addf %512, %526 : vector<2x9xf32>
    %cst_157 = arith.constant 0.00999999977 : f32
    %528 = vector.broadcast %cst_157 : f32 to vector<2x9xf32>
    %529 = arith.mulf %524, %528 : vector<2x9xf32>
    %530 = arith.addf %515, %529 : vector<2x9xf32>
    %531 = vector.extract_strided_slice %24 {offsets = [0, 297], sizes = [2, 9], strides = [1, 1]} : vector<2x900xf32> to vector<2x9xf32>
    %532 = arith.mulf %531, %27 : vector<2x9xf32>
    %533 = arith.subf %19, %527 : vector<2x9xf32>
    %cst_158 = arith.constant 1.562500e+02 : f32
    %534 = vector.broadcast %cst_158 : f32 to vector<2x9xf32>
    %535 = arith.mulf %534, %533 : vector<2x9xf32>
    %cst_159 = arith.constant 2.500000e+01 : f32
    %536 = vector.broadcast %cst_159 : f32 to vector<2x9xf32>
    %537 = arith.mulf %536, %530 : vector<2x9xf32>
    %538 = arith.subf %535, %537 : vector<2x9xf32>
    %539 = arith.addf %538, %532 : vector<2x9xf32>
    %cst_160 = arith.constant 0.00999999977 : f32
    %540 = vector.broadcast %cst_160 : f32 to vector<2x9xf32>
    %541 = arith.mulf %530, %540 : vector<2x9xf32>
    %542 = arith.addf %527, %541 : vector<2x9xf32>
    %cst_161 = arith.constant 0.00999999977 : f32
    %543 = vector.broadcast %cst_161 : f32 to vector<2x9xf32>
    %544 = arith.mulf %539, %543 : vector<2x9xf32>
    %545 = arith.addf %530, %544 : vector<2x9xf32>
    %546 = vector.extract_strided_slice %24 {offsets = [0, 306], sizes = [2, 9], strides = [1, 1]} : vector<2x900xf32> to vector<2x9xf32>
    %547 = arith.mulf %546, %27 : vector<2x9xf32>
    %548 = arith.subf %19, %542 : vector<2x9xf32>
    %cst_162 = arith.constant 1.562500e+02 : f32
    %549 = vector.broadcast %cst_162 : f32 to vector<2x9xf32>
    %550 = arith.mulf %549, %548 : vector<2x9xf32>
    %cst_163 = arith.constant 2.500000e+01 : f32
    %551 = vector.broadcast %cst_163 : f32 to vector<2x9xf32>
    %552 = arith.mulf %551, %545 : vector<2x9xf32>
    %553 = arith.subf %550, %552 : vector<2x9xf32>
    %554 = arith.addf %553, %547 : vector<2x9xf32>
    %cst_164 = arith.constant 0.00999999977 : f32
    %555 = vector.broadcast %cst_164 : f32 to vector<2x9xf32>
    %556 = arith.mulf %545, %555 : vector<2x9xf32>
    %557 = arith.addf %542, %556 : vector<2x9xf32>
    %cst_165 = arith.constant 0.00999999977 : f32
    %558 = vector.broadcast %cst_165 : f32 to vector<2x9xf32>
    %559 = arith.mulf %554, %558 : vector<2x9xf32>
    %560 = arith.addf %545, %559 : vector<2x9xf32>
    %561 = vector.extract_strided_slice %24 {offsets = [0, 315], sizes = [2, 9], strides = [1, 1]} : vector<2x900xf32> to vector<2x9xf32>
    %562 = arith.mulf %561, %27 : vector<2x9xf32>
    %563 = arith.subf %19, %557 : vector<2x9xf32>
    %cst_166 = arith.constant 1.562500e+02 : f32
    %564 = vector.broadcast %cst_166 : f32 to vector<2x9xf32>
    %565 = arith.mulf %564, %563 : vector<2x9xf32>
    %cst_167 = arith.constant 2.500000e+01 : f32
    %566 = vector.broadcast %cst_167 : f32 to vector<2x9xf32>
    %567 = arith.mulf %566, %560 : vector<2x9xf32>
    %568 = arith.subf %565, %567 : vector<2x9xf32>
    %569 = arith.addf %568, %562 : vector<2x9xf32>
    %cst_168 = arith.constant 0.00999999977 : f32
    %570 = vector.broadcast %cst_168 : f32 to vector<2x9xf32>
    %571 = arith.mulf %560, %570 : vector<2x9xf32>
    %572 = arith.addf %557, %571 : vector<2x9xf32>
    %cst_169 = arith.constant 0.00999999977 : f32
    %573 = vector.broadcast %cst_169 : f32 to vector<2x9xf32>
    %574 = arith.mulf %569, %573 : vector<2x9xf32>
    %575 = arith.addf %560, %574 : vector<2x9xf32>
    %576 = vector.extract_strided_slice %24 {offsets = [0, 324], sizes = [2, 9], strides = [1, 1]} : vector<2x900xf32> to vector<2x9xf32>
    %577 = arith.mulf %576, %27 : vector<2x9xf32>
    %578 = arith.subf %19, %572 : vector<2x9xf32>
    %cst_170 = arith.constant 1.562500e+02 : f32
    %579 = vector.broadcast %cst_170 : f32 to vector<2x9xf32>
    %580 = arith.mulf %579, %578 : vector<2x9xf32>
    %cst_171 = arith.constant 2.500000e+01 : f32
    %581 = vector.broadcast %cst_171 : f32 to vector<2x9xf32>
    %582 = arith.mulf %581, %575 : vector<2x9xf32>
    %583 = arith.subf %580, %582 : vector<2x9xf32>
    %584 = arith.addf %583, %577 : vector<2x9xf32>
    %cst_172 = arith.constant 0.00999999977 : f32
    %585 = vector.broadcast %cst_172 : f32 to vector<2x9xf32>
    %586 = arith.mulf %575, %585 : vector<2x9xf32>
    %587 = arith.addf %572, %586 : vector<2x9xf32>
    %cst_173 = arith.constant 0.00999999977 : f32
    %588 = vector.broadcast %cst_173 : f32 to vector<2x9xf32>
    %589 = arith.mulf %584, %588 : vector<2x9xf32>
    %590 = arith.addf %575, %589 : vector<2x9xf32>
    %591 = vector.extract_strided_slice %24 {offsets = [0, 333], sizes = [2, 9], strides = [1, 1]} : vector<2x900xf32> to vector<2x9xf32>
    %592 = arith.mulf %591, %27 : vector<2x9xf32>
    %593 = arith.subf %19, %587 : vector<2x9xf32>
    %cst_174 = arith.constant 1.562500e+02 : f32
    %594 = vector.broadcast %cst_174 : f32 to vector<2x9xf32>
    %595 = arith.mulf %594, %593 : vector<2x9xf32>
    %cst_175 = arith.constant 2.500000e+01 : f32
    %596 = vector.broadcast %cst_175 : f32 to vector<2x9xf32>
    %597 = arith.mulf %596, %590 : vector<2x9xf32>
    %598 = arith.subf %595, %597 : vector<2x9xf32>
    %599 = arith.addf %598, %592 : vector<2x9xf32>
    %cst_176 = arith.constant 0.00999999977 : f32
    %600 = vector.broadcast %cst_176 : f32 to vector<2x9xf32>
    %601 = arith.mulf %590, %600 : vector<2x9xf32>
    %602 = arith.addf %587, %601 : vector<2x9xf32>
    %cst_177 = arith.constant 0.00999999977 : f32
    %603 = vector.broadcast %cst_177 : f32 to vector<2x9xf32>
    %604 = arith.mulf %599, %603 : vector<2x9xf32>
    %605 = arith.addf %590, %604 : vector<2x9xf32>
    %606 = vector.extract_strided_slice %24 {offsets = [0, 342], sizes = [2, 9], strides = [1, 1]} : vector<2x900xf32> to vector<2x9xf32>
    %607 = arith.mulf %606, %27 : vector<2x9xf32>
    %608 = arith.subf %19, %602 : vector<2x9xf32>
    %cst_178 = arith.constant 1.562500e+02 : f32
    %609 = vector.broadcast %cst_178 : f32 to vector<2x9xf32>
    %610 = arith.mulf %609, %608 : vector<2x9xf32>
    %cst_179 = arith.constant 2.500000e+01 : f32
    %611 = vector.broadcast %cst_179 : f32 to vector<2x9xf32>
    %612 = arith.mulf %611, %605 : vector<2x9xf32>
    %613 = arith.subf %610, %612 : vector<2x9xf32>
    %614 = arith.addf %613, %607 : vector<2x9xf32>
    %cst_180 = arith.constant 0.00999999977 : f32
    %615 = vector.broadcast %cst_180 : f32 to vector<2x9xf32>
    %616 = arith.mulf %605, %615 : vector<2x9xf32>
    %617 = arith.addf %602, %616 : vector<2x9xf32>
    %cst_181 = arith.constant 0.00999999977 : f32
    %618 = vector.broadcast %cst_181 : f32 to vector<2x9xf32>
    %619 = arith.mulf %614, %618 : vector<2x9xf32>
    %620 = arith.addf %605, %619 : vector<2x9xf32>
    %621 = vector.extract_strided_slice %24 {offsets = [0, 351], sizes = [2, 9], strides = [1, 1]} : vector<2x900xf32> to vector<2x9xf32>
    %622 = arith.mulf %621, %27 : vector<2x9xf32>
    %623 = arith.subf %19, %617 : vector<2x9xf32>
    %cst_182 = arith.constant 1.562500e+02 : f32
    %624 = vector.broadcast %cst_182 : f32 to vector<2x9xf32>
    %625 = arith.mulf %624, %623 : vector<2x9xf32>
    %cst_183 = arith.constant 2.500000e+01 : f32
    %626 = vector.broadcast %cst_183 : f32 to vector<2x9xf32>
    %627 = arith.mulf %626, %620 : vector<2x9xf32>
    %628 = arith.subf %625, %627 : vector<2x9xf32>
    %629 = arith.addf %628, %622 : vector<2x9xf32>
    %cst_184 = arith.constant 0.00999999977 : f32
    %630 = vector.broadcast %cst_184 : f32 to vector<2x9xf32>
    %631 = arith.mulf %620, %630 : vector<2x9xf32>
    %632 = arith.addf %617, %631 : vector<2x9xf32>
    %cst_185 = arith.constant 0.00999999977 : f32
    %633 = vector.broadcast %cst_185 : f32 to vector<2x9xf32>
    %634 = arith.mulf %629, %633 : vector<2x9xf32>
    %635 = arith.addf %620, %634 : vector<2x9xf32>
    %636 = arith.subf %632, %480 : vector<2x9xf32>
    %c0_186 = arith.constant 0 : index
    %c27 = arith.constant 27 : index
    %637 = vector.load %arg9[%c0_186, %c27] : memref<2x90xf32, #tpu.memory_space<vmem>>, vector<2x9xf32>
    tpu.vector_store %arg9[%c0_186, %c27], %636 {strides = array<i32>} : memref<2x90xf32, #tpu.memory_space<vmem>>, vector<2x9xf32>,
    %638 = vector.extract_strided_slice %24 {offsets = [0, 360], sizes = [2, 9], strides = [1, 1]} : vector<2x900xf32> to vector<2x9xf32>
    %639 = arith.mulf %638, %27 : vector<2x9xf32>
    %640 = arith.subf %19, %632 : vector<2x9xf32>
    %cst_187 = arith.constant 1.562500e+02 : f32
    %641 = vector.broadcast %cst_187 : f32 to vector<2x9xf32>
    %642 = arith.mulf %641, %640 : vector<2x9xf32>
    %cst_188 = arith.constant 2.500000e+01 : f32
    %643 = vector.broadcast %cst_188 : f32 to vector<2x9xf32>
    %644 = arith.mulf %643, %635 : vector<2x9xf32>
    %645 = arith.subf %642, %644 : vector<2x9xf32>
    %646 = arith.addf %645, %639 : vector<2x9xf32>
    %cst_189 = arith.constant 0.00999999977 : f32
    %647 = vector.broadcast %cst_189 : f32 to vector<2x9xf32>
    %648 = arith.mulf %635, %647 : vector<2x9xf32>
    %649 = arith.addf %632, %648 : vector<2x9xf32>
    %cst_190 = arith.constant 0.00999999977 : f32
    %650 = vector.broadcast %cst_190 : f32 to vector<2x9xf32>
    %651 = arith.mulf %646, %650 : vector<2x9xf32>
    %652 = arith.addf %635, %651 : vector<2x9xf32>
    %653 = vector.extract_strided_slice %24 {offsets = [0, 369], sizes = [2, 9], strides = [1, 1]} : vector<2x900xf32> to vector<2x9xf32>
    %654 = arith.mulf %653, %27 : vector<2x9xf32>
    %655 = arith.subf %19, %649 : vector<2x9xf32>
    %cst_191 = arith.constant 1.562500e+02 : f32
    %656 = vector.broadcast %cst_191 : f32 to vector<2x9xf32>
    %657 = arith.mulf %656, %655 : vector<2x9xf32>
    %cst_192 = arith.constant 2.500000e+01 : f32
    %658 = vector.broadcast %cst_192 : f32 to vector<2x9xf32>
    %659 = arith.mulf %658, %652 : vector<2x9xf32>
    %660 = arith.subf %657, %659 : vector<2x9xf32>
    %661 = arith.addf %660, %654 : vector<2x9xf32>
    %cst_193 = arith.constant 0.00999999977 : f32
    %662 = vector.broadcast %cst_193 : f32 to vector<2x9xf32>
    %663 = arith.mulf %652, %662 : vector<2x9xf32>
    %664 = arith.addf %649, %663 : vector<2x9xf32>
    %cst_194 = arith.constant 0.00999999977 : f32
    %665 = vector.broadcast %cst_194 : f32 to vector<2x9xf32>
    %666 = arith.mulf %661, %665 : vector<2x9xf32>
    %667 = arith.addf %652, %666 : vector<2x9xf32>
    %668 = vector.extract_strided_slice %24 {offsets = [0, 378], sizes = [2, 9], strides = [1, 1]} : vector<2x900xf32> to vector<2x9xf32>
    %669 = arith.mulf %668, %27 : vector<2x9xf32>
    %670 = arith.subf %19, %664 : vector<2x9xf32>
    %cst_195 = arith.constant 1.562500e+02 : f32
    %671 = vector.broadcast %cst_195 : f32 to vector<2x9xf32>
    %672 = arith.mulf %671, %670 : vector<2x9xf32>
    %cst_196 = arith.constant 2.500000e+01 : f32
    %673 = vector.broadcast %cst_196 : f32 to vector<2x9xf32>
    %674 = arith.mulf %673, %667 : vector<2x9xf32>
    %675 = arith.subf %672, %674 : vector<2x9xf32>
    %676 = arith.addf %675, %669 : vector<2x9xf32>
    %cst_197 = arith.constant 0.00999999977 : f32
    %677 = vector.broadcast %cst_197 : f32 to vector<2x9xf32>
    %678 = arith.mulf %667, %677 : vector<2x9xf32>
    %679 = arith.addf %664, %678 : vector<2x9xf32>
    %cst_198 = arith.constant 0.00999999977 : f32
    %680 = vector.broadcast %cst_198 : f32 to vector<2x9xf32>
    %681 = arith.mulf %676, %680 : vector<2x9xf32>
    %682 = arith.addf %667, %681 : vector<2x9xf32>
    %683 = vector.extract_strided_slice %24 {offsets = [0, 387], sizes = [2, 9], strides = [1, 1]} : vector<2x900xf32> to vector<2x9xf32>
    %684 = arith.mulf %683, %27 : vector<2x9xf32>
    %685 = arith.subf %19, %679 : vector<2x9xf32>
    %cst_199 = arith.constant 1.562500e+02 : f32
    %686 = vector.broadcast %cst_199 : f32 to vector<2x9xf32>
    %687 = arith.mulf %686, %685 : vector<2x9xf32>
    %cst_200 = arith.constant 2.500000e+01 : f32
    %688 = vector.broadcast %cst_200 : f32 to vector<2x9xf32>
    %689 = arith.mulf %688, %682 : vector<2x9xf32>
    %690 = arith.subf %687, %689 : vector<2x9xf32>
    %691 = arith.addf %690, %684 : vector<2x9xf32>
    %cst_201 = arith.constant 0.00999999977 : f32
    %692 = vector.broadcast %cst_201 : f32 to vector<2x9xf32>
    %693 = arith.mulf %682, %692 : vector<2x9xf32>
    %694 = arith.addf %679, %693 : vector<2x9xf32>
    %cst_202 = arith.constant 0.00999999977 : f32
    %695 = vector.broadcast %cst_202 : f32 to vector<2x9xf32>
    %696 = arith.mulf %691, %695 : vector<2x9xf32>
    %697 = arith.addf %682, %696 : vector<2x9xf32>
    %698 = vector.extract_strided_slice %24 {offsets = [0, 396], sizes = [2, 9], strides = [1, 1]} : vector<2x900xf32> to vector<2x9xf32>
    %699 = arith.mulf %698, %27 : vector<2x9xf32>
    %700 = arith.subf %19, %694 : vector<2x9xf32>
    %cst_203 = arith.constant 1.562500e+02 : f32
    %701 = vector.broadcast %cst_203 : f32 to vector<2x9xf32>
    %702 = arith.mulf %701, %700 : vector<2x9xf32>
    %cst_204 = arith.constant 2.500000e+01 : f32
    %703 = vector.broadcast %cst_204 : f32 to vector<2x9xf32>
    %704 = arith.mulf %703, %697 : vector<2x9xf32>
    %705 = arith.subf %702, %704 : vector<2x9xf32>
    %706 = arith.addf %705, %699 : vector<2x9xf32>
    %cst_205 = arith.constant 0.00999999977 : f32
    %707 = vector.broadcast %cst_205 : f32 to vector<2x9xf32>
    %708 = arith.mulf %697, %707 : vector<2x9xf32>
    %709 = arith.addf %694, %708 : vector<2x9xf32>
    %cst_206 = arith.constant 0.00999999977 : f32
    %710 = vector.broadcast %cst_206 : f32 to vector<2x9xf32>
    %711 = arith.mulf %706, %710 : vector<2x9xf32>
    %712 = arith.addf %697, %711 : vector<2x9xf32>
    %713 = vector.extract_strided_slice %24 {offsets = [0, 405], sizes = [2, 9], strides = [1, 1]} : vector<2x900xf32> to vector<2x9xf32>
    %714 = arith.mulf %713, %27 : vector<2x9xf32>
    %715 = arith.subf %19, %709 : vector<2x9xf32>
    %cst_207 = arith.constant 1.562500e+02 : f32
    %716 = vector.broadcast %cst_207 : f32 to vector<2x9xf32>
    %717 = arith.mulf %716, %715 : vector<2x9xf32>
    %cst_208 = arith.constant 2.500000e+01 : f32
    %718 = vector.broadcast %cst_208 : f32 to vector<2x9xf32>
    %719 = arith.mulf %718, %712 : vector<2x9xf32>
    %720 = arith.subf %717, %719 : vector<2x9xf32>
    %721 = arith.addf %720, %714 : vector<2x9xf32>
    %cst_209 = arith.constant 0.00999999977 : f32
    %722 = vector.broadcast %cst_209 : f32 to vector<2x9xf32>
    %723 = arith.mulf %712, %722 : vector<2x9xf32>
    %724 = arith.addf %709, %723 : vector<2x9xf32>
    %cst_210 = arith.constant 0.00999999977 : f32
    %725 = vector.broadcast %cst_210 : f32 to vector<2x9xf32>
    %726 = arith.mulf %721, %725 : vector<2x9xf32>
    %727 = arith.addf %712, %726 : vector<2x9xf32>
    %728 = vector.extract_strided_slice %24 {offsets = [0, 414], sizes = [2, 9], strides = [1, 1]} : vector<2x900xf32> to vector<2x9xf32>
    %729 = arith.mulf %728, %27 : vector<2x9xf32>
    %730 = arith.subf %19, %724 : vector<2x9xf32>
    %cst_211 = arith.constant 1.562500e+02 : f32
    %731 = vector.broadcast %cst_211 : f32 to vector<2x9xf32>
    %732 = arith.mulf %731, %730 : vector<2x9xf32>
    %cst_212 = arith.constant 2.500000e+01 : f32
    %733 = vector.broadcast %cst_212 : f32 to vector<2x9xf32>
    %734 = arith.mulf %733, %727 : vector<2x9xf32>
    %735 = arith.subf %732, %734 : vector<2x9xf32>
    %736 = arith.addf %735, %729 : vector<2x9xf32>
    %cst_213 = arith.constant 0.00999999977 : f32
    %737 = vector.broadcast %cst_213 : f32 to vector<2x9xf32>
    %738 = arith.mulf %727, %737 : vector<2x9xf32>
    %739 = arith.addf %724, %738 : vector<2x9xf32>
    %cst_214 = arith.constant 0.00999999977 : f32
    %740 = vector.broadcast %cst_214 : f32 to vector<2x9xf32>
    %741 = arith.mulf %736, %740 : vector<2x9xf32>
    %742 = arith.addf %727, %741 : vector<2x9xf32>
    %743 = vector.extract_strided_slice %24 {offsets = [0, 423], sizes = [2, 9], strides = [1, 1]} : vector<2x900xf32> to vector<2x9xf32>
    %744 = arith.mulf %743, %27 : vector<2x9xf32>
    %745 = arith.subf %19, %739 : vector<2x9xf32>
    %cst_215 = arith.constant 1.562500e+02 : f32
    %746 = vector.broadcast %cst_215 : f32 to vector<2x9xf32>
    %747 = arith.mulf %746, %745 : vector<2x9xf32>
    %cst_216 = arith.constant 2.500000e+01 : f32
    %748 = vector.broadcast %cst_216 : f32 to vector<2x9xf32>
    %749 = arith.mulf %748, %742 : vector<2x9xf32>
    %750 = arith.subf %747, %749 : vector<2x9xf32>
    %751 = arith.addf %750, %744 : vector<2x9xf32>
    %cst_217 = arith.constant 0.00999999977 : f32
    %752 = vector.broadcast %cst_217 : f32 to vector<2x9xf32>
    %753 = arith.mulf %742, %752 : vector<2x9xf32>
    %754 = arith.addf %739, %753 : vector<2x9xf32>
    %cst_218 = arith.constant 0.00999999977 : f32
    %755 = vector.broadcast %cst_218 : f32 to vector<2x9xf32>
    %756 = arith.mulf %751, %755 : vector<2x9xf32>
    %757 = arith.addf %742, %756 : vector<2x9xf32>
    %758 = vector.extract_strided_slice %24 {offsets = [0, 432], sizes = [2, 9], strides = [1, 1]} : vector<2x900xf32> to vector<2x9xf32>
    %759 = arith.mulf %758, %27 : vector<2x9xf32>
    %760 = arith.subf %19, %754 : vector<2x9xf32>
    %cst_219 = arith.constant 1.562500e+02 : f32
    %761 = vector.broadcast %cst_219 : f32 to vector<2x9xf32>
    %762 = arith.mulf %761, %760 : vector<2x9xf32>
    %cst_220 = arith.constant 2.500000e+01 : f32
    %763 = vector.broadcast %cst_220 : f32 to vector<2x9xf32>
    %764 = arith.mulf %763, %757 : vector<2x9xf32>
    %765 = arith.subf %762, %764 : vector<2x9xf32>
    %766 = arith.addf %765, %759 : vector<2x9xf32>
    %cst_221 = arith.constant 0.00999999977 : f32
    %767 = vector.broadcast %cst_221 : f32 to vector<2x9xf32>
    %768 = arith.mulf %757, %767 : vector<2x9xf32>
    %769 = arith.addf %754, %768 : vector<2x9xf32>
    %cst_222 = arith.constant 0.00999999977 : f32
    %770 = vector.broadcast %cst_222 : f32 to vector<2x9xf32>
    %771 = arith.mulf %766, %770 : vector<2x9xf32>
    %772 = arith.addf %757, %771 : vector<2x9xf32>
    %773 = vector.extract_strided_slice %24 {offsets = [0, 441], sizes = [2, 9], strides = [1, 1]} : vector<2x900xf32> to vector<2x9xf32>
    %774 = arith.mulf %773, %27 : vector<2x9xf32>
    %775 = arith.subf %19, %769 : vector<2x9xf32>
    %cst_223 = arith.constant 1.562500e+02 : f32
    %776 = vector.broadcast %cst_223 : f32 to vector<2x9xf32>
    %777 = arith.mulf %776, %775 : vector<2x9xf32>
    %cst_224 = arith.constant 2.500000e+01 : f32
    %778 = vector.broadcast %cst_224 : f32 to vector<2x9xf32>
    %779 = arith.mulf %778, %772 : vector<2x9xf32>
    %780 = arith.subf %777, %779 : vector<2x9xf32>
    %781 = arith.addf %780, %774 : vector<2x9xf32>
    %cst_225 = arith.constant 0.00999999977 : f32
    %782 = vector.broadcast %cst_225 : f32 to vector<2x9xf32>
    %783 = arith.mulf %772, %782 : vector<2x9xf32>
    %784 = arith.addf %769, %783 : vector<2x9xf32>
    %cst_226 = arith.constant 0.00999999977 : f32
    %785 = vector.broadcast %cst_226 : f32 to vector<2x9xf32>
    %786 = arith.mulf %781, %785 : vector<2x9xf32>
    %787 = arith.addf %772, %786 : vector<2x9xf32>
    %788 = arith.subf %784, %632 : vector<2x9xf32>
    %c0_227 = arith.constant 0 : index
    %c36 = arith.constant 36 : index
    %789 = vector.load %arg9[%c0_227, %c36] : memref<2x90xf32, #tpu.memory_space<vmem>>, vector<2x9xf32>
    tpu.vector_store %arg9[%c0_227, %c36], %788 {strides = array<i32>} : memref<2x90xf32, #tpu.memory_space<vmem>>, vector<2x9xf32>,
    %790 = vector.extract_strided_slice %24 {offsets = [0, 450], sizes = [2, 9], strides = [1, 1]} : vector<2x900xf32> to vector<2x9xf32>
    %791 = arith.mulf %790, %27 : vector<2x9xf32>
    %792 = arith.subf %19, %784 : vector<2x9xf32>
    %cst_228 = arith.constant 1.562500e+02 : f32
    %793 = vector.broadcast %cst_228 : f32 to vector<2x9xf32>
    %794 = arith.mulf %793, %792 : vector<2x9xf32>
    %cst_229 = arith.constant 2.500000e+01 : f32
    %795 = vector.broadcast %cst_229 : f32 to vector<2x9xf32>
    %796 = arith.mulf %795, %787 : vector<2x9xf32>
    %797 = arith.subf %794, %796 : vector<2x9xf32>
    %798 = arith.addf %797, %791 : vector<2x9xf32>
    %cst_230 = arith.constant 0.00999999977 : f32
    %799 = vector.broadcast %cst_230 : f32 to vector<2x9xf32>
    %800 = arith.mulf %787, %799 : vector<2x9xf32>
    %801 = arith.addf %784, %800 : vector<2x9xf32>
    %cst_231 = arith.constant 0.00999999977 : f32
    %802 = vector.broadcast %cst_231 : f32 to vector<2x9xf32>
    %803 = arith.mulf %798, %802 : vector<2x9xf32>
    %804 = arith.addf %787, %803 : vector<2x9xf32>
    %805 = vector.extract_strided_slice %24 {offsets = [0, 459], sizes = [2, 9], strides = [1, 1]} : vector<2x900xf32> to vector<2x9xf32>
    %806 = arith.mulf %805, %27 : vector<2x9xf32>
    %807 = arith.subf %19, %801 : vector<2x9xf32>
    %cst_232 = arith.constant 1.562500e+02 : f32
    %808 = vector.broadcast %cst_232 : f32 to vector<2x9xf32>
    %809 = arith.mulf %808, %807 : vector<2x9xf32>
    %cst_233 = arith.constant 2.500000e+01 : f32
    %810 = vector.broadcast %cst_233 : f32 to vector<2x9xf32>
    %811 = arith.mulf %810, %804 : vector<2x9xf32>
    %812 = arith.subf %809, %811 : vector<2x9xf32>
    %813 = arith.addf %812, %806 : vector<2x9xf32>
    %cst_234 = arith.constant 0.00999999977 : f32
    %814 = vector.broadcast %cst_234 : f32 to vector<2x9xf32>
    %815 = arith.mulf %804, %814 : vector<2x9xf32>
    %816 = arith.addf %801, %815 : vector<2x9xf32>
    %cst_235 = arith.constant 0.00999999977 : f32
    %817 = vector.broadcast %cst_235 : f32 to vector<2x9xf32>
    %818 = arith.mulf %813, %817 : vector<2x9xf32>
    %819 = arith.addf %804, %818 : vector<2x9xf32>
    %820 = vector.extract_strided_slice %24 {offsets = [0, 468], sizes = [2, 9], strides = [1, 1]} : vector<2x900xf32> to vector<2x9xf32>
    %821 = arith.mulf %820, %27 : vector<2x9xf32>
    %822 = arith.subf %19, %816 : vector<2x9xf32>
    %cst_236 = arith.constant 1.562500e+02 : f32
    %823 = vector.broadcast %cst_236 : f32 to vector<2x9xf32>
    %824 = arith.mulf %823, %822 : vector<2x9xf32>
    %cst_237 = arith.constant 2.500000e+01 : f32
    %825 = vector.broadcast %cst_237 : f32 to vector<2x9xf32>
    %826 = arith.mulf %825, %819 : vector<2x9xf32>
    %827 = arith.subf %824, %826 : vector<2x9xf32>
    %828 = arith.addf %827, %821 : vector<2x9xf32>
    %cst_238 = arith.constant 0.00999999977 : f32
    %829 = vector.broadcast %cst_238 : f32 to vector<2x9xf32>
    %830 = arith.mulf %819, %829 : vector<2x9xf32>
    %831 = arith.addf %816, %830 : vector<2x9xf32>
    %cst_239 = arith.constant 0.00999999977 : f32
    %832 = vector.broadcast %cst_239 : f32 to vector<2x9xf32>
    %833 = arith.mulf %828, %832 : vector<2x9xf32>
    %834 = arith.addf %819, %833 : vector<2x9xf32>
    %835 = vector.extract_strided_slice %24 {offsets = [0, 477], sizes = [2, 9], strides = [1, 1]} : vector<2x900xf32> to vector<2x9xf32>
    %836 = arith.mulf %835, %27 : vector<2x9xf32>
    %837 = arith.subf %19, %831 : vector<2x9xf32>
    %cst_240 = arith.constant 1.562500e+02 : f32
    %838 = vector.broadcast %cst_240 : f32 to vector<2x9xf32>
    %839 = arith.mulf %838, %837 : vector<2x9xf32>
    %cst_241 = arith.constant 2.500000e+01 : f32
    %840 = vector.broadcast %cst_241 : f32 to vector<2x9xf32>
    %841 = arith.mulf %840, %834 : vector<2x9xf32>
    %842 = arith.subf %839, %841 : vector<2x9xf32>
    %843 = arith.addf %842, %836 : vector<2x9xf32>
    %cst_242 = arith.constant 0.00999999977 : f32
    %844 = vector.broadcast %cst_242 : f32 to vector<2x9xf32>
    %845 = arith.mulf %834, %844 : vector<2x9xf32>
    %846 = arith.addf %831, %845 : vector<2x9xf32>
    %cst_243 = arith.constant 0.00999999977 : f32
    %847 = vector.broadcast %cst_243 : f32 to vector<2x9xf32>
    %848 = arith.mulf %843, %847 : vector<2x9xf32>
    %849 = arith.addf %834, %848 : vector<2x9xf32>
    %850 = vector.extract_strided_slice %24 {offsets = [0, 486], sizes = [2, 9], strides = [1, 1]} : vector<2x900xf32> to vector<2x9xf32>
    %851 = arith.mulf %850, %27 : vector<2x9xf32>
    %852 = arith.subf %19, %846 : vector<2x9xf32>
    %cst_244 = arith.constant 1.562500e+02 : f32
    %853 = vector.broadcast %cst_244 : f32 to vector<2x9xf32>
    %854 = arith.mulf %853, %852 : vector<2x9xf32>
    %cst_245 = arith.constant 2.500000e+01 : f32
    %855 = vector.broadcast %cst_245 : f32 to vector<2x9xf32>
    %856 = arith.mulf %855, %849 : vector<2x9xf32>
    %857 = arith.subf %854, %856 : vector<2x9xf32>
    %858 = arith.addf %857, %851 : vector<2x9xf32>
    %cst_246 = arith.constant 0.00999999977 : f32
    %859 = vector.broadcast %cst_246 : f32 to vector<2x9xf32>
    %860 = arith.mulf %849, %859 : vector<2x9xf32>
    %861 = arith.addf %846, %860 : vector<2x9xf32>
    %cst_247 = arith.constant 0.00999999977 : f32
    %862 = vector.broadcast %cst_247 : f32 to vector<2x9xf32>
    %863 = arith.mulf %858, %862 : vector<2x9xf32>
    %864 = arith.addf %849, %863 : vector<2x9xf32>
    %865 = vector.extract_strided_slice %24 {offsets = [0, 495], sizes = [2, 9], strides = [1, 1]} : vector<2x900xf32> to vector<2x9xf32>
    %866 = arith.mulf %865, %27 : vector<2x9xf32>
    %867 = arith.subf %19, %861 : vector<2x9xf32>
    %cst_248 = arith.constant 1.562500e+02 : f32
    %868 = vector.broadcast %cst_248 : f32 to vector<2x9xf32>
    %869 = arith.mulf %868, %867 : vector<2x9xf32>
    %cst_249 = arith.constant 2.500000e+01 : f32
    %870 = vector.broadcast %cst_249 : f32 to vector<2x9xf32>
    %871 = arith.mulf %870, %864 : vector<2x9xf32>
    %872 = arith.subf %869, %871 : vector<2x9xf32>
    %873 = arith.addf %872, %866 : vector<2x9xf32>
    %cst_250 = arith.constant 0.00999999977 : f32
    %874 = vector.broadcast %cst_250 : f32 to vector<2x9xf32>
    %875 = arith.mulf %864, %874 : vector<2x9xf32>
    %876 = arith.addf %861, %875 : vector<2x9xf32>
    %cst_251 = arith.constant 0.00999999977 : f32
    %877 = vector.broadcast %cst_251 : f32 to vector<2x9xf32>
    %878 = arith.mulf %873, %877 : vector<2x9xf32>
    %879 = arith.addf %864, %878 : vector<2x9xf32>
    %880 = vector.extract_strided_slice %24 {offsets = [0, 504], sizes = [2, 9], strides = [1, 1]} : vector<2x900xf32> to vector<2x9xf32>
    %881 = arith.mulf %880, %27 : vector<2x9xf32>
    %882 = arith.subf %19, %876 : vector<2x9xf32>
    %cst_252 = arith.constant 1.562500e+02 : f32
    %883 = vector.broadcast %cst_252 : f32 to vector<2x9xf32>
    %884 = arith.mulf %883, %882 : vector<2x9xf32>
    %cst_253 = arith.constant 2.500000e+01 : f32
    %885 = vector.broadcast %cst_253 : f32 to vector<2x9xf32>
    %886 = arith.mulf %885, %879 : vector<2x9xf32>
    %887 = arith.subf %884, %886 : vector<2x9xf32>
    %888 = arith.addf %887, %881 : vector<2x9xf32>
    %cst_254 = arith.constant 0.00999999977 : f32
    %889 = vector.broadcast %cst_254 : f32 to vector<2x9xf32>
    %890 = arith.mulf %879, %889 : vector<2x9xf32>
    %891 = arith.addf %876, %890 : vector<2x9xf32>
    %cst_255 = arith.constant 0.00999999977 : f32
    %892 = vector.broadcast %cst_255 : f32 to vector<2x9xf32>
    %893 = arith.mulf %888, %892 : vector<2x9xf32>
    %894 = arith.addf %879, %893 : vector<2x9xf32>
    %895 = vector.extract_strided_slice %24 {offsets = [0, 513], sizes = [2, 9], strides = [1, 1]} : vector<2x900xf32> to vector<2x9xf32>
    %896 = arith.mulf %895, %27 : vector<2x9xf32>
    %897 = arith.subf %19, %891 : vector<2x9xf32>
    %cst_256 = arith.constant 1.562500e+02 : f32
    %898 = vector.broadcast %cst_256 : f32 to vector<2x9xf32>
    %899 = arith.mulf %898, %897 : vector<2x9xf32>
    %cst_257 = arith.constant 2.500000e+01 : f32
    %900 = vector.broadcast %cst_257 : f32 to vector<2x9xf32>
    %901 = arith.mulf %900, %894 : vector<2x9xf32>
    %902 = arith.subf %899, %901 : vector<2x9xf32>
    %903 = arith.addf %902, %896 : vector<2x9xf32>
    %cst_258 = arith.constant 0.00999999977 : f32
    %904 = vector.broadcast %cst_258 : f32 to vector<2x9xf32>
    %905 = arith.mulf %894, %904 : vector<2x9xf32>
    %906 = arith.addf %891, %905 : vector<2x9xf32>
    %cst_259 = arith.constant 0.00999999977 : f32
    %907 = vector.broadcast %cst_259 : f32 to vector<2x9xf32>
    %908 = arith.mulf %903, %907 : vector<2x9xf32>
    %909 = arith.addf %894, %908 : vector<2x9xf32>
    %910 = vector.extract_strided_slice %24 {offsets = [0, 522], sizes = [2, 9], strides = [1, 1]} : vector<2x900xf32> to vector<2x9xf32>
    %911 = arith.mulf %910, %27 : vector<2x9xf32>
    %912 = arith.subf %19, %906 : vector<2x9xf32>
    %cst_260 = arith.constant 1.562500e+02 : f32
    %913 = vector.broadcast %cst_260 : f32 to vector<2x9xf32>
    %914 = arith.mulf %913, %912 : vector<2x9xf32>
    %cst_261 = arith.constant 2.500000e+01 : f32
    %915 = vector.broadcast %cst_261 : f32 to vector<2x9xf32>
    %916 = arith.mulf %915, %909 : vector<2x9xf32>
    %917 = arith.subf %914, %916 : vector<2x9xf32>
    %918 = arith.addf %917, %911 : vector<2x9xf32>
    %cst_262 = arith.constant 0.00999999977 : f32
    %919 = vector.broadcast %cst_262 : f32 to vector<2x9xf32>
    %920 = arith.mulf %909, %919 : vector<2x9xf32>
    %921 = arith.addf %906, %920 : vector<2x9xf32>
    %cst_263 = arith.constant 0.00999999977 : f32
    %922 = vector.broadcast %cst_263 : f32 to vector<2x9xf32>
    %923 = arith.mulf %918, %922 : vector<2x9xf32>
    %924 = arith.addf %909, %923 : vector<2x9xf32>
    %925 = vector.extract_strided_slice %24 {offsets = [0, 531], sizes = [2, 9], strides = [1, 1]} : vector<2x900xf32> to vector<2x9xf32>
    %926 = arith.mulf %925, %27 : vector<2x9xf32>
    %927 = arith.subf %19, %921 : vector<2x9xf32>
    %cst_264 = arith.constant 1.562500e+02 : f32
    %928 = vector.broadcast %cst_264 : f32 to vector<2x9xf32>
    %929 = arith.mulf %928, %927 : vector<2x9xf32>
    %cst_265 = arith.constant 2.500000e+01 : f32
    %930 = vector.broadcast %cst_265 : f32 to vector<2x9xf32>
    %931 = arith.mulf %930, %924 : vector<2x9xf32>
    %932 = arith.subf %929, %931 : vector<2x9xf32>
    %933 = arith.addf %932, %926 : vector<2x9xf32>
    %cst_266 = arith.constant 0.00999999977 : f32
    %934 = vector.broadcast %cst_266 : f32 to vector<2x9xf32>
    %935 = arith.mulf %924, %934 : vector<2x9xf32>
    %936 = arith.addf %921, %935 : vector<2x9xf32>
    %cst_267 = arith.constant 0.00999999977 : f32
    %937 = vector.broadcast %cst_267 : f32 to vector<2x9xf32>
    %938 = arith.mulf %933, %937 : vector<2x9xf32>
    %939 = arith.addf %924, %938 : vector<2x9xf32>
    %940 = arith.subf %936, %784 : vector<2x9xf32>
    %c0_268 = arith.constant 0 : index
    %c45 = arith.constant 45 : index
    %941 = vector.load %arg9[%c0_268, %c45] : memref<2x90xf32, #tpu.memory_space<vmem>>, vector<2x9xf32>
    tpu.vector_store %arg9[%c0_268, %c45], %940 {strides = array<i32>} : memref<2x90xf32, #tpu.memory_space<vmem>>, vector<2x9xf32>,
    %942 = vector.extract_strided_slice %24 {offsets = [0, 540], sizes = [2, 9], strides = [1, 1]} : vector<2x900xf32> to vector<2x9xf32>
    %943 = arith.mulf %942, %27 : vector<2x9xf32>
    %944 = arith.subf %19, %936 : vector<2x9xf32>
    %cst_269 = arith.constant 1.562500e+02 : f32
    %945 = vector.broadcast %cst_269 : f32 to vector<2x9xf32>
    %946 = arith.mulf %945, %944 : vector<2x9xf32>
    %cst_270 = arith.constant 2.500000e+01 : f32
    %947 = vector.broadcast %cst_270 : f32 to vector<2x9xf32>
    %948 = arith.mulf %947, %939 : vector<2x9xf32>
    %949 = arith.subf %946, %948 : vector<2x9xf32>
    %950 = arith.addf %949, %943 : vector<2x9xf32>
    %cst_271 = arith.constant 0.00999999977 : f32
    %951 = vector.broadcast %cst_271 : f32 to vector<2x9xf32>
    %952 = arith.mulf %939, %951 : vector<2x9xf32>
    %953 = arith.addf %936, %952 : vector<2x9xf32>
    %cst_272 = arith.constant 0.00999999977 : f32
    %954 = vector.broadcast %cst_272 : f32 to vector<2x9xf32>
    %955 = arith.mulf %950, %954 : vector<2x9xf32>
    %956 = arith.addf %939, %955 : vector<2x9xf32>
    %957 = vector.extract_strided_slice %24 {offsets = [0, 549], sizes = [2, 9], strides = [1, 1]} : vector<2x900xf32> to vector<2x9xf32>
    %958 = arith.mulf %957, %27 : vector<2x9xf32>
    %959 = arith.subf %19, %953 : vector<2x9xf32>
    %cst_273 = arith.constant 1.562500e+02 : f32
    %960 = vector.broadcast %cst_273 : f32 to vector<2x9xf32>
    %961 = arith.mulf %960, %959 : vector<2x9xf32>
    %cst_274 = arith.constant 2.500000e+01 : f32
    %962 = vector.broadcast %cst_274 : f32 to vector<2x9xf32>
    %963 = arith.mulf %962, %956 : vector<2x9xf32>
    %964 = arith.subf %961, %963 : vector<2x9xf32>
    %965 = arith.addf %964, %958 : vector<2x9xf32>
    %cst_275 = arith.constant 0.00999999977 : f32
    %966 = vector.broadcast %cst_275 : f32 to vector<2x9xf32>
    %967 = arith.mulf %956, %966 : vector<2x9xf32>
    %968 = arith.addf %953, %967 : vector<2x9xf32>
    %cst_276 = arith.constant 0.00999999977 : f32
    %969 = vector.broadcast %cst_276 : f32 to vector<2x9xf32>
    %970 = arith.mulf %965, %969 : vector<2x9xf32>
    %971 = arith.addf %956, %970 : vector<2x9xf32>
    %972 = vector.extract_strided_slice %24 {offsets = [0, 558], sizes = [2, 9], strides = [1, 1]} : vector<2x900xf32> to vector<2x9xf32>
    %973 = arith.mulf %972, %27 : vector<2x9xf32>
    %974 = arith.subf %19, %968 : vector<2x9xf32>
    %cst_277 = arith.constant 1.562500e+02 : f32
    %975 = vector.broadcast %cst_277 : f32 to vector<2x9xf32>
    %976 = arith.mulf %975, %974 : vector<2x9xf32>
    %cst_278 = arith.constant 2.500000e+01 : f32
    %977 = vector.broadcast %cst_278 : f32 to vector<2x9xf32>
    %978 = arith.mulf %977, %971 : vector<2x9xf32>
    %979 = arith.subf %976, %978 : vector<2x9xf32>
    %980 = arith.addf %979, %973 : vector<2x9xf32>
    %cst_279 = arith.constant 0.00999999977 : f32
    %981 = vector.broadcast %cst_279 : f32 to vector<2x9xf32>
    %982 = arith.mulf %971, %981 : vector<2x9xf32>
    %983 = arith.addf %968, %982 : vector<2x9xf32>
    %cst_280 = arith.constant 0.00999999977 : f32
    %984 = vector.broadcast %cst_280 : f32 to vector<2x9xf32>
    %985 = arith.mulf %980, %984 : vector<2x9xf32>
    %986 = arith.addf %971, %985 : vector<2x9xf32>
    %987 = vector.extract_strided_slice %24 {offsets = [0, 567], sizes = [2, 9], strides = [1, 1]} : vector<2x900xf32> to vector<2x9xf32>
    %988 = arith.mulf %987, %27 : vector<2x9xf32>
    %989 = arith.subf %19, %983 : vector<2x9xf32>
    %cst_281 = arith.constant 1.562500e+02 : f32
    %990 = vector.broadcast %cst_281 : f32 to vector<2x9xf32>
    %991 = arith.mulf %990, %989 : vector<2x9xf32>
    %cst_282 = arith.constant 2.500000e+01 : f32
    %992 = vector.broadcast %cst_282 : f32 to vector<2x9xf32>
    %993 = arith.mulf %992, %986 : vector<2x9xf32>
    %994 = arith.subf %991, %993 : vector<2x9xf32>
    %995 = arith.addf %994, %988 : vector<2x9xf32>
    %cst_283 = arith.constant 0.00999999977 : f32
    %996 = vector.broadcast %cst_283 : f32 to vector<2x9xf32>
    %997 = arith.mulf %986, %996 : vector<2x9xf32>
    %998 = arith.addf %983, %997 : vector<2x9xf32>
    %cst_284 = arith.constant 0.00999999977 : f32
    %999 = vector.broadcast %cst_284 : f32 to vector<2x9xf32>
    %1000 = arith.mulf %995, %999 : vector<2x9xf32>
    %1001 = arith.addf %986, %1000 : vector<2x9xf32>
    %1002 = vector.extract_strided_slice %24 {offsets = [0, 576], sizes = [2, 9], strides = [1, 1]} : vector<2x900xf32> to vector<2x9xf32>
    %1003 = arith.mulf %1002, %27 : vector<2x9xf32>
    %1004 = arith.subf %19, %998 : vector<2x9xf32>
    %cst_285 = arith.constant 1.562500e+02 : f32
    %1005 = vector.broadcast %cst_285 : f32 to vector<2x9xf32>
    %1006 = arith.mulf %1005, %1004 : vector<2x9xf32>
    %cst_286 = arith.constant 2.500000e+01 : f32
    %1007 = vector.broadcast %cst_286 : f32 to vector<2x9xf32>
    %1008 = arith.mulf %1007, %1001 : vector<2x9xf32>
    %1009 = arith.subf %1006, %1008 : vector<2x9xf32>
    %1010 = arith.addf %1009, %1003 : vector<2x9xf32>
    %cst_287 = arith.constant 0.00999999977 : f32
    %1011 = vector.broadcast %cst_287 : f32 to vector<2x9xf32>
    %1012 = arith.mulf %1001, %1011 : vector<2x9xf32>
    %1013 = arith.addf %998, %1012 : vector<2x9xf32>
    %cst_288 = arith.constant 0.00999999977 : f32
    %1014 = vector.broadcast %cst_288 : f32 to vector<2x9xf32>
    %1015 = arith.mulf %1010, %1014 : vector<2x9xf32>
    %1016 = arith.addf %1001, %1015 : vector<2x9xf32>
    %1017 = vector.extract_strided_slice %24 {offsets = [0, 585], sizes = [2, 9], strides = [1, 1]} : vector<2x900xf32> to vector<2x9xf32>
    %1018 = arith.mulf %1017, %27 : vector<2x9xf32>
    %1019 = arith.subf %19, %1013 : vector<2x9xf32>
    %cst_289 = arith.constant 1.562500e+02 : f32
    %1020 = vector.broadcast %cst_289 : f32 to vector<2x9xf32>
    %1021 = arith.mulf %1020, %1019 : vector<2x9xf32>
    %cst_290 = arith.constant 2.500000e+01 : f32
    %1022 = vector.broadcast %cst_290 : f32 to vector<2x9xf32>
    %1023 = arith.mulf %1022, %1016 : vector<2x9xf32>
    %1024 = arith.subf %1021, %1023 : vector<2x9xf32>
    %1025 = arith.addf %1024, %1018 : vector<2x9xf32>
    %cst_291 = arith.constant 0.00999999977 : f32
    %1026 = vector.broadcast %cst_291 : f32 to vector<2x9xf32>
    %1027 = arith.mulf %1016, %1026 : vector<2x9xf32>
    %1028 = arith.addf %1013, %1027 : vector<2x9xf32>
    %cst_292 = arith.constant 0.00999999977 : f32
    %1029 = vector.broadcast %cst_292 : f32 to vector<2x9xf32>
    %1030 = arith.mulf %1025, %1029 : vector<2x9xf32>
    %1031 = arith.addf %1016, %1030 : vector<2x9xf32>
    %1032 = vector.extract_strided_slice %24 {offsets = [0, 594], sizes = [2, 9], strides = [1, 1]} : vector<2x900xf32> to vector<2x9xf32>
    %1033 = arith.mulf %1032, %27 : vector<2x9xf32>
    %1034 = arith.subf %19, %1028 : vector<2x9xf32>
    %cst_293 = arith.constant 1.562500e+02 : f32
    %1035 = vector.broadcast %cst_293 : f32 to vector<2x9xf32>
    %1036 = arith.mulf %1035, %1034 : vector<2x9xf32>
    %cst_294 = arith.constant 2.500000e+01 : f32
    %1037 = vector.broadcast %cst_294 : f32 to vector<2x9xf32>
    %1038 = arith.mulf %1037, %1031 : vector<2x9xf32>
    %1039 = arith.subf %1036, %1038 : vector<2x9xf32>
    %1040 = arith.addf %1039, %1033 : vector<2x9xf32>
    %cst_295 = arith.constant 0.00999999977 : f32
    %1041 = vector.broadcast %cst_295 : f32 to vector<2x9xf32>
    %1042 = arith.mulf %1031, %1041 : vector<2x9xf32>
    %1043 = arith.addf %1028, %1042 : vector<2x9xf32>
    %cst_296 = arith.constant 0.00999999977 : f32
    %1044 = vector.broadcast %cst_296 : f32 to vector<2x9xf32>
    %1045 = arith.mulf %1040, %1044 : vector<2x9xf32>
    %1046 = arith.addf %1031, %1045 : vector<2x9xf32>
    %1047 = vector.extract_strided_slice %24 {offsets = [0, 603], sizes = [2, 9], strides = [1, 1]} : vector<2x900xf32> to vector<2x9xf32>
    %1048 = arith.mulf %1047, %27 : vector<2x9xf32>
    %1049 = arith.subf %19, %1043 : vector<2x9xf32>
    %cst_297 = arith.constant 1.562500e+02 : f32
    %1050 = vector.broadcast %cst_297 : f32 to vector<2x9xf32>
    %1051 = arith.mulf %1050, %1049 : vector<2x9xf32>
    %cst_298 = arith.constant 2.500000e+01 : f32
    %1052 = vector.broadcast %cst_298 : f32 to vector<2x9xf32>
    %1053 = arith.mulf %1052, %1046 : vector<2x9xf32>
    %1054 = arith.subf %1051, %1053 : vector<2x9xf32>
    %1055 = arith.addf %1054, %1048 : vector<2x9xf32>
    %cst_299 = arith.constant 0.00999999977 : f32
    %1056 = vector.broadcast %cst_299 : f32 to vector<2x9xf32>
    %1057 = arith.mulf %1046, %1056 : vector<2x9xf32>
    %1058 = arith.addf %1043, %1057 : vector<2x9xf32>
    %cst_300 = arith.constant 0.00999999977 : f32
    %1059 = vector.broadcast %cst_300 : f32 to vector<2x9xf32>
    %1060 = arith.mulf %1055, %1059 : vector<2x9xf32>
    %1061 = arith.addf %1046, %1060 : vector<2x9xf32>
    %1062 = vector.extract_strided_slice %24 {offsets = [0, 612], sizes = [2, 9], strides = [1, 1]} : vector<2x900xf32> to vector<2x9xf32>
    %1063 = arith.mulf %1062, %27 : vector<2x9xf32>
    %1064 = arith.subf %19, %1058 : vector<2x9xf32>
    %cst_301 = arith.constant 1.562500e+02 : f32
    %1065 = vector.broadcast %cst_301 : f32 to vector<2x9xf32>
    %1066 = arith.mulf %1065, %1064 : vector<2x9xf32>
    %cst_302 = arith.constant 2.500000e+01 : f32
    %1067 = vector.broadcast %cst_302 : f32 to vector<2x9xf32>
    %1068 = arith.mulf %1067, %1061 : vector<2x9xf32>
    %1069 = arith.subf %1066, %1068 : vector<2x9xf32>
    %1070 = arith.addf %1069, %1063 : vector<2x9xf32>
    %cst_303 = arith.constant 0.00999999977 : f32
    %1071 = vector.broadcast %cst_303 : f32 to vector<2x9xf32>
    %1072 = arith.mulf %1061, %1071 : vector<2x9xf32>
    %1073 = arith.addf %1058, %1072 : vector<2x9xf32>
    %cst_304 = arith.constant 0.00999999977 : f32
    %1074 = vector.broadcast %cst_304 : f32 to vector<2x9xf32>
    %1075 = arith.mulf %1070, %1074 : vector<2x9xf32>
    %1076 = arith.addf %1061, %1075 : vector<2x9xf32>
    %1077 = vector.extract_strided_slice %24 {offsets = [0, 621], sizes = [2, 9], strides = [1, 1]} : vector<2x900xf32> to vector<2x9xf32>
    %1078 = arith.mulf %1077, %27 : vector<2x9xf32>
    %1079 = arith.subf %19, %1073 : vector<2x9xf32>
    %cst_305 = arith.constant 1.562500e+02 : f32
    %1080 = vector.broadcast %cst_305 : f32 to vector<2x9xf32>
    %1081 = arith.mulf %1080, %1079 : vector<2x9xf32>
    %cst_306 = arith.constant 2.500000e+01 : f32
    %1082 = vector.broadcast %cst_306 : f32 to vector<2x9xf32>
    %1083 = arith.mulf %1082, %1076 : vector<2x9xf32>
    %1084 = arith.subf %1081, %1083 : vector<2x9xf32>
    %1085 = arith.addf %1084, %1078 : vector<2x9xf32>
    %cst_307 = arith.constant 0.00999999977 : f32
    %1086 = vector.broadcast %cst_307 : f32 to vector<2x9xf32>
    %1087 = arith.mulf %1076, %1086 : vector<2x9xf32>
    %1088 = arith.addf %1073, %1087 : vector<2x9xf32>
    %cst_308 = arith.constant 0.00999999977 : f32
    %1089 = vector.broadcast %cst_308 : f32 to vector<2x9xf32>
    %1090 = arith.mulf %1085, %1089 : vector<2x9xf32>
    %1091 = arith.addf %1076, %1090 : vector<2x9xf32>
    %1092 = arith.subf %1088, %936 : vector<2x9xf32>
    %c0_309 = arith.constant 0 : index
    %c54 = arith.constant 54 : index
    %1093 = vector.load %arg9[%c0_309, %c54] : memref<2x90xf32, #tpu.memory_space<vmem>>, vector<2x9xf32>
    tpu.vector_store %arg9[%c0_309, %c54], %1092 {strides = array<i32>} : memref<2x90xf32, #tpu.memory_space<vmem>>, vector<2x9xf32>,
    %1094 = vector.extract_strided_slice %24 {offsets = [0, 630], sizes = [2, 9], strides = [1, 1]} : vector<2x900xf32> to vector<2x9xf32>
    %1095 = arith.mulf %1094, %27 : vector<2x9xf32>
    %1096 = arith.subf %19, %1088 : vector<2x9xf32>
    %cst_310 = arith.constant 1.562500e+02 : f32
    %1097 = vector.broadcast %cst_310 : f32 to vector<2x9xf32>
    %1098 = arith.mulf %1097, %1096 : vector<2x9xf32>
    %cst_311 = arith.constant 2.500000e+01 : f32
    %1099 = vector.broadcast %cst_311 : f32 to vector<2x9xf32>
    %1100 = arith.mulf %1099, %1091 : vector<2x9xf32>
    %1101 = arith.subf %1098, %1100 : vector<2x9xf32>
    %1102 = arith.addf %1101, %1095 : vector<2x9xf32>
    %cst_312 = arith.constant 0.00999999977 : f32
    %1103 = vector.broadcast %cst_312 : f32 to vector<2x9xf32>
    %1104 = arith.mulf %1091, %1103 : vector<2x9xf32>
    %1105 = arith.addf %1088, %1104 : vector<2x9xf32>
    %cst_313 = arith.constant 0.00999999977 : f32
    %1106 = vector.broadcast %cst_313 : f32 to vector<2x9xf32>
    %1107 = arith.mulf %1102, %1106 : vector<2x9xf32>
    %1108 = arith.addf %1091, %1107 : vector<2x9xf32>
    %1109 = vector.extract_strided_slice %24 {offsets = [0, 639], sizes = [2, 9], strides = [1, 1]} : vector<2x900xf32> to vector<2x9xf32>
    %1110 = arith.mulf %1109, %27 : vector<2x9xf32>
    %1111 = arith.subf %19, %1105 : vector<2x9xf32>
    %cst_314 = arith.constant 1.562500e+02 : f32
    %1112 = vector.broadcast %cst_314 : f32 to vector<2x9xf32>
    %1113 = arith.mulf %1112, %1111 : vector<2x9xf32>
    %cst_315 = arith.constant 2.500000e+01 : f32
    %1114 = vector.broadcast %cst_315 : f32 to vector<2x9xf32>
    %1115 = arith.mulf %1114, %1108 : vector<2x9xf32>
    %1116 = arith.subf %1113, %1115 : vector<2x9xf32>
    %1117 = arith.addf %1116, %1110 : vector<2x9xf32>
    %cst_316 = arith.constant 0.00999999977 : f32
    %1118 = vector.broadcast %cst_316 : f32 to vector<2x9xf32>
    %1119 = arith.mulf %1108, %1118 : vector<2x9xf32>
    %1120 = arith.addf %1105, %1119 : vector<2x9xf32>
    %cst_317 = arith.constant 0.00999999977 : f32
    %1121 = vector.broadcast %cst_317 : f32 to vector<2x9xf32>
    %1122 = arith.mulf %1117, %1121 : vector<2x9xf32>
    %1123 = arith.addf %1108, %1122 : vector<2x9xf32>
    %1124 = vector.extract_strided_slice %24 {offsets = [0, 648], sizes = [2, 9], strides = [1, 1]} : vector<2x900xf32> to vector<2x9xf32>
    %1125 = arith.mulf %1124, %27 : vector<2x9xf32>
    %1126 = arith.subf %19, %1120 : vector<2x9xf32>
    %cst_318 = arith.constant 1.562500e+02 : f32
    %1127 = vector.broadcast %cst_318 : f32 to vector<2x9xf32>
    %1128 = arith.mulf %1127, %1126 : vector<2x9xf32>
    %cst_319 = arith.constant 2.500000e+01 : f32
    %1129 = vector.broadcast %cst_319 : f32 to vector<2x9xf32>
    %1130 = arith.mulf %1129, %1123 : vector<2x9xf32>
    %1131 = arith.subf %1128, %1130 : vector<2x9xf32>
    %1132 = arith.addf %1131, %1125 : vector<2x9xf32>
    %cst_320 = arith.constant 0.00999999977 : f32
    %1133 = vector.broadcast %cst_320 : f32 to vector<2x9xf32>
    %1134 = arith.mulf %1123, %1133 : vector<2x9xf32>
    %1135 = arith.addf %1120, %1134 : vector<2x9xf32>
    %cst_321 = arith.constant 0.00999999977 : f32
    %1136 = vector.broadcast %cst_321 : f32 to vector<2x9xf32>
    %1137 = arith.mulf %1132, %1136 : vector<2x9xf32>
    %1138 = arith.addf %1123, %1137 : vector<2x9xf32>
    %1139 = vector.extract_strided_slice %24 {offsets = [0, 657], sizes = [2, 9], strides = [1, 1]} : vector<2x900xf32> to vector<2x9xf32>
    %1140 = arith.mulf %1139, %27 : vector<2x9xf32>
    %1141 = arith.subf %19, %1135 : vector<2x9xf32>
    %cst_322 = arith.constant 1.562500e+02 : f32
    %1142 = vector.broadcast %cst_322 : f32 to vector<2x9xf32>
    %1143 = arith.mulf %1142, %1141 : vector<2x9xf32>
    %cst_323 = arith.constant 2.500000e+01 : f32
    %1144 = vector.broadcast %cst_323 : f32 to vector<2x9xf32>
    %1145 = arith.mulf %1144, %1138 : vector<2x9xf32>
    %1146 = arith.subf %1143, %1145 : vector<2x9xf32>
    %1147 = arith.addf %1146, %1140 : vector<2x9xf32>
    %cst_324 = arith.constant 0.00999999977 : f32
    %1148 = vector.broadcast %cst_324 : f32 to vector<2x9xf32>
    %1149 = arith.mulf %1138, %1148 : vector<2x9xf32>
    %1150 = arith.addf %1135, %1149 : vector<2x9xf32>
    %cst_325 = arith.constant 0.00999999977 : f32
    %1151 = vector.broadcast %cst_325 : f32 to vector<2x9xf32>
    %1152 = arith.mulf %1147, %1151 : vector<2x9xf32>
    %1153 = arith.addf %1138, %1152 : vector<2x9xf32>
    %1154 = vector.extract_strided_slice %24 {offsets = [0, 666], sizes = [2, 9], strides = [1, 1]} : vector<2x900xf32> to vector<2x9xf32>
    %1155 = arith.mulf %1154, %27 : vector<2x9xf32>
    %1156 = arith.subf %19, %1150 : vector<2x9xf32>
    %cst_326 = arith.constant 1.562500e+02 : f32
    %1157 = vector.broadcast %cst_326 : f32 to vector<2x9xf32>
    %1158 = arith.mulf %1157, %1156 : vector<2x9xf32>
    %cst_327 = arith.constant 2.500000e+01 : f32
    %1159 = vector.broadcast %cst_327 : f32 to vector<2x9xf32>
    %1160 = arith.mulf %1159, %1153 : vector<2x9xf32>
    %1161 = arith.subf %1158, %1160 : vector<2x9xf32>
    %1162 = arith.addf %1161, %1155 : vector<2x9xf32>
    %cst_328 = arith.constant 0.00999999977 : f32
    %1163 = vector.broadcast %cst_328 : f32 to vector<2x9xf32>
    %1164 = arith.mulf %1153, %1163 : vector<2x9xf32>
    %1165 = arith.addf %1150, %1164 : vector<2x9xf32>
    %cst_329 = arith.constant 0.00999999977 : f32
    %1166 = vector.broadcast %cst_329 : f32 to vector<2x9xf32>
    %1167 = arith.mulf %1162, %1166 : vector<2x9xf32>
    %1168 = arith.addf %1153, %1167 : vector<2x9xf32>
    %1169 = vector.extract_strided_slice %24 {offsets = [0, 675], sizes = [2, 9], strides = [1, 1]} : vector<2x900xf32> to vector<2x9xf32>
    %1170 = arith.mulf %1169, %27 : vector<2x9xf32>
    %1171 = arith.subf %19, %1165 : vector<2x9xf32>
    %cst_330 = arith.constant 1.562500e+02 : f32
    %1172 = vector.broadcast %cst_330 : f32 to vector<2x9xf32>
    %1173 = arith.mulf %1172, %1171 : vector<2x9xf32>
    %cst_331 = arith.constant 2.500000e+01 : f32
    %1174 = vector.broadcast %cst_331 : f32 to vector<2x9xf32>
    %1175 = arith.mulf %1174, %1168 : vector<2x9xf32>
    %1176 = arith.subf %1173, %1175 : vector<2x9xf32>
    %1177 = arith.addf %1176, %1170 : vector<2x9xf32>
    %cst_332 = arith.constant 0.00999999977 : f32
    %1178 = vector.broadcast %cst_332 : f32 to vector<2x9xf32>
    %1179 = arith.mulf %1168, %1178 : vector<2x9xf32>
    %1180 = arith.addf %1165, %1179 : vector<2x9xf32>
    %cst_333 = arith.constant 0.00999999977 : f32
    %1181 = vector.broadcast %cst_333 : f32 to vector<2x9xf32>
    %1182 = arith.mulf %1177, %1181 : vector<2x9xf32>
    %1183 = arith.addf %1168, %1182 : vector<2x9xf32>
    %1184 = vector.extract_strided_slice %24 {offsets = [0, 684], sizes = [2, 9], strides = [1, 1]} : vector<2x900xf32> to vector<2x9xf32>
    %1185 = arith.mulf %1184, %27 : vector<2x9xf32>
    %1186 = arith.subf %19, %1180 : vector<2x9xf32>
    %cst_334 = arith.constant 1.562500e+02 : f32
    %1187 = vector.broadcast %cst_334 : f32 to vector<2x9xf32>
    %1188 = arith.mulf %1187, %1186 : vector<2x9xf32>
    %cst_335 = arith.constant 2.500000e+01 : f32
    %1189 = vector.broadcast %cst_335 : f32 to vector<2x9xf32>
    %1190 = arith.mulf %1189, %1183 : vector<2x9xf32>
    %1191 = arith.subf %1188, %1190 : vector<2x9xf32>
    %1192 = arith.addf %1191, %1185 : vector<2x9xf32>
    %cst_336 = arith.constant 0.00999999977 : f32
    %1193 = vector.broadcast %cst_336 : f32 to vector<2x9xf32>
    %1194 = arith.mulf %1183, %1193 : vector<2x9xf32>
    %1195 = arith.addf %1180, %1194 : vector<2x9xf32>
    %cst_337 = arith.constant 0.00999999977 : f32
    %1196 = vector.broadcast %cst_337 : f32 to vector<2x9xf32>
    %1197 = arith.mulf %1192, %1196 : vector<2x9xf32>
    %1198 = arith.addf %1183, %1197 : vector<2x9xf32>
    %1199 = vector.extract_strided_slice %24 {offsets = [0, 693], sizes = [2, 9], strides = [1, 1]} : vector<2x900xf32> to vector<2x9xf32>
    %1200 = arith.mulf %1199, %27 : vector<2x9xf32>
    %1201 = arith.subf %19, %1195 : vector<2x9xf32>
    %cst_338 = arith.constant 1.562500e+02 : f32
    %1202 = vector.broadcast %cst_338 : f32 to vector<2x9xf32>
    %1203 = arith.mulf %1202, %1201 : vector<2x9xf32>
    %cst_339 = arith.constant 2.500000e+01 : f32
    %1204 = vector.broadcast %cst_339 : f32 to vector<2x9xf32>
    %1205 = arith.mulf %1204, %1198 : vector<2x9xf32>
    %1206 = arith.subf %1203, %1205 : vector<2x9xf32>
    %1207 = arith.addf %1206, %1200 : vector<2x9xf32>
    %cst_340 = arith.constant 0.00999999977 : f32
    %1208 = vector.broadcast %cst_340 : f32 to vector<2x9xf32>
    %1209 = arith.mulf %1198, %1208 : vector<2x9xf32>
    %1210 = arith.addf %1195, %1209 : vector<2x9xf32>
    %cst_341 = arith.constant 0.00999999977 : f32
    %1211 = vector.broadcast %cst_341 : f32 to vector<2x9xf32>
    %1212 = arith.mulf %1207, %1211 : vector<2x9xf32>
    %1213 = arith.addf %1198, %1212 : vector<2x9xf32>
    %1214 = vector.extract_strided_slice %24 {offsets = [0, 702], sizes = [2, 9], strides = [1, 1]} : vector<2x900xf32> to vector<2x9xf32>
    %1215 = arith.mulf %1214, %27 : vector<2x9xf32>
    %1216 = arith.subf %19, %1210 : vector<2x9xf32>
    %cst_342 = arith.constant 1.562500e+02 : f32
    %1217 = vector.broadcast %cst_342 : f32 to vector<2x9xf32>
    %1218 = arith.mulf %1217, %1216 : vector<2x9xf32>
    %cst_343 = arith.constant 2.500000e+01 : f32
    %1219 = vector.broadcast %cst_343 : f32 to vector<2x9xf32>
    %1220 = arith.mulf %1219, %1213 : vector<2x9xf32>
    %1221 = arith.subf %1218, %1220 : vector<2x9xf32>
    %1222 = arith.addf %1221, %1215 : vector<2x9xf32>
    %cst_344 = arith.constant 0.00999999977 : f32
    %1223 = vector.broadcast %cst_344 : f32 to vector<2x9xf32>
    %1224 = arith.mulf %1213, %1223 : vector<2x9xf32>
    %1225 = arith.addf %1210, %1224 : vector<2x9xf32>
    %cst_345 = arith.constant 0.00999999977 : f32
    %1226 = vector.broadcast %cst_345 : f32 to vector<2x9xf32>
    %1227 = arith.mulf %1222, %1226 : vector<2x9xf32>
    %1228 = arith.addf %1213, %1227 : vector<2x9xf32>
    %1229 = vector.extract_strided_slice %24 {offsets = [0, 711], sizes = [2, 9], strides = [1, 1]} : vector<2x900xf32> to vector<2x9xf32>
    %1230 = arith.mulf %1229, %27 : vector<2x9xf32>
    %1231 = arith.subf %19, %1225 : vector<2x9xf32>
    %cst_346 = arith.constant 1.562500e+02 : f32
    %1232 = vector.broadcast %cst_346 : f32 to vector<2x9xf32>
    %1233 = arith.mulf %1232, %1231 : vector<2x9xf32>
    %cst_347 = arith.constant 2.500000e+01 : f32
    %1234 = vector.broadcast %cst_347 : f32 to vector<2x9xf32>
    %1235 = arith.mulf %1234, %1228 : vector<2x9xf32>
    %1236 = arith.subf %1233, %1235 : vector<2x9xf32>
    %1237 = arith.addf %1236, %1230 : vector<2x9xf32>
    %cst_348 = arith.constant 0.00999999977 : f32
    %1238 = vector.broadcast %cst_348 : f32 to vector<2x9xf32>
    %1239 = arith.mulf %1228, %1238 : vector<2x9xf32>
    %1240 = arith.addf %1225, %1239 : vector<2x9xf32>
    %cst_349 = arith.constant 0.00999999977 : f32
    %1241 = vector.broadcast %cst_349 : f32 to vector<2x9xf32>
    %1242 = arith.mulf %1237, %1241 : vector<2x9xf32>
    %1243 = arith.addf %1228, %1242 : vector<2x9xf32>
    %1244 = arith.subf %1240, %1088 : vector<2x9xf32>
    %c0_350 = arith.constant 0 : index
    %c63 = arith.constant 63 : index
    %1245 = vector.load %arg9[%c0_350, %c63] : memref<2x90xf32, #tpu.memory_space<vmem>>, vector<2x9xf32>
    tpu.vector_store %arg9[%c0_350, %c63], %1244 {strides = array<i32>} : memref<2x90xf32, #tpu.memory_space<vmem>>, vector<2x9xf32>,
    %1246 = vector.extract_strided_slice %24 {offsets = [0, 720], sizes = [2, 9], strides = [1, 1]} : vector<2x900xf32> to vector<2x9xf32>
    %1247 = arith.mulf %1246, %27 : vector<2x9xf32>
    %1248 = arith.subf %19, %1240 : vector<2x9xf32>
    %cst_351 = arith.constant 1.562500e+02 : f32
    %1249 = vector.broadcast %cst_351 : f32 to vector<2x9xf32>
    %1250 = arith.mulf %1249, %1248 : vector<2x9xf32>
    %cst_352 = arith.constant 2.500000e+01 : f32
    %1251 = vector.broadcast %cst_352 : f32 to vector<2x9xf32>
    %1252 = arith.mulf %1251, %1243 : vector<2x9xf32>
    %1253 = arith.subf %1250, %1252 : vector<2x9xf32>
    %1254 = arith.addf %1253, %1247 : vector<2x9xf32>
    %cst_353 = arith.constant 0.00999999977 : f32
    %1255 = vector.broadcast %cst_353 : f32 to vector<2x9xf32>
    %1256 = arith.mulf %1243, %1255 : vector<2x9xf32>
    %1257 = arith.addf %1240, %1256 : vector<2x9xf32>
    %cst_354 = arith.constant 0.00999999977 : f32
    %1258 = vector.broadcast %cst_354 : f32 to vector<2x9xf32>
    %1259 = arith.mulf %1254, %1258 : vector<2x9xf32>
    %1260 = arith.addf %1243, %1259 : vector<2x9xf32>
    %1261 = vector.extract_strided_slice %24 {offsets = [0, 729], sizes = [2, 9], strides = [1, 1]} : vector<2x900xf32> to vector<2x9xf32>
    %1262 = arith.mulf %1261, %27 : vector<2x9xf32>
    %1263 = arith.subf %19, %1257 : vector<2x9xf32>
    %cst_355 = arith.constant 1.562500e+02 : f32
    %1264 = vector.broadcast %cst_355 : f32 to vector<2x9xf32>
    %1265 = arith.mulf %1264, %1263 : vector<2x9xf32>
    %cst_356 = arith.constant 2.500000e+01 : f32
    %1266 = vector.broadcast %cst_356 : f32 to vector<2x9xf32>
    %1267 = arith.mulf %1266, %1260 : vector<2x9xf32>
    %1268 = arith.subf %1265, %1267 : vector<2x9xf32>
    %1269 = arith.addf %1268, %1262 : vector<2x9xf32>
    %cst_357 = arith.constant 0.00999999977 : f32
    %1270 = vector.broadcast %cst_357 : f32 to vector<2x9xf32>
    %1271 = arith.mulf %1260, %1270 : vector<2x9xf32>
    %1272 = arith.addf %1257, %1271 : vector<2x9xf32>
    %cst_358 = arith.constant 0.00999999977 : f32
    %1273 = vector.broadcast %cst_358 : f32 to vector<2x9xf32>
    %1274 = arith.mulf %1269, %1273 : vector<2x9xf32>
    %1275 = arith.addf %1260, %1274 : vector<2x9xf32>
    %1276 = vector.extract_strided_slice %24 {offsets = [0, 738], sizes = [2, 9], strides = [1, 1]} : vector<2x900xf32> to vector<2x9xf32>
    %1277 = arith.mulf %1276, %27 : vector<2x9xf32>
    %1278 = arith.subf %19, %1272 : vector<2x9xf32>
    %cst_359 = arith.constant 1.562500e+02 : f32
    %1279 = vector.broadcast %cst_359 : f32 to vector<2x9xf32>
    %1280 = arith.mulf %1279, %1278 : vector<2x9xf32>
    %cst_360 = arith.constant 2.500000e+01 : f32
    %1281 = vector.broadcast %cst_360 : f32 to vector<2x9xf32>
    %1282 = arith.mulf %1281, %1275 : vector<2x9xf32>
    %1283 = arith.subf %1280, %1282 : vector<2x9xf32>
    %1284 = arith.addf %1283, %1277 : vector<2x9xf32>
    %cst_361 = arith.constant 0.00999999977 : f32
    %1285 = vector.broadcast %cst_361 : f32 to vector<2x9xf32>
    %1286 = arith.mulf %1275, %1285 : vector<2x9xf32>
    %1287 = arith.addf %1272, %1286 : vector<2x9xf32>
    %cst_362 = arith.constant 0.00999999977 : f32
    %1288 = vector.broadcast %cst_362 : f32 to vector<2x9xf32>
    %1289 = arith.mulf %1284, %1288 : vector<2x9xf32>
    %1290 = arith.addf %1275, %1289 : vector<2x9xf32>
    %1291 = vector.extract_strided_slice %24 {offsets = [0, 747], sizes = [2, 9], strides = [1, 1]} : vector<2x900xf32> to vector<2x9xf32>
    %1292 = arith.mulf %1291, %27 : vector<2x9xf32>
    %1293 = arith.subf %19, %1287 : vector<2x9xf32>
    %cst_363 = arith.constant 1.562500e+02 : f32
    %1294 = vector.broadcast %cst_363 : f32 to vector<2x9xf32>
    %1295 = arith.mulf %1294, %1293 : vector<2x9xf32>
    %cst_364 = arith.constant 2.500000e+01 : f32
    %1296 = vector.broadcast %cst_364 : f32 to vector<2x9xf32>
    %1297 = arith.mulf %1296, %1290 : vector<2x9xf32>
    %1298 = arith.subf %1295, %1297 : vector<2x9xf32>
    %1299 = arith.addf %1298, %1292 : vector<2x9xf32>
    %cst_365 = arith.constant 0.00999999977 : f32
    %1300 = vector.broadcast %cst_365 : f32 to vector<2x9xf32>
    %1301 = arith.mulf %1290, %1300 : vector<2x9xf32>
    %1302 = arith.addf %1287, %1301 : vector<2x9xf32>
    %cst_366 = arith.constant 0.00999999977 : f32
    %1303 = vector.broadcast %cst_366 : f32 to vector<2x9xf32>
    %1304 = arith.mulf %1299, %1303 : vector<2x9xf32>
    %1305 = arith.addf %1290, %1304 : vector<2x9xf32>
    %1306 = vector.extract_strided_slice %24 {offsets = [0, 756], sizes = [2, 9], strides = [1, 1]} : vector<2x900xf32> to vector<2x9xf32>
    %1307 = arith.mulf %1306, %27 : vector<2x9xf32>
    %1308 = arith.subf %19, %1302 : vector<2x9xf32>
    %cst_367 = arith.constant 1.562500e+02 : f32
    %1309 = vector.broadcast %cst_367 : f32 to vector<2x9xf32>
    %1310 = arith.mulf %1309, %1308 : vector<2x9xf32>
    %cst_368 = arith.constant 2.500000e+01 : f32
    %1311 = vector.broadcast %cst_368 : f32 to vector<2x9xf32>
    %1312 = arith.mulf %1311, %1305 : vector<2x9xf32>
    %1313 = arith.subf %1310, %1312 : vector<2x9xf32>
    %1314 = arith.addf %1313, %1307 : vector<2x9xf32>
    %cst_369 = arith.constant 0.00999999977 : f32
    %1315 = vector.broadcast %cst_369 : f32 to vector<2x9xf32>
    %1316 = arith.mulf %1305, %1315 : vector<2x9xf32>
    %1317 = arith.addf %1302, %1316 : vector<2x9xf32>
    %cst_370 = arith.constant 0.00999999977 : f32
    %1318 = vector.broadcast %cst_370 : f32 to vector<2x9xf32>
    %1319 = arith.mulf %1314, %1318 : vector<2x9xf32>
    %1320 = arith.addf %1305, %1319 : vector<2x9xf32>
    %1321 = vector.extract_strided_slice %24 {offsets = [0, 765], sizes = [2, 9], strides = [1, 1]} : vector<2x900xf32> to vector<2x9xf32>
    %1322 = arith.mulf %1321, %27 : vector<2x9xf32>
    %1323 = arith.subf %19, %1317 : vector<2x9xf32>
    %cst_371 = arith.constant 1.562500e+02 : f32
    %1324 = vector.broadcast %cst_371 : f32 to vector<2x9xf32>
    %1325 = arith.mulf %1324, %1323 : vector<2x9xf32>
    %cst_372 = arith.constant 2.500000e+01 : f32
    %1326 = vector.broadcast %cst_372 : f32 to vector<2x9xf32>
    %1327 = arith.mulf %1326, %1320 : vector<2x9xf32>
    %1328 = arith.subf %1325, %1327 : vector<2x9xf32>
    %1329 = arith.addf %1328, %1322 : vector<2x9xf32>
    %cst_373 = arith.constant 0.00999999977 : f32
    %1330 = vector.broadcast %cst_373 : f32 to vector<2x9xf32>
    %1331 = arith.mulf %1320, %1330 : vector<2x9xf32>
    %1332 = arith.addf %1317, %1331 : vector<2x9xf32>
    %cst_374 = arith.constant 0.00999999977 : f32
    %1333 = vector.broadcast %cst_374 : f32 to vector<2x9xf32>
    %1334 = arith.mulf %1329, %1333 : vector<2x9xf32>
    %1335 = arith.addf %1320, %1334 : vector<2x9xf32>
    %1336 = vector.extract_strided_slice %24 {offsets = [0, 774], sizes = [2, 9], strides = [1, 1]} : vector<2x900xf32> to vector<2x9xf32>
    %1337 = arith.mulf %1336, %27 : vector<2x9xf32>
    %1338 = arith.subf %19, %1332 : vector<2x9xf32>
    %cst_375 = arith.constant 1.562500e+02 : f32
    %1339 = vector.broadcast %cst_375 : f32 to vector<2x9xf32>
    %1340 = arith.mulf %1339, %1338 : vector<2x9xf32>
    %cst_376 = arith.constant 2.500000e+01 : f32
    %1341 = vector.broadcast %cst_376 : f32 to vector<2x9xf32>
    %1342 = arith.mulf %1341, %1335 : vector<2x9xf32>
    %1343 = arith.subf %1340, %1342 : vector<2x9xf32>
    %1344 = arith.addf %1343, %1337 : vector<2x9xf32>
    %cst_377 = arith.constant 0.00999999977 : f32
    %1345 = vector.broadcast %cst_377 : f32 to vector<2x9xf32>
    %1346 = arith.mulf %1335, %1345 : vector<2x9xf32>
    %1347 = arith.addf %1332, %1346 : vector<2x9xf32>
    %cst_378 = arith.constant 0.00999999977 : f32
    %1348 = vector.broadcast %cst_378 : f32 to vector<2x9xf32>
    %1349 = arith.mulf %1344, %1348 : vector<2x9xf32>
    %1350 = arith.addf %1335, %1349 : vector<2x9xf32>
    %1351 = vector.extract_strided_slice %24 {offsets = [0, 783], sizes = [2, 9], strides = [1, 1]} : vector<2x900xf32> to vector<2x9xf32>
    %1352 = arith.mulf %1351, %27 : vector<2x9xf32>
    %1353 = arith.subf %19, %1347 : vector<2x9xf32>
    %cst_379 = arith.constant 1.562500e+02 : f32
    %1354 = vector.broadcast %cst_379 : f32 to vector<2x9xf32>
    %1355 = arith.mulf %1354, %1353 : vector<2x9xf32>
    %cst_380 = arith.constant 2.500000e+01 : f32
    %1356 = vector.broadcast %cst_380 : f32 to vector<2x9xf32>
    %1357 = arith.mulf %1356, %1350 : vector<2x9xf32>
    %1358 = arith.subf %1355, %1357 : vector<2x9xf32>
    %1359 = arith.addf %1358, %1352 : vector<2x9xf32>
    %cst_381 = arith.constant 0.00999999977 : f32
    %1360 = vector.broadcast %cst_381 : f32 to vector<2x9xf32>
    %1361 = arith.mulf %1350, %1360 : vector<2x9xf32>
    %1362 = arith.addf %1347, %1361 : vector<2x9xf32>
    %cst_382 = arith.constant 0.00999999977 : f32
    %1363 = vector.broadcast %cst_382 : f32 to vector<2x9xf32>
    %1364 = arith.mulf %1359, %1363 : vector<2x9xf32>
    %1365 = arith.addf %1350, %1364 : vector<2x9xf32>
    %1366 = vector.extract_strided_slice %24 {offsets = [0, 792], sizes = [2, 9], strides = [1, 1]} : vector<2x900xf32> to vector<2x9xf32>
    %1367 = arith.mulf %1366, %27 : vector<2x9xf32>
    %1368 = arith.subf %19, %1362 : vector<2x9xf32>
    %cst_383 = arith.constant 1.562500e+02 : f32
    %1369 = vector.broadcast %cst_383 : f32 to vector<2x9xf32>
    %1370 = arith.mulf %1369, %1368 : vector<2x9xf32>
    %cst_384 = arith.constant 2.500000e+01 : f32
    %1371 = vector.broadcast %cst_384 : f32 to vector<2x9xf32>
    %1372 = arith.mulf %1371, %1365 : vector<2x9xf32>
    %1373 = arith.subf %1370, %1372 : vector<2x9xf32>
    %1374 = arith.addf %1373, %1367 : vector<2x9xf32>
    %cst_385 = arith.constant 0.00999999977 : f32
    %1375 = vector.broadcast %cst_385 : f32 to vector<2x9xf32>
    %1376 = arith.mulf %1365, %1375 : vector<2x9xf32>
    %1377 = arith.addf %1362, %1376 : vector<2x9xf32>
    %cst_386 = arith.constant 0.00999999977 : f32
    %1378 = vector.broadcast %cst_386 : f32 to vector<2x9xf32>
    %1379 = arith.mulf %1374, %1378 : vector<2x9xf32>
    %1380 = arith.addf %1365, %1379 : vector<2x9xf32>
    %1381 = vector.extract_strided_slice %24 {offsets = [0, 801], sizes = [2, 9], strides = [1, 1]} : vector<2x900xf32> to vector<2x9xf32>
    %1382 = arith.mulf %1381, %27 : vector<2x9xf32>
    %1383 = arith.subf %19, %1377 : vector<2x9xf32>
    %cst_387 = arith.constant 1.562500e+02 : f32
    %1384 = vector.broadcast %cst_387 : f32 to vector<2x9xf32>
    %1385 = arith.mulf %1384, %1383 : vector<2x9xf32>
    %cst_388 = arith.constant 2.500000e+01 : f32
    %1386 = vector.broadcast %cst_388 : f32 to vector<2x9xf32>
    %1387 = arith.mulf %1386, %1380 : vector<2x9xf32>
    %1388 = arith.subf %1385, %1387 : vector<2x9xf32>
    %1389 = arith.addf %1388, %1382 : vector<2x9xf32>
    %cst_389 = arith.constant 0.00999999977 : f32
    %1390 = vector.broadcast %cst_389 : f32 to vector<2x9xf32>
    %1391 = arith.mulf %1380, %1390 : vector<2x9xf32>
    %1392 = arith.addf %1377, %1391 : vector<2x9xf32>
    %cst_390 = arith.constant 0.00999999977 : f32
    %1393 = vector.broadcast %cst_390 : f32 to vector<2x9xf32>
    %1394 = arith.mulf %1389, %1393 : vector<2x9xf32>
    %1395 = arith.addf %1380, %1394 : vector<2x9xf32>
    %1396 = arith.subf %1392, %1240 : vector<2x9xf32>
    %c0_391 = arith.constant 0 : index
    %c72 = arith.constant 72 : index
    %1397 = vector.load %arg9[%c0_391, %c72] : memref<2x90xf32, #tpu.memory_space<vmem>>, vector<2x9xf32>
    tpu.vector_store %arg9[%c0_391, %c72], %1396 {strides = array<i32>} : memref<2x90xf32, #tpu.memory_space<vmem>>, vector<2x9xf32>,
    %1398 = vector.extract_strided_slice %24 {offsets = [0, 810], sizes = [2, 9], strides = [1, 1]} : vector<2x900xf32> to vector<2x9xf32>
    %1399 = arith.mulf %1398, %27 : vector<2x9xf32>
    %1400 = arith.subf %19, %1392 : vector<2x9xf32>
    %cst_392 = arith.constant 1.562500e+02 : f32
    %1401 = vector.broadcast %cst_392 : f32 to vector<2x9xf32>
    %1402 = arith.mulf %1401, %1400 : vector<2x9xf32>
    %cst_393 = arith.constant 2.500000e+01 : f32
    %1403 = vector.broadcast %cst_393 : f32 to vector<2x9xf32>
    %1404 = arith.mulf %1403, %1395 : vector<2x9xf32>
    %1405 = arith.subf %1402, %1404 : vector<2x9xf32>
    %1406 = arith.addf %1405, %1399 : vector<2x9xf32>
    %cst_394 = arith.constant 0.00999999977 : f32
    %1407 = vector.broadcast %cst_394 : f32 to vector<2x9xf32>
    %1408 = arith.mulf %1395, %1407 : vector<2x9xf32>
    %1409 = arith.addf %1392, %1408 : vector<2x9xf32>
    %cst_395 = arith.constant 0.00999999977 : f32
    %1410 = vector.broadcast %cst_395 : f32 to vector<2x9xf32>
    %1411 = arith.mulf %1406, %1410 : vector<2x9xf32>
    %1412 = arith.addf %1395, %1411 : vector<2x9xf32>
    %1413 = vector.extract_strided_slice %24 {offsets = [0, 819], sizes = [2, 9], strides = [1, 1]} : vector<2x900xf32> to vector<2x9xf32>
    %1414 = arith.mulf %1413, %27 : vector<2x9xf32>
    %1415 = arith.subf %19, %1409 : vector<2x9xf32>
    %cst_396 = arith.constant 1.562500e+02 : f32
    %1416 = vector.broadcast %cst_396 : f32 to vector<2x9xf32>
    %1417 = arith.mulf %1416, %1415 : vector<2x9xf32>
    %cst_397 = arith.constant 2.500000e+01 : f32
    %1418 = vector.broadcast %cst_397 : f32 to vector<2x9xf32>
    %1419 = arith.mulf %1418, %1412 : vector<2x9xf32>
    %1420 = arith.subf %1417, %1419 : vector<2x9xf32>
    %1421 = arith.addf %1420, %1414 : vector<2x9xf32>
    %cst_398 = arith.constant 0.00999999977 : f32
    %1422 = vector.broadcast %cst_398 : f32 to vector<2x9xf32>
    %1423 = arith.mulf %1412, %1422 : vector<2x9xf32>
    %1424 = arith.addf %1409, %1423 : vector<2x9xf32>
    %cst_399 = arith.constant 0.00999999977 : f32
    %1425 = vector.broadcast %cst_399 : f32 to vector<2x9xf32>
    %1426 = arith.mulf %1421, %1425 : vector<2x9xf32>
    %1427 = arith.addf %1412, %1426 : vector<2x9xf32>
    %1428 = vector.extract_strided_slice %24 {offsets = [0, 828], sizes = [2, 9], strides = [1, 1]} : vector<2x900xf32> to vector<2x9xf32>
    %1429 = arith.mulf %1428, %27 : vector<2x9xf32>
    %1430 = arith.subf %19, %1424 : vector<2x9xf32>
    %cst_400 = arith.constant 1.562500e+02 : f32
    %1431 = vector.broadcast %cst_400 : f32 to vector<2x9xf32>
    %1432 = arith.mulf %1431, %1430 : vector<2x9xf32>
    %cst_401 = arith.constant 2.500000e+01 : f32
    %1433 = vector.broadcast %cst_401 : f32 to vector<2x9xf32>
    %1434 = arith.mulf %1433, %1427 : vector<2x9xf32>
    %1435 = arith.subf %1432, %1434 : vector<2x9xf32>
    %1436 = arith.addf %1435, %1429 : vector<2x9xf32>
    %cst_402 = arith.constant 0.00999999977 : f32
    %1437 = vector.broadcast %cst_402 : f32 to vector<2x9xf32>
    %1438 = arith.mulf %1427, %1437 : vector<2x9xf32>
    %1439 = arith.addf %1424, %1438 : vector<2x9xf32>
    %cst_403 = arith.constant 0.00999999977 : f32
    %1440 = vector.broadcast %cst_403 : f32 to vector<2x9xf32>
    %1441 = arith.mulf %1436, %1440 : vector<2x9xf32>
    %1442 = arith.addf %1427, %1441 : vector<2x9xf32>
    %1443 = vector.extract_strided_slice %24 {offsets = [0, 837], sizes = [2, 9], strides = [1, 1]} : vector<2x900xf32> to vector<2x9xf32>
    %1444 = arith.mulf %1443, %27 : vector<2x9xf32>
    %1445 = arith.subf %19, %1439 : vector<2x9xf32>
    %cst_404 = arith.constant 1.562500e+02 : f32
    %1446 = vector.broadcast %cst_404 : f32 to vector<2x9xf32>
    %1447 = arith.mulf %1446, %1445 : vector<2x9xf32>
    %cst_405 = arith.constant 2.500000e+01 : f32
    %1448 = vector.broadcast %cst_405 : f32 to vector<2x9xf32>
    %1449 = arith.mulf %1448, %1442 : vector<2x9xf32>
    %1450 = arith.subf %1447, %1449 : vector<2x9xf32>
    %1451 = arith.addf %1450, %1444 : vector<2x9xf32>
    %cst_406 = arith.constant 0.00999999977 : f32
    %1452 = vector.broadcast %cst_406 : f32 to vector<2x9xf32>
    %1453 = arith.mulf %1442, %1452 : vector<2x9xf32>
    %1454 = arith.addf %1439, %1453 : vector<2x9xf32>
    %cst_407 = arith.constant 0.00999999977 : f32
    %1455 = vector.broadcast %cst_407 : f32 to vector<2x9xf32>
    %1456 = arith.mulf %1451, %1455 : vector<2x9xf32>
    %1457 = arith.addf %1442, %1456 : vector<2x9xf32>
    %1458 = vector.extract_strided_slice %24 {offsets = [0, 846], sizes = [2, 9], strides = [1, 1]} : vector<2x900xf32> to vector<2x9xf32>
    %1459 = arith.mulf %1458, %27 : vector<2x9xf32>
    %1460 = arith.subf %19, %1454 : vector<2x9xf32>
    %cst_408 = arith.constant 1.562500e+02 : f32
    %1461 = vector.broadcast %cst_408 : f32 to vector<2x9xf32>
    %1462 = arith.mulf %1461, %1460 : vector<2x9xf32>
    %cst_409 = arith.constant 2.500000e+01 : f32
    %1463 = vector.broadcast %cst_409 : f32 to vector<2x9xf32>
    %1464 = arith.mulf %1463, %1457 : vector<2x9xf32>
    %1465 = arith.subf %1462, %1464 : vector<2x9xf32>
    %1466 = arith.addf %1465, %1459 : vector<2x9xf32>
    %cst_410 = arith.constant 0.00999999977 : f32
    %1467 = vector.broadcast %cst_410 : f32 to vector<2x9xf32>
    %1468 = arith.mulf %1457, %1467 : vector<2x9xf32>
    %1469 = arith.addf %1454, %1468 : vector<2x9xf32>
    %cst_411 = arith.constant 0.00999999977 : f32
    %1470 = vector.broadcast %cst_411 : f32 to vector<2x9xf32>
    %1471 = arith.mulf %1466, %1470 : vector<2x9xf32>
    %1472 = arith.addf %1457, %1471 : vector<2x9xf32>
    %1473 = vector.extract_strided_slice %24 {offsets = [0, 855], sizes = [2, 9], strides = [1, 1]} : vector<2x900xf32> to vector<2x9xf32>
    %1474 = arith.mulf %1473, %27 : vector<2x9xf32>
    %1475 = arith.subf %19, %1469 : vector<2x9xf32>
    %cst_412 = arith.constant 1.562500e+02 : f32
    %1476 = vector.broadcast %cst_412 : f32 to vector<2x9xf32>
    %1477 = arith.mulf %1476, %1475 : vector<2x9xf32>
    %cst_413 = arith.constant 2.500000e+01 : f32
    %1478 = vector.broadcast %cst_413 : f32 to vector<2x9xf32>
    %1479 = arith.mulf %1478, %1472 : vector<2x9xf32>
    %1480 = arith.subf %1477, %1479 : vector<2x9xf32>
    %1481 = arith.addf %1480, %1474 : vector<2x9xf32>
    %cst_414 = arith.constant 0.00999999977 : f32
    %1482 = vector.broadcast %cst_414 : f32 to vector<2x9xf32>
    %1483 = arith.mulf %1472, %1482 : vector<2x9xf32>
    %1484 = arith.addf %1469, %1483 : vector<2x9xf32>
    %cst_415 = arith.constant 0.00999999977 : f32
    %1485 = vector.broadcast %cst_415 : f32 to vector<2x9xf32>
    %1486 = arith.mulf %1481, %1485 : vector<2x9xf32>
    %1487 = arith.addf %1472, %1486 : vector<2x9xf32>
    %1488 = vector.extract_strided_slice %24 {offsets = [0, 864], sizes = [2, 9], strides = [1, 1]} : vector<2x900xf32> to vector<2x9xf32>
    %1489 = arith.mulf %1488, %27 : vector<2x9xf32>
    %1490 = arith.subf %19, %1484 : vector<2x9xf32>
    %cst_416 = arith.constant 1.562500e+02 : f32
    %1491 = vector.broadcast %cst_416 : f32 to vector<2x9xf32>
    %1492 = arith.mulf %1491, %1490 : vector<2x9xf32>
    %cst_417 = arith.constant 2.500000e+01 : f32
    %1493 = vector.broadcast %cst_417 : f32 to vector<2x9xf32>
    %1494 = arith.mulf %1493, %1487 : vector<2x9xf32>
    %1495 = arith.subf %1492, %1494 : vector<2x9xf32>
    %1496 = arith.addf %1495, %1489 : vector<2x9xf32>
    %cst_418 = arith.constant 0.00999999977 : f32
    %1497 = vector.broadcast %cst_418 : f32 to vector<2x9xf32>
    %1498 = arith.mulf %1487, %1497 : vector<2x9xf32>
    %1499 = arith.addf %1484, %1498 : vector<2x9xf32>
    %cst_419 = arith.constant 0.00999999977 : f32
    %1500 = vector.broadcast %cst_419 : f32 to vector<2x9xf32>
    %1501 = arith.mulf %1496, %1500 : vector<2x9xf32>
    %1502 = arith.addf %1487, %1501 : vector<2x9xf32>
    %1503 = vector.extract_strided_slice %24 {offsets = [0, 873], sizes = [2, 9], strides = [1, 1]} : vector<2x900xf32> to vector<2x9xf32>
    %1504 = arith.mulf %1503, %27 : vector<2x9xf32>
    %1505 = arith.subf %19, %1499 : vector<2x9xf32>
    %cst_420 = arith.constant 1.562500e+02 : f32
    %1506 = vector.broadcast %cst_420 : f32 to vector<2x9xf32>
    %1507 = arith.mulf %1506, %1505 : vector<2x9xf32>
    %cst_421 = arith.constant 2.500000e+01 : f32
    %1508 = vector.broadcast %cst_421 : f32 to vector<2x9xf32>
    %1509 = arith.mulf %1508, %1502 : vector<2x9xf32>
    %1510 = arith.subf %1507, %1509 : vector<2x9xf32>
    %1511 = arith.addf %1510, %1504 : vector<2x9xf32>
    %cst_422 = arith.constant 0.00999999977 : f32
    %1512 = vector.broadcast %cst_422 : f32 to vector<2x9xf32>
    %1513 = arith.mulf %1502, %1512 : vector<2x9xf32>
    %1514 = arith.addf %1499, %1513 : vector<2x9xf32>
    %cst_423 = arith.constant 0.00999999977 : f32
    %1515 = vector.broadcast %cst_423 : f32 to vector<2x9xf32>
    %1516 = arith.mulf %1511, %1515 : vector<2x9xf32>
    %1517 = arith.addf %1502, %1516 : vector<2x9xf32>
    %1518 = vector.extract_strided_slice %24 {offsets = [0, 882], sizes = [2, 9], strides = [1, 1]} : vector<2x900xf32> to vector<2x9xf32>
    %1519 = arith.mulf %1518, %27 : vector<2x9xf32>
    %1520 = arith.subf %19, %1514 : vector<2x9xf32>
    %cst_424 = arith.constant 1.562500e+02 : f32
    %1521 = vector.broadcast %cst_424 : f32 to vector<2x9xf32>
    %1522 = arith.mulf %1521, %1520 : vector<2x9xf32>
    %cst_425 = arith.constant 2.500000e+01 : f32
    %1523 = vector.broadcast %cst_425 : f32 to vector<2x9xf32>
    %1524 = arith.mulf %1523, %1517 : vector<2x9xf32>
    %1525 = arith.subf %1522, %1524 : vector<2x9xf32>
    %1526 = arith.addf %1525, %1519 : vector<2x9xf32>
    %cst_426 = arith.constant 0.00999999977 : f32
    %1527 = vector.broadcast %cst_426 : f32 to vector<2x9xf32>
    %1528 = arith.mulf %1517, %1527 : vector<2x9xf32>
    %1529 = arith.addf %1514, %1528 : vector<2x9xf32>
    %cst_427 = arith.constant 0.00999999977 : f32
    %1530 = vector.broadcast %cst_427 : f32 to vector<2x9xf32>
    %1531 = arith.mulf %1526, %1530 : vector<2x9xf32>
    %1532 = arith.addf %1517, %1531 : vector<2x9xf32>
    %cst_428 = arith.constant 0.00999999977 : f32
    %1533 = vector.broadcast %cst_428 : f32 to vector<2x9xf32>
    %1534 = arith.mulf %1532, %1533 : vector<2x9xf32>
    %1535 = arith.addf %1529, %1534 : vector<2x9xf32>
    %1536 = arith.subf %1535, %1392 : vector<2x9xf32>
    %c0_429 = arith.constant 0 : index
    %c81 = arith.constant 81 : index
    %1537 = vector.load %arg9[%c0_429, %c81] : memref<2x90xf32, #tpu.memory_space<vmem>>, vector<2x9xf32>
    tpu.vector_store %arg9[%c0_429, %c81], %1536 {strides = array<i32>} : memref<2x90xf32, #tpu.memory_space<vmem>>, vector<2x9xf32>,
    return
  }
}

</mosaic_0001>

<bundles_post_ra>
// kernel: squeeze.1
= control target key start
LH: loop header
LB: loop body
LE: loop exit
PB: predicated region body
PF: predicated region fallthrough
CT: control target
= control target key end

     0   :  { %s98_s8 = smov 123   ;;  %vm19_vm0 = vcmask 39936   ;;  %s99_s9 = smov 108   ;;  %s130_s0 = inlined_call_operand.vmem [shape: bf16[45], index: 0, kind: input, shape index: {}]   ;;  %s131_s1 = inlined_call_operand.vmem [shape: bf16[9,5], index: 1, kind: output, shape index: {}]  }
   0x1   :  { %v14_v0 = vld [vmem:[%s130_s0] sm:$0x1]  ;;  %s97_s0 = smov 113   ;;  %s100_s10 = smov 118  }
   0x2   :  { %v15_v1 = vunpack.c.l.bf16 %v14_v0  ;;  %s101_s11 = smov 98   ;;  %s102_s12 = smov 103  }
   0x3   :  { %s103_s13 = smov 88   ;;  %s104_s14 = smov 93  }
   0x4   :  { %17 = vst [vmem:[#allocation1] sm:$0x3] %v15_v1 }
   0xb   :  { %v33_v2 = vld [vmem:[#allocation1] sm:$0x1]  }
   0xc   :  { %v21_v3 = vld [vmem:[#allocation1] sm:$0x1]   ;;  %34 = vrot.lane.b32.xlu1 %v33_v2, %s97_s0 }
   0xd   :  { %22 = vrot.lane.b32.xlu0 %v21_v3, %s98_s8  ;;  %v39_v4 = vld [vmem:[#allocation1] sm:$0x1]  }
   0xe   :  { %v27_v5 = vld [vmem:[#allocation1] sm:$0x1]  }
   0xf   :  { %v18_v6 = vld [vmem:[#allocation1] sm:$0x1]  }
  0x10   :  { %20 = vst.msk [vmem:[#allocation0] sm:$0x1] %vm19_vm0, %v18_v6   ;;  %40 = vrot.lane.b32.xlu1 %v39_v4, %s99_s9  ;;  %v51_v7 = vld [vmem:[#allocation1] sm:$0x1]  }
  0x11   :  { %28 = vrot.lane.b32.xlu0 %v27_v5, %s100_s10  ;;  %v45_v8 = vld [vmem:[#allocation1] sm:$0x1]  }
  0x12   :  { %v63_v9 = vld [vmem:[#allocation1] sm:$0x1]  }
  0x13   :  { %v57_v10 = vld [vmem:[#allocation1] sm:$0x1]  }
  0x14   :  { %52 = vrot.lane.b32.xlu1 %v51_v7, %s101_s11 }
  0x15   :  { %46 = vrot.lane.b32.xlu0 %v45_v8, %s102_s12 }
  0x18   :  { %64 = vrot.lane.b32.xlu1 %v63_v9, %s103_s13 }
  0x19   :  { %58 = vrot.lane.b32.xlu0 %v57_v10, %s104_s14 }
  0x7e   :  { %v35_v11 = vpop.permute.xlu1 %34  }
  0x7f   :  { %v23_v12 = vpop.permute.xlu0 %22   ;;  %38 = vst.msk [vmem:[#allocation0 + $0x3] sm:$0x1] %vm19_vm0, %v35_v11  }
  0x80   :  { %26 = vst.msk [vmem:[#allocation0 + $0x1] sm:$0x1] %vm19_vm0, %v23_v12  }
  0x82   :  { %v41_v13 = vpop.permute.xlu1 %40  }
  0x83   :  { %v29_v14 = vpop.permute.xlu0 %28   ;;  %44 = vst.msk [vmem:[#allocation0 + $0x4] sm:$0x1] %vm19_vm0, %v41_v13  }
  0x84   :  { %32 = vst.msk [vmem:[#allocation0 + $0x2] sm:$0x1] %vm19_vm0, %v29_v14  }
  0x86   :  { %v53_v15 = vpop.permute.xlu1 %52  }
  0x87   :  { %v47_v16 = vpop.permute.xlu0 %46   ;;  %56 = vst.msk [vmem:[#allocation0 + $0x6] sm:$0x1] %vm19_vm0, %v53_v15  }
  0x88   :  { %50 = vst.msk [vmem:[#allocation0 + $0x5] sm:$0x1] %vm19_vm0, %v47_v16  }
  0x8a   :  { %v65_v17 = vpop.permute.xlu1 %64  }
  0x8b   :  { %v59_v18 = vpop.permute.xlu0 %58   ;;  %68 = vst.msk [vmem:[#allocation0 + $0x8] sm:$0x1] %vm19_vm0, %v65_v17  }
  0x8c   :  { %62 = vst.msk [vmem:[#allocation0 + $0x7] sm:$0x1] %vm19_vm0, %v59_v18  }
  0x92   :  { %v78_v19 = vld [vmem:[#allocation0 + $0x8] sm:$0xff] }
  0x93   :  { %v73_v20 = vld [vmem:[#allocation0] sm:$0xff] }
  0x94   :  { %v87_v21 = vpack.c.bf16 %v78_v19, %v73_v20 }
  0x96   :  { %88 = vst [vmem:[%s131_s1] sm:$0xff] %v87_v21  }

// kernel: dmp_net_forward.1
= control target key start
LH: loop header
LB: loop body
LE: loop exit
PB: predicated region body
PF: predicated region fallthrough
CT: control target
= control target key end

     0   :  { %v4260_v0 = vmov 0.0|0.0   ;;  %vm4261_vm0 = vmmov 0   ;;  %v4262_v4 = vmov 0.0   ;;  %vm44_vm1 = vcmask 261120   ;;  %s4263_s12 = smov 121   ;;  %s4264_s13 = smov 113   ;;  %s5587_s1 = inlined_call_operand.vmem [shape: f32[32,32], index: 1, kind: input, shape index: {}]   ;;  %s5588_s0 = inlined_call_operand.vmem [shape: f32[2,32], index: 0, kind: input, shape index: {}]   ;;  %s5589_s3 = inlined_call_operand.vmem [shape: f32[32,32], index: 3, kind: input, shape index: {}]   ;;  %s5590_s2 = inlined_call_operand.vmem [shape: f32[1,32], index: 2, kind: input, shape index: {}]   ;;  %s5591_s7 = inlined_call_operand.vmem [shape: f32[32,900], index: 7, kind: input, shape index: {}]   ;;  %s5592_s5 = inlined_call_operand.vmem [shape: f32[32,9], index: 5, kind: input, shape index: {}]   ;;  %s5593_s4 = inlined_call_operand.vmem [shape: f32[1,32], index: 4, kind: input, shape index: {}]   ;;  %s5594_s8 = inlined_call_operand.vmem [shape: f32[1,900], index: 8, kind: input, shape index: {}]   ;;  %s5595_s6 = inlined_call_operand.vmem [shape: f32[1,9], index: 6, kind: input, shape index: {}]   ;;  %s5596_s9 = inlined_call_operand.vmem [shape: f32[2,90], index: 9, kind: output, shape index: {}]  }
   0x1   :  { %4075 = vmatprep.subr.bf16.mxu0 %v4260_v0  ;;  %v33_v1 = vld [vmem:[%s5587_s1] sm:$0xff]  ;;  %v34_v2 = vld [vmem:[%s5587_s1 + $0x8] sm:$0xff]  ;;  %v35_v3 = vld [vmem:[%s5587_s1 + $0x10] sm:$0xff]  ;;  %4050 = vmatprep.mubr.msk.f32.mxu0 %vm4261_vm0, %v4262_v4  ;;  %s4265_s14 = smov 106   ;;  %s4268_s11 = smov 119   ;;  %vm1126_vm2 = vcmask 15360  }
   0x2   :  { %v4076_v5 = vpack.c.bf16 %v34_v2, %v33_v1  ;;  %v36_v6 = vld [vmem:[%s5587_s1 + $0x18] sm:$0xff]  ;;  %4081 = vmatprep.subr.bf16.mxu1 %v4260_v0  ;;  %4061 = vmatprep.mubr.msk.f32.mxu1 %vm4261_vm0, %v4262_v4  ;;  %v4462_v8 = vld [vmem:[%s5588_s0] sm:$0x3]  ;;  %v120_v10 = vld [vmem:[%s5589_s3 + $0x8] sm:$0xff]  ;;  %s4269_s15 = smov 18   ;;  %s4270_s16 = smov 110  }
   0x3   :  { %v4079_v7 = vpack.c.bf16 %v36_v6, %v35_v3  ;;  %v119_v9 = vld [vmem:[%s5589_s3] sm:$0xff]  ;;  %v121_v11 = vld [vmem:[%s5589_s3 + $0x10] sm:$0xff]  ;;  %v122_v13 = vld [vmem:[%s5589_s3 + $0x18] sm:$0xff]  ;;  %v654_v44 = vmul.f32 0.01, %v4462_v8  ;;  %641 = vrot.lane.b32.xlu0 %v4462_v8, %s4263_s12  ;;  %v647_v45 = vmul.f32 25.0, %v4462_v8 }
   0x4   :  { %4077 = vmatpush3.bf16.msra.mxu0 %v4076_v5  ;;  %v4082_v12 = vpack.c.bf16 %v120_v10, %v119_v9  ;;  %v4085_v14 = vpack.c.bf16 %v122_v13, %v121_v11  ;;  %v4017_v15 = vld [vmem:[%s5590_s2] ss:$0 sm:$0xff]  ;;  %v290_v20 = vld [vmem:[%s5591_s7 + $0x8] sm:$0xff]  ;;  %v206_v32 = vld [vmem:[%s5592_s5 + $0x10] sm:$0xff]  ;;  %s4271_s17 = smov 27   ;;  %s4272_s18 = smov 101  }
   0x5   :  { %4078 = vmatprep.subr.bf16.mxu0 %v4260_v0  ;;  %v298_v21 = vld [vmem:[%s5591_s7 + $0x48] sm:$0xff]  ;;  %v204_v23 = vld [vmem:[%s5592_s5] sm:$0xff]  ;;  %v207_v33 = vld [vmem:[%s5592_s5 + $0x18] sm:$0xff]  ;;  %656 = vrot.lane.b32.xlu1 %v654_v44, %s4264_s13  ;;  %s4273_s1 = smov 36   ;;  %s4274_s19 = smov 92   ;;  %vm1601_vm3 = vcmask 31744  }
   0x6   :  { %4083 = vmatpush3.bf16.msra.mxu1 %v4082_v12  ;;  %v4093_v22 = vpack.c.bf16 %v298_v21, %v290_v20  ;;  %v205_v24 = vld [vmem:[%s5592_s5 + $0x8] sm:$0xff]  ;;  %v289_v25 = vld [vmem:[%s5591_s7] sm:$0xff]  ;;  %v4091_v35 = vpack.c.bf16 %v207_v33, %v206_v32  ;;  %v292_v37 = vld [vmem:[%s5591_s7 + $0x18] sm:$0xff]  ;;  %s4275_s20 = smov 45   ;;  %s4276_s21 = smov 83   ;;  %vm2083_vm4 = vcmask 48128  }
   0x7   :  { %4084 = vmatprep.subr.bf16.mxu1 %v4260_v0  ;;  %v4088_v26 = vpack.c.bf16 %v205_v24, %v204_v23  ;;  %v297_v27 = vld [vmem:[%s5591_s7 + $0x40] sm:$0xff]  ;;  %v306_v28 = vld [vmem:[%s5591_s7 + $0x88] sm:$0xff]  ;;  %v300_v38 = vld [vmem:[%s5591_s7 + $0x58] sm:$0xff]  ;;  %649 = vrot.lane.b32.xlu0 %v647_v45, %s4265_s14  ;;  %s4277_s22 = smov 54   ;;  %s5597_s23 = smov 74   ;;  %vm2558_vm5 = vcmask 64512  }
   0x8   :  { %4080 = vmatpush3.bf16.msra.mxu0 %v4079_v7  ;;  %v314_v29 = vld [vmem:[%s5591_s7 + $0xc8] sm:$0xff]  ;;  %v4095_v30 = vpack.c.bf16 %v297_v27, %v289_v25  ;;  %v305_v34 = vld [vmem:[%s5591_s7 + $0x80] sm:$0xff]  ;;  %v4101_v40 = vpack.c.bf16 %v300_v38, %v292_v37  ;;  %v291_v50 = vld [vmem:[%s5591_s7 + $0x10] sm:$0xff]  ;;  %s5602_s24 = smov 65   ;;  %s4281_s25 = smov 72   ;;  %vm3073_vm6 = vcmask 7168  }
   0x9   :  { %4087 = vmatprep.subr.bf16.mxu0 %v4260_v0  ;;  %v4097_v31 = vpack.c.bf16 %v314_v29, %v306_v28  ;;  %v313_v36 = vld [vmem:[%s5591_s7 + $0xc0] sm:$0xff]  ;;  %v294_v41 = vld [vmem:[%s5591_s7 + $0x28] sm:$0xff]  ;;  %v299_v51 = vld [vmem:[%s5591_s7 + $0x50] sm:$0xff]  ;;  %s5598_s26 = smov 56   ;;  %s4283_s27 = smov 81   ;;  %vm3548_vm7 = vcmask 23552  }
   0xa   :  { %4086 = vmatpush3.bf16.msra.mxu1 %v4085_v14  ;;  %v4099_v39 = vpack.c.bf16 %v313_v36, %v305_v34  ;;  %v302_v42 = vld [vmem:[%s5591_s7 + $0x68] sm:$0xff]  ;;  %v4019_v46 = vld [vmem:[%s5593_s4] ss:$0 sm:$0xff]  ;;  %v308_v54 = vld [vmem:[%s5591_s7 + $0x98] sm:$0xff]  ;;  %v4103_v58 = vpack.c.bf16 %v299_v51, %v291_v50  ;;  %s4279_s4 = smov 63   ;;  %s5603_s28 = smov 47  }
   0xb   :  { %4051 = vmatmul.mubr.msk.f32.vlgmr.msra.gmra.mrb[0].mxu0 %vm44_vm1, %v4462_v8  ;;  %4094 = vmatprep.subr.bf16.mxu1 %v4093_v22  ;;  %v4109_v43 = vpack.c.bf16 %v302_v42, %v294_v41  ;;  %v293_v52 = vld [vmem:[%s5591_s7 + $0x20] sm:$0xff]  ;;  %v316_v55 = vld [vmem:[%s5591_s7 + $0xd8] sm:$0xff]  ;;  %v310_v56 = vld [vmem:[%s5591_s7 + $0xa8] sm:$0xff]  ;;  %s4285_s3 = smov 90   ;;  %s5599_s29 = smov 38   ;;  %vm969_vm8 = vcmask 66560  }
   0xc   :  { %4072 = vmatprep.mubr.msk.f32.mxu0 %vm4261_vm0, %v4262_v4  ;;  %4089 = vmatpush3.bf16.msra.mxu0 %v4088_v26  ;;  %v301_v53 = vld [vmem:[%s5591_s7 + $0x60] sm:$0xff]  ;;  %v318_v57 = vld [vmem:[%s5591_s7 + $0xe8] sm:$0xff]  ;;  %v307_v60 = vld [vmem:[%s5591_s7 + $0x90] sm:$0xff]  ;;  %v4105_v61 = vpack.c.bf16 %v316_v55, %v308_v54  ;;  %s4287_s30 = smov 99   ;;  %s5604_s5 = smov 29   ;;  %vm1312_vm9 = vcmask 140360  }
   0xd   :  { %4090 = vmatprep.subr.bf16.mxu0 %v4260_v0  ;;  %v4111_v59 = vpack.c.bf16 %v301_v53, %v293_v52  ;;  %v4113_v62 = vpack.c.bf16 %v318_v57, %v310_v56  ;;  %v315_v63 = vld [vmem:[%s5591_s7 + $0xd0] sm:$0xff]  ;;  %v309_v0 = vld [vmem:[%s5591_s7 + $0xa0] sm:$0xff]  ;;  %v296_v3 = vld [vmem:[%s5591_s7 + $0x38] sm:$0xff]  ;;  %s4289_s10 = smov 108   ;;  %s4291_s2 = smov 117   ;;  %vm1655_vm10 = vcmask 214160  }
   0xe   :  { %v317_v1 = vld [vmem:[%s5591_s7 + $0xe0] sm:$0xff]  ;;  %v304_v5 = vld [vmem:[%s5591_s7 + $0x78] sm:$0xff]  ;;  %v4107_v6 = vpack.c.bf16 %v315_v63, %v307_v60  ;;  %v295_v10 = vld [vmem:[%s5591_s7 + $0x30] sm:$0xff]  ;;  %vm1992_vm11 = vcmask 287960   ;;  %vm2335_vm12 = vcmask 361760   ;;  %vm2678_vm13 = vcmask 435560  }
   0xf   :  { %v4115_v7 = vpack.c.bf16 %v317_v1, %v309_v0  ;;  %v4117_v9 = vpack.c.bf16 %v304_v5, %v296_v3  ;;  %v303_v11 = vld [vmem:[%s5591_s7 + $0x70] sm:$0xff]  ;;  %v312_v12 = vld [vmem:[%s5591_s7 + $0xb8] sm:$0xff]  ;;  %v321_v21 = vld [vmem:[%s5594_s8] sm:$0xff]  ;;  %s4266_s8 = smov 9   ;;  %vm3015_vm14 = vcmask 509360   ;;  %vm3358_vm15 = vcmask 583160  }
  0x10   :  { %4092 = vmatpush3.bf16.msra.mxu0 %v4091_v35  ;;  %v320_v13 = vld [vmem:[%s5591_s7 + $0xf8] sm:$0xff]  ;;  %v4119_v14 = vpack.c.bf16 %v303_v11, %v295_v10  ;;  %v4021_v33 = vld [vmem:[%s5595_s6] ss:$0 sm:$0xff]  ;;  %s4267_s6 = smov 22   ;;  %vm3701_vm0 = vcmask 656960  }
  0x11   :  { %4102 = vmatprep.subr.bf16.mxu0 %v4101_v40 }
  0x75   :  { %v642_v35 = vpop.permute.xlu0 %641 }
  0x79   :  { %v650_v45 = vpop.permute.xlu0 %649 }
  0xde   :  { %v114_v16 = vpop.f32.mrb[0].mxu0 }
  0xdf   :  { %v115_v17 = vadd.f32 %v4017_v15, %v114_v16  ;;  %v4052_v18 = vpop.f32.mrb[1].mxu0  ;;  %v4121_v15 = vpack.c.bf16 %v320_v13, %v312_v12  ;;  %v311_v16 = vld [vmem:[%s5591_s7 + $0xb0] sm:$0xff] }
  0xe1   :  { %4255 = vtanh.f32 %v115_v17  ;;  %v319_v17 = vld [vmem:[%s5591_s7 + $0xf0] sm:$0xff]  ;;  %s5600_s7 = smov 20  }
  0xe2   :  { %v4123_v18 = vpack.c.bf16 %v319_v17, %v311_v16 }
  0xeb   :  { %v4256_v19 = vpop.eup %4255 }
  0xec   :  { %4062 = vmatmul.mubr.msk.f32.vlgmr.msra.gmra.mrb[0].mxu1 %vm44_vm1, %v4256_v19  ;;  %v323_v19 = vlaneseq }
  0xed   :  { %422 = vmatprep.mubr.f32.mxu1 %v4262_v4  ;;  %4096 = vmatpush1.bf16.msra.mxu1 %v4095_v30 }
  0xee   :  { %4098 = vmatprep.subr.bf16.mxu1 %v4097_v31  ;;  %v324_v20 = vshrl.u32 %v323_v19, 7 }
  0xf0   :  { %v329_v22 = vsub.s32 1, %v324_v20  ;;  %v341_v24 = vsub.s32 4, %v324_v20  ;;  %v333_v25 = vsub.s32 2, %v324_v20  ;;  %v337_v26 = vsub.s32 3, %v324_v20 }
  0xf1   :  { %4100 = vmatpush1.bf16.msra.mxu1 %v4099_v39  ;;  %v345_v27 = vsub.s32 5, %v324_v20  ;;  %v349_v31 = vsub.s32 6, %v324_v20  ;;  %v325_v34 = vsub.s32 0, %v324_v20 }
  0xf2   :  { %4110 = vmatprep.subr.bf16.mxu1 %v4109_v43  ;;  %v330_v23 = vrot.slane %v321_v21, %v329_v22  ;;  %v342_v28 = vrot.slane %v321_v21, %v341_v24  ;;  %v334_v29 = vrot.slane %v321_v21, %v333_v25  ;;  %v338_v30 = vrot.slane %v321_v21, %v337_v26 }
  0xf3   :  { %v350_v32 = vrot.slane %v321_v21, %v349_v31  ;;  %v326_v43 = vrot.slane %v321_v21, %v325_v34 }
 0x1bf   :  { %v199_v47 = vpop.f32.mrb[0].mxu1 }
 0x1c0   :  { %v200_v48 = vadd.f32 %v4019_v46, %v199_v47  ;;  %v4063_v49 = vpop.f32.mrb[1].mxu1 }
 0x1c2   :  { %4257 = vtanh.f32 %v200_v48 }
 0x1cc   :  { %v4258_v2 = vpop.eup %4257 }
 0x1cd   :  { %4073 = vmatmul.mubr.msk.f32.vlgmr.msra.gmra.mrb[2].mxu0 %vm44_vm1, %v4258_v2  ;;  %4023 = vmatmul.mubr.msk.f32.vlgmr.msra.gmra.mrb[2].mxu1 %vm44_vm1, %v4258_v2 }
 0x1ce   :  { %4104 = vmatpush1.bf16.msra.mxu0 %v4103_v58  ;;  %4112 = vmatpush1.bf16.msra.mxu1 %v4111_v59  ;;  %v657_v59 = vpop.permute.xlu1 %656 }
 0x1cf   :  { %4106 = vmatprep.subr.bf16.mxu0 %v4105_v61  ;;  %4114 = vmatprep.subr.bf16.mxu1 %v4113_v62  ;;  %v659_v61 = vadd.f32 %v657_v59, %v4462_v8 }
 0x1d0   :  { %493 = vmatprep.mubr.f32.mxu0 %v4262_v4  ;;  %564 = vmatprep.mubr.f32.mxu1 %v4262_v4 }
 0x1d2   :  { %4108 = vmatpush1.bf16.msra.mxu0 %v4107_v6  ;;  %4116 = vmatpush1.bf16.msra.mxu1 %v4115_v7 }
 0x1d3   :  { %4118 = vmatprep.subr.bf16.mxu0 %v4117_v9 }
 0x1d5   :  { %4024 = vmatmul.mubr.msk.f32.vlgmr.msra.gmra.mrb[4].mxu0 %vm44_vm1, %v4258_v2  ;;  %4025 = vmatmul.mubr.msk.f32.vlgmr.msra.gmra.mrb[4].mxu1 %vm44_vm1, %v4258_v2 }
 0x1d6   :  { %4120 = vmatpush1.bf16.msra.mxu0 %v4119_v14  ;;  %635 = vmatprep.mubr.f32.mxu0 %v4262_v4  ;;  %v346_v4 = vrot.slane %v321_v21, %v345_v27 }
 0x1d7   :  { %4122 = vmatprep.subr.bf16.mxu0 %v4121_v15 }
 0x1da   :  { %4124 = vmatpush1.bf16.msra.mxu0 %v4123_v18 }
 0x1dd   :  { %4026 = vmatmul.mubr.msk.f32.vlgmr.msra.gmra.mrb[6].mxu0 %vm44_vm1, %v4258_v2  ;;  %vm4011_vm1 = vcmask 730760  }
 0x2a0   :  { %v284_v36 = vpop.f32.mrb[2].mxu0  ;;  %v424_v37 = vpop.f32.mrb[2].mxu1 }
 0x2a1   :  { %v285_v38 = vadd.f32 %v4021_v33, %v284_v36  ;;  %v4074_v39 = vpop.f32.mrb[3].mxu0  ;;  %v426_v40 = vpop.f32.mrb[3].mxu1  ;;  %v4626_v46 = vadd.f32 %v424_v37, %v326_v43 }
 0x2a2   :  { %v4619_v41 = vadd.f32 %v426_v40, %v330_v23 }
 0x2a3   :  { %v4621_v42 = vmul.f32 100.0, %v285_v38 }
 0x2a5   :  { %v4624_v44 = vsub.f32 %v4621_v42, %v642_v35 }
 0x2a7   :  { %667 = vrot.lane.b32.xlu0 %v4624_v44, %s4266_s8  ;;  %v646_v47 = vmul.f32 156.25, %v4624_v44  ;;  %v645_v52 = vmul.f32 %v4624_v44, %v4626_v46  ;;  %s5605_s8 = smov 11  }
 0x2a8   :  { %v566_v48 = vpop.f32.mrb[4].mxu1  ;;  %v495_v49 = vpop.f32.mrb[4].mxu0 }
 0x2a9   :  { %v4630_v50 = vadd.f32 %v566_v48, %v342_v28  ;;  %v4632_v51 = vadd.f32 %v495_v49, %v334_v29  ;;  %v652_v53 = vsub.f32 %v646_v47, %v650_v45  ;;  %v497_v54 = vpop.f32.mrb[5].mxu0  ;;  %v568_v55 = vpop.f32.mrb[5].mxu1 }
 0x2aa   :  { %v4636_v56 = vadd.f32 %v497_v54, %v338_v30  ;;  %v4638_v57 = vadd.f32 %v568_v55, %v346_v4 }
 0x2ab   :  { %v653_v58 = vadd.f32 %v652_v53, %v645_v52 }
 0x2ad   :  { %v660_v60 = vmul.f32 0.01, %v653_v58 }
 0x2af   :  { %662 = vrot.lane.b32.xlu1 %v660_v60, %s4267_s6 }
 0x2b0   :  { %v637_v62 = vpop.f32.mrb[6].mxu0 }
 0x2b1   :  { %v4642_v63 = vadd.f32 %v637_v62, %v350_v32  ;;  %v639_v0 = vpop.f32.mrb[7].mxu0 }
 0x2b3   :  { %672 = vrot.lane.b32.xlu1 %v659_v61, %s4263_s12 }
 0x319   :  { %v668_v1 = vpop.permute.xlu0 %667 }
 0x31a   :  { %v670_v2 = vmul.f32 %v668_v1, %v4626_v46 }
 0x31c   :  { %684 = vrot.lane.b32.xlu1 %v670_v2, %s4268_s11  ;;  %s4293_s11 = smov 126  }
 0x321   :  { %v663_v3 = vpop.permute.xlu1 %662 }
 0x322   :  { %v665_v5 = vadd.f32 %v663_v3, %v4462_v8 }
 0x324   :  { %v677_v6 = vmul.f32 25.0, %v665_v5  ;;  %v688_v7 = vmul.f32 0.01, %v665_v5 }
 0x325   :  { %v673_v9 = vpop.permute.xlu1 %672 }
 0x326   :  { %679 = vrot.lane.b32.xlu0 %v677_v6, %s4265_s14  ;;  %v675_v10 = vsub.f32 %v4621_v42, %v673_v9 }
 0x328   :  { %v676_v11 = vmul.f32 156.25, %v675_v10 }
 0x32a   :  { %690 = vrot.lane.b32.xlu0 %v688_v7, %s4264_s13 }
 0x32e   :  { %700 = vrot.lane.b32.xlu0 %v4624_v44, %s4269_s15  ;;  %s5601_s15 = smov 2  }
 0x38e   :  { %v685_v14 = vpop.permute.xlu1 %684 }
 0x398   :  { %v680_v12 = vpop.permute.xlu0 %679 }
 0x399   :  { %v682_v13 = vsub.f32 %v676_v11, %v680_v12 }
 0x39b   :  { %v687_v15 = vadd.f32 %v685_v14, %v682_v13 }
 0x39c   :  { %v691_v16 = vpop.permute.xlu0 %690 }
 0x39d   :  { %v694_v17 = vmul.f32 0.01, %v687_v15  ;;  %v693_v8 = vadd.f32 %v691_v16, %v659_v61 }
 0x39f   :  { %696 = vrot.lane.b32.xlu1 %v694_v17, %s4267_s6 }
 0x3a0   :  { %v701_v18 = vpop.permute.xlu0 %700 }
 0x3a1   :  { %v703_v19 = vmul.f32 %v701_v18, %v4626_v46 }
 0x3a3   :  { %705 = vrot.lane.b32.xlu1 %v693_v8, %s4263_s12 }
 0x3a7   :  { %717 = vrot.lane.b32.xlu1 %v703_v19, %s4270_s16  ;;  %s4295_s16 = smov 7  }
 0x411   :  { %v697_v20 = vpop.permute.xlu1 %696 }
 0x412   :  { %v699_v21 = vadd.f32 %v697_v20, %v665_v5 }
 0x414   :  { %v710_v22 = vmul.f32 25.0, %v699_v21  ;;  %v721_v23 = vmul.f32 0.01, %v699_v21 }
 0x415   :  { %v706_v24 = vpop.permute.xlu1 %705 }
 0x416   :  { %712 = vrot.lane.b32.xlu0 %v710_v22, %s4265_s14  ;;  %v708_v25 = vsub.f32 %v4621_v42, %v706_v24 }
 0x418   :  { %v709_v26 = vmul.f32 156.25, %v708_v25 }
 0x419   :  { %v718_v29 = vpop.permute.xlu1 %717 }
 0x41a   :  { %723 = vrot.lane.b32.xlu0 %v721_v23, %s4264_s13 }
 0x41e   :  { %733 = vrot.lane.b32.xlu0 %v4624_v44, %s4271_s17  ;;  %s4296_s17 = smov 16  }
 0x488   :  { %v713_v27 = vpop.permute.xlu0 %712 }
 0x489   :  { %v715_v28 = vsub.f32 %v709_v26, %v713_v27 }
 0x48b   :  { %v720_v30 = vadd.f32 %v718_v29, %v715_v28 }
 0x48c   :  { %v724_v4 = vpop.permute.xlu0 %723 }
 0x48d   :  { %v727_v31 = vmul.f32 0.01, %v720_v30  ;;  %v726_v32 = vadd.f32 %v724_v4, %v693_v8 }
 0x48f   :  { %729 = vrot.lane.b32.xlu1 %v727_v31, %s4267_s6 }
 0x490   :  { %v734_v33 = vpop.permute.xlu0 %733 }
 0x491   :  { %v736_v34 = vmul.f32 %v734_v33, %v4626_v46 }
 0x493   :  { %738 = vrot.lane.b32.xlu1 %v726_v32, %s4263_s12 }
 0x497   :  { %750 = vrot.lane.b32.xlu1 %v736_v34, %s4272_s18  ;;  %s4297_s18 = smov 112  }
 0x501   :  { %v730_v35 = vpop.permute.xlu1 %729 }
 0x502   :  { %v732_v36 = vadd.f32 %v730_v35, %v699_v21 }
 0x504   :  { %v743_v37 = vmul.f32 25.0, %v732_v36  ;;  %v754_v38 = vmul.f32 0.01, %v732_v36 }
 0x505   :  { %v739_v39 = vpop.permute.xlu1 %738 }
 0x506   :  { %745 = vrot.lane.b32.xlu0 %v743_v37, %s4265_s14  ;;  %v741_v40 = vsub.f32 %v4621_v42, %v739_v39 }
 0x508   :  { %v742_v43 = vmul.f32 156.25, %v741_v40 }
 0x509   :  { %v751_v48 = vpop.permute.xlu1 %750 }
 0x50a   :  { %756 = vrot.lane.b32.xlu0 %v754_v38, %s4264_s13 }
 0x50e   :  { %766 = vrot.lane.b32.xlu0 %v4624_v44, %s4273_s1  ;;  %s4298_s1 = smov 25  }
 0x578   :  { %v746_v45 = vpop.permute.xlu0 %745 }
 0x579   :  { %v748_v47 = vsub.f32 %v742_v43, %v746_v45 }
 0x57b   :  { %v753_v49 = vadd.f32 %v751_v48, %v748_v47 }
 0x57c   :  { %v757_v52 = vpop.permute.xlu0 %756 }
 0x57d   :  { %v760_v53 = vmul.f32 0.01, %v753_v49  ;;  %v759_v54 = vadd.f32 %v757_v52, %v726_v32 }
 0x57f   :  { %762 = vrot.lane.b32.xlu1 %v760_v53, %s4267_s6 }
 0x580   :  { %v767_v55 = vpop.permute.xlu0 %766 }
 0x581   :  { %v769_v58 = vmul.f32 %v767_v55, %v4626_v46 }
 0x583   :  { %771 = vrot.lane.b32.xlu1 %v759_v54, %s4263_s12 }
 0x587   :  { %783 = vrot.lane.b32.xlu1 %v769_v58, %s4274_s19  ;;  %s4299_s19 = smov 103  }
 0x5f1   :  { %v763_v59 = vpop.permute.xlu1 %762 }
 0x5f2   :  { %v765_v60 = vadd.f32 %v763_v59, %v732_v36 }
 0x5f4   :  { %v776_v61 = vmul.f32 25.0, %v765_v60  ;;  %v787_v62 = vmul.f32 0.01, %v765_v60 }
 0x5f5   :  { %v772_v0 = vpop.permute.xlu1 %771 }
 0x5f6   :  { %778 = vrot.lane.b32.xlu0 %v776_v61, %s4265_s14  ;;  %v774_v1 = vsub.f32 %v4621_v42, %v772_v0 }
 0x5f8   :  { %v775_v2 = vmul.f32 156.25, %v774_v1 }
 0x5f9   :  { %v784_v6 = vpop.permute.xlu1 %783 }
 0x5fa   :  { %789 = vrot.lane.b32.xlu0 %v787_v62, %s4264_s13 }
 0x5fe   :  { %799 = vrot.lane.b32.xlu0 %v4624_v44, %s4275_s20  ;;  %s4300_s20 = smov 34  }
 0x668   :  { %v779_v3 = vpop.permute.xlu0 %778 }
 0x669   :  { %v781_v5 = vsub.f32 %v775_v2, %v779_v3 }
 0x66b   :  { %v786_v7 = vadd.f32 %v784_v6, %v781_v5 }
 0x66c   :  { %v790_v9 = vpop.permute.xlu0 %789 }
 0x66d   :  { %v793_v10 = vmul.f32 0.01, %v786_v7  ;;  %v792_v11 = vadd.f32 %v790_v9, %v759_v54 }
 0x66f   :  { %795 = vrot.lane.b32.xlu1 %v793_v10, %s4267_s6 }
 0x670   :  { %v800_v12 = vpop.permute.xlu0 %799 }
 0x671   :  { %v802_v13 = vmul.f32 %v800_v12, %v4626_v46 }
 0x673   :  { %804 = vrot.lane.b32.xlu1 %v792_v11, %s4263_s12 }
 0x677   :  { %816 = vrot.lane.b32.xlu1 %v802_v13, %s4276_s21  ;;  %s4301_s21 = smov 94  }
 0x6e1   :  { %v796_v14 = vpop.permute.xlu1 %795 }
 0x6e2   :  { %v798_v15 = vadd.f32 %v796_v14, %v765_v60 }
 0x6e4   :  { %v809_v16 = vmul.f32 25.0, %v798_v15  ;;  %v820_v17 = vmul.f32 0.01, %v798_v15 }
 0x6e5   :  { %v805_v8 = vpop.permute.xlu1 %804 }
 0x6e6   :  { %811 = vrot.lane.b32.xlu0 %v809_v16, %s4265_s14  ;;  %v807_v18 = vsub.f32 %v4621_v42, %v805_v8 }
 0x6e8   :  { %v808_v19 = vmul.f32 156.25, %v807_v18 }
 0x6e9   :  { %v817_v22 = vpop.permute.xlu1 %816 }
 0x6ea   :  { %822 = vrot.lane.b32.xlu0 %v820_v17, %s4264_s13 }
 0x6ee   :  { %832 = vrot.lane.b32.xlu0 %v4624_v44, %s4277_s22  ;;  %s4302_s22 = smov 43  }
 0x758   :  { %v812_v20 = vpop.permute.xlu0 %811 }
 0x759   :  { %v814_v21 = vsub.f32 %v808_v19, %v812_v20 }
 0x75b   :  { %v819_v23 = vadd.f32 %v817_v22, %v814_v21 }
 0x75c   :  { %v823_v24 = vpop.permute.xlu0 %822 }
 0x75d   :  { %v826_v25 = vmul.f32 0.01, %v819_v23  ;;  %v825_v26 = vadd.f32 %v823_v24, %v792_v11 }
 0x75f   :  { %828 = vrot.lane.b32.xlu1 %v826_v25, %s4267_s6 }
 0x760   :  { %v833_v27 = vpop.permute.xlu0 %832 }
 0x761   :  { %v835_v28 = vmul.f32 %v833_v27, %v4626_v46 }
 0x763   :  { %837 = vrot.lane.b32.xlu1 %v825_v26, %s4263_s12 }
 0x767   :  { %849 = vrot.lane.b32.xlu1 %v835_v28, %s5597_s23  ;;  %s5622_s23 = smov 86  }
 0x7d1   :  { %v829_v29 = vpop.permute.xlu1 %828 }
 0x7d2   :  { %v831_v30 = vadd.f32 %v829_v29, %v798_v15 }
 0x7d4   :  { %v842_v4 = vmul.f32 25.0, %v831_v30  ;;  %v853_v31 = vmul.f32 0.01, %v831_v30 }
 0x7d5   :  { %v838_v32 = vpop.permute.xlu1 %837 }
 0x7d6   :  { %844 = vrot.lane.b32.xlu0 %v842_v4, %s4265_s14  ;;  %v840_v33 = vsub.f32 %v4621_v42, %v838_v32 }
 0x7d8   :  { %v841_v34 = vmul.f32 156.25, %v840_v33 }
 0x7d9   :  { %v850_v37 = vpop.permute.xlu1 %849 }
 0x7da   :  { %855 = vrot.lane.b32.xlu0 %v853_v31, %s4264_s13 }
 0x7de   :  { %865 = vrot.lane.b32.xlu0 %v4624_v44, %s4279_s4  ;;  %s4303_s4 = smov 85  }
 0x848   :  { %v845_v35 = vpop.permute.xlu0 %844 }
 0x849   :  { %v847_v36 = vsub.f32 %v841_v34, %v845_v35 }
 0x84b   :  { %v852_v38 = vadd.f32 %v850_v37, %v847_v36 }
 0x84c   :  { %v856_v39 = vpop.permute.xlu0 %855 }
 0x84d   :  { %v859_v40 = vmul.f32 0.01, %v852_v38  ;;  %v858_v43 = vadd.f32 %v856_v39, %v825_v26 }
 0x84f   :  { %861 = vrot.lane.b32.xlu1 %v859_v40, %s4267_s6 }
 0x850   :  { %v866_v45 = vpop.permute.xlu0 %865 }
 0x851   :  { %v868_v47 = vmul.f32 %v866_v45, %v4626_v46 }
 0x853   :  { %870 = vrot.lane.b32.xlu1 %v858_v43, %s4263_s12 }
 0x857   :  { %882 = vrot.lane.b32.xlu1 %v868_v47, %s5602_s24  ;;  %s5627_s24 = smov 24  }
 0x8c1   :  { %v862_v48 = vpop.permute.xlu1 %861 }
 0x8c2   :  { %v864_v49 = vadd.f32 %v862_v48, %v831_v30 }
 0x8c4   :  { %v875_v52 = vmul.f32 25.0, %v864_v49  ;;  %v886_v53 = vmul.f32 0.01, %v864_v49 }
 0x8c5   :  { %v871_v54 = vpop.permute.xlu1 %870 }
 0x8c6   :  { %877 = vrot.lane.b32.xlu0 %v875_v52, %s4265_s14  ;;  %v873_v55 = vsub.f32 %v4621_v42, %v871_v54 }
 0x8c8   :  { %v874_v58 = vmul.f32 156.25, %v873_v55 }
 0x8c9   :  { %v883_v61 = vpop.permute.xlu1 %882 }
 0x8ca   :  { %888 = vrot.lane.b32.xlu0 %v886_v53, %s4264_s13 }
 0x8ce   :  { %898 = vrot.lane.b32.xlu0 %v4624_v44, %s4281_s25  ;;  %s4304_s25 = smov 52  }
 0x938   :  { %v878_v59 = vpop.permute.xlu0 %877 }
 0x939   :  { %v880_v60 = vsub.f32 %v874_v58, %v878_v59 }
 0x93b   :  { %v885_v62 = vadd.f32 %v883_v61, %v880_v60 }
 0x93c   :  { %v889_v0 = vpop.permute.xlu0 %888 }
 0x93d   :  { %v892_v1 = vmul.f32 0.01, %v885_v62  ;;  %v891_v2 = vadd.f32 %v889_v0, %v858_v43 }
 0x93f   :  { %894 = vrot.lane.b32.xlu1 %v892_v1, %s4267_s6 }
 0x940   :  { %v899_v3 = vpop.permute.xlu0 %898 }
 0x941   :  { %v901_v5 = vmul.f32 %v899_v3, %v4626_v46 }
 0x943   :  { %903 = vrot.lane.b32.xlu1 %v891_v2, %s4263_s12 }
 0x947   :  { %915 = vrot.lane.b32.xlu1 %v901_v5, %s5598_s26  ;;  %s5623_s26 = smov 42  }
 0x9b1   :  { %v895_v6 = vpop.permute.xlu1 %894 }
 0x9b2   :  { %v897_v7 = vadd.f32 %v895_v6, %v864_v49 }
 0x9b4   :  { %v908_v9 = vmul.f32 25.0, %v897_v7  ;;  %v919_v10 = vmul.f32 0.01, %v897_v7 }
 0x9b5   :  { %v904_v11 = vpop.permute.xlu1 %903 }
 0x9b6   :  { %910 = vrot.lane.b32.xlu0 %v908_v9, %s4265_s14  ;;  %v906_v12 = vsub.f32 %v4621_v42, %v904_v11 }
 0x9b8   :  { %v907_v13 = vmul.f32 156.25, %v906_v12 }
 0x9b9   :  { %v916_v16 = vpop.permute.xlu1 %915 }
 0x9ba   :  { %921 = vrot.lane.b32.xlu0 %v919_v10, %s4264_s13 }
 0x9be   :  { %931 = vrot.lane.b32.xlu0 %v4624_v44, %s4283_s27  ;;  %s4305_s27 = smov 76  }
 0xa28   :  { %v911_v14 = vpop.permute.xlu0 %910 }
 0xa29   :  { %v913_v15 = vsub.f32 %v907_v13, %v911_v14 }
 0xa2b   :  { %v918_v17 = vadd.f32 %v916_v16, %v913_v15 }
 0xa2c   :  { %v922_v8 = vpop.permute.xlu0 %921 }
 0xa2d   :  { %v925_v18 = vmul.f32 0.01, %v918_v17  ;;  %v924_v19 = vadd.f32 %v922_v8, %v891_v2 }
 0xa2f   :  { %927 = vrot.lane.b32.xlu1 %v925_v18, %s4267_s6 }
 0xa30   :  { %v932_v20 = vpop.permute.xlu0 %931 }
 0xa31   :  { %v934_v21 = vmul.f32 %v932_v20, %v4626_v46 }
 0xa33   :  { %936 = vrot.lane.b32.xlu1 %v924_v19, %s4263_s12 }
 0xa37   :  { %948 = vrot.lane.b32.xlu1 %v934_v21, %s5603_s28  ;;  %s5628_s28 = smov 15  }
 0xaa1   :  { %v928_v22 = vpop.permute.xlu1 %927 }
 0xaa2   :  { %v930_v23 = vadd.f32 %v928_v22, %v897_v7 }
 0xaa4   :  { %v941_v24 = vmul.f32 25.0, %v930_v23  ;;  %v952_v25 = vmul.f32 0.01, %v930_v23 }
 0xaa5   :  { %v937_v26 = vpop.permute.xlu1 %936 }
 0xaa6   :  { %943 = vrot.lane.b32.xlu0 %v941_v24, %s4265_s14  ;;  %v939_v27 = vsub.f32 %v4621_v42, %v937_v26 }
 0xaa8   :  { %v940_v28 = vmul.f32 156.25, %v939_v27 }
 0xaa9   :  { %v949_v4 = vpop.permute.xlu1 %948 }
 0xaaa   :  { %954 = vrot.lane.b32.xlu0 %v952_v25, %s4264_s13 }
 0xaae   :  { %971 = vrot.lane.b32.xlu0 %v4624_v44, %s4285_s3  ;;  %s4306_s3 = smov 61  }
 0xb18   :  { %v944_v29 = vpop.permute.xlu0 %943 }
 0xb19   :  { %v946_v30 = vsub.f32 %v940_v28, %v944_v29 }
 0xb1b   :  { %v951_v31 = vadd.f32 %v949_v4, %v946_v30 }
 0xb1c   :  { %v955_v32 = vpop.permute.xlu0 %954 }
 0xb1d   :  { %v958_v33 = vmul.f32 0.01, %v951_v31  ;;  %v4712_v34 = vadd.f32 %v955_v32, %v924_v19 }
 0xb1f   :  { %960 = vrot.lane.b32.xlu1 %v958_v33, %s4267_s6 }
 0xb20   :  { %v972_v35 = vpop.permute.xlu0 %971 }
 0xb21   :  { %v974_v36 = vmul.f32 %v972_v35, %v4626_v46 }
 0xb23   :  { %976 = vrot.lane.b32.xlu1 %v4712_v34, %s4263_s12 }
 0xb27   :  { %988 = vrot.lane.b32.xlu1 %v974_v36, %s5599_s29  ;;  %s5624_s29 = smov 95  }
 0xb91   :  { %v961_v37 = vpop.permute.xlu1 %960 }
 0xb92   :  { %v963_v38 = vadd.f32 %v961_v37, %v930_v23 }
 0xb94   :  { %v981_v39 = vmul.f32 25.0, %v963_v38  ;;  %v992_v40 = vmul.f32 0.01, %v963_v38 }
 0xb95   :  { %v977_v43 = vpop.permute.xlu1 %976 }
 0xb96   :  { %983 = vrot.lane.b32.xlu0 %v981_v39, %s4265_s14  ;;  %v979_v45 = vsub.f32 %v4621_v42, %v977_v43 }
 0xb98   :  { %v980_v47 = vmul.f32 156.25, %v979_v45 }
 0xb99   :  { %v989_v52 = vpop.permute.xlu1 %988 }
 0xb9a   :  { %994 = vrot.lane.b32.xlu0 %v992_v40, %s4264_s13 }
 0xb9e   :  { %1004 = vrot.lane.b32.xlu0 %v4624_v44, %s4287_s30  ;;  %s4307_s30 = smov 67  }
 0xc08   :  { %v984_v48 = vpop.permute.xlu0 %983 }
 0xc09   :  { %v986_v49 = vsub.f32 %v980_v47, %v984_v48 }
 0xc0b   :  { %v991_v53 = vadd.f32 %v989_v52, %v986_v49 }
 0xc0c   :  { %v995_v54 = vpop.permute.xlu0 %994 }
 0xc0d   :  { %v998_v55 = vmul.f32 0.01, %v991_v53  ;;  %v997_v58 = vadd.f32 %v995_v54, %v4712_v34 }
 0xc0f   :  { %1000 = vrot.lane.b32.xlu1 %v998_v55, %s4267_s6 }
 0xc10   :  { %v1005_v59 = vpop.permute.xlu0 %1004 }
 0xc11   :  { %v1007_v60 = vmul.f32 %v1005_v59, %v4626_v46 }
 0xc13   :  { %1009 = vrot.lane.b32.xlu1 %v997_v58, %s4263_s12 }
 0xc17   :  { %1021 = vrot.lane.b32.xlu1 %v1007_v60, %s5604_s5  ;;  %s5629_s5 = smov 122  }
 0xc81   :  { %v1001_v61 = vpop.permute.xlu1 %1000 }
 0xc82   :  { %v1003_v62 = vadd.f32 %v1001_v61, %v963_v38 }
 0xc84   :  { %v1014_v0 = vmul.f32 25.0, %v1003_v62  ;;  %v1025_v1 = vmul.f32 0.01, %v1003_v62 }
 0xc85   :  { %v1010_v2 = vpop.permute.xlu1 %1009 }
 0xc86   :  { %1016 = vrot.lane.b32.xlu0 %v1014_v0, %s4265_s14  ;;  %v1012_v3 = vsub.f32 %v4621_v42, %v1010_v2 }
 0xc88   :  { %v1013_v5 = vmul.f32 156.25, %v1012_v3 }
 0xc89   :  { %v1022_v9 = vpop.permute.xlu1 %1021 }
 0xc8a   :  { %1027 = vrot.lane.b32.xlu0 %v1025_v1, %s4264_s13 }
 0xc8e   :  { %1037 = vrot.lane.b32.xlu0 %v4624_v44, %s4289_s10  ;;  %s4308_s10 = smov 70  }
 0xcf8   :  { %v1017_v6 = vpop.permute.xlu0 %1016 }
 0xcf9   :  { %v1019_v7 = vsub.f32 %v1013_v5, %v1017_v6 }
 0xcfb   :  { %v1024_v10 = vadd.f32 %v1022_v9, %v1019_v7 }
 0xcfc   :  { %v1028_v11 = vpop.permute.xlu0 %1027 }
 0xcfd   :  { %v1031_v12 = vmul.f32 0.01, %v1024_v10  ;;  %v1030_v13 = vadd.f32 %v1028_v11, %v997_v58 }
 0xcff   :  { %1033 = vrot.lane.b32.xlu1 %v1031_v12, %s4267_s6 }
 0xd00   :  { %v1038_v14 = vpop.permute.xlu0 %1037 }
 0xd01   :  { %v1040_v15 = vmul.f32 %v1038_v14, %v4626_v46 }
 0xd03   :  { %1042 = vrot.lane.b32.xlu1 %v1030_v13, %s4263_s12 }
 0xd07   :  { %1054 = vrot.lane.b32.xlu1 %v1040_v15, %s5600_s7  ;;  %s5625_s7 = smov 33  }
 0xd71   :  { %v1034_v16 = vpop.permute.xlu1 %1033 }
 0xd72   :  { %v1036_v17 = vadd.f32 %v1034_v16, %v1003_v62 }
 0xd74   :  { %v1047_v8 = vmul.f32 25.0, %v1036_v17  ;;  %v1058_v18 = vmul.f32 0.01, %v1036_v17 }
 0xd75   :  { %v1043_v19 = vpop.permute.xlu1 %1042 }
 0xd76   :  { %1049 = vrot.lane.b32.xlu0 %v1047_v8, %s4265_s14  ;;  %v1045_v20 = vsub.f32 %v4621_v42, %v1043_v19 }
 0xd78   :  { %v1046_v21 = vmul.f32 156.25, %v1045_v20 }
 0xd79   :  { %v1055_v24 = vpop.permute.xlu1 %1054 }
 0xd7a   :  { %1060 = vrot.lane.b32.xlu0 %v1058_v18, %s4264_s13 }
 0xd7e   :  { %1070 = vrot.lane.b32.xlu0 %v4624_v44, %s4291_s2  ;;  %s4309_s2 = smov 58  }
 0xde8   :  { %v1050_v22 = vpop.permute.xlu0 %1049 }
 0xde9   :  { %v1052_v23 = vsub.f32 %v1046_v21, %v1050_v22 }
 0xdeb   :  { %v1057_v25 = vadd.f32 %v1055_v24, %v1052_v23 }
 0xdec   :  { %v1061_v26 = vpop.permute.xlu0 %1060 }
 0xded   :  { %v1064_v27 = vmul.f32 0.01, %v1057_v25  ;;  %v1063_v28 = vadd.f32 %v1061_v26, %v1030_v13 }
 0xdef   :  { %1066 = vrot.lane.b32.xlu1 %v1064_v27, %s4267_s6 }
 0xdf0   :  { %v1071_v29 = vpop.permute.xlu0 %1070 }
 0xdf1   :  { %v1073_v30 = vmul.f32 %v1071_v29, %v4626_v46 }
 0xdf3   :  { %1075 = vrot.lane.b32.xlu1 %v1063_v28, %s4263_s12 }
 0xdf7   :  { %1087 = vrot.lane.b32.xlu1 %v1073_v30, %s5605_s8  ;;  %s5630_s8 = smov 6  }
 0xe61   :  { %v1067_v4 = vpop.permute.xlu1 %1066 }
 0xe62   :  { %v1069_v31 = vadd.f32 %v1067_v4, %v1036_v17 }
 0xe64   :  { %v1080_v32 = vmul.f32 25.0, %v1069_v31  ;;  %v1091_v33 = vmul.f32 0.01, %v1069_v31 }
 0xe65   :  { %v1076_v35 = vpop.permute.xlu1 %1075 }
 0xe66   :  { %1082 = vrot.lane.b32.xlu0 %v1080_v32, %s4265_s14  ;;  %v1078_v36 = vsub.f32 %v4621_v42, %v1076_v35 }
 0xe68   :  { %v1079_v37 = vmul.f32 156.25, %v1078_v36 }
 0xe69   :  { %v1088_v40 = vpop.permute.xlu1 %1087 }
 0xe6a   :  { %1093 = vrot.lane.b32.xlu0 %v1091_v33, %s4264_s13 }
 0xe6e   :  { %1103 = vrot.lane.b32.xlu0 %v4624_v44, %s4293_s11  ;;  %s4310_s11 = smov 79  }
 0xed8   :  { %v1083_v38 = vpop.permute.xlu0 %1082 }
 0xed9   :  { %v1085_v39 = vsub.f32 %v1079_v37, %v1083_v38 }
 0xedb   :  { %v1090_v43 = vadd.f32 %v1088_v40, %v1085_v39 }
 0xedc   :  { %v1094_v45 = vpop.permute.xlu0 %1093 }
 0xedd   :  { %v1097_v47 = vmul.f32 0.01, %v1090_v43  ;;  %v1096_v48 = vadd.f32 %v1094_v45, %v1063_v28 }
 0xedf   :  { %1099 = vrot.lane.b32.xlu1 %v1097_v47, %s4267_s6 }
 0xee0   :  { %v1104_v49 = vpop.permute.xlu0 %1103 }
 0xee1   :  { %v1106_v52 = vmul.f32 %v1104_v49, %v4626_v46  ;;  %v1107_v59 = vmul.f32 %v1104_v49, %v4619_v41 }
 0xee3   :  { %1109 = vrot.lane.b32.xlu1 %v1096_v48, %s4263_s12 }
 0xee7   :  { %1122 = vrot.lane.b32.xlu1 %v1106_v52, %s5601_s15 }
 0xf51   :  { %v1100_v53 = vpop.permute.xlu1 %1099 }
 0xf52   :  { %v1102_v54 = vadd.f32 %v1100_v53, %v1069_v31 }
 0xf54   :  { %v1130_v55 = vmul.f32 0.01, %v1102_v54  ;;  %v1114_v58 = vmul.f32 25.0, %v1102_v54 }
 0xf55   :  { %v1110_v60 = vpop.permute.xlu1 %1109 }
 0xf56   :  { %1132 = vrot.lane.b32.xlu1 %v1130_v55, %s4264_s13  ;;  %1116 = vrot.lane.b32.xlu0 %v1114_v58, %s4265_s14  ;;  %v1112_v46 = vsub.f32 %v4621_v42, %v1110_v60 }
 0xf58   :  { %v1113_v62 = vmul.f32 156.25, %v1112_v46 }
 0xf59   :  { %v1123_v0 = vpop.permute.xlu1 %1122 }
 0xf5a   :  { %1142 = vrot.lane.b32.xlu1 %v4624_v44, %s4295_s16  ;;  %1124 = vrot.lane.b32.xlu0 %v1107_v59, %s5601_s15  ;;  %s4311_s16 = smov 49   ;;  %s5626_s15 = smov 104  }
 0xfc8   :  { %v1117_v61 = vpop.permute.xlu0 %1116  ;;  %v1133_v6 = vpop.permute.xlu1 %1132 }
 0xfc9   :  { %v1119_v1 = vsub.f32 %v1113_v62, %v1117_v61  ;;  %v1135_v9 = vadd.f32 %v1133_v6, %v1096_v48 }
 0xfcc   :  { %v1125_v2 = vpop.permute.xlu0 %1124  ;;  %v1143_v10 = vpop.permute.xlu1 %1142 }
 0xfcd   :  { %v1127_v3 = vsel %vm1126_vm2, %v1123_v0, %v1125_v2  ;;  %v1145_v11 = vmul.f32 %v1143_v10, %v4619_v41 }
 0xfce   :  { %v1129_v5 = vadd.f32 %v1127_v3, %v1119_v1 }
 0xfd0   :  { %v1136_v7 = vmul.f32 0.01, %v1129_v5 }
 0xfd2   :  { %1138 = vrot.lane.b32.xlu0 %v1136_v7, %s4267_s6 }
 0xfd6   :  { %1147 = vrot.lane.b32.xlu0 %v1135_v9, %s4263_s12 }
 0xfda   :  { %1159 = vrot.lane.b32.xlu0 %v1145_v11, %s4263_s12 }
0x1044   :  { %v1139_v12 = vpop.permute.xlu0 %1138 }
0x1045   :  { %v1141_v13 = vadd.f32 %v1139_v12, %v1102_v54 }
0x1047   :  { %v1152_v14 = vmul.f32 25.0, %v1141_v13  ;;  %v1163_v15 = vmul.f32 0.01, %v1141_v13 }
0x1048   :  { %v1148_v16 = vpop.permute.xlu0 %1147 }
0x1049   :  { %1154 = vrot.lane.b32.xlu1 %v1152_v14, %s4265_s14  ;;  %v1150_v17 = vsub.f32 %v4621_v42, %v1148_v16 }
0x104b   :  { %v1151_v8 = vmul.f32 156.25, %v1150_v17 }
0x104c   :  { %v1160_v20 = vpop.permute.xlu0 %1159 }
0x104d   :  { %1165 = vrot.lane.b32.xlu1 %v1163_v15, %s4264_s13 }
0x1051   :  { %1175 = vrot.lane.b32.xlu1 %v4624_v44, %s4296_s17  ;;  %s4312_s17 = smov 88  }
0x10bb   :  { %v1155_v18 = vpop.permute.xlu1 %1154 }
0x10bc   :  { %v1157_v19 = vsub.f32 %v1151_v8, %v1155_v18 }
0x10be   :  { %v1162_v21 = vadd.f32 %v1160_v20, %v1157_v19 }
0x10bf   :  { %v1166_v22 = vpop.permute.xlu1 %1165 }
0x10c0   :  { %v1169_v23 = vmul.f32 0.01, %v1162_v21  ;;  %v1168_v24 = vadd.f32 %v1166_v22, %v1135_v9 }
0x10c2   :  { %1171 = vrot.lane.b32.xlu0 %v1169_v23, %s4267_s6 }
0x10c3   :  { %v1176_v25 = vpop.permute.xlu1 %1175 }
0x10c4   :  { %v1178_v26 = vmul.f32 %v1176_v25, %v4619_v41 }
0x10c6   :  { %1180 = vrot.lane.b32.xlu0 %v1168_v24, %s4263_s12 }
0x10ca   :  { %1192 = vrot.lane.b32.xlu0 %v1178_v26, %s4297_s18  ;;  %s4313_s18 = smov 40  }
0x1134   :  { %v1172_v27 = vpop.permute.xlu0 %1171 }
0x1135   :  { %v1174_v28 = vadd.f32 %v1172_v27, %v1141_v13 }
0x1137   :  { %v1185_v29 = vmul.f32 25.0, %v1174_v28  ;;  %v1196_v30 = vmul.f32 0.01, %v1174_v28 }
0x1138   :  { %v1181_v4 = vpop.permute.xlu0 %1180 }
0x1139   :  { %1187 = vrot.lane.b32.xlu1 %v1185_v29, %s4265_s14  ;;  %v1183_v31 = vsub.f32 %v4621_v42, %v1181_v4 }
0x113b   :  { %v1184_v32 = vmul.f32 156.25, %v1183_v31 }
0x113c   :  { %v1193_v36 = vpop.permute.xlu0 %1192 }
0x113d   :  { %1198 = vrot.lane.b32.xlu1 %v1196_v30, %s4264_s13 }
0x1141   :  { %1208 = vrot.lane.b32.xlu1 %v4624_v44, %s4298_s1  ;;  %s4314_s1 = smov 97  }
0x11ab   :  { %v1188_v33 = vpop.permute.xlu1 %1187 }
0x11ac   :  { %v1190_v35 = vsub.f32 %v1184_v32, %v1188_v33 }
0x11ae   :  { %v1195_v37 = vadd.f32 %v1193_v36, %v1190_v35 }
0x11af   :  { %v1199_v38 = vpop.permute.xlu1 %1198 }
0x11b0   :  { %v1202_v39 = vmul.f32 0.01, %v1195_v37  ;;  %v1201_v40 = vadd.f32 %v1199_v38, %v1168_v24 }
0x11b2   :  { %1204 = vrot.lane.b32.xlu0 %v1202_v39, %s4267_s6 }
0x11b3   :  { %v1209_v43 = vpop.permute.xlu1 %1208 }
0x11b4   :  { %v1211_v45 = vmul.f32 %v1209_v43, %v4619_v41 }
0x11b6   :  { %1213 = vrot.lane.b32.xlu0 %v1201_v40, %s4263_s12 }
0x11ba   :  { %1225 = vrot.lane.b32.xlu0 %v1211_v45, %s4299_s19  ;;  %s4315_s19 = smov 31  }
0x1224   :  { %v1205_v47 = vpop.permute.xlu0 %1204 }
0x1225   :  { %v1207_v48 = vadd.f32 %v1205_v47, %v1174_v28 }
0x1227   :  { %v1218_v49 = vmul.f32 25.0, %v1207_v48  ;;  %v1229_v52 = vmul.f32 0.01, %v1207_v48 }
0x1228   :  { %v1214_v53 = vpop.permute.xlu0 %1213 }
0x1229   :  { %1220 = vrot.lane.b32.xlu1 %v1218_v49, %s4265_s14  ;;  %v1216_v54 = vsub.f32 %v4621_v42, %v1214_v53 }
0x122b   :  { %v1217_v55 = vmul.f32 156.25, %v1216_v54 }
0x122c   :  { %v1226_v60 = vpop.permute.xlu0 %1225 }
0x122d   :  { %1231 = vrot.lane.b32.xlu1 %v1229_v52, %s4264_s13 }
0x1231   :  { %1241 = vrot.lane.b32.xlu1 %v4624_v44, %s4300_s20  ;;  %s4316_s20 = smov 115  }
0x129b   :  { %v1221_v58 = vpop.permute.xlu1 %1220 }
0x129c   :  { %v1223_v59 = vsub.f32 %v1217_v55, %v1221_v58 }
0x129e   :  { %v1228_v46 = vadd.f32 %v1226_v60, %v1223_v59 }
0x129f   :  { %v1232_v61 = vpop.permute.xlu1 %1231 }
0x12a0   :  { %v1235_v62 = vmul.f32 0.01, %v1228_v46  ;;  %v1234_v0 = vadd.f32 %v1232_v61, %v1201_v40 }
0x12a2   :  { %1237 = vrot.lane.b32.xlu0 %v1235_v62, %s4267_s6 }
0x12a3   :  { %v1242_v1 = vpop.permute.xlu1 %1241 }
0x12a4   :  { %v1244_v2 = vmul.f32 %v1242_v1, %v4619_v41 }
0x12a6   :  { %1246 = vrot.lane.b32.xlu0 %v1234_v0, %s4263_s12 }
0x12aa   :  { %1258 = vrot.lane.b32.xlu0 %v1244_v2, %s4301_s21  ;;  %s4317_s21 = smov 13  }
0x1314   :  { %v1238_v3 = vpop.permute.xlu0 %1237 }
0x1315   :  { %v1240_v5 = vadd.f32 %v1238_v3, %v1207_v48 }
0x1317   :  { %v1251_v6 = vmul.f32 25.0, %v1240_v5  ;;  %v1262_v7 = vmul.f32 0.01, %v1240_v5 }
0x1318   :  { %v1247_v9 = vpop.permute.xlu0 %1246 }
0x1319   :  { %1253 = vrot.lane.b32.xlu1 %v1251_v6, %s4265_s14  ;;  %v1249_v10 = vsub.f32 %v4621_v42, %v1247_v9 }
0x131b   :  { %v1250_v11 = vmul.f32 156.25, %v1249_v10 }
0x131c   :  { %v1259_v14 = vpop.permute.xlu0 %1258 }
0x131d   :  { %1264 = vrot.lane.b32.xlu1 %v1262_v7, %s4264_s13 }
0x1321   :  { %1274 = vrot.lane.b32.xlu1 %v4624_v44, %s4302_s22  ;;  %s4318_s22 = smov 124  }
0x138b   :  { %v1254_v12 = vpop.permute.xlu1 %1253 }
0x138c   :  { %v1256_v13 = vsub.f32 %v1250_v11, %v1254_v12 }
0x138e   :  { %v1261_v15 = vadd.f32 %v1259_v14, %v1256_v13 }
0x138f   :  { %v1265_v16 = vpop.permute.xlu1 %1264 }
0x1390   :  { %v1268_v17 = vmul.f32 0.01, %v1261_v15  ;;  %v1267_v8 = vadd.f32 %v1265_v16, %v1234_v0 }
0x1392   :  { %1270 = vrot.lane.b32.xlu0 %v1268_v17, %s4267_s6 }
0x1393   :  { %v1275_v18 = vpop.permute.xlu1 %1274 }
0x1394   :  { %v1277_v19 = vmul.f32 %v1275_v18, %v4619_v41 }
0x1396   :  { %1279 = vrot.lane.b32.xlu0 %v1267_v8, %s4263_s12 }
0x139a   :  { %1291 = vrot.lane.b32.xlu0 %v1277_v19, %s4303_s4  ;;  %s4319_s4 = smov 4  }
0x1404   :  { %v1271_v20 = vpop.permute.xlu0 %1270 }
0x1405   :  { %v1273_v21 = vadd.f32 %v1271_v20, %v1240_v5 }
0x1407   :  { %v1284_v22 = vmul.f32 25.0, %v1273_v21  ;;  %v1295_v23 = vmul.f32 0.01, %v1273_v21 }
0x1408   :  { %v1280_v24 = vpop.permute.xlu0 %1279 }
0x1409   :  { %1286 = vrot.lane.b32.xlu1 %v1284_v22, %s4265_s14  ;;  %v1282_v25 = vsub.f32 %v4621_v42, %v1280_v24 }
0x140b   :  { %v1283_v26 = vmul.f32 156.25, %v1282_v25 }
0x140c   :  { %v1292_v29 = vpop.permute.xlu0 %1291 }
0x140d   :  { %1297 = vrot.lane.b32.xlu1 %v1295_v23, %s4264_s13 }
0x1411   :  { %1314 = vrot.lane.b32.xlu1 %v4624_v44, %s4304_s25  ;;  %s4320_s25 = smov 5  }
0x147b   :  { %v1287_v27 = vpop.permute.xlu1 %1286 }
0x147c   :  { %v1289_v28 = vsub.f32 %v1283_v26, %v1287_v27 }
0x147e   :  { %v1294_v30 = vadd.f32 %v1292_v29, %v1289_v28 }
0x147f   :  { %v1298_v4 = vpop.permute.xlu1 %1297 }
0x1480   :  { %v1301_v31 = vmul.f32 0.01, %v1294_v30  ;;  %v4794_v32 = vadd.f32 %v1298_v4, %v1267_v8 }
0x1482   :  { %1303 = vrot.lane.b32.xlu0 %v1301_v31, %s4267_s6 }
0x1483   :  { %v1315_v33 = vpop.permute.xlu1 %1314 }
0x1484   :  { %v1317_v35 = vmul.f32 %v1315_v33, %v4619_v41 }
0x1486   :  { %1319 = vrot.lane.b32.xlu0 %v4794_v32, %s4263_s12 }
0x148a   :  { %1331 = vrot.lane.b32.xlu0 %v1317_v35, %s4305_s27  ;;  %s4321_s27 = smov 123  }
0x14f4   :  { %v1304_v36 = vpop.permute.xlu0 %1303 }
0x14f5   :  { %v1306_v37 = vadd.f32 %v1304_v36, %v1273_v21 }
0x14f7   :  { %v1324_v38 = vmul.f32 25.0, %v1306_v37  ;;  %v1335_v39 = vmul.f32 0.01, %v1306_v37 }
0x14f8   :  { %v1320_v40 = vpop.permute.xlu0 %1319 }
0x14f9   :  { %1326 = vrot.lane.b32.xlu1 %v1324_v38, %s4265_s14  ;;  %v1322_v43 = vsub.f32 %v4621_v42, %v1320_v40 }
0x14fb   :  { %v1323_v45 = vmul.f32 156.25, %v1322_v43 }
0x14fc   :  { %v1332_v49 = vpop.permute.xlu0 %1331 }
0x14fd   :  { %1337 = vrot.lane.b32.xlu1 %v1335_v39, %s4264_s13 }
0x1501   :  { %1347 = vrot.lane.b32.xlu1 %v4624_v44, %s4306_s3  ;;  %s5606_s3 = smov 14  }
0x156b   :  { %v1327_v47 = vpop.permute.xlu1 %1326 }
0x156c   :  { %v1329_v48 = vsub.f32 %v1323_v45, %v1327_v47 }
0x156e   :  { %v1334_v52 = vadd.f32 %v1332_v49, %v1329_v48 }
0x156f   :  { %v1338_v53 = vpop.permute.xlu1 %1337 }
0x1570   :  { %v1341_v54 = vmul.f32 0.01, %v1334_v52  ;;  %v1340_v55 = vadd.f32 %v1338_v53, %v4794_v32 }
0x1572   :  { %1343 = vrot.lane.b32.xlu0 %v1341_v54, %s4267_s6 }
0x1573   :  { %v1348_v58 = vpop.permute.xlu1 %1347 }
0x1574   :  { %v1350_v59 = vmul.f32 %v1348_v58, %v4619_v41 }
0x1576   :  { %1352 = vrot.lane.b32.xlu0 %v1340_v55, %s4263_s12 }
0x157a   :  { %1364 = vrot.lane.b32.xlu0 %v1350_v59, %s4307_s30  ;;  %s5607_s30 = smov 114  }
0x15e4   :  { %v1344_v60 = vpop.permute.xlu0 %1343 }
0x15e5   :  { %v1346_v46 = vadd.f32 %v1344_v60, %v1306_v37 }
0x15e7   :  { %v1357_v61 = vmul.f32 25.0, %v1346_v46  ;;  %v1368_v62 = vmul.f32 0.01, %v1346_v46 }
0x15e8   :  { %v1353_v0 = vpop.permute.xlu0 %1352 }
0x15e9   :  { %1359 = vrot.lane.b32.xlu1 %v1357_v61, %s4265_s14  ;;  %v1355_v1 = vsub.f32 %v4621_v42, %v1353_v0 }
0x15eb   :  { %v1356_v2 = vmul.f32 156.25, %v1355_v1 }
0x15ec   :  { %v1365_v6 = vpop.permute.xlu0 %1364 }
0x15ed   :  { %1370 = vrot.lane.b32.xlu1 %v1368_v62, %s4264_s13 }
0x15f1   :  { %1380 = vrot.lane.b32.xlu1 %v4624_v44, %s4308_s10  ;;  %s5608_s10 = smov 23  }
0x165b   :  { %v1360_v3 = vpop.permute.xlu1 %1359 }
0x165c   :  { %v1362_v5 = vsub.f32 %v1356_v2, %v1360_v3 }
0x165e   :  { %v1367_v7 = vadd.f32 %v1365_v6, %v1362_v5 }
0x165f   :  { %v1371_v9 = vpop.permute.xlu1 %1370 }
0x1660   :  { %v1374_v10 = vmul.f32 0.01, %v1367_v7  ;;  %v1373_v11 = vadd.f32 %v1371_v9, %v1340_v55 }
0x1662   :  { %1376 = vrot.lane.b32.xlu0 %v1374_v10, %s4267_s6 }
0x1663   :  { %v1381_v12 = vpop.permute.xlu1 %1380 }
0x1664   :  { %v1383_v13 = vmul.f32 %v1381_v12, %v4619_v41 }
0x1666   :  { %1385 = vrot.lane.b32.xlu0 %v1373_v11, %s4263_s12 }
0x166a   :  { %1397 = vrot.lane.b32.xlu0 %v1383_v13, %s4309_s2  ;;  %s5609_s2 = smov 105  }
0x16d4   :  { %v1377_v14 = vpop.permute.xlu0 %1376 }
0x16d5   :  { %v1379_v15 = vadd.f32 %v1377_v14, %v1346_v46 }
0x16d7   :  { %v1390_v16 = vmul.f32 25.0, %v1379_v15  ;;  %v1401_v17 = vmul.f32 0.01, %v1379_v15 }
0x16d8   :  { %v1386_v8 = vpop.permute.xlu0 %1385 }
0x16d9   :  { %1392 = vrot.lane.b32.xlu1 %v1390_v16, %s4265_s14  ;;  %v1388_v18 = vsub.f32 %v4621_v42, %v1386_v8 }
0x16db   :  { %v1389_v19 = vmul.f32 156.25, %v1388_v18 }
0x16dc   :  { %v1398_v22 = vpop.permute.xlu0 %1397 }
0x16dd   :  { %1403 = vrot.lane.b32.xlu1 %v1401_v17, %s4264_s13 }
0x16e1   :  { %1413 = vrot.lane.b32.xlu1 %v4624_v44, %s4310_s11  ;;  %s5610_s11 = smov 32  }
0x174b   :  { %v1393_v20 = vpop.permute.xlu1 %1392 }
0x174c   :  { %v1395_v21 = vsub.f32 %v1389_v19, %v1393_v20 }
0x174e   :  { %v1400_v23 = vadd.f32 %v1398_v22, %v1395_v21 }
0x174f   :  { %v1404_v24 = vpop.permute.xlu1 %1403 }
0x1750   :  { %v1407_v25 = vmul.f32 0.01, %v1400_v23  ;;  %v1406_v26 = vadd.f32 %v1404_v24, %v1373_v11 }
0x1752   :  { %1409 = vrot.lane.b32.xlu0 %v1407_v25, %s4267_s6 }
0x1753   :  { %v1414_v27 = vpop.permute.xlu1 %1413 }
0x1754   :  { %v1416_v28 = vmul.f32 %v1414_v27, %v4619_v41 }
0x1756   :  { %1418 = vrot.lane.b32.xlu0 %v1406_v26, %s4263_s12 }
0x175a   :  { %1430 = vrot.lane.b32.xlu0 %v1416_v28, %s4311_s16  ;;  %s5611_s16 = smov 96  }
0x17c4   :  { %v1410_v29 = vpop.permute.xlu0 %1409 }
0x17c5   :  { %v1412_v30 = vadd.f32 %v1410_v29, %v1379_v15 }
0x17c7   :  { %v1423_v4 = vmul.f32 25.0, %v1412_v30  ;;  %v1434_v31 = vmul.f32 0.01, %v1412_v30 }
0x17c8   :  { %v1419_v33 = vpop.permute.xlu0 %1418 }
0x17c9   :  { %1425 = vrot.lane.b32.xlu1 %v1423_v4, %s4265_s14  ;;  %v1421_v35 = vsub.f32 %v4621_v42, %v1419_v33 }
0x17cb   :  { %v1422_v36 = vmul.f32 156.25, %v1421_v35 }
0x17cc   :  { %v1431_v39 = vpop.permute.xlu0 %1430 }
0x17cd   :  { %1436 = vrot.lane.b32.xlu1 %v1434_v31, %s4264_s13 }
0x17d1   :  { %1446 = vrot.lane.b32.xlu1 %v4624_v44, %s4312_s17  ;;  %s5612_s17 = smov 41  }
0x183b   :  { %v1426_v37 = vpop.permute.xlu1 %1425 }
0x183c   :  { %v1428_v38 = vsub.f32 %v1422_v36, %v1426_v37 }
0x183e   :  { %v1433_v40 = vadd.f32 %v1431_v39, %v1428_v38 }
0x183f   :  { %v1437_v43 = vpop.permute.xlu1 %1436 }
0x1840   :  { %v1440_v45 = vmul.f32 0.01, %v1433_v40  ;;  %v1439_v47 = vadd.f32 %v1437_v43, %v1406_v26 }
0x1842   :  { %1442 = vrot.lane.b32.xlu0 %v1440_v45, %s4267_s6 }
0x1843   :  { %v1447_v48 = vpop.permute.xlu1 %1446 }
0x1844   :  { %v1449_v49 = vmul.f32 %v1447_v48, %v4619_v41 }
0x1846   :  { %1451 = vrot.lane.b32.xlu0 %v1439_v47, %s4263_s12 }
0x184a   :  { %1463 = vrot.lane.b32.xlu0 %v1449_v49, %s4313_s18  ;;  %s5613_s18 = smov 87  }
0x18b4   :  { %v1443_v52 = vpop.permute.xlu0 %1442 }
0x18b5   :  { %v1445_v53 = vadd.f32 %v1443_v52, %v1412_v30 }
0x18b7   :  { %v1456_v54 = vmul.f32 25.0, %v1445_v53  ;;  %v1467_v55 = vmul.f32 0.01, %v1445_v53 }
0x18b8   :  { %v1452_v58 = vpop.permute.xlu0 %1451 }
0x18b9   :  { %1458 = vrot.lane.b32.xlu1 %v1456_v54, %s4265_s14  ;;  %v1454_v59 = vsub.f32 %v4621_v42, %v1452_v58 }
0x18bb   :  { %v1455_v60 = vmul.f32 156.25, %v1454_v59 }
0x18bc   :  { %v1464_v62 = vpop.permute.xlu0 %1463 }
0x18bd   :  { %1469 = vrot.lane.b32.xlu1 %v1467_v55, %s4264_s13 }
0x18c1   :  { %1479 = vrot.lane.b32.xlu1 %v4624_v44, %s4314_s1  ;;  %s5614_s1 = smov 50  }
0x192b   :  { %v1459_v46 = vpop.permute.xlu1 %1458 }
0x192c   :  { %v1461_v61 = vsub.f32 %v1455_v60, %v1459_v46 }
0x192e   :  { %v1466_v0 = vadd.f32 %v1464_v62, %v1461_v61 }
0x192f   :  { %v1470_v1 = vpop.permute.xlu1 %1469 }
0x1930   :  { %v1473_v2 = vmul.f32 0.01, %v1466_v0  ;;  %v1472_v3 = vadd.f32 %v1470_v1, %v1439_v47 }
0x1932   :  { %1475 = vrot.lane.b32.xlu0 %v1473_v2, %s4267_s6 }
0x1933   :  { %v1480_v5 = vpop.permute.xlu1 %1479 }
0x1934   :  { %v1482_v6 = vmul.f32 %v1480_v5, %v4619_v41 }
0x1936   :  { %1484 = vrot.lane.b32.xlu0 %v1472_v3, %s4263_s12 }
0x193a   :  { %1496 = vrot.lane.b32.xlu0 %v1482_v6, %s4315_s19  ;;  %s5615_s19 = smov 78  }
0x19a4   :  { %v1476_v7 = vpop.permute.xlu0 %1475 }
0x19a5   :  { %v1478_v9 = vadd.f32 %v1476_v7, %v1445_v53 }
0x19a7   :  { %v1489_v10 = vmul.f32 25.0, %v1478_v9  ;;  %v1500_v11 = vmul.f32 0.01, %v1478_v9 }
0x19a8   :  { %v1485_v12 = vpop.permute.xlu0 %1484 }
0x19a9   :  { %1491 = vrot.lane.b32.xlu1 %v1489_v10, %s4265_s14  ;;  %v1487_v13 = vsub.f32 %v4621_v42, %v1485_v12 }
0x19ab   :  { %v1488_v14 = vmul.f32 156.25, %v1487_v13 }
0x19ac   :  { %v1497_v17 = vpop.permute.xlu0 %1496 }
0x19ad   :  { %1502 = vrot.lane.b32.xlu1 %v1500_v11, %s4264_s13 }
0x19b1   :  { %1512 = vrot.lane.b32.xlu1 %v4624_v44, %s4265_s14 }
0x1a1b   :  { %v1492_v15 = vpop.permute.xlu1 %1491 }
0x1a1c   :  { %v1494_v16 = vsub.f32 %v1488_v14, %v1492_v15 }
0x1a1e   :  { %v1499_v8 = vadd.f32 %v1497_v17, %v1494_v16 }
0x1a1f   :  { %v1503_v18 = vpop.permute.xlu1 %1502 }
0x1a20   :  { %v1506_v19 = vmul.f32 0.01, %v1499_v8  ;;  %v1505_v20 = vadd.f32 %v1503_v18, %v1472_v3 }
0x1a22   :  { %1508 = vrot.lane.b32.xlu0 %v1506_v19, %s4267_s6 }
0x1a23   :  { %v1513_v21 = vpop.permute.xlu1 %1512 }
0x1a24   :  { %v1515_v22 = vmul.f32 %v1513_v21, %v4619_v41 }
0x1a26   :  { %1517 = vrot.lane.b32.xlu0 %v1505_v20, %s4263_s12 }
0x1a2a   :  { %1529 = vrot.lane.b32.xlu0 %v1515_v22, %s4267_s6 }
0x1a94   :  { %v1509_v23 = vpop.permute.xlu0 %1508 }
0x1a95   :  { %v1511_v24 = vadd.f32 %v1509_v23, %v1478_v9 }
0x1a97   :  { %v1522_v25 = vmul.f32 25.0, %v1511_v24  ;;  %v1533_v26 = vmul.f32 0.01, %v1511_v24 }
0x1a98   :  { %v1518_v27 = vpop.permute.xlu0 %1517 }
0x1a99   :  { %1524 = vrot.lane.b32.xlu1 %v1522_v25, %s4265_s14  ;;  %v1520_v28 = vsub.f32 %v4621_v42, %v1518_v27 }
0x1a9b   :  { %v1521_v29 = vmul.f32 156.25, %v1520_v28 }
0x1a9c   :  { %v1530_v31 = vpop.permute.xlu0 %1529 }
0x1a9d   :  { %1535 = vrot.lane.b32.xlu1 %v1533_v26, %s4264_s13 }
0x1aa1   :  { %1545 = vrot.lane.b32.xlu1 %v4624_v44, %s4316_s20  ;;  %s5616_s20 = smov 59  }
0x1b0b   :  { %v1525_v30 = vpop.permute.xlu1 %1524 }
0x1b0c   :  { %v1527_v4 = vsub.f32 %v1521_v29, %v1525_v30 }
0x1b0e   :  { %v1532_v33 = vadd.f32 %v1530_v31, %v1527_v4 }
0x1b0f   :  { %v1536_v35 = vpop.permute.xlu1 %1535 }
0x1b10   :  { %v1539_v36 = vmul.f32 0.01, %v1532_v33  ;;  %v1538_v37 = vadd.f32 %v1536_v35, %v1505_v20 }
0x1b12   :  { %1541 = vrot.lane.b32.xlu0 %v1539_v36, %s4267_s6 }
0x1b13   :  { %v1546_v38 = vpop.permute.xlu1 %1545 }
0x1b14   :  { %v1548_v39 = vmul.f32 %v1546_v38, %v4619_v41 }
0x1b16   :  { %1550 = vrot.lane.b32.xlu0 %v1538_v37, %s4263_s12 }
0x1b1a   :  { %1562 = vrot.lane.b32.xlu0 %v1548_v39, %s4317_s21  ;;  %s5617_s21 = smov 69  }
0x1b84   :  { %v1542_v40 = vpop.permute.xlu0 %1541 }
0x1b85   :  { %v1544_v43 = vadd.f32 %v1542_v40, %v1511_v24 }
0x1b87   :  { %v1555_v45 = vmul.f32 25.0, %v1544_v43  ;;  %v1566_v47 = vmul.f32 0.01, %v1544_v43 }
0x1b88   :  { %v1551_v48 = vpop.permute.xlu0 %1550 }
0x1b89   :  { %1557 = vrot.lane.b32.xlu1 %v1555_v45, %s4265_s14  ;;  %v1553_v49 = vsub.f32 %v4621_v42, %v1551_v48 }
0x1b8b   :  { %v1554_v52 = vmul.f32 156.25, %v1553_v49 }
0x1b8c   :  { %v1563_v55 = vpop.permute.xlu0 %1562 }
0x1b8d   :  { %1568 = vrot.lane.b32.xlu1 %v1566_v47, %s4264_s13 }
0x1b91   :  { %1578 = vrot.lane.b32.xlu1 %v4624_v44, %s4318_s22  ;;  %s5618_s22 = smov 68  }
0x1bfb   :  { %v1558_v53 = vpop.permute.xlu1 %1557 }
0x1bfc   :  { %v1560_v54 = vsub.f32 %v1554_v52, %v1558_v53 }
0x1bfe   :  { %v1565_v58 = vadd.f32 %v1563_v55, %v1560_v54 }
0x1bff   :  { %v1569_v59 = vpop.permute.xlu1 %1568 }
0x1c00   :  { %v1572_v60 = vmul.f32 0.01, %v1565_v58  ;;  %v1571_v46 = vadd.f32 %v1569_v59, %v1538_v37 }
0x1c02   :  { %1574 = vrot.lane.b32.xlu0 %v1572_v60, %s4267_s6 }
0x1c03   :  { %v1579_v61 = vpop.permute.xlu1 %1578 }
0x1c04   :  { %v1581_v62 = vmul.f32 %v1579_v61, %v4619_v41  ;;  %v1582_v5 = vmul.f32 %v1579_v61, %v4632_v51 }
0x1c06   :  { %1584 = vrot.lane.b32.xlu0 %v1571_v46, %s4263_s12 }
0x1c0a   :  { %1597 = vrot.lane.b32.xlu0 %v1581_v62, %s4319_s4 }
0x1c74   :  { %v1575_v0 = vpop.permute.xlu0 %1574 }
0x1c75   :  { %v1577_v1 = vadd.f32 %v1575_v0, %v1544_v43 }
0x1c77   :  { %v1589_v2 = vmul.f32 25.0, %v1577_v1  ;;  %v1605_v3 = vmul.f32 0.01, %v1577_v1 }
0x1c78   :  { %v1585_v6 = vpop.permute.xlu0 %1584 }
0x1c79   :  { %1591 = vrot.lane.b32.xlu1 %v1589_v2, %s4265_s14  ;;  %1607 = vrot.lane.b32.xlu0 %v1605_v3, %s4264_s13  ;;  %v1587_v7 = vsub.f32 %v4621_v42, %v1585_v6 }
0x1c7b   :  { %v1588_v9 = vmul.f32 156.25, %v1587_v7 }
0x1c7c   :  { %v1598_v10 = vpop.permute.xlu0 %1597 }
0x1c7d   :  { %1617 = vrot.lane.b32.xlu0 %v4624_v44, %s4320_s25  ;;  %1599 = vrot.lane.b32.xlu1 %v1582_v5, %s4319_s4  ;;  %s5619_s4 = smov 60   ;;  %s5620_s25 = smov 77  }
0x1ceb   :  { %v1592_v41 = vpop.permute.xlu1 %1591  ;;  %v1608_v15 = vpop.permute.xlu0 %1607 }
0x1cec   :  { %v1594_v11 = vsub.f32 %v1588_v9, %v1592_v41  ;;  %v1610_v17 = vadd.f32 %v1608_v15, %v1571_v46 }
0x1cef   :  { %v1600_v12 = vpop.permute.xlu1 %1599  ;;  %v1618_v8 = vpop.permute.xlu0 %1617 }
0x1cf0   :  { %v1602_v13 = vsel %vm1601_vm3, %v1598_v10, %v1600_v12  ;;  %v1620_v18 = vmul.f32 %v1618_v8, %v4632_v51 }
0x1cf1   :  { %v1604_v14 = vadd.f32 %v1602_v13, %v1594_v11 }
0x1cf3   :  { %v1611_v16 = vmul.f32 0.01, %v1604_v14 }
0x1cf5   :  { %1613 = vrot.lane.b32.xlu1 %v1611_v16, %s4267_s6 }
0x1cf9   :  { %1622 = vrot.lane.b32.xlu1 %v1610_v17, %s4263_s12 }
0x1cfd   :  { %1634 = vrot.lane.b32.xlu1 %v1620_v18, %s4321_s27  ;;  %s5621_s27 = smov 51  }
0x1d67   :  { %v1614_v19 = vpop.permute.xlu1 %1613 }
0x1d68   :  { %v1616_v20 = vadd.f32 %v1614_v19, %v1577_v1 }
0x1d6a   :  { %v1627_v21 = vmul.f32 25.0, %v1616_v20  ;;  %v1638_v22 = vmul.f32 0.01, %v1616_v20 }
0x1d6b   :  { %v1623_v23 = vpop.permute.xlu1 %1622 }
0x1d6c   :  { %1629 = vrot.lane.b32.xlu0 %v1627_v21, %s4265_s14  ;;  %v1625_v24 = vsub.f32 %v4621_v42, %v1623_v23 }
0x1d6e   :  { %v1626_v25 = vmul.f32 156.25, %v1625_v24 }
0x1d6f   :  { %v1635_v28 = vpop.permute.xlu1 %1634 }
0x1d70   :  { %1640 = vrot.lane.b32.xlu0 %v1638_v22, %s4264_s13 }
0x1d74   :  { %1657 = vrot.lane.b32.xlu0 %v4624_v44, %s5606_s3  ;;  %s5631_s3 = smov 3  }
0x1dde   :  { %v1630_v26 = vpop.permute.xlu0 %1629 }
0x1ddf   :  { %v1632_v27 = vsub.f32 %v1626_v25, %v1630_v26 }
0x1de1   :  { %v1637_v29 = vadd.f32 %v1635_v28, %v1632_v27 }
0x1de2   :  { %v1641_v30 = vpop.permute.xlu0 %1640 }
0x1de3   :  { %v1644_v4 = vmul.f32 0.01, %v1637_v29  ;;  %v4872_v31 = vadd.f32 %v1641_v30, %v1610_v17 }
0x1de5   :  { %1646 = vrot.lane.b32.xlu1 %v1644_v4, %s4267_s6 }
0x1de6   :  { %v1658_v33 = vpop.permute.xlu0 %1657 }
0x1de7   :  { %v1660_v35 = vmul.f32 %v1658_v33, %v4632_v51 }
0x1de9   :  { %1662 = vrot.lane.b32.xlu1 %v4872_v31, %s4263_s12 }
0x1ded   :  { %1674 = vrot.lane.b32.xlu1 %v1660_v35, %s5607_s30  ;;  %s5633_s30 = smov 125  }
0x1e57   :  { %v1647_v36 = vpop.permute.xlu1 %1646 }
0x1e58   :  { %v1649_v37 = vadd.f32 %v1647_v36, %v1616_v20 }
0x1e5a   :  { %v1667_v38 = vmul.f32 25.0, %v1649_v37  ;;  %v1678_v39 = vmul.f32 0.01, %v1649_v37 }
0x1e5b   :  { %v1663_v40 = vpop.permute.xlu1 %1662 }
0x1e5c   :  { %1669 = vrot.lane.b32.xlu0 %v1667_v38, %s4265_s14  ;;  %v1665_v43 = vsub.f32 %v4621_v42, %v1663_v40 }
0x1e5e   :  { %v1666_v45 = vmul.f32 156.25, %v1665_v43 }
0x1e5f   :  { %v1675_v49 = vpop.permute.xlu1 %1674 }
0x1e60   :  { %1680 = vrot.lane.b32.xlu0 %v1678_v39, %s4264_s13 }
0x1e64   :  { %1690 = vrot.lane.b32.xlu0 %v4624_v44, %s5608_s10  ;;  %s5634_s10 = smov 12  }
0x1ece   :  { %v1670_v47 = vpop.permute.xlu0 %1669 }
0x1ecf   :  { %v1672_v48 = vsub.f32 %v1666_v45, %v1670_v47 }
0x1ed1   :  { %v1677_v52 = vadd.f32 %v1675_v49, %v1672_v48 }
0x1ed2   :  { %v1681_v53 = vpop.permute.xlu0 %1680 }
0x1ed3   :  { %v1684_v54 = vmul.f32 0.01, %v1677_v52  ;;  %v1683_v55 = vadd.f32 %v1681_v53, %v4872_v31 }
0x1ed5   :  { %1686 = vrot.lane.b32.xlu1 %v1684_v54, %s4267_s6 }
0x1ed6   :  { %v1691_v58 = vpop.permute.xlu0 %1690 }
0x1ed7   :  { %v1693_v59 = vmul.f32 %v1691_v58, %v4632_v51 }
0x1ed9   :  { %1695 = vrot.lane.b32.xlu1 %v1683_v55, %s4263_s12 }
0x1edd   :  { %1707 = vrot.lane.b32.xlu1 %v1693_v59, %s5609_s2  ;;  %s5635_s2 = smov 116  }
0x1f47   :  { %v1687_v60 = vpop.permute.xlu1 %1686 }
0x1f48   :  { %v1689_v46 = vadd.f32 %v1687_v60, %v1649_v37 }
0x1f4a   :  { %v1700_v61 = vmul.f32 25.0, %v1689_v46  ;;  %v1711_v62 = vmul.f32 0.01, %v1689_v46 }
0x1f4b   :  { %v1696_v0 = vpop.permute.xlu1 %1695 }
0x1f4c   :  { %1702 = vrot.lane.b32.xlu0 %v1700_v61, %s4265_s14  ;;  %v1698_v1 = vsub.f32 %v4621_v42, %v1696_v0 }
0x1f4e   :  { %v1699_v2 = vmul.f32 156.25, %v1698_v1 }
0x1f4f   :  { %v1708_v6 = vpop.permute.xlu1 %1707 }
0x1f50   :  { %1713 = vrot.lane.b32.xlu0 %v1711_v62, %s4264_s13 }
0x1f54   :  { %1723 = vrot.lane.b32.xlu0 %v4624_v44, %s5610_s11  ;;  %s5636_s11 = smov 21  }
0x1fbe   :  { %v1703_v3 = vpop.permute.xlu0 %1702 }
0x1fbf   :  { %v1705_v5 = vsub.f32 %v1699_v2, %v1703_v3 }
0x1fc1   :  { %v1710_v7 = vadd.f32 %v1708_v6, %v1705_v5 }
0x1fc2   :  { %v1714_v41 = vpop.permute.xlu0 %1713 }
0x1fc3   :  { %v1717_v9 = vmul.f32 0.01, %v1710_v7  ;;  %v1716_v10 = vadd.f32 %v1714_v41, %v1683_v55 }
0x1fc5   :  { %1719 = vrot.lane.b32.xlu1 %v1717_v9, %s4267_s6 }
0x1fc6   :  { %v1724_v11 = vpop.permute.xlu0 %1723 }
0x1fc7   :  { %v1726_v12 = vmul.f32 %v1724_v11, %v4632_v51 }
0x1fc9   :  { %1728 = vrot.lane.b32.xlu1 %v1716_v10, %s4263_s12 }
0x1fcd   :  { %1740 = vrot.lane.b32.xlu1 %v1726_v12, %s5611_s16  ;;  %s5637_s16 = smov 107  }
0x2037   :  { %v1720_v13 = vpop.permute.xlu1 %1719 }
0x2038   :  { %v1722_v14 = vadd.f32 %v1720_v13, %v1689_v46 }
0x203a   :  { %v1733_v15 = vmul.f32 25.0, %v1722_v14  ;;  %v1744_v16 = vmul.f32 0.01, %v1722_v14 }
0x203b   :  { %v1729_v17 = vpop.permute.xlu1 %1728 }
0x203c   :  { %1735 = vrot.lane.b32.xlu0 %v1733_v15, %s4265_s14  ;;  %v1731_v8 = vsub.f32 %v4621_v42, %v1729_v17 }
0x203e   :  { %v1732_v18 = vmul.f32 156.25, %v1731_v8 }
0x203f   :  { %v1741_v21 = vpop.permute.xlu1 %1740 }
0x2040   :  { %1746 = vrot.lane.b32.xlu0 %v1744_v16, %s4264_s13 }
0x2044   :  { %1756 = vrot.lane.b32.xlu0 %v4624_v44, %s5612_s17  ;;  %s5638_s17 = smov 30  }
0x20ae   :  { %v1736_v19 = vpop.permute.xlu0 %1735 }
0x20af   :  { %v1738_v20 = vsub.f32 %v1732_v18, %v1736_v19 }
0x20b1   :  { %v1743_v22 = vadd.f32 %v1741_v21, %v1738_v20 }
0x20b2   :  { %v1747_v23 = vpop.permute.xlu0 %1746 }
0x20b3   :  { %v1750_v24 = vmul.f32 0.01, %v1743_v22  ;;  %v1749_v25 = vadd.f32 %v1747_v23, %v1716_v10 }
0x20b5   :  { %1752 = vrot.lane.b32.xlu1 %v1750_v24, %s4267_s6 }
0x20b6   :  { %v1757_v26 = vpop.permute.xlu0 %1756 }
0x20b7   :  { %v1759_v27 = vmul.f32 %v1757_v26, %v4632_v51 }
0x20b9   :  { %1761 = vrot.lane.b32.xlu1 %v1749_v25, %s4263_s12 }
0x20bd   :  { %1773 = vrot.lane.b32.xlu1 %v1759_v27, %s5613_s18  ;;  %s5639_s18 = smov 98  }
0x2127   :  { %v1753_v28 = vpop.permute.xlu1 %1752 }
0x2128   :  { %v1755_v29 = vadd.f32 %v1753_v28, %v1722_v14 }
0x212a   :  { %v1766_v30 = vmul.f32 25.0, %v1755_v29  ;;  %v1777_v4 = vmul.f32 0.01, %v1755_v29 }
0x212b   :  { %v1762_v33 = vpop.permute.xlu1 %1761 }
0x212c   :  { %1768 = vrot.lane.b32.xlu0 %v1766_v30, %s4265_s14  ;;  %v1764_v35 = vsub.f32 %v4621_v42, %v1762_v33 }
0x212e   :  { %v1765_v36 = vmul.f32 156.25, %v1764_v35 }
0x212f   :  { %v1774_v39 = vpop.permute.xlu1 %1773 }
0x2130   :  { %1779 = vrot.lane.b32.xlu0 %v1777_v4, %s4264_s13 }
0x2134   :  { %1789 = vrot.lane.b32.xlu0 %v4624_v44, %s5614_s1  ;;  %s5640_s1 = smov 39  }
0x219e   :  { %v1769_v37 = vpop.permute.xlu0 %1768 }
0x219f   :  { %v1771_v38 = vsub.f32 %v1765_v36, %v1769_v37 }
0x21a1   :  { %v1776_v40 = vadd.f32 %v1774_v39, %v1771_v38 }
0x21a2   :  { %v1780_v43 = vpop.permute.xlu0 %1779 }
0x21a3   :  { %v1783_v45 = vmul.f32 0.01, %v1776_v40  ;;  %v1782_v47 = vadd.f32 %v1780_v43, %v1749_v25 }
0x21a5   :  { %1785 = vrot.lane.b32.xlu1 %v1783_v45, %s4267_s6 }
0x21a6   :  { %v1790_v48 = vpop.permute.xlu0 %1789 }
0x21a7   :  { %v1792_v49 = vmul.f32 %v1790_v48, %v4632_v51 }
0x21a9   :  { %1794 = vrot.lane.b32.xlu1 %v1782_v47, %s4263_s12 }
0x21ad   :  { %1806 = vrot.lane.b32.xlu1 %v1792_v49, %s5615_s19  ;;  %s5641_s19 = smov 89  }
0x2217   :  { %v1786_v52 = vpop.permute.xlu1 %1785 }
0x2218   :  { %v1788_v53 = vadd.f32 %v1786_v52, %v1755_v29 }
0x221a   :  { %v1799_v54 = vmul.f32 25.0, %v1788_v53  ;;  %v1810_v55 = vmul.f32 0.01, %v1788_v53 }
0x221b   :  { %v1795_v58 = vpop.permute.xlu1 %1794 }
0x221c   :  { %1801 = vrot.lane.b32.xlu0 %v1799_v54, %s4265_s14  ;;  %v1797_v59 = vsub.f32 %v4621_v42, %v1795_v58 }
0x221e   :  { %v1798_v60 = vmul.f32 156.25, %v1797_v59 }
0x221f   :  { %v1807_v62 = vpop.permute.xlu1 %1806 }
0x2220   :  { %1812 = vrot.lane.b32.xlu0 %v1810_v55, %s4264_s13 }
0x2224   :  { %1822 = vrot.lane.b32.xlu0 %v4624_v44, %s5616_s20  ;;  %s5642_s20 = smov 48  }
0x228e   :  { %v1802_v46 = vpop.permute.xlu0 %1801 }
0x228f   :  { %v1804_v61 = vsub.f32 %v1798_v60, %v1802_v46 }
0x2291   :  { %v1809_v0 = vadd.f32 %v1807_v62, %v1804_v61 }
0x2292   :  { %v1813_v1 = vpop.permute.xlu0 %1812 }
0x2293   :  { %v1816_v2 = vmul.f32 0.01, %v1809_v0  ;;  %v1815_v3 = vadd.f32 %v1813_v1, %v1782_v47 }
0x2295   :  { %1818 = vrot.lane.b32.xlu1 %v1816_v2, %s4267_s6 }
0x2296   :  { %v1823_v5 = vpop.permute.xlu0 %1822 }
0x2297   :  { %v1825_v6 = vmul.f32 %v1823_v5, %v4632_v51 }
0x2299   :  { %1827 = vrot.lane.b32.xlu1 %v1815_v3, %s4263_s12 }
0x229d   :  { %1839 = vrot.lane.b32.xlu1 %v1825_v6, %s5617_s21  ;;  %s5643_s21 = smov 80  }
0x2307   :  { %v1819_v7 = vpop.permute.xlu1 %1818 }
0x2308   :  { %v1821_v41 = vadd.f32 %v1819_v7, %v1788_v53 }
0x230a   :  { %v1832_v9 = vmul.f32 25.0, %v1821_v41  ;;  %v1843_v10 = vmul.f32 0.01, %v1821_v41 }
0x230b   :  { %v1828_v11 = vpop.permute.xlu1 %1827 }
0x230c   :  { %1834 = vrot.lane.b32.xlu0 %v1832_v9, %s4265_s14  ;;  %v1830_v12 = vsub.f32 %v4621_v42, %v1828_v11 }
0x230e   :  { %v1831_v13 = vmul.f32 156.25, %v1830_v12 }
0x230f   :  { %v1840_v16 = vpop.permute.xlu1 %1839 }
0x2310   :  { %1845 = vrot.lane.b32.xlu0 %v1843_v10, %s4264_s13 }
0x2314   :  { %1855 = vrot.lane.b32.xlu0 %v4624_v44, %s5618_s22  ;;  %s5644_s22 = smov 57  }
0x237e   :  { %v1835_v14 = vpop.permute.xlu0 %1834 }
0x237f   :  { %v1837_v15 = vsub.f32 %v1831_v13, %v1835_v14 }
0x2381   :  { %v1842_v17 = vadd.f32 %v1840_v16, %v1837_v15 }
0x2382   :  { %v1846_v8 = vpop.permute.xlu0 %1845 }
0x2383   :  { %v1849_v18 = vmul.f32 0.01, %v1842_v17  ;;  %v1848_v19 = vadd.f32 %v1846_v8, %v1815_v3 }
0x2385   :  { %1851 = vrot.lane.b32.xlu1 %v1849_v18, %s4267_s6 }
0x2386   :  { %v1856_v20 = vpop.permute.xlu0 %1855 }
0x2387   :  { %v1858_v21 = vmul.f32 %v1856_v20, %v4632_v51 }
0x2389   :  { %1860 = vrot.lane.b32.xlu1 %v1848_v19, %s4263_s12 }
0x238d   :  { %1872 = vrot.lane.b32.xlu1 %v1858_v21, %s5619_s4  ;;  %s5645_s4 = smov 71  }
0x23f7   :  { %v1852_v22 = vpop.permute.xlu1 %1851 }
0x23f8   :  { %v1854_v23 = vadd.f32 %v1852_v22, %v1821_v41 }
0x23fa   :  { %v1865_v24 = vmul.f32 25.0, %v1854_v23  ;;  %v1876_v25 = vmul.f32 0.01, %v1854_v23 }
0x23fb   :  { %v1861_v26 = vpop.permute.xlu1 %1860 }
0x23fc   :  { %1867 = vrot.lane.b32.xlu0 %v1865_v24, %s4265_s14  ;;  %v1863_v27 = vsub.f32 %v4621_v42, %v1861_v26 }
0x23fe   :  { %v1864_v28 = vmul.f32 156.25, %v1863_v27 }
0x23ff   :  { %v1873_v4 = vpop.permute.xlu1 %1872 }
0x2400   :  { %1878 = vrot.lane.b32.xlu0 %v1876_v25, %s4264_s13 }
0x2404   :  { %1888 = vrot.lane.b32.xlu0 %v4624_v44, %s5620_s25  ;;  %s5646_s25 = smov 66  }
0x246e   :  { %v1868_v29 = vpop.permute.xlu0 %1867 }
0x246f   :  { %v1870_v30 = vsub.f32 %v1864_v28, %v1868_v29 }
0x2471   :  { %v1875_v33 = vadd.f32 %v1873_v4, %v1870_v30 }
0x2472   :  { %v1879_v35 = vpop.permute.xlu0 %1878 }
0x2473   :  { %v1882_v36 = vmul.f32 0.01, %v1875_v33  ;;  %v1881_v37 = vadd.f32 %v1879_v35, %v1848_v19 }
0x2475   :  { %1884 = vrot.lane.b32.xlu1 %v1882_v36, %s4267_s6 }
0x2476   :  { %v1889_v38 = vpop.permute.xlu0 %1888 }
0x2477   :  { %v1891_v39 = vmul.f32 %v1889_v38, %v4632_v51 }
0x2479   :  { %1893 = vrot.lane.b32.xlu1 %v1881_v37, %s4263_s12 }
0x247d   :  { %1905 = vrot.lane.b32.xlu1 %v1891_v39, %s5621_s27  ;;  %s5647_s27 = smov 62  }
0x24e7   :  { %v1885_v40 = vpop.permute.xlu1 %1884 }
0x24e8   :  { %v1887_v43 = vadd.f32 %v1885_v40, %v1854_v23 }
0x24ea   :  { %v1898_v45 = vmul.f32 25.0, %v1887_v43  ;;  %v1909_v47 = vmul.f32 0.01, %v1887_v43 }
0x24eb   :  { %v1894_v48 = vpop.permute.xlu1 %1893 }
0x24ec   :  { %1900 = vrot.lane.b32.xlu0 %v1898_v45, %s4265_s14  ;;  %v1896_v49 = vsub.f32 %v4621_v42, %v1894_v48 }
0x24ee   :  { %v1897_v52 = vmul.f32 156.25, %v1896_v49 }
0x24ef   :  { %v1906_v55 = vpop.permute.xlu1 %1905 }
0x24f0   :  { %1911 = vrot.lane.b32.xlu0 %v1909_v47, %s4264_s13 }
0x24f4   :  { %1921 = vrot.lane.b32.xlu0 %v4624_v44, %s5622_s23  ;;  %s5648_s23 = smov 75  }
0x255e   :  { %v1901_v53 = vpop.permute.xlu0 %1900 }
0x255f   :  { %v1903_v54 = vsub.f32 %v1897_v52, %v1901_v53 }
0x2561   :  { %v1908_v58 = vadd.f32 %v1906_v55, %v1903_v54 }
0x2562   :  { %v1912_v59 = vpop.permute.xlu0 %1911 }
0x2563   :  { %v1915_v60 = vmul.f32 0.01, %v1908_v58  ;;  %v1914_v46 = vadd.f32 %v1912_v59, %v1881_v37 }
0x2565   :  { %1917 = vrot.lane.b32.xlu1 %v1915_v60, %s4267_s6 }
0x2566   :  { %v1922_v61 = vpop.permute.xlu0 %1921 }
0x2567   :  { %v1924_v62 = vmul.f32 %v1922_v61, %v4632_v51 }
0x2569   :  { %1926 = vrot.lane.b32.xlu1 %v1914_v46, %s4263_s12 }
0x256d   :  { %1938 = vrot.lane.b32.xlu1 %v1924_v62, %s5623_s26  ;;  %s5649_s26 = smov 53  }
0x25d7   :  { %v1918_v0 = vpop.permute.xlu1 %1917 }
0x25d8   :  { %v1920_v1 = vadd.f32 %v1918_v0, %v1887_v43 }
0x25da   :  { %v1931_v2 = vmul.f32 25.0, %v1920_v1  ;;  %v1942_v3 = vmul.f32 0.01, %v1920_v1 }
0x25db   :  { %v1927_v5 = vpop.permute.xlu1 %1926 }
0x25dc   :  { %1933 = vrot.lane.b32.xlu0 %v1931_v2, %s4265_s14  ;;  %v1929_v6 = vsub.f32 %v4621_v42, %v1927_v5 }
0x25de   :  { %v1930_v7 = vmul.f32 156.25, %v1929_v6 }
0x25df   :  { %v1939_v10 = vpop.permute.xlu1 %1938 }
0x25e0   :  { %1944 = vrot.lane.b32.xlu0 %v1942_v3, %s4264_s13 }
0x25e4   :  { %1954 = vrot.lane.b32.xlu0 %v4624_v44, %s5624_s29  ;;  %s4365_s29 = smov 84  }
0x264e   :  { %v1934_v41 = vpop.permute.xlu0 %1933 }
0x264f   :  { %v1936_v9 = vsub.f32 %v1930_v7, %v1934_v41 }
0x2651   :  { %v1941_v11 = vadd.f32 %v1939_v10, %v1936_v9 }
0x2652   :  { %v1945_v12 = vpop.permute.xlu0 %1944 }
0x2653   :  { %v1948_v13 = vmul.f32 0.01, %v1941_v11  ;;  %v1947_v14 = vadd.f32 %v1945_v12, %v1914_v46 }
0x2655   :  { %1950 = vrot.lane.b32.xlu1 %v1948_v13, %s4267_s6 }
0x2656   :  { %v1955_v15 = vpop.permute.xlu0 %1954 }
0x2657   :  { %v1957_v16 = vmul.f32 %v1955_v15, %v4632_v51 }
0x2659   :  { %1959 = vrot.lane.b32.xlu1 %v1947_v14, %s4263_s12 }
0x265d   :  { %1971 = vrot.lane.b32.xlu1 %v1957_v16, %s5625_s7  ;;  %s4366_s7 = smov 44  }
0x26c7   :  { %v1951_v17 = vpop.permute.xlu1 %1950 }
0x26c8   :  { %v1953_v8 = vadd.f32 %v1951_v17, %v1920_v1 }
0x26ca   :  { %v1964_v18 = vmul.f32 25.0, %v1953_v8  ;;  %v1975_v19 = vmul.f32 0.01, %v1953_v8 }
0x26cb   :  { %v1960_v20 = vpop.permute.xlu1 %1959 }
0x26cc   :  { %1966 = vrot.lane.b32.xlu0 %v1964_v18, %s4265_s14  ;;  %v1962_v21 = vsub.f32 %v4621_v42, %v1960_v20 }
0x26ce   :  { %v1963_v22 = vmul.f32 156.25, %v1962_v21 }
0x26cf   :  { %v1972_v25 = vpop.permute.xlu1 %1971 }
0x26d0   :  { %1977 = vrot.lane.b32.xlu0 %v1975_v19, %s4264_s13 }
0x26d4   :  { %1994 = vrot.lane.b32.xlu0 %v4624_v44, %s5626_s15  ;;  %s4367_s15 = smov 93  }
0x273e   :  { %v1967_v23 = vpop.permute.xlu0 %1966 }
0x273f   :  { %v1969_v24 = vsub.f32 %v1963_v22, %v1967_v23 }
0x2741   :  { %v1974_v26 = vadd.f32 %v1972_v25, %v1969_v24 }
0x2742   :  { %v1978_v27 = vpop.permute.xlu0 %1977 }
0x2743   :  { %v1981_v28 = vmul.f32 0.01, %v1974_v26  ;;  %v4966_v29 = vadd.f32 %v1978_v27, %v1947_v14 }
0x2745   :  { %1983 = vrot.lane.b32.xlu1 %v1981_v28, %s4267_s6 }
0x2746   :  { %v1995_v30 = vpop.permute.xlu0 %1994 }
0x2747   :  { %v1997_v4 = vmul.f32 %v1995_v30, %v4632_v51 }
0x2749   :  { %1999 = vrot.lane.b32.xlu1 %v4966_v29, %s4263_s12 }
0x274d   :  { %2011 = vrot.lane.b32.xlu1 %v1997_v4, %s5627_s24  ;;  %s4368_s24 = smov 35  }
0x27b7   :  { %v1984_v33 = vpop.permute.xlu1 %1983 }
0x27b8   :  { %v1986_v35 = vadd.f32 %v1984_v33, %v1953_v8 }
0x27ba   :  { %v2004_v36 = vmul.f32 25.0, %v1986_v35  ;;  %v2015_v37 = vmul.f32 0.01, %v1986_v35 }
0x27bb   :  { %v2000_v38 = vpop.permute.xlu1 %1999 }
0x27bc   :  { %2006 = vrot.lane.b32.xlu0 %v2004_v36, %s4265_s14  ;;  %v2002_v39 = vsub.f32 %v4621_v42, %v2000_v38 }
0x27be   :  { %v2003_v40 = vmul.f32 156.25, %v2002_v39 }
0x27bf   :  { %v2012_v47 = vpop.permute.xlu1 %2011 }
0x27c0   :  { %2017 = vrot.lane.b32.xlu0 %v2015_v37, %s4264_s13 }
0x27c4   :  { %2027 = vrot.lane.b32.xlu0 %v4624_v44, %s4264_s13 }
0x282e   :  { %v2007_v43 = vpop.permute.xlu0 %2006 }
0x282f   :  { %v2009_v45 = vsub.f32 %v2003_v40, %v2007_v43 }
0x2831   :  { %v2014_v48 = vadd.f32 %v2012_v47, %v2009_v45 }
0x2832   :  { %v2018_v49 = vpop.permute.xlu0 %2017 }
0x2833   :  { %v2021_v52 = vmul.f32 0.01, %v2014_v48  ;;  %v2020_v53 = vadd.f32 %v2018_v49, %v4966_v29 }
0x2835   :  { %2023 = vrot.lane.b32.xlu1 %v2021_v52, %s4267_s6 }
0x2836   :  { %v2028_v54 = vpop.permute.xlu0 %2027 }
0x2837   :  { %v2030_v55 = vmul.f32 %v2028_v54, %v4632_v51 }
0x2839   :  { %2032 = vrot.lane.b32.xlu1 %v2020_v53, %s4263_s12 }
0x283d   :  { %2044 = vrot.lane.b32.xlu1 %v2030_v55, %s5628_s28  ;;  %s4369_s28 = smov 102  }
0x28a7   :  { %v2024_v58 = vpop.permute.xlu1 %2023 }
0x28a8   :  { %v2026_v59 = vadd.f32 %v2024_v58, %v1986_v35 }
0x28aa   :  { %v2037_v60 = vmul.f32 25.0, %v2026_v59  ;;  %v2048_v46 = vmul.f32 0.01, %v2026_v59 }
0x28ab   :  { %v2033_v61 = vpop.permute.xlu1 %2032 }
0x28ac   :  { %2039 = vrot.lane.b32.xlu0 %v2037_v60, %s4265_s14  ;;  %v2035_v62 = vsub.f32 %v4621_v42, %v2033_v61 }
0x28ae   :  { %v2036_v0 = vmul.f32 156.25, %v2035_v62 }
0x28af   :  { %v2045_v3 = vpop.permute.xlu1 %2044 }
0x28b0   :  { %2050 = vrot.lane.b32.xlu0 %v2048_v46, %s4264_s13 }
0x28b4   :  { %2060 = vrot.lane.b32.xlu0 %v4624_v44, %s5629_s5  ;;  %s4370_s5 = smov 26  }
0x291e   :  { %v2040_v1 = vpop.permute.xlu0 %2039 }
0x291f   :  { %v2042_v2 = vsub.f32 %v2036_v0, %v2040_v1 }
0x2921   :  { %v2047_v5 = vadd.f32 %v2045_v3, %v2042_v2 }
0x2922   :  { %v2051_v6 = vpop.permute.xlu0 %2050 }
0x2923   :  { %v2054_v7 = vmul.f32 0.01, %v2047_v5  ;;  %v2053_v41 = vadd.f32 %v2051_v6, %v2020_v53 }
0x2925   :  { %2056 = vrot.lane.b32.xlu1 %v2054_v7, %s4267_s6 }
0x2926   :  { %v2061_v9 = vpop.permute.xlu0 %2060 }
0x2927   :  { %v2063_v10 = vmul.f32 %v2061_v9, %v4632_v51  ;;  %v2064_v15 = vmul.f32 %v2061_v9, %v4636_v56 }
0x2929   :  { %2066 = vrot.lane.b32.xlu1 %v2053_v41, %s4263_s12 }
0x292d   :  { %2079 = vrot.lane.b32.xlu1 %v2063_v10, %s5630_s8 }
0x2997   :  { %v2057_v11 = vpop.permute.xlu1 %2056 }
0x2998   :  { %v2059_v12 = vadd.f32 %v2057_v11, %v2026_v59 }
0x299a   :  { %v2071_v13 = vmul.f32 25.0, %v2059_v12  ;;  %v2087_v14 = vmul.f32 0.01, %v2059_v12 }
0x299b   :  { %v2067_v51 = vpop.permute.xlu1 %2066 }
0x299c   :  { %2089 = vrot.lane.b32.xlu1 %v2087_v14, %s4264_s13  ;;  %2073 = vrot.lane.b32.xlu0 %v2071_v13, %s4265_s14  ;;  %v2069_v16 = vsub.f32 %v4621_v42, %v2067_v51 }
0x299e   :  { %v2070_v8 = vmul.f32 156.25, %v2069_v16 }
0x299f   :  { %v2080_v18 = vpop.permute.xlu1 %2079 }
0x29a0   :  { %2099 = vrot.lane.b32.xlu1 %v4624_v44, %s5631_s3  ;;  %2081 = vrot.lane.b32.xlu0 %v2064_v15, %s5630_s8  ;;  %s4371_s8 = smov 111   ;;  %s4372_s3 = smov 17  }
0x2a0e   :  { %v2074_v17 = vpop.permute.xlu0 %2073  ;;  %v2090_v23 = vpop.permute.xlu1 %2089 }
0x2a0f   :  { %v2076_v19 = vsub.f32 %v2070_v8, %v2074_v17  ;;  %v2092_v25 = vadd.f32 %v2090_v23, %v2053_v41 }
0x2a12   :  { %v2082_v20 = vpop.permute.xlu0 %2081  ;;  %v2100_v26 = vpop.permute.xlu1 %2099 }
0x2a13   :  { %v2084_v21 = vsel %vm2083_vm4, %v2080_v18, %v2082_v20  ;;  %v2102_v27 = vmul.f32 %v2100_v26, %v4636_v56 }
0x2a14   :  { %v2086_v22 = vadd.f32 %v2084_v21, %v2076_v19 }
0x2a16   :  { %v2093_v24 = vmul.f32 0.01, %v2086_v22 }
0x2a18   :  { %2095 = vrot.lane.b32.xlu0 %v2093_v24, %s4267_s6 }
0x2a1c   :  { %2104 = vrot.lane.b32.xlu0 %v2092_v25, %s4263_s12 }
0x2a20   :  { %2116 = vrot.lane.b32.xlu0 %v2102_v27, %s5633_s30  ;;  %s4373_s30 = smov 120  }
0x2a8a   :  { %v2096_v28 = vpop.permute.xlu0 %2095 }
0x2a8b   :  { %v2098_v30 = vadd.f32 %v2096_v28, %v2059_v12 }
0x2a8d   :  { %v2109_v4 = vmul.f32 25.0, %v2098_v30  ;;  %v2120_v33 = vmul.f32 0.01, %v2098_v30 }
0x2a8e   :  { %v2105_v35 = vpop.permute.xlu0 %2104 }
0x2a8f   :  { %2111 = vrot.lane.b32.xlu1 %v2109_v4, %s4265_s14  ;;  %v2107_v36 = vsub.f32 %v4621_v42, %v2105_v35 }
0x2a91   :  { %v2108_v37 = vmul.f32 156.25, %v2107_v36 }
0x2a92   :  { %v2117_v40 = vpop.permute.xlu0 %2116 }
0x2a93   :  { %2122 = vrot.lane.b32.xlu1 %v2120_v33, %s4264_s13 }
0x2a97   :  { %2132 = vrot.lane.b32.xlu1 %v4624_v44, %s5634_s10  ;;  %s4374_s10 = smov 8  }
0x2b01   :  { %v2112_v38 = vpop.permute.xlu1 %2111 }
0x2b02   :  { %v2114_v39 = vsub.f32 %v2108_v37, %v2112_v38 }
0x2b04   :  { %v2119_v43 = vadd.f32 %v2117_v40, %v2114_v39 }
0x2b05   :  { %v2123_v45 = vpop.permute.xlu1 %2122 }
0x2b06   :  { %v2126_v47 = vmul.f32 0.01, %v2119_v43  ;;  %v2125_v48 = vadd.f32 %v2123_v45, %v2092_v25 }
0x2b08   :  { %2128 = vrot.lane.b32.xlu0 %v2126_v47, %s4267_s6 }
0x2b09   :  { %v2133_v49 = vpop.permute.xlu1 %2132 }
0x2b0a   :  { %v2135_v52 = vmul.f32 %v2133_v49, %v4636_v56 }
0x2b0c   :  { %2137 = vrot.lane.b32.xlu0 %v2125_v48, %s4263_s12 }
0x2b10   :  { %2149 = vrot.lane.b32.xlu0 %v2135_v52, %s5635_s2  ;;  %s4375_s2 = smov 1  }
0x2b7a   :  { %v2129_v53 = vpop.permute.xlu0 %2128 }
0x2b7b   :  { %v2131_v54 = vadd.f32 %v2129_v53, %v2098_v30 }
0x2b7d   :  { %v2142_v55 = vmul.f32 25.0, %v2131_v54  ;;  %v2153_v58 = vmul.f32 0.01, %v2131_v54 }
0x2b7e   :  { %v2138_v59 = vpop.permute.xlu0 %2137 }
0x2b7f   :  { %2144 = vrot.lane.b32.xlu1 %v2142_v55, %s4265_s14  ;;  %v2140_v60 = vsub.f32 %v4621_v42, %v2138_v59 }
0x2b81   :  { %v2141_v46 = vmul.f32 156.25, %v2140_v60 }
0x2b82   :  { %v2150_v0 = vpop.permute.xlu0 %2149 }
0x2b83   :  { %2155 = vrot.lane.b32.xlu1 %v2153_v58, %s4264_s13 }
0x2b87   :  { %2165 = vrot.lane.b32.xlu1 %v4624_v44, %s5636_s11  ;;  %s4376_s11 = smov 127  }
0x2bf1   :  { %v2145_v61 = vpop.permute.xlu1 %2144 }
0x2bf2   :  { %v2147_v62 = vsub.f32 %v2141_v46, %v2145_v61 }
0x2bf4   :  { %v2152_v1 = vadd.f32 %v2150_v0, %v2147_v62 }
0x2bf5   :  { %v2156_v2 = vpop.permute.xlu1 %2155 }
0x2bf6   :  { %v2159_v3 = vmul.f32 0.01, %v2152_v1  ;;  %v2158_v5 = vadd.f32 %v2156_v2, %v2125_v48 }
0x2bf8   :  { %2161 = vrot.lane.b32.xlu0 %v2159_v3, %s4267_s6 }
0x2bf9   :  { %v2166_v6 = vpop.permute.xlu1 %2165 }
0x2bfa   :  { %v2168_v7 = vmul.f32 %v2166_v6, %v4636_v56 }
0x2bfc   :  { %2170 = vrot.lane.b32.xlu0 %v2158_v5, %s4263_s12 }
0x2c00   :  { %2182 = vrot.lane.b32.xlu0 %v2168_v7, %s5637_s16  ;;  %s4377_s16 = smov 10  }
0x2c6a   :  { %v2162_v41 = vpop.permute.xlu0 %2161 }
0x2c6b   :  { %v2164_v9 = vadd.f32 %v2162_v41, %v2131_v54 }
0x2c6d   :  { %v2175_v10 = vmul.f32 25.0, %v2164_v9  ;;  %v2186_v11 = vmul.f32 0.01, %v2164_v9 }
0x2c6e   :  { %v2171_v12 = vpop.permute.xlu0 %2170 }
0x2c6f   :  { %2177 = vrot.lane.b32.xlu1 %v2175_v10, %s4265_s14  ;;  %v2173_v13 = vsub.f32 %v4621_v42, %v2171_v12 }
0x2c71   :  { %v2174_v14 = vmul.f32 156.25, %v2173_v13 }
0x2c72   :  { %v2183_v16 = vpop.permute.xlu0 %2182 }
0x2c73   :  { %2188 = vrot.lane.b32.xlu1 %v2186_v11, %s4264_s13 }
0x2c77   :  { %2198 = vrot.lane.b32.xlu1 %v4624_v44, %s5638_s17  ;;  %s4378_s17 = smov 118  }
0x2ce1   :  { %v2178_v15 = vpop.permute.xlu1 %2177 }
0x2ce2   :  { %v2180_v51 = vsub.f32 %v2174_v14, %v2178_v15 }
0x2ce4   :  { %v2185_v17 = vadd.f32 %v2183_v16, %v2180_v51 }
0x2ce5   :  { %v2189_v8 = vpop.permute.xlu1 %2188 }
0x2ce6   :  { %v2192_v18 = vmul.f32 0.01, %v2185_v17  ;;  %v2191_v19 = vadd.f32 %v2189_v8, %v2158_v5 }
0x2ce8   :  { %2194 = vrot.lane.b32.xlu0 %v2192_v18, %s4267_s6 }
0x2ce9   :  { %v2199_v20 = vpop.permute.xlu1 %2198 }
0x2cea   :  { %v2201_v21 = vmul.f32 %v2199_v20, %v4636_v56 }
0x2cec   :  { %2203 = vrot.lane.b32.xlu0 %v2191_v19, %s4263_s12 }
0x2cf0   :  { %2215 = vrot.lane.b32.xlu0 %v2201_v21, %s5639_s18  ;;  %s4379_s18 = smov 19  }
0x2d5a   :  { %v2195_v22 = vpop.permute.xlu0 %2194 }
0x2d5b   :  { %v2197_v23 = vadd.f32 %v2195_v22, %v2164_v9 }
0x2d5d   :  { %v2208_v24 = vmul.f32 25.0, %v2197_v23  ;;  %v2219_v25 = vmul.f32 0.01, %v2197_v23 }
0x2d5e   :  { %v2204_v26 = vpop.permute.xlu0 %2203 }
0x2d5f   :  { %2210 = vrot.lane.b32.xlu1 %v2208_v24, %s4265_s14  ;;  %v2206_v27 = vsub.f32 %v4621_v42, %v2204_v26 }
0x2d61   :  { %v2207_v28 = vmul.f32 156.25, %v2206_v27 }
0x2d62   :  { %v2216_v33 = vpop.permute.xlu0 %2215 }
0x2d63   :  { %2221 = vrot.lane.b32.xlu1 %v2219_v25, %s4264_s13 }
0x2d67   :  { %2231 = vrot.lane.b32.xlu1 %v4624_v44, %s5640_s1  ;;  %s4380_s1 = smov 109  }
0x2dd1   :  { %v2211_v30 = vpop.permute.xlu1 %2210 }
0x2dd2   :  { %v2213_v4 = vsub.f32 %v2207_v28, %v2211_v30 }
0x2dd4   :  { %v2218_v35 = vadd.f32 %v2216_v33, %v2213_v4 }
0x2dd5   :  { %v2222_v36 = vpop.permute.xlu1 %2221 }
0x2dd6   :  { %v2225_v37 = vmul.f32 0.01, %v2218_v35  ;;  %v2224_v38 = vadd.f32 %v2222_v36, %v2191_v19 }
0x2dd8   :  { %2227 = vrot.lane.b32.xlu0 %v2225_v37, %s4267_s6 }
0x2dd9   :  { %v2232_v39 = vpop.permute.xlu1 %2231 }
0x2dda   :  { %v2234_v40 = vmul.f32 %v2232_v39, %v4636_v56 }
0x2ddc   :  { %2236 = vrot.lane.b32.xlu0 %v2224_v38, %s4263_s12 }
0x2de0   :  { %2248 = vrot.lane.b32.xlu0 %v2234_v40, %s5641_s19  ;;  %s4381_s19 = smov 28  }
0x2e4a   :  { %v2228_v43 = vpop.permute.xlu0 %2227 }
0x2e4b   :  { %v2230_v45 = vadd.f32 %v2228_v43, %v2197_v23 }
0x2e4d   :  { %v2241_v47 = vmul.f32 25.0, %v2230_v45  ;;  %v2252_v48 = vmul.f32 0.01, %v2230_v45 }
0x2e4e   :  { %v2237_v49 = vpop.permute.xlu0 %2236 }
0x2e4f   :  { %2243 = vrot.lane.b32.xlu1 %v2241_v47, %s4265_s14  ;;  %v2239_v52 = vsub.f32 %v4621_v42, %v2237_v49 }
0x2e51   :  { %v2240_v53 = vmul.f32 156.25, %v2239_v52 }
0x2e52   :  { %v2249_v58 = vpop.permute.xlu0 %2248 }
0x2e53   :  { %2254 = vrot.lane.b32.xlu1 %v2252_v48, %s4264_s13 }
0x2e57   :  { %2264 = vrot.lane.b32.xlu1 %v4624_v44, %s5642_s20  ;;  %s4382_s20 = smov 100  }
0x2ec1   :  { %v2244_v54 = vpop.permute.xlu1 %2243 }
0x2ec2   :  { %v2246_v55 = vsub.f32 %v2240_v53, %v2244_v54 }
0x2ec4   :  { %v2251_v59 = vadd.f32 %v2249_v58, %v2246_v55 }
0x2ec5   :  { %v2255_v60 = vpop.permute.xlu1 %2254 }
0x2ec6   :  { %v2258_v46 = vmul.f32 0.01, %v2251_v59  ;;  %v2257_v61 = vadd.f32 %v2255_v60, %v2224_v38 }
0x2ec8   :  { %2260 = vrot.lane.b32.xlu0 %v2258_v46, %s4267_s6 }
0x2ec9   :  { %v2265_v62 = vpop.permute.xlu1 %2264 }
0x2eca   :  { %v2267_v0 = vmul.f32 %v2265_v62, %v4636_v56 }
0x2ecc   :  { %2269 = vrot.lane.b32.xlu0 %v2257_v61, %s4263_s12 }
0x2ed0   :  { %2281 = vrot.lane.b32.xlu0 %v2267_v0, %s5643_s21  ;;  %s4383_s21 = smov 37  }
0x2f3a   :  { %v2261_v1 = vpop.permute.xlu0 %2260 }
0x2f3b   :  { %v2263_v2 = vadd.f32 %v2261_v1, %v2230_v45 }
0x2f3d   :  { %v2274_v3 = vmul.f32 25.0, %v2263_v2  ;;  %v2285_v5 = vmul.f32 0.01, %v2263_v2 }
0x2f3e   :  { %v2270_v6 = vpop.permute.xlu0 %2269 }
0x2f3f   :  { %2276 = vrot.lane.b32.xlu1 %v2274_v3, %s4265_s14  ;;  %v2272_v7 = vsub.f32 %v4621_v42, %v2270_v6 }
0x2f41   :  { %v2273_v41 = vmul.f32 156.25, %v2272_v7 }
0x2f42   :  { %v2282_v11 = vpop.permute.xlu0 %2281 }
0x2f43   :  { %2287 = vrot.lane.b32.xlu1 %v2285_v5, %s4264_s13 }
0x2f47   :  { %2297 = vrot.lane.b32.xlu1 %v4624_v44, %s5644_s22  ;;  %s4384_s22 = smov 91  }
0x2fb1   :  { %v2277_v9 = vpop.permute.xlu1 %2276 }
0x2fb2   :  { %v2279_v10 = vsub.f32 %v2273_v41, %v2277_v9 }
0x2fb4   :  { %v2284_v12 = vadd.f32 %v2282_v11, %v2279_v10 }
0x2fb5   :  { %v2288_v13 = vpop.permute.xlu1 %2287 }
0x2fb6   :  { %v2291_v14 = vmul.f32 0.01, %v2284_v12  ;;  %v2290_v15 = vadd.f32 %v2288_v13, %v2257_v61 }
0x2fb8   :  { %2293 = vrot.lane.b32.xlu0 %v2291_v14, %s4267_s6 }
0x2fb9   :  { %v2298_v51 = vpop.permute.xlu1 %2297 }
0x2fba   :  { %v2300_v16 = vmul.f32 %v2298_v51, %v4636_v56 }
0x2fbc   :  { %2302 = vrot.lane.b32.xlu0 %v2290_v15, %s4263_s12 }
0x2fc0   :  { %2314 = vrot.lane.b32.xlu0 %v2300_v16, %s5645_s4  ;;  %s4385_s4 = smov 46  }
0x302a   :  { %v2294_v17 = vpop.permute.xlu0 %2293 }
0x302b   :  { %v2296_v8 = vadd.f32 %v2294_v17, %v2263_v2 }
0x302d   :  { %v2307_v18 = vmul.f32 25.0, %v2296_v8  ;;  %v2318_v19 = vmul.f32 0.01, %v2296_v8 }
0x302e   :  { %v2303_v20 = vpop.permute.xlu0 %2302 }
0x302f   :  { %2309 = vrot.lane.b32.xlu1 %v2307_v18, %s4265_s14  ;;  %v2305_v21 = vsub.f32 %v4621_v42, %v2303_v20 }
0x3031   :  { %v2306_v22 = vmul.f32 156.25, %v2305_v21 }
0x3032   :  { %v2315_v25 = vpop.permute.xlu0 %2314 }
0x3033   :  { %2320 = vrot.lane.b32.xlu1 %v2318_v19, %s4264_s13 }
0x3037   :  { %2337 = vrot.lane.b32.xlu1 %v4624_v44, %s5646_s25  ;;  %s4386_s25 = smov 82  }
0x30a1   :  { %v2310_v23 = vpop.permute.xlu1 %2309 }
0x30a2   :  { %v2312_v24 = vsub.f32 %v2306_v22, %v2310_v23 }
0x30a4   :  { %v2317_v26 = vadd.f32 %v2315_v25, %v2312_v24 }
0x30a5   :  { %v2321_v27 = vpop.permute.xlu1 %2320 }
0x30a6   :  { %v2324_v28 = vmul.f32 0.01, %v2317_v26  ;;  %v5062_v30 = vadd.f32 %v2321_v27, %v2290_v15 }
0x30a8   :  { %2326 = vrot.lane.b32.xlu0 %v2324_v28, %s4267_s6 }
0x30a9   :  { %v2338_v4 = vpop.permute.xlu1 %2337 }
0x30aa   :  { %v2340_v33 = vmul.f32 %v2338_v4, %v4636_v56 }
0x30ac   :  { %2342 = vrot.lane.b32.xlu0 %v5062_v30, %s4263_s12 }
0x30b0   :  { %2354 = vrot.lane.b32.xlu0 %v2340_v33, %s5647_s27  ;;  %s4387_s27 = smov 55  }
0x311a   :  { %v2327_v35 = vpop.permute.xlu0 %2326 }
0x311b   :  { %v2329_v36 = vadd.f32 %v2327_v35, %v2296_v8 }
0x311d   :  { %v2347_v37 = vmul.f32 25.0, %v2329_v36  ;;  %v2358_v38 = vmul.f32 0.01, %v2329_v36 }
0x311e   :  { %v2343_v39 = vpop.permute.xlu0 %2342 }
0x311f   :  { %2349 = vrot.lane.b32.xlu1 %v2347_v37, %s4265_s14  ;;  %v2345_v40 = vsub.f32 %v4621_v42, %v2343_v39 }
0x3121   :  { %v2346_v43 = vmul.f32 156.25, %v2345_v40 }
0x3122   :  { %v2355_v48 = vpop.permute.xlu0 %2354 }
0x3123   :  { %2360 = vrot.lane.b32.xlu1 %v2358_v38, %s4264_s13 }
0x3127   :  { %2370 = vrot.lane.b32.xlu1 %v4624_v44, %s5648_s23  ;;  %s4388_s23 = smov 73  }
0x3191   :  { %v2350_v45 = vpop.permute.xlu1 %2349 }
0x3192   :  { %v2352_v47 = vsub.f32 %v2346_v43, %v2350_v45 }
0x3194   :  { %v2357_v49 = vadd.f32 %v2355_v48, %v2352_v47 }
0x3195   :  { %v2361_v52 = vpop.permute.xlu1 %2360 }
0x3196   :  { %v2364_v53 = vmul.f32 0.01, %v2357_v49  ;;  %v2363_v54 = vadd.f32 %v2361_v52, %v5062_v30 }
0x3198   :  { %2366 = vrot.lane.b32.xlu0 %v2364_v53, %s4267_s6 }
0x3199   :  { %v2371_v55 = vpop.permute.xlu1 %2370 }
0x319a   :  { %v2373_v58 = vmul.f32 %v2371_v55, %v4636_v56 }
0x319c   :  { %2375 = vrot.lane.b32.xlu0 %v2363_v54, %s4263_s12 }
0x31a0   :  { %2387 = vrot.lane.b32.xlu0 %v2373_v58, %s5649_s26  ;;  %s4389_s26 = smov 64  }
0x320a   :  { %v2367_v59 = vpop.permute.xlu0 %2366 }
0x320b   :  { %v2369_v60 = vadd.f32 %v2367_v59, %v2329_v36 }
0x320d   :  { %v2380_v46 = vmul.f32 25.0, %v2369_v60  ;;  %v2391_v61 = vmul.f32 0.01, %v2369_v60 }
0x320e   :  { %v2376_v62 = vpop.permute.xlu0 %2375 }
0x320f   :  { %2382 = vrot.lane.b32.xlu1 %v2380_v46, %s4265_s14  ;;  %v2378_v0 = vsub.f32 %v4621_v42, %v2376_v62 }
0x3211   :  { %v2379_v1 = vmul.f32 156.25, %v2378_v0 }
0x3212   :  { %v2388_v5 = vpop.permute.xlu0 %2387 }
0x3213   :  { %2393 = vrot.lane.b32.xlu1 %v2391_v61, %s4264_s13 }
0x3217   :  { %2403 = vrot.lane.b32.xlu1 %v4624_v44, %s4365_s29 }
0x3281   :  { %v2383_v2 = vpop.permute.xlu1 %2382 }
0x3282   :  { %v2385_v3 = vsub.f32 %v2379_v1, %v2383_v2 }
0x3284   :  { %v2390_v6 = vadd.f32 %v2388_v5, %v2385_v3 }
0x3285   :  { %v2394_v7 = vpop.permute.xlu1 %2393 }
0x3286   :  { %v2397_v41 = vmul.f32 0.01, %v2390_v6  ;;  %v2396_v9 = vadd.f32 %v2394_v7, %v2363_v54 }
0x3288   :  { %2399 = vrot.lane.b32.xlu0 %v2397_v41, %s4267_s6 }
0x3289   :  { %v2404_v10 = vpop.permute.xlu1 %2403 }
0x328a   :  { %v2406_v11 = vmul.f32 %v2404_v10, %v4636_v56 }
0x328c   :  { %2408 = vrot.lane.b32.xlu0 %v2396_v9, %s4263_s12 }
0x3290   :  { %2420 = vrot.lane.b32.xlu0 %v2406_v11, %s4366_s7 }
0x32fa   :  { %v2400_v12 = vpop.permute.xlu0 %2399 }
0x32fb   :  { %v2402_v13 = vadd.f32 %v2400_v12, %v2369_v60 }
0x32fd   :  { %v2413_v14 = vmul.f32 25.0, %v2402_v13  ;;  %v2424_v15 = vmul.f32 0.01, %v2402_v13 }
0x32fe   :  { %v2409_v51 = vpop.permute.xlu0 %2408 }
0x32ff   :  { %2415 = vrot.lane.b32.xlu1 %v2413_v14, %s4265_s14  ;;  %v2411_v16 = vsub.f32 %v4621_v42, %v2409_v51 }
0x3301   :  { %v2412_v17 = vmul.f32 156.25, %v2411_v16 }
0x3302   :  { %v2421_v19 = vpop.permute.xlu0 %2420 }
0x3303   :  { %2426 = vrot.lane.b32.xlu1 %v2424_v15, %s4264_s13 }
0x3307   :  { %2436 = vrot.lane.b32.xlu1 %v4624_v44, %s4367_s15 }
0x3371   :  { %v2416_v8 = vpop.permute.xlu1 %2415 }
0x3372   :  { %v2418_v18 = vsub.f32 %v2412_v17, %v2416_v8 }
0x3374   :  { %v2423_v20 = vadd.f32 %v2421_v19, %v2418_v18 }
0x3375   :  { %v2427_v21 = vpop.permute.xlu1 %2426 }
0x3376   :  { %v2430_v22 = vmul.f32 0.01, %v2423_v20  ;;  %v2429_v23 = vadd.f32 %v2427_v21, %v2396_v9 }
0x3378   :  { %2432 = vrot.lane.b32.xlu0 %v2430_v22, %s4267_s6 }
0x3379   :  { %v2437_v24 = vpop.permute.xlu1 %2436 }
0x337a   :  { %v2439_v25 = vmul.f32 %v2437_v24, %v4636_v56 }
0x337c   :  { %2441 = vrot.lane.b32.xlu0 %v2429_v23, %s4263_s12 }
0x3380   :  { %2453 = vrot.lane.b32.xlu0 %v2439_v25, %s4368_s24 }
0x33ea   :  { %v2433_v26 = vpop.permute.xlu0 %2432 }
0x33eb   :  { %v2435_v27 = vadd.f32 %v2433_v26, %v2402_v13 }
0x33ed   :  { %v2446_v28 = vmul.f32 25.0, %v2435_v27  ;;  %v2457_v4 = vmul.f32 0.01, %v2435_v27 }
0x33ee   :  { %v2442_v33 = vpop.permute.xlu0 %2441 }
0x33ef   :  { %2448 = vrot.lane.b32.xlu1 %v2446_v28, %s4265_s14  ;;  %v2444_v35 = vsub.f32 %v4621_v42, %v2442_v33 }
0x33f1   :  { %v2445_v36 = vmul.f32 156.25, %v2444_v35 }
0x33f2   :  { %v2454_v39 = vpop.permute.xlu0 %2453 }
0x33f3   :  { %2459 = vrot.lane.b32.xlu1 %v2457_v4, %s4264_s13 }
0x33f7   :  { %2469 = vrot.lane.b32.xlu1 %v4624_v44, %s4369_s28 }
0x3461   :  { %v2449_v37 = vpop.permute.xlu1 %2448 }
0x3462   :  { %v2451_v38 = vsub.f32 %v2445_v36, %v2449_v37 }
0x3464   :  { %v2456_v40 = vadd.f32 %v2454_v39, %v2451_v38 }
0x3465   :  { %v2460_v43 = vpop.permute.xlu1 %2459 }
0x3466   :  { %v2463_v45 = vmul.f32 0.01, %v2456_v40  ;;  %v2462_v47 = vadd.f32 %v2460_v43, %v2429_v23 }
0x3468   :  { %2465 = vrot.lane.b32.xlu0 %v2463_v45, %s4267_s6 }
0x3469   :  { %v2470_v48 = vpop.permute.xlu1 %2469 }
0x346a   :  { %v2472_v49 = vmul.f32 %v2470_v48, %v4636_v56 }
0x346c   :  { %2474 = vrot.lane.b32.xlu0 %v2462_v47, %s4263_s12 }
0x3470   :  { %2486 = vrot.lane.b32.xlu0 %v2472_v49, %s4370_s5 }
0x34da   :  { %v2466_v52 = vpop.permute.xlu0 %2465 }
0x34db   :  { %v2468_v53 = vadd.f32 %v2466_v52, %v2435_v27 }
0x34dd   :  { %v2479_v54 = vmul.f32 25.0, %v2468_v53  ;;  %v2490_v55 = vmul.f32 0.01, %v2468_v53 }
0x34de   :  { %v2475_v58 = vpop.permute.xlu0 %2474 }
0x34df   :  { %2481 = vrot.lane.b32.xlu1 %v2479_v54, %s4265_s14  ;;  %v2477_v59 = vsub.f32 %v4621_v42, %v2475_v58 }
0x34e1   :  { %v2478_v60 = vmul.f32 156.25, %v2477_v59 }
0x34e2   :  { %v2487_v62 = vpop.permute.xlu0 %2486 }
0x34e3   :  { %2492 = vrot.lane.b32.xlu1 %v2490_v55, %s4264_s13 }
0x34e7   :  { %2502 = vrot.lane.b32.xlu1 %v4624_v44, %s4371_s8 }
0x3551   :  { %v2482_v46 = vpop.permute.xlu1 %2481 }
0x3552   :  { %v2484_v61 = vsub.f32 %v2478_v60, %v2482_v46 }
0x3554   :  { %v2489_v0 = vadd.f32 %v2487_v62, %v2484_v61 }
0x3555   :  { %v2493_v1 = vpop.permute.xlu1 %2492 }
0x3556   :  { %v2496_v2 = vmul.f32 0.01, %v2489_v0  ;;  %v2495_v3 = vadd.f32 %v2493_v1, %v2462_v47 }
0x3558   :  { %2498 = vrot.lane.b32.xlu0 %v2496_v2, %s4267_s6 }
0x3559   :  { %v2503_v5 = vpop.permute.xlu1 %2502 }
0x355a   :  { %v2505_v6 = vmul.f32 %v2503_v5, %v4636_v56 }
0x355c   :  { %2507 = vrot.lane.b32.xlu0 %v2495_v3, %s4263_s12 }
0x3560   :  { %2519 = vrot.lane.b32.xlu0 %v2505_v6, %s4372_s3 }
0x35ca   :  { %v2499_v7 = vpop.permute.xlu0 %2498 }
0x35cb   :  { %v2501_v41 = vadd.f32 %v2499_v7, %v2468_v53 }
0x35cd   :  { %v2512_v9 = vmul.f32 25.0, %v2501_v41  ;;  %v2523_v10 = vmul.f32 0.01, %v2501_v41 }
0x35ce   :  { %v2508_v11 = vpop.permute.xlu0 %2507 }
0x35cf   :  { %2514 = vrot.lane.b32.xlu1 %v2512_v9, %s4265_s14  ;;  %v2510_v12 = vsub.f32 %v4621_v42, %v2508_v11 }
0x35d1   :  { %v2511_v13 = vmul.f32 156.25, %v2510_v12 }
0x35d2   :  { %v2520_v51 = vpop.permute.xlu0 %2519 }
0x35d3   :  { %2525 = vrot.lane.b32.xlu1 %v2523_v10, %s4264_s13 }
0x35d7   :  { %2535 = vrot.lane.b32.xlu1 %v4624_v44, %s4373_s30 }
0x3641   :  { %v2515_v14 = vpop.permute.xlu1 %2514 }
0x3642   :  { %v2517_v15 = vsub.f32 %v2511_v13, %v2515_v14 }
0x3644   :  { %v2522_v16 = vadd.f32 %v2520_v51, %v2517_v15 }
0x3645   :  { %v2526_v17 = vpop.permute.xlu1 %2525 }
0x3646   :  { %v2529_v8 = vmul.f32 0.01, %v2522_v16  ;;  %v2528_v18 = vadd.f32 %v2526_v17, %v2495_v3 }
0x3648   :  { %2531 = vrot.lane.b32.xlu0 %v2529_v8, %s4267_s6 }
0x3649   :  { %v2536_v19 = vpop.permute.xlu1 %2535 }
0x364a   :  { %v2538_v20 = vmul.f32 %v2536_v19, %v4636_v56  ;;  %v2539_v25 = vmul.f32 %v2536_v19, %v4630_v50 }
0x364c   :  { %2541 = vrot.lane.b32.xlu0 %v2528_v18, %s4263_s12 }
0x3650   :  { %2554 = vrot.lane.b32.xlu0 %v2538_v20, %s4374_s10 }
0x36ba   :  { %v2532_v21 = vpop.permute.xlu0 %2531 }
0x36bb   :  { %v2534_v22 = vadd.f32 %v2532_v21, %v2501_v41 }
0x36bd   :  { %v2546_v23 = vmul.f32 25.0, %v2534_v22  ;;  %v2562_v24 = vmul.f32 0.01, %v2534_v22 }
0x36be   :  { %v2542_v56 = vpop.permute.xlu0 %2541 }
0x36bf   :  { %2548 = vrot.lane.b32.xlu1 %v2546_v23, %s4265_s14  ;;  %2564 = vrot.lane.b32.xlu0 %v2562_v24, %s4264_s13  ;;  %v2544_v26 = vsub.f32 %v4621_v42, %v2542_v56 }
0x36c1   :  { %v2545_v28 = vmul.f32 156.25, %v2544_v26 }
0x36c2   :  { %v2555_v4 = vpop.permute.xlu0 %2554 }
0x36c3   :  { %2556 = vrot.lane.b32.xlu1 %v2539_v25, %s4374_s10  ;;  %2574 = vrot.lane.b32.xlu0 %v4624_v44, %s4375_s2 }
0x3731   :  { %v2549_v27 = vpop.permute.xlu1 %2548  ;;  %v2565_v38 = vpop.permute.xlu0 %2564 }
0x3732   :  { %v2551_v33 = vsub.f32 %v2545_v28, %v2549_v27  ;;  %v2567_v40 = vadd.f32 %v2565_v38, %v2528_v18 }
0x3735   :  { %v2557_v35 = vpop.permute.xlu1 %2556  ;;  %v2575_v43 = vpop.permute.xlu0 %2574 }
0x3736   :  { %v2559_v36 = vsel %vm2558_vm5, %v2555_v4, %v2557_v35  ;;  %v2577_v45 = vmul.f32 %v2575_v43, %v4630_v50 }
0x3737   :  { %v2561_v37 = vadd.f32 %v2559_v36, %v2551_v33 }
0x3739   :  { %v2568_v39 = vmul.f32 0.01, %v2561_v37 }
0x373b   :  { %2570 = vrot.lane.b32.xlu1 %v2568_v39, %s4267_s6 }
0x373f   :  { %2579 = vrot.lane.b32.xlu1 %v2567_v40, %s4263_s12 }
0x3743   :  { %2591 = vrot.lane.b32.xlu1 %v2577_v45, %s4376_s11 }
0x37ad   :  { %v2571_v47 = vpop.permute.xlu1 %2570 }
0x37ae   :  { %v2573_v48 = vadd.f32 %v2571_v47, %v2534_v22 }
0x37b0   :  { %v2584_v49 = vmul.f32 25.0, %v2573_v48  ;;  %v2595_v52 = vmul.f32 0.01, %v2573_v48 }
0x37b1   :  { %v2580_v53 = vpop.permute.xlu1 %2579 }
0x37b2   :  { %2586 = vrot.lane.b32.xlu0 %v2584_v49, %s4265_s14  ;;  %v2582_v54 = vsub.f32 %v4621_v42, %v2580_v53 }
0x37b4   :  { %v2583_v55 = vmul.f32 156.25, %v2582_v54 }
0x37b5   :  { %v2592_v60 = vpop.permute.xlu1 %2591 }
0x37b6   :  { %2597 = vrot.lane.b32.xlu0 %v2595_v52, %s4264_s13 }
0x37ba   :  { %2607 = vrot.lane.b32.xlu0 %v4624_v44, %s4377_s16 }
0x3824   :  { %v2587_v58 = vpop.permute.xlu0 %2586 }
0x3825   :  { %v2589_v59 = vsub.f32 %v2583_v55, %v2587_v58 }
0x3827   :  { %v2594_v46 = vadd.f32 %v2592_v60, %v2589_v59 }
0x3828   :  { %v2598_v61 = vpop.permute.xlu0 %2597 }
0x3829   :  { %v2601_v62 = vmul.f32 0.01, %v2594_v46  ;;  %v2600_v0 = vadd.f32 %v2598_v61, %v2567_v40 }
0x382b   :  { %2603 = vrot.lane.b32.xlu1 %v2601_v62, %s4267_s6 }
0x382c   :  { %v2608_v1 = vpop.permute.xlu0 %2607 }
0x382d   :  { %v2610_v2 = vmul.f32 %v2608_v1, %v4630_v50 }
0x382f   :  { %2612 = vrot.lane.b32.xlu1 %v2600_v0, %s4263_s12 }
0x3833   :  { %2624 = vrot.lane.b32.xlu1 %v2610_v2, %s4378_s17 }
0x389d   :  { %v2604_v3 = vpop.permute.xlu1 %2603 }
0x389e   :  { %v2606_v5 = vadd.f32 %v2604_v3, %v2573_v48 }
0x38a0   :  { %v2617_v6 = vmul.f32 25.0, %v2606_v5  ;;  %v2628_v7 = vmul.f32 0.01, %v2606_v5 }
0x38a1   :  { %v2613_v41 = vpop.permute.xlu1 %2612 }
0x38a2   :  { %2619 = vrot.lane.b32.xlu0 %v2617_v6, %s4265_s14  ;;  %v2615_v9 = vsub.f32 %v4621_v42, %v2613_v41 }
0x38a4   :  { %v2616_v10 = vmul.f32 156.25, %v2615_v9 }
0x38a5   :  { %v2625_v13 = vpop.permute.xlu1 %2624 }
0x38a6   :  { %2630 = vrot.lane.b32.xlu0 %v2628_v7, %s4264_s13 }
0x38aa   :  { %2640 = vrot.lane.b32.xlu0 %v4624_v44, %s4379_s18 }
0x3914   :  { %v2620_v11 = vpop.permute.xlu0 %2619 }
0x3915   :  { %v2622_v12 = vsub.f32 %v2616_v10, %v2620_v11 }
0x3917   :  { %v2627_v14 = vadd.f32 %v2625_v13, %v2622_v12 }
0x3918   :  { %v2631_v15 = vpop.permute.xlu0 %2630 }
0x3919   :  { %v2634_v51 = vmul.f32 0.01, %v2627_v14  ;;  %v2633_v16 = vadd.f32 %v2631_v15, %v2600_v0 }
0x391b   :  { %2636 = vrot.lane.b32.xlu1 %v2634_v51, %s4267_s6 }
0x391c   :  { %v2641_v17 = vpop.permute.xlu0 %2640 }
0x391d   :  { %v2643_v8 = vmul.f32 %v2641_v17, %v4630_v50 }
0x391f   :  { %2645 = vrot.lane.b32.xlu1 %v2633_v16, %s4263_s12 }
0x3923   :  { %2657 = vrot.lane.b32.xlu1 %v2643_v8, %s4380_s1 }
0x398d   :  { %v2637_v18 = vpop.permute.xlu1 %2636 }
0x398e   :  { %v2639_v19 = vadd.f32 %v2637_v18, %v2606_v5 }
0x3990   :  { %v2650_v20 = vmul.f32 25.0, %v2639_v19  ;;  %v2661_v21 = vmul.f32 0.01, %v2639_v19 }
0x3991   :  { %v2646_v22 = vpop.permute.xlu1 %2645 }
0x3992   :  { %2652 = vrot.lane.b32.xlu0 %v2650_v20, %s4265_s14  ;;  %v2648_v23 = vsub.f32 %v4621_v42, %v2646_v22 }
0x3994   :  { %v2649_v24 = vmul.f32 156.25, %v2648_v23 }
0x3995   :  { %v2658_v26 = vpop.permute.xlu1 %2657 }
0x3996   :  { %2663 = vrot.lane.b32.xlu0 %v2661_v21, %s4264_s13 }
0x399a   :  { %2680 = vrot.lane.b32.xlu0 %v4624_v44, %s4381_s19 }
0x3a04   :  { %v2653_v25 = vpop.permute.xlu0 %2652 }
0x3a05   :  { %v2655_v56 = vsub.f32 %v2649_v24, %v2653_v25 }
0x3a07   :  { %v2660_v27 = vadd.f32 %v2658_v26, %v2655_v56 }
0x3a08   :  { %v2664_v28 = vpop.permute.xlu0 %2663 }
0x3a09   :  { %v2667_v4 = vmul.f32 0.01, %v2660_v27  ;;  %v5158_v33 = vadd.f32 %v2664_v28, %v2633_v16 }
0x3a0b   :  { %2669 = vrot.lane.b32.xlu1 %v2667_v4, %s4267_s6 }
0x3a0c   :  { %v2681_v35 = vpop.permute.xlu0 %2680 }
0x3a0d   :  { %v2683_v36 = vmul.f32 %v2681_v35, %v4630_v50 }
0x3a0f   :  { %2685 = vrot.lane.b32.xlu1 %v5158_v33, %s4263_s12 }
0x3a13   :  { %2697 = vrot.lane.b32.xlu1 %v2683_v36, %s4382_s20 }
0x3a7d   :  { %v2670_v37 = vpop.permute.xlu1 %2669 }
0x3a7e   :  { %v2672_v38 = vadd.f32 %v2670_v37, %v2639_v19 }
0x3a80   :  { %v2690_v39 = vmul.f32 25.0, %v2672_v38  ;;  %v2701_v40 = vmul.f32 0.01, %v2672_v38 }
0x3a81   :  { %v2686_v43 = vpop.permute.xlu1 %2685 }
0x3a82   :  { %2692 = vrot.lane.b32.xlu0 %v2690_v39, %s4265_s14  ;;  %v2688_v45 = vsub.f32 %v4621_v42, %v2686_v43 }
0x3a84   :  { %v2689_v47 = vmul.f32 156.25, %v2688_v45 }
0x3a85   :  { %v2698_v52 = vpop.permute.xlu1 %2697 }
0x3a86   :  { %2703 = vrot.lane.b32.xlu0 %v2701_v40, %s4264_s13 }
0x3a8a   :  { %2713 = vrot.lane.b32.xlu0 %v4624_v44, %s4383_s21 }
0x3af4   :  { %v2693_v48 = vpop.permute.xlu0 %2692 }
0x3af5   :  { %v2695_v49 = vsub.f32 %v2689_v47, %v2693_v48 }
0x3af7   :  { %v2700_v53 = vadd.f32 %v2698_v52, %v2695_v49 }
0x3af8   :  { %v2704_v54 = vpop.permute.xlu0 %2703 }
0x3af9   :  { %v2707_v55 = vmul.f32 0.01, %v2700_v53  ;;  %v2706_v58 = vadd.f32 %v2704_v54, %v5158_v33 }
0x3afb   :  { %2709 = vrot.lane.b32.xlu1 %v2707_v55, %s4267_s6 }
0x3afc   :  { %v2714_v59 = vpop.permute.xlu0 %2713 }
0x3afd   :  { %v2716_v60 = vmul.f32 %v2714_v59, %v4630_v50 }
0x3aff   :  { %2718 = vrot.lane.b32.xlu1 %v2706_v58, %s4263_s12 }
0x3b03   :  { %2730 = vrot.lane.b32.xlu1 %v2716_v60, %s4384_s22 }
0x3b6d   :  { %v2710_v46 = vpop.permute.xlu1 %2709 }
0x3b6e   :  { %v2712_v61 = vadd.f32 %v2710_v46, %v2672_v38 }
0x3b70   :  { %v2723_v62 = vmul.f32 25.0, %v2712_v61  ;;  %v2734_v0 = vmul.f32 0.01, %v2712_v61 }
0x3b71   :  { %v2719_v1 = vpop.permute.xlu1 %2718 }
0x3b72   :  { %2725 = vrot.lane.b32.xlu0 %v2723_v62, %s4265_s14  ;;  %v2721_v2 = vsub.f32 %v4621_v42, %v2719_v1 }
0x3b74   :  { %v2722_v3 = vmul.f32 156.25, %v2721_v2 }
0x3b75   :  { %v2731_v7 = vpop.permute.xlu1 %2730 }
0x3b76   :  { %2736 = vrot.lane.b32.xlu0 %v2734_v0, %s4264_s13 }
0x3b7a   :  { %2746 = vrot.lane.b32.xlu0 %v4624_v44, %s4385_s4 }
0x3be4   :  { %v2726_v5 = vpop.permute.xlu0 %2725 }
0x3be5   :  { %v2728_v6 = vsub.f32 %v2722_v3, %v2726_v5 }
0x3be7   :  { %v2733_v41 = vadd.f32 %v2731_v7, %v2728_v6 }
0x3be8   :  { %v2737_v9 = vpop.permute.xlu0 %2736 }
0x3be9   :  { %v2740_v10 = vmul.f32 0.01, %v2733_v41  ;;  %v2739_v11 = vadd.f32 %v2737_v9, %v2706_v58 }
0x3beb   :  { %2742 = vrot.lane.b32.xlu1 %v2740_v10, %s4267_s6 }
0x3bec   :  { %v2747_v12 = vpop.permute.xlu0 %2746 }
0x3bed   :  { %v2749_v13 = vmul.f32 %v2747_v12, %v4630_v50 }
0x3bef   :  { %2751 = vrot.lane.b32.xlu1 %v2739_v11, %s4263_s12 }
0x3bf3   :  { %2763 = vrot.lane.b32.xlu1 %v2749_v13, %s4386_s25 }
0x3c5d   :  { %v2743_v14 = vpop.permute.xlu1 %2742 }
0x3c5e   :  { %v2745_v15 = vadd.f32 %v2743_v14, %v2712_v61 }
0x3c60   :  { %v2756_v51 = vmul.f32 25.0, %v2745_v15  ;;  %v2767_v16 = vmul.f32 0.01, %v2745_v15 }
0x3c61   :  { %v2752_v17 = vpop.permute.xlu1 %2751 }
0x3c62   :  { %2758 = vrot.lane.b32.xlu0 %v2756_v51, %s4265_s14  ;;  %v2754_v8 = vsub.f32 %v4621_v42, %v2752_v17 }
0x3c64   :  { %v2755_v18 = vmul.f32 156.25, %v2754_v8 }
0x3c65   :  { %v2764_v21 = vpop.permute.xlu1 %2763 }
0x3c66   :  { %2769 = vrot.lane.b32.xlu0 %v2767_v16, %s4264_s13 }
0x3c6a   :  { %2779 = vrot.lane.b32.xlu0 %v4624_v44, %s4387_s27 }
0x3cd4   :  { %v2759_v19 = vpop.permute.xlu0 %2758 }
0x3cd5   :  { %v2761_v20 = vsub.f32 %v2755_v18, %v2759_v19 }
0x3cd7   :  { %v2766_v22 = vadd.f32 %v2764_v21, %v2761_v20 }
0x3cd8   :  { %v2770_v23 = vpop.permute.xlu0 %2769 }
0x3cd9   :  { %v2773_v24 = vmul.f32 0.01, %v2766_v22  ;;  %v2772_v25 = vadd.f32 %v2770_v23, %v2739_v11 }
0x3cdb   :  { %2775 = vrot.lane.b32.xlu1 %v2773_v24, %s4267_s6 }
0x3cdc   :  { %v2780_v56 = vpop.permute.xlu0 %2779 }
0x3cdd   :  { %v2782_v26 = vmul.f32 %v2780_v56, %v4630_v50 }
0x3cdf   :  { %2784 = vrot.lane.b32.xlu1 %v2772_v25, %s4263_s12 }
0x3ce3   :  { %2796 = vrot.lane.b32.xlu1 %v2782_v26, %s4388_s23 }
0x3d4d   :  { %v2776_v27 = vpop.permute.xlu1 %2775 }
0x3d4e   :  { %v2778_v28 = vadd.f32 %v2776_v27, %v2745_v15 }
0x3d50   :  { %v2789_v4 = vmul.f32 25.0, %v2778_v28  ;;  %v2800_v35 = vmul.f32 0.01, %v2778_v28 }
0x3d51   :  { %v2785_v36 = vpop.permute.xlu1 %2784 }
0x3d52   :  { %2791 = vrot.lane.b32.xlu0 %v2789_v4, %s4265_s14  ;;  %v2787_v37 = vsub.f32 %v4621_v42, %v2785_v36 }
0x3d54   :  { %v2788_v38 = vmul.f32 156.25, %v2787_v37 }
0x3d55   :  { %v2797_v43 = vpop.permute.xlu1 %2796 }
0x3d56   :  { %2802 = vrot.lane.b32.xlu0 %v2800_v35, %s4264_s13 }
0x3d5a   :  { %2812 = vrot.lane.b32.xlu0 %v4624_v44, %s4389_s26 }
0x3dc4   :  { %v2792_v39 = vpop.permute.xlu0 %2791 }
0x3dc5   :  { %v2794_v40 = vsub.f32 %v2788_v38, %v2792_v39 }
0x3dc7   :  { %v2799_v45 = vadd.f32 %v2797_v43, %v2794_v40 }
0x3dc8   :  { %v2803_v47 = vpop.permute.xlu0 %2802 }
0x3dc9   :  { %v2806_v48 = vmul.f32 0.01, %v2799_v45  ;;  %v2805_v49 = vadd.f32 %v2803_v47, %v2772_v25 }
0x3dcb   :  { %2808 = vrot.lane.b32.xlu1 %v2806_v48, %s4267_s6 }
0x3dcc   :  { %v2813_v52 = vpop.permute.xlu0 %2812 }
0x3dcd   :  { %v2815_v53 = vmul.f32 %v2813_v52, %v4630_v50 }
0x3dcf   :  { %2817 = vrot.lane.b32.xlu1 %v2805_v49, %s4263_s12 }
0x3dd3   :  { %2829 = vrot.lane.b32.xlu1 %v2815_v53, %s4389_s26  ;;  %s5652_s26 = smov 62  }
0x3e3d   :  { %v2809_v54 = vpop.permute.xlu1 %2808 }
0x3e3e   :  { %v2811_v55 = vadd.f32 %v2809_v54, %v2778_v28 }
0x3e40   :  { %v2822_v58 = vmul.f32 25.0, %v2811_v55  ;;  %v2833_v59 = vmul.f32 0.01, %v2811_v55 }
0x3e41   :  { %v2818_v60 = vpop.permute.xlu1 %2817 }
0x3e42   :  { %2824 = vrot.lane.b32.xlu0 %v2822_v58, %s4265_s14  ;;  %v2820_v46 = vsub.f32 %v4621_v42, %v2818_v60 }
0x3e44   :  { %v2821_v61 = vmul.f32 156.25, %v2820_v46 }
0x3e45   :  { %v2830_v1 = vpop.permute.xlu1 %2829 }
0x3e46   :  { %2835 = vrot.lane.b32.xlu0 %v2833_v59, %s4264_s13 }
0x3e4a   :  { %2845 = vrot.lane.b32.xlu0 %v4624_v44, %s4388_s23  ;;  %s5650_s23 = smov 53  }
0x3eb4   :  { %v2825_v62 = vpop.permute.xlu0 %2824 }
0x3eb5   :  { %v2827_v0 = vsub.f32 %v2821_v61, %v2825_v62 }
0x3eb7   :  { %v2832_v2 = vadd.f32 %v2830_v1, %v2827_v0 }
0x3eb8   :  { %v2836_v3 = vpop.permute.xlu0 %2835 }
0x3eb9   :  { %v2839_v5 = vmul.f32 0.01, %v2832_v2  ;;  %v2838_v6 = vadd.f32 %v2836_v3, %v2805_v49 }
0x3ebb   :  { %2841 = vrot.lane.b32.xlu1 %v2839_v5, %s4267_s6 }
0x3ebc   :  { %v2846_v7 = vpop.permute.xlu0 %2845 }
0x3ebd   :  { %v2848_v41 = vmul.f32 %v2846_v7, %v4630_v50 }
0x3ebf   :  { %2850 = vrot.lane.b32.xlu1 %v2838_v6, %s4263_s12 }
0x3ec3   :  { %2862 = vrot.lane.b32.xlu1 %v2848_v41, %s4387_s27  ;;  %s5674_s27 = smov 95  }
0x3f2d   :  { %v2842_v9 = vpop.permute.xlu1 %2841 }
0x3f2e   :  { %v2844_v10 = vadd.f32 %v2842_v9, %v2811_v55 }
0x3f30   :  { %v2855_v11 = vmul.f32 25.0, %v2844_v10  ;;  %v2866_v12 = vmul.f32 0.01, %v2844_v10 }
0x3f31   :  { %v2851_v13 = vpop.permute.xlu1 %2850 }
0x3f32   :  { %2857 = vrot.lane.b32.xlu0 %v2855_v11, %s4265_s14  ;;  %v2853_v14 = vsub.f32 %v4621_v42, %v2851_v13 }
0x3f34   :  { %v2854_v15 = vmul.f32 156.25, %v2853_v14 }
0x3f35   :  { %v2863_v17 = vpop.permute.xlu1 %2862 }
0x3f36   :  { %2868 = vrot.lane.b32.xlu0 %v2866_v12, %s4264_s13 }
0x3f3a   :  { %2878 = vrot.lane.b32.xlu0 %v4624_v44, %s4386_s25  ;;  %s5673_s25 = smov 33  }
0x3fa4   :  { %v2858_v51 = vpop.permute.xlu0 %2857 }
0x3fa5   :  { %v2860_v16 = vsub.f32 %v2854_v15, %v2858_v51 }
0x3fa7   :  { %v2865_v8 = vadd.f32 %v2863_v17, %v2860_v16 }
0x3fa8   :  { %v2869_v18 = vpop.permute.xlu0 %2868 }
0x3fa9   :  { %v2872_v19 = vmul.f32 0.01, %v2865_v8  ;;  %v2871_v20 = vadd.f32 %v2869_v18, %v2838_v6 }
0x3fab   :  { %2874 = vrot.lane.b32.xlu1 %v2872_v19, %s4267_s6 }
0x3fac   :  { %v2879_v21 = vpop.permute.xlu0 %2878 }
0x3fad   :  { %v2881_v22 = vmul.f32 %v2879_v21, %v4630_v50 }
0x3faf   :  { %2883 = vrot.lane.b32.xlu1 %v2871_v20, %s4263_s12 }
0x3fb3   :  { %2895 = vrot.lane.b32.xlu1 %v2881_v22, %s4385_s4  ;;  %s5672_s4 = smov 104  }
0x401d   :  { %v2875_v23 = vpop.permute.xlu1 %2874 }
0x401e   :  { %v2877_v24 = vadd.f32 %v2875_v23, %v2844_v10 }
0x4020   :  { %v2888_v25 = vmul.f32 25.0, %v2877_v24  ;;  %v2899_v56 = vmul.f32 0.01, %v2877_v24 }
0x4021   :  { %v2884_v26 = vpop.permute.xlu1 %2883 }
0x4022   :  { %2890 = vrot.lane.b32.xlu0 %v2888_v25, %s4265_s14  ;;  %v2886_v27 = vsub.f32 %v4621_v42, %v2884_v26 }
0x4024   :  { %v2887_v28 = vmul.f32 156.25, %v2886_v27 }
0x4025   :  { %v2896_v36 = vpop.permute.xlu1 %2895 }
0x4026   :  { %2901 = vrot.lane.b32.xlu0 %v2899_v56, %s4264_s13 }
0x402a   :  { %2911 = vrot.lane.b32.xlu0 %v4624_v44, %s4384_s22  ;;  %s5671_s22 = smov 24  }
0x4094   :  { %v2891_v4 = vpop.permute.xlu0 %2890 }
0x4095   :  { %v2893_v35 = vsub.f32 %v2887_v28, %v2891_v4 }
0x4097   :  { %v2898_v37 = vadd.f32 %v2896_v36, %v2893_v35 }
0x4098   :  { %v2902_v38 = vpop.permute.xlu0 %2901 }
0x4099   :  { %v2905_v39 = vmul.f32 0.01, %v2898_v37  ;;  %v2904_v40 = vadd.f32 %v2902_v38, %v2871_v20 }
0x409b   :  { %2907 = vrot.lane.b32.xlu1 %v2905_v39, %s4267_s6 }
0x409c   :  { %v2912_v43 = vpop.permute.xlu0 %2911 }
0x409d   :  { %v2914_v45 = vmul.f32 %v2912_v43, %v4630_v50 }
0x409f   :  { %2916 = vrot.lane.b32.xlu1 %v2904_v40, %s4263_s12 }
0x40a3   :  { %2928 = vrot.lane.b32.xlu1 %v2914_v45, %s4383_s21  ;;  %s5670_s21 = smov 15  }
0x410d   :  { %v2908_v47 = vpop.permute.xlu1 %2907 }
0x410e   :  { %v2910_v48 = vadd.f32 %v2908_v47, %v2877_v24 }
0x4110   :  { %v2921_v49 = vmul.f32 25.0, %v2910_v48  ;;  %v2932_v52 = vmul.f32 0.01, %v2910_v48 }
0x4111   :  { %v2917_v53 = vpop.permute.xlu1 %2916 }
0x4112   :  { %2923 = vrot.lane.b32.xlu0 %v2921_v49, %s4265_s14  ;;  %v2919_v54 = vsub.f32 %v4621_v42, %v2917_v53 }
0x4114   :  { %v2920_v55 = vmul.f32 156.25, %v2919_v54 }
0x4115   :  { %v2929_v60 = vpop.permute.xlu1 %2928 }
0x4116   :  { %2934 = vrot.lane.b32.xlu0 %v2932_v52, %s4264_s13 }
0x411a   :  { %2944 = vrot.lane.b32.xlu0 %v4624_v44, %s4382_s20  ;;  %s5669_s20 = smov 122  }
0x4184   :  { %v2924_v58 = vpop.permute.xlu0 %2923 }
0x4185   :  { %v2926_v59 = vsub.f32 %v2920_v55, %v2924_v58 }
0x4187   :  { %v2931_v46 = vadd.f32 %v2929_v60, %v2926_v59 }
0x4188   :  { %v2935_v61 = vpop.permute.xlu0 %2934 }
0x4189   :  { %v2938_v62 = vmul.f32 0.01, %v2931_v46  ;;  %v2937_v0 = vadd.f32 %v2935_v61, %v2904_v40 }
0x418b   :  { %2940 = vrot.lane.b32.xlu1 %v2938_v62, %s4267_s6 }
0x418c   :  { %v2945_v1 = vpop.permute.xlu0 %2944 }
0x418d   :  { %v2947_v2 = vmul.f32 %v2945_v1, %v4630_v50 }
0x418f   :  { %2949 = vrot.lane.b32.xlu1 %v2937_v0, %s4263_s12 }
0x4193   :  { %2961 = vrot.lane.b32.xlu1 %v2947_v2, %s4381_s19  ;;  %s5668_s19 = smov 6  }
0x41fd   :  { %v2941_v3 = vpop.permute.xlu1 %2940 }
0x41fe   :  { %v2943_v5 = vadd.f32 %v2941_v3, %v2910_v48 }
0x4200   :  { %v2954_v6 = vmul.f32 25.0, %v2943_v5  ;;  %v2965_v7 = vmul.f32 0.01, %v2943_v5 }
0x4201   :  { %v2950_v41 = vpop.permute.xlu1 %2949 }
0x4202   :  { %2956 = vrot.lane.b32.xlu0 %v2954_v6, %s4265_s14  ;;  %v2952_v9 = vsub.f32 %v4621_v42, %v2950_v41 }
0x4204   :  { %v2953_v10 = vmul.f32 156.25, %v2952_v9 }
0x4205   :  { %v2962_v13 = vpop.permute.xlu1 %2961 }
0x4206   :  { %2967 = vrot.lane.b32.xlu0 %v2965_v7, %s4264_s13 }
0x420a   :  { %2977 = vrot.lane.b32.xlu0 %v4624_v44, %s4380_s1  ;;  %s5667_s1 = smov 3  }
0x4274   :  { %v2957_v11 = vpop.permute.xlu0 %2956 }
0x4275   :  { %v2959_v12 = vsub.f32 %v2953_v10, %v2957_v11 }
0x4277   :  { %v2964_v14 = vadd.f32 %v2962_v13, %v2959_v12 }
0x4278   :  { %v2968_v15 = vpop.permute.xlu0 %2967 }
0x4279   :  { %v2971_v51 = vmul.f32 0.01, %v2964_v14  ;;  %v2970_v16 = vadd.f32 %v2968_v15, %v2937_v0 }
0x427b   :  { %2973 = vrot.lane.b32.xlu1 %v2971_v51, %s4267_s6 }
0x427c   :  { %v2978_v17 = vpop.permute.xlu0 %2977 }
0x427d   :  { %v2980_v8 = vmul.f32 %v2978_v17, %v4630_v50 }
0x427f   :  { %2982 = vrot.lane.b32.xlu1 %v2970_v16, %s4263_s12 }
0x4283   :  { %2994 = vrot.lane.b32.xlu1 %v2980_v8, %s4379_s18  ;;  %s5666_s18 = smov 125  }
0x42ed   :  { %v2974_v18 = vpop.permute.xlu1 %2973 }
0x42ee   :  { %v2976_v19 = vadd.f32 %v2974_v18, %v2943_v5 }
0x42f0   :  { %v2987_v20 = vmul.f32 25.0, %v2976_v19  ;;  %v2998_v21 = vmul.f32 0.01, %v2976_v19 }
0x42f1   :  { %v2983_v22 = vpop.permute.xlu1 %2982 }
0x42f2   :  { %2989 = vrot.lane.b32.xlu0 %v2987_v20, %s4265_s14  ;;  %v2985_v23 = vsub.f32 %v4621_v42, %v2983_v22 }
0x42f4   :  { %v2986_v24 = vmul.f32 156.25, %v2985_v23 }
0x42f5   :  { %v2995_v26 = vpop.permute.xlu1 %2994 }
0x42f6   :  { %3000 = vrot.lane.b32.xlu0 %v2998_v21, %s4264_s13 }
0x42fa   :  { %3017 = vrot.lane.b32.xlu0 %v4624_v44, %s4378_s17  ;;  %s5665_s17 = smov 12  }
0x4364   :  { %v2990_v25 = vpop.permute.xlu0 %2989 }
0x4365   :  { %v2992_v56 = vsub.f32 %v2986_v24, %v2990_v25 }
0x4367   :  { %v2997_v27 = vadd.f32 %v2995_v26, %v2992_v56 }
0x4368   :  { %v3001_v28 = vpop.permute.xlu0 %3000 }
0x4369   :  { %v3004_v4 = vmul.f32 0.01, %v2997_v27  ;;  %v5250_v35 = vadd.f32 %v3001_v28, %v2970_v16 }
0x436b   :  { %3006 = vrot.lane.b32.xlu1 %v3004_v4, %s4267_s6 }
0x436c   :  { %v3018_v36 = vpop.permute.xlu0 %3017 }
0x436d   :  { %v3020_v37 = vmul.f32 %v3018_v36, %v4630_v50 }
0x436f   :  { %3022 = vrot.lane.b32.xlu1 %v5250_v35, %s4263_s12 }
0x4373   :  { %3034 = vrot.lane.b32.xlu1 %v3020_v37, %s4377_s16  ;;  %s5664_s16 = smov 116  }
0x43dd   :  { %v3007_v38 = vpop.permute.xlu1 %3006 }
0x43de   :  { %v3009_v39 = vadd.f32 %v3007_v38, %v2976_v19 }
0x43e0   :  { %v3027_v40 = vmul.f32 25.0, %v3009_v39  ;;  %v3038_v43 = vmul.f32 0.01, %v3009_v39 }
0x43e1   :  { %v3023_v45 = vpop.permute.xlu1 %3022 }
0x43e2   :  { %3029 = vrot.lane.b32.xlu0 %v3027_v40, %s4265_s14  ;;  %v3025_v47 = vsub.f32 %v4621_v42, %v3023_v45 }
0x43e4   :  { %v3026_v48 = vmul.f32 156.25, %v3025_v47 }
0x43e5   :  { %v3035_v53 = vpop.permute.xlu1 %3034 }
0x43e6   :  { %3040 = vrot.lane.b32.xlu0 %v3038_v43, %s4264_s13 }
0x43ea   :  { %3050 = vrot.lane.b32.xlu0 %v4624_v44, %s4376_s11  ;;  %s5663_s11 = smov 21  }
0x4454   :  { %v3030_v49 = vpop.permute.xlu0 %3029 }
0x4455   :  { %v3032_v52 = vsub.f32 %v3026_v48, %v3030_v49 }
0x4457   :  { %v3037_v54 = vadd.f32 %v3035_v53, %v3032_v52 }
0x4458   :  { %v3041_v55 = vpop.permute.xlu0 %3040 }
0x4459   :  { %v3044_v58 = vmul.f32 0.01, %v3037_v54  ;;  %v3043_v59 = vadd.f32 %v3041_v55, %v5250_v35 }
0x445b   :  { %3046 = vrot.lane.b32.xlu1 %v3044_v58, %s4267_s6 }
0x445c   :  { %v3051_v60 = vpop.permute.xlu0 %3050 }
0x445d   :  { %v3053_v46 = vmul.f32 %v3051_v60, %v4630_v50  ;;  %v3054_v2 = vmul.f32 %v3051_v60, %v4638_v57 }
0x445f   :  { %3056 = vrot.lane.b32.xlu1 %v3043_v59, %s4263_s12 }
0x4463   :  { %3069 = vrot.lane.b32.xlu1 %v3053_v46, %s4375_s2 }
0x44cd   :  { %v3047_v61 = vpop.permute.xlu1 %3046 }
0x44ce   :  { %v3049_v62 = vadd.f32 %v3047_v61, %v3009_v39 }
0x44d0   :  { %v3061_v0 = vmul.f32 25.0, %v3049_v62  ;;  %v3077_v1 = vmul.f32 0.01, %v3049_v62 }
0x44d1   :  { %v3057_v3 = vpop.permute.xlu1 %3056 }
0x44d2   :  { %3079 = vrot.lane.b32.xlu1 %v3077_v1, %s4264_s13  ;;  %3063 = vrot.lane.b32.xlu0 %v3061_v0, %s4265_s14  ;;  %v3059_v50 = vsub.f32 %v4621_v42, %v3057_v3 }
0x44d4   :  { %v3060_v6 = vmul.f32 156.25, %v3059_v50 }
0x44d5   :  { %v3070_v7 = vpop.permute.xlu1 %3069 }
0x44d6   :  { %3089 = vrot.lane.b32.xlu1 %v4624_v44, %s4374_s10  ;;  %3071 = vrot.lane.b32.xlu0 %v3054_v2, %s4375_s2  ;;  %s5661_s10 = smov 30   ;;  %s5662_s2 = smov 107  }
0x4544   :  { %v3064_v5 = vpop.permute.xlu0 %3063  ;;  %v3080_v12 = vpop.permute.xlu1 %3079 }
0x4545   :  { %v3066_v41 = vsub.f32 %v3060_v6, %v3064_v5  ;;  %v3082_v14 = vadd.f32 %v3080_v12, %v3043_v59 }
0x4548   :  { %v3072_v9 = vpop.permute.xlu0 %3071  ;;  %v3090_v15 = vpop.permute.xlu1 %3089 }
0x4549   :  { %v3074_v10 = vsel %vm3073_vm6, %v3070_v7, %v3072_v9  ;;  %v3092_v51 = vmul.f32 %v3090_v15, %v4638_v57 }
0x454a   :  { %v3076_v11 = vadd.f32 %v3074_v10, %v3066_v41 }
0x454c   :  { %v3083_v13 = vmul.f32 0.01, %v3076_v11 }
0x454e   :  { %3085 = vrot.lane.b32.xlu0 %v3083_v13, %s4267_s6 }
0x4552   :  { %3094 = vrot.lane.b32.xlu0 %v3082_v14, %s4263_s12 }
0x4556   :  { %3106 = vrot.lane.b32.xlu0 %v3092_v51, %s4373_s30  ;;  %s5660_s30 = smov 98  }
0x45c0   :  { %v3086_v16 = vpop.permute.xlu0 %3085 }
0x45c1   :  { %v3088_v17 = vadd.f32 %v3086_v16, %v3049_v62 }
0x45c3   :  { %v3099_v8 = vmul.f32 25.0, %v3088_v17  ;;  %v3110_v18 = vmul.f32 0.01, %v3088_v17 }
0x45c4   :  { %v3095_v19 = vpop.permute.xlu0 %3094 }
0x45c5   :  { %3101 = vrot.lane.b32.xlu1 %v3099_v8, %s4265_s14  ;;  %v3097_v20 = vsub.f32 %v4621_v42, %v3095_v19 }
0x45c7   :  { %v3098_v21 = vmul.f32 156.25, %v3097_v20 }
0x45c8   :  { %v3107_v24 = vpop.permute.xlu0 %3106 }
0x45c9   :  { %3112 = vrot.lane.b32.xlu1 %v3110_v18, %s4264_s13 }
0x45cd   :  { %3122 = vrot.lane.b32.xlu1 %v4624_v44, %s4372_s3  ;;  %s5659_s3 = smov 39  }
0x4637   :  { %v3102_v22 = vpop.permute.xlu1 %3101 }
0x4638   :  { %v3104_v23 = vsub.f32 %v3098_v21, %v3102_v22 }
0x463a   :  { %v3109_v25 = vadd.f32 %v3107_v24, %v3104_v23 }
0x463b   :  { %v3113_v56 = vpop.permute.xlu1 %3112 }
0x463c   :  { %v3116_v26 = vmul.f32 0.01, %v3109_v25  ;;  %v3115_v27 = vadd.f32 %v3113_v56, %v3082_v14 }
0x463e   :  { %3118 = vrot.lane.b32.xlu0 %v3116_v26, %s4267_s6 }
0x463f   :  { %v3123_v28 = vpop.permute.xlu1 %3122 }
0x4640   :  { %v3125_v4 = vmul.f32 %v3123_v28, %v4638_v57 }
0x4642   :  { %3127 = vrot.lane.b32.xlu0 %v3115_v27, %s4263_s12 }
0x4646   :  { %3139 = vrot.lane.b32.xlu0 %v3125_v4, %s4371_s8  ;;  %s5657_s8 = smov 48  }
0x46b0   :  { %v3119_v36 = vpop.permute.xlu0 %3118 }
0x46b1   :  { %v3121_v37 = vadd.f32 %v3119_v36, %v3088_v17 }
0x46b3   :  { %v3132_v38 = vmul.f32 25.0, %v3121_v37  ;;  %v3143_v39 = vmul.f32 0.01, %v3121_v37 }
0x46b4   :  { %v3128_v40 = vpop.permute.xlu0 %3127 }
0x46b5   :  { %3134 = vrot.lane.b32.xlu1 %v3132_v38, %s4265_s14  ;;  %v3130_v43 = vsub.f32 %v4621_v42, %v3128_v40 }
0x46b7   :  { %v3131_v45 = vmul.f32 156.25, %v3130_v43 }
0x46b8   :  { %v3140_v49 = vpop.permute.xlu0 %3139 }
0x46b9   :  { %3145 = vrot.lane.b32.xlu1 %v3143_v39, %s4264_s13 }
0x46bd   :  { %3155 = vrot.lane.b32.xlu1 %v4624_v44, %s4370_s5  ;;  %s5655_s5 = smov 57  }
0x4727   :  { %v3135_v47 = vpop.permute.xlu1 %3134 }
0x4728   :  { %v3137_v48 = vsub.f32 %v3131_v45, %v3135_v47 }
0x472a   :  { %v3142_v52 = vadd.f32 %v3140_v49, %v3137_v48 }
0x472b   :  { %v3146_v53 = vpop.permute.xlu1 %3145 }
0x472c   :  { %v3149_v54 = vmul.f32 0.01, %v3142_v52  ;;  %v3148_v55 = vadd.f32 %v3146_v53, %v3115_v27 }
0x472e   :  { %3151 = vrot.lane.b32.xlu0 %v3149_v54, %s4267_s6 }
0x472f   :  { %v3156_v58 = vpop.permute.xlu1 %3155 }
0x4730   :  { %v3158_v59 = vmul.f32 %v3156_v58, %v4638_v57 }
0x4732   :  { %3160 = vrot.lane.b32.xlu0 %v3148_v55, %s4263_s12 }
0x4736   :  { %3172 = vrot.lane.b32.xlu0 %v3158_v59, %s4369_s28  ;;  %s5653_s28 = smov 66  }
0x47a0   :  { %v3152_v60 = vpop.permute.xlu0 %3151 }
0x47a1   :  { %v3154_v46 = vadd.f32 %v3152_v60, %v3121_v37 }
0x47a3   :  { %v3165_v61 = vmul.f32 25.0, %v3154_v46  ;;  %v3176_v62 = vmul.f32 0.01, %v3154_v46 }
0x47a4   :  { %v3161_v0 = vpop.permute.xlu0 %3160 }
0x47a5   :  { %3167 = vrot.lane.b32.xlu1 %v3165_v61, %s4265_s14  ;;  %v3163_v1 = vsub.f32 %v4621_v42, %v3161_v0 }
0x47a7   :  { %v3164_v2 = vmul.f32 156.25, %v3163_v1 }
0x47a8   :  { %v3173_v5 = vpop.permute.xlu0 %3172 }
0x47a9   :  { %3178 = vrot.lane.b32.xlu1 %v3176_v62, %s4264_s13 }
0x47ad   :  { %3188 = vrot.lane.b32.xlu1 %v4624_v44, %s4368_s24  ;;  %s5651_s24 = smov 75  }
0x4817   :  { %v3168_v3 = vpop.permute.xlu1 %3167 }
0x4818   :  { %v3170_v50 = vsub.f32 %v3164_v2, %v3168_v3 }
0x481a   :  { %v3175_v6 = vadd.f32 %v3173_v5, %v3170_v50 }
0x481b   :  { %v3179_v7 = vpop.permute.xlu1 %3178 }
0x481c   :  { %v3182_v41 = vmul.f32 0.01, %v3175_v6  ;;  %v3181_v9 = vadd.f32 %v3179_v7, %v3148_v55 }
0x481e   :  { %3184 = vrot.lane.b32.xlu0 %v3182_v41, %s4267_s6 }
0x481f   :  { %v3189_v10 = vpop.permute.xlu1 %3188 }
0x4820   :  { %v3191_v11 = vmul.f32 %v3189_v10, %v4638_v57 }
0x4822   :  { %3193 = vrot.lane.b32.xlu0 %v3181_v9, %s4263_s12 }
0x4826   :  { %3205 = vrot.lane.b32.xlu0 %v3191_v11, %s4367_s15  ;;  %s5658_s15 = smov 89  }
0x4890   :  { %v3185_v12 = vpop.permute.xlu0 %3184 }
0x4891   :  { %v3187_v13 = vadd.f32 %v3185_v12, %v3154_v46 }
0x4893   :  { %v3198_v14 = vmul.f32 25.0, %v3187_v13  ;;  %v3209_v15 = vmul.f32 0.01, %v3187_v13 }
0x4894   :  { %v3194_v51 = vpop.permute.xlu0 %3193 }
0x4895   :  { %3200 = vrot.lane.b32.xlu1 %v3198_v14, %s4265_s14  ;;  %v3196_v16 = vsub.f32 %v4621_v42, %v3194_v51 }
0x4897   :  { %v3197_v17 = vmul.f32 156.25, %v3196_v16 }
0x4898   :  { %v3206_v19 = vpop.permute.xlu0 %3205 }
0x4899   :  { %3211 = vrot.lane.b32.xlu1 %v3209_v15, %s4264_s13 }
0x489d   :  { %3221 = vrot.lane.b32.xlu1 %v4624_v44, %s4366_s7  ;;  %s5656_s7 = smov 80  }
0x4907   :  { %v3201_v8 = vpop.permute.xlu1 %3200 }
0x4908   :  { %v3203_v18 = vsub.f32 %v3197_v17, %v3201_v8 }
0x490a   :  { %v3208_v20 = vadd.f32 %v3206_v19, %v3203_v18 }
0x490b   :  { %v3212_v21 = vpop.permute.xlu1 %3211 }
0x490c   :  { %v3215_v22 = vmul.f32 0.01, %v3208_v20  ;;  %v3214_v23 = vadd.f32 %v3212_v21, %v3181_v9 }
0x490e   :  { %3217 = vrot.lane.b32.xlu0 %v3215_v22, %s4267_s6 }
0x490f   :  { %v3222_v24 = vpop.permute.xlu1 %3221 }
0x4910   :  { %v3224_v25 = vmul.f32 %v3222_v24, %v4638_v57 }
0x4912   :  { %3226 = vrot.lane.b32.xlu0 %v3214_v23, %s4263_s12 }
0x4916   :  { %3238 = vrot.lane.b32.xlu0 %v3224_v25, %s4365_s29  ;;  %s5654_s29 = smov 71  }
0x4980   :  { %v3218_v56 = vpop.permute.xlu0 %3217 }
0x4981   :  { %v3220_v26 = vadd.f32 %v3218_v56, %v3187_v13 }
0x4983   :  { %v3231_v27 = vmul.f32 25.0, %v3220_v26  ;;  %v3242_v28 = vmul.f32 0.01, %v3220_v26 }
0x4984   :  { %v3227_v4 = vpop.permute.xlu0 %3226 }
0x4985   :  { %3233 = vrot.lane.b32.xlu1 %v3231_v27, %s4265_s14  ;;  %v3229_v36 = vsub.f32 %v4621_v42, %v3227_v4 }
0x4987   :  { %v3230_v37 = vmul.f32 156.25, %v3229_v36 }
0x4988   :  { %v3239_v40 = vpop.permute.xlu0 %3238 }
0x4989   :  { %3244 = vrot.lane.b32.xlu1 %v3242_v28, %s4264_s13 }
0x498d   :  { %3254 = vrot.lane.b32.xlu1 %v4624_v44, %s5650_s23  ;;  %s5675_s23 = smov 42  }
0x49f7   :  { %v3234_v38 = vpop.permute.xlu1 %3233 }
0x49f8   :  { %v3236_v39 = vsub.f32 %v3230_v37, %v3234_v38 }
0x49fa   :  { %v3241_v43 = vadd.f32 %v3239_v40, %v3236_v39 }
0x49fb   :  { %v3245_v45 = vpop.permute.xlu1 %3244 }
0x49fc   :  { %v3248_v47 = vmul.f32 0.01, %v3241_v43  ;;  %v3247_v48 = vadd.f32 %v3245_v45, %v3214_v23 }
0x49fe   :  { %3250 = vrot.lane.b32.xlu0 %v3248_v47, %s4267_s6 }
0x49ff   :  { %v3255_v49 = vpop.permute.xlu1 %3254 }
0x4a00   :  { %v3257_v52 = vmul.f32 %v3255_v49, %v4638_v57 }
0x4a02   :  { %3259 = vrot.lane.b32.xlu0 %v3247_v48, %s4263_s12 }
0x4a06   :  { %3271 = vrot.lane.b32.xlu0 %v3257_v52, %s5651_s24  ;;  %s5676_s24 = smov 86  }
0x4a70   :  { %v3251_v53 = vpop.permute.xlu0 %3250 }
0x4a71   :  { %v3253_v54 = vadd.f32 %v3251_v53, %v3220_v26 }
0x4a73   :  { %v3264_v55 = vmul.f32 25.0, %v3253_v54  ;;  %v3275_v58 = vmul.f32 0.01, %v3253_v54 }
0x4a74   :  { %v3260_v59 = vpop.permute.xlu0 %3259 }
0x4a75   :  { %3266 = vrot.lane.b32.xlu1 %v3264_v55, %s4265_s14  ;;  %v3262_v60 = vsub.f32 %v4621_v42, %v3260_v59 }
0x4a77   :  { %v3263_v46 = vmul.f32 156.25, %v3262_v60 }
0x4a78   :  { %v3272_v0 = vpop.permute.xlu0 %3271 }
0x4a79   :  { %3277 = vrot.lane.b32.xlu1 %v3275_v58, %s4264_s13 }
0x4a7d   :  { %3287 = vrot.lane.b32.xlu1 %v4624_v44, %s5652_s26  ;;  %s5677_s26 = smov 51  }
0x4ae7   :  { %v3267_v61 = vpop.permute.xlu1 %3266 }
0x4ae8   :  { %v3269_v62 = vsub.f32 %v3263_v46, %v3267_v61 }
0x4aea   :  { %v3274_v1 = vadd.f32 %v3272_v0, %v3269_v62 }
0x4aeb   :  { %v3278_v2 = vpop.permute.xlu1 %3277 }
0x4aec   :  { %v3281_v3 = vmul.f32 0.01, %v3274_v1  ;;  %v3280_v50 = vadd.f32 %v3278_v2, %v3247_v48 }
0x4aee   :  { %3283 = vrot.lane.b32.xlu0 %v3281_v3, %s4267_s6 }
0x4aef   :  { %v3288_v5 = vpop.permute.xlu1 %3287 }
0x4af0   :  { %v3290_v6 = vmul.f32 %v3288_v5, %v4638_v57 }
0x4af2   :  { %3292 = vrot.lane.b32.xlu0 %v3280_v50, %s4263_s12 }
0x4af6   :  { %3304 = vrot.lane.b32.xlu0 %v3290_v6, %s5653_s28  ;;  %s5678_s28 = smov 77  }
0x4b60   :  { %v3284_v7 = vpop.permute.xlu0 %3283 }
0x4b61   :  { %v3286_v41 = vadd.f32 %v3284_v7, %v3253_v54 }
0x4b63   :  { %v3297_v9 = vmul.f32 25.0, %v3286_v41  ;;  %v3308_v10 = vmul.f32 0.01, %v3286_v41 }
0x4b64   :  { %v3293_v11 = vpop.permute.xlu0 %3292 }
0x4b65   :  { %3299 = vrot.lane.b32.xlu1 %v3297_v9, %s4265_s14  ;;  %v3295_v12 = vsub.f32 %v4621_v42, %v3293_v11 }
0x4b67   :  { %v3296_v13 = vmul.f32 156.25, %v3295_v12 }
0x4b68   :  { %v3305_v51 = vpop.permute.xlu0 %3304 }
0x4b69   :  { %3310 = vrot.lane.b32.xlu1 %v3308_v10, %s4264_s13 }
0x4b6d   :  { %3320 = vrot.lane.b32.xlu1 %v4624_v44, %s5654_s29  ;;  %s5679_s29 = smov 60  }
0x4bd7   :  { %v3300_v14 = vpop.permute.xlu1 %3299 }
0x4bd8   :  { %v3302_v15 = vsub.f32 %v3296_v13, %v3300_v14 }
0x4bda   :  { %v3307_v16 = vadd.f32 %v3305_v51, %v3302_v15 }
0x4bdb   :  { %v3311_v17 = vpop.permute.xlu1 %3310 }
0x4bdc   :  { %v3314_v8 = vmul.f32 0.01, %v3307_v16  ;;  %v3313_v18 = vadd.f32 %v3311_v17, %v3280_v50 }
0x4bde   :  { %3316 = vrot.lane.b32.xlu0 %v3314_v8, %s4267_s6 }
0x4bdf   :  { %v3321_v19 = vpop.permute.xlu1 %3320 }
0x4be0   :  { %v3323_v20 = vmul.f32 %v3321_v19, %v4638_v57 }
0x4be2   :  { %3325 = vrot.lane.b32.xlu0 %v3313_v18, %s4263_s12 }
0x4be6   :  { %3337 = vrot.lane.b32.xlu0 %v3323_v20, %s5655_s5  ;;  %s5680_s5 = smov 68  }
0x4c50   :  { %v3317_v21 = vpop.permute.xlu0 %3316 }
0x4c51   :  { %v3319_v22 = vadd.f32 %v3317_v21, %v3286_v41 }
0x4c53   :  { %v3330_v23 = vmul.f32 25.0, %v3319_v22  ;;  %v3341_v24 = vmul.f32 0.01, %v3319_v22 }
0x4c54   :  { %v3326_v25 = vpop.permute.xlu0 %3325 }
0x4c55   :  { %3332 = vrot.lane.b32.xlu1 %v3330_v23, %s4265_s14  ;;  %v3328_v56 = vsub.f32 %v4621_v42, %v3326_v25 }
0x4c57   :  { %v3329_v26 = vmul.f32 156.25, %v3328_v56 }
0x4c58   :  { %v3338_v4 = vpop.permute.xlu0 %3337 }
0x4c59   :  { %3343 = vrot.lane.b32.xlu1 %v3341_v24, %s4264_s13 }
0x4c5d   :  { %3360 = vrot.lane.b32.xlu1 %v4624_v44, %s5656_s7  ;;  %s5681_s7 = smov 69  }
0x4cc7   :  { %v3333_v27 = vpop.permute.xlu1 %3332 }
0x4cc8   :  { %v3335_v28 = vsub.f32 %v3329_v26, %v3333_v27 }
0x4cca   :  { %v3340_v36 = vadd.f32 %v3338_v4, %v3335_v28 }
0x4ccb   :  { %v3344_v37 = vpop.permute.xlu1 %3343 }
0x4ccc   :  { %v3347_v38 = vmul.f32 0.01, %v3340_v36  ;;  %v5346_v39 = vadd.f32 %v3344_v37, %v3313_v18 }
0x4cce   :  { %3349 = vrot.lane.b32.xlu0 %v3347_v38, %s4267_s6 }
0x4ccf   :  { %v3361_v40 = vpop.permute.xlu1 %3360 }
0x4cd0   :  { %v3363_v43 = vmul.f32 %v3361_v40, %v4638_v57 }
0x4cd2   :  { %3365 = vrot.lane.b32.xlu0 %v5346_v39, %s4263_s12 }
0x4cd6   :  { %3377 = vrot.lane.b32.xlu0 %v3363_v43, %s5657_s8  ;;  %s5682_s8 = smov 59  }
0x4d40   :  { %v3350_v45 = vpop.permute.xlu0 %3349 }
0x4d41   :  { %v3352_v47 = vadd.f32 %v3350_v45, %v3319_v22 }
0x4d43   :  { %v3370_v48 = vmul.f32 25.0, %v3352_v47  ;;  %v3381_v49 = vmul.f32 0.01, %v3352_v47 }
0x4d44   :  { %v3366_v52 = vpop.permute.xlu0 %3365 }
0x4d45   :  { %3372 = vrot.lane.b32.xlu1 %v3370_v48, %s4265_s14  ;;  %v3368_v53 = vsub.f32 %v4621_v42, %v3366_v52 }
0x4d47   :  { %v3369_v54 = vmul.f32 156.25, %v3368_v53 }
0x4d48   :  { %v3378_v59 = vpop.permute.xlu0 %3377 }
0x4d49   :  { %3383 = vrot.lane.b32.xlu1 %v3381_v49, %s4264_s13 }
0x4d4d   :  { %3393 = vrot.lane.b32.xlu1 %v4624_v44, %s5658_s15  ;;  %s5683_s15 = smov 78  }
0x4db7   :  { %v3373_v55 = vpop.permute.xlu1 %3372 }
0x4db8   :  { %v3375_v58 = vsub.f32 %v3369_v54, %v3373_v55 }
0x4dba   :  { %v3380_v60 = vadd.f32 %v3378_v59, %v3375_v58 }
0x4dbb   :  { %v3384_v46 = vpop.permute.xlu1 %3383 }
0x4dbc   :  { %v3387_v61 = vmul.f32 0.01, %v3380_v60  ;;  %v3386_v62 = vadd.f32 %v3384_v46, %v5346_v39 }
0x4dbe   :  { %3389 = vrot.lane.b32.xlu0 %v3387_v61, %s4267_s6 }
0x4dbf   :  { %v3394_v0 = vpop.permute.xlu1 %3393 }
0x4dc0   :  { %v3396_v1 = vmul.f32 %v3394_v0, %v4638_v57 }
0x4dc2   :  { %3398 = vrot.lane.b32.xlu0 %v3386_v62, %s4263_s12 }
0x4dc6   :  { %3410 = vrot.lane.b32.xlu0 %v3396_v1, %s5659_s3  ;;  %s5684_s3 = smov 50  }
0x4e30   :  { %v3390_v2 = vpop.permute.xlu0 %3389 }
0x4e31   :  { %v3392_v3 = vadd.f32 %v3390_v2, %v3352_v47 }
0x4e33   :  { %v3403_v50 = vmul.f32 25.0, %v3392_v3  ;;  %v3414_v5 = vmul.f32 0.01, %v3392_v3 }
0x4e34   :  { %v3399_v6 = vpop.permute.xlu0 %3398 }
0x4e35   :  { %3405 = vrot.lane.b32.xlu1 %v3403_v50, %s4265_s14  ;;  %v3401_v7 = vsub.f32 %v4621_v42, %v3399_v6 }
0x4e37   :  { %v3402_v41 = vmul.f32 156.25, %v3401_v7 }
0x4e38   :  { %v3411_v11 = vpop.permute.xlu0 %3410 }
0x4e39   :  { %3416 = vrot.lane.b32.xlu1 %v3414_v5, %s4264_s13 }
0x4e3d   :  { %3426 = vrot.lane.b32.xlu1 %v4624_v44, %s5660_s30  ;;  %s5685_s30 = smov 87  }
0x4ea7   :  { %v3406_v9 = vpop.permute.xlu1 %3405 }
0x4ea8   :  { %v3408_v10 = vsub.f32 %v3402_v41, %v3406_v9 }
0x4eaa   :  { %v3413_v12 = vadd.f32 %v3411_v11, %v3408_v10 }
0x4eab   :  { %v3417_v13 = vpop.permute.xlu1 %3416 }
0x4eac   :  { %v3420_v14 = vmul.f32 0.01, %v3413_v12  ;;  %v3419_v15 = vadd.f32 %v3417_v13, %v3386_v62 }
0x4eae   :  { %3422 = vrot.lane.b32.xlu0 %v3420_v14, %s4267_s6 }
0x4eaf   :  { %v3427_v51 = vpop.permute.xlu1 %3426 }
0x4eb0   :  { %v3429_v16 = vmul.f32 %v3427_v51, %v4638_v57 }
0x4eb2   :  { %3431 = vrot.lane.b32.xlu0 %v3419_v15, %s4263_s12 }
0x4eb6   :  { %3443 = vrot.lane.b32.xlu0 %v3429_v16, %s5661_s10  ;;  %s5686_s10 = smov 41  }
0x4f20   :  { %v3423_v17 = vpop.permute.xlu0 %3422 }
0x4f21   :  { %v3425_v8 = vadd.f32 %v3423_v17, %v3392_v3 }
0x4f23   :  { %v3436_v18 = vmul.f32 25.0, %v3425_v8  ;;  %v3447_v19 = vmul.f32 0.01, %v3425_v8 }
0x4f24   :  { %v3432_v20 = vpop.permute.xlu0 %3431 }
0x4f25   :  { %3438 = vrot.lane.b32.xlu1 %v3436_v18, %s4265_s14  ;;  %v3434_v21 = vsub.f32 %v4621_v42, %v3432_v20 }
0x4f27   :  { %v3435_v22 = vmul.f32 156.25, %v3434_v21 }
0x4f28   :  { %v3444_v25 = vpop.permute.xlu0 %3443 }
0x4f29   :  { %3449 = vrot.lane.b32.xlu1 %v3447_v19, %s4264_s13 }
0x4f2d   :  { %3459 = vrot.lane.b32.xlu1 %v4624_v44, %s5662_s2  ;;  %s5687_s2 = smov 96  }
0x4f97   :  { %v3439_v23 = vpop.permute.xlu1 %3438 }
0x4f98   :  { %v3441_v24 = vsub.f32 %v3435_v22, %v3439_v23 }
0x4f9a   :  { %v3446_v56 = vadd.f32 %v3444_v25, %v3441_v24 }
0x4f9b   :  { %v3450_v26 = vpop.permute.xlu1 %3449 }
0x4f9c   :  { %v3453_v27 = vmul.f32 0.01, %v3446_v56  ;;  %v3452_v28 = vadd.f32 %v3450_v26, %v3419_v15 }
0x4f9e   :  { %3455 = vrot.lane.b32.xlu0 %v3453_v27, %s4267_s6 }
0x4f9f   :  { %v3460_v4 = vpop.permute.xlu1 %3459 }
0x4fa0   :  { %v3462_v36 = vmul.f32 %v3460_v4, %v4638_v57 }
0x4fa2   :  { %3464 = vrot.lane.b32.xlu0 %v3452_v28, %s4263_s12 }
0x4fa6   :  { %3476 = vrot.lane.b32.xlu0 %v3462_v36, %s5663_s11  ;;  %s5688_s11 = smov 32  }
0x5010   :  { %v3456_v37 = vpop.permute.xlu0 %3455 }
0x5011   :  { %v3458_v38 = vadd.f32 %v3456_v37, %v3425_v8 }
0x5013   :  { %v3469_v40 = vmul.f32 25.0, %v3458_v38  ;;  %v3480_v43 = vmul.f32 0.01, %v3458_v38 }
0x5014   :  { %v3465_v45 = vpop.permute.xlu0 %3464 }
0x5015   :  { %3471 = vrot.lane.b32.xlu1 %v3469_v40, %s4265_s14  ;;  %v3467_v47 = vsub.f32 %v4621_v42, %v3465_v45 }
0x5017   :  { %v3468_v48 = vmul.f32 156.25, %v3467_v47 }
0x5018   :  { %v3477_v53 = vpop.permute.xlu0 %3476 }
0x5019   :  { %3482 = vrot.lane.b32.xlu1 %v3480_v43, %s4264_s13 }
0x501d   :  { %3492 = vrot.lane.b32.xlu1 %v4624_v44, %s5664_s16  ;;  %s5689_s16 = smov 105  }
0x5087   :  { %v3472_v49 = vpop.permute.xlu1 %3471 }
0x5088   :  { %v3474_v52 = vsub.f32 %v3468_v48, %v3472_v49 }
0x508a   :  { %v3479_v54 = vadd.f32 %v3477_v53, %v3474_v52 }
0x508b   :  { %v3483_v55 = vpop.permute.xlu1 %3482 }
0x508c   :  { %v3486_v58 = vmul.f32 0.01, %v3479_v54  ;;  %v3485_v59 = vadd.f32 %v3483_v55, %v3452_v28 }
0x508e   :  { %3488 = vrot.lane.b32.xlu0 %v3486_v58, %s4267_s6 }
0x508f   :  { %v3493_v60 = vpop.permute.xlu1 %3492 }
0x5090   :  { %v3495_v46 = vmul.f32 %v3493_v60, %v4638_v57 }
0x5092   :  { %3497 = vrot.lane.b32.xlu0 %v3485_v59, %s4263_s12 }
0x5096   :  { %3509 = vrot.lane.b32.xlu0 %v3495_v46, %s5665_s17  ;;  %s5690_s17 = smov 23  }
0x5100   :  { %v3489_v61 = vpop.permute.xlu0 %3488 }
0x5101   :  { %v3491_v62 = vadd.f32 %v3489_v61, %v3458_v38 }
0x5103   :  { %v3502_v0 = vmul.f32 25.0, %v3491_v62  ;;  %v3513_v1 = vmul.f32 0.01, %v3491_v62 }
0x5104   :  { %v3498_v2 = vpop.permute.xlu0 %3497 }
0x5105   :  { %3504 = vrot.lane.b32.xlu1 %v3502_v0, %s4265_s14  ;;  %v3500_v3 = vsub.f32 %v4621_v42, %v3498_v2 }
0x5107   :  { %v3501_v50 = vmul.f32 156.25, %v3500_v3 }
0x5108   :  { %v3510_v7 = vpop.permute.xlu0 %3509 }
0x5109   :  { %3515 = vrot.lane.b32.xlu1 %v3513_v1, %s4264_s13 }
0x510d   :  { %3525 = vrot.lane.b32.xlu1 %v4624_v44, %s5666_s18  ;;  %s5691_s18 = smov 114  }
0x5177   :  { %v3505_v5 = vpop.permute.xlu1 %3504 }
0x5178   :  { %v3507_v6 = vsub.f32 %v3501_v50, %v3505_v5 }
0x517a   :  { %v3512_v41 = vadd.f32 %v3510_v7, %v3507_v6 }
0x517b   :  { %v3516_v9 = vpop.permute.xlu1 %3515 }
0x517c   :  { %v3519_v10 = vmul.f32 0.01, %v3512_v41  ;;  %v3518_v11 = vadd.f32 %v3516_v9, %v3485_v59 }
0x517e   :  { %3521 = vrot.lane.b32.xlu0 %v3519_v10, %s4267_s6 }
0x517f   :  { %v3526_v12 = vpop.permute.xlu1 %3525 }
0x5180   :  { %v3528_v13 = vmul.f32 %v3526_v12, %v4638_v57  ;;  %v3529_v17 = vmul.f32 %v3526_v12, %v4642_v63 }
0x5182   :  { %3531 = vrot.lane.b32.xlu0 %v3518_v11, %s4263_s12 }
0x5186   :  { %3544 = vrot.lane.b32.xlu0 %v3528_v13, %s5667_s1 }
0x51f0   :  { %v3522_v14 = vpop.permute.xlu0 %3521 }
0x51f1   :  { %v3524_v15 = vadd.f32 %v3522_v14, %v3491_v62 }
0x51f3   :  { %v3536_v51 = vmul.f32 25.0, %v3524_v15  ;;  %v3552_v16 = vmul.f32 0.01, %v3524_v15 }
0x51f4   :  { %v3532_v8 = vpop.permute.xlu0 %3531 }
0x51f5   :  { %3538 = vrot.lane.b32.xlu1 %v3536_v51, %s4265_s14  ;;  %3554 = vrot.lane.b32.xlu0 %v3552_v16, %s4264_s13  ;;  %v3534_v57 = vsub.f32 %v4621_v42, %v3532_v8 }
0x51f7   :  { %v3535_v19 = vmul.f32 156.25, %v3534_v57 }
0x51f8   :  { %v3545_v20 = vpop.permute.xlu0 %3544 }
0x51f9   :  { %3546 = vrot.lane.b32.xlu1 %v3529_v17, %s5667_s1  ;;  %3564 = vrot.lane.b32.xlu0 %v4624_v44, %s5668_s19  ;;  %s5692_s1 = smov 14  }
0x5267   :  { %v3539_v18 = vpop.permute.xlu1 %3538  ;;  %v3555_v25 = vpop.permute.xlu0 %3554 }
0x5268   :  { %v3541_v21 = vsub.f32 %v3535_v19, %v3539_v18  ;;  %v3557_v26 = vadd.f32 %v3555_v25, %v3518_v11 }
0x526b   :  { %v3547_v22 = vpop.permute.xlu1 %3546  ;;  %v3565_v27 = vpop.permute.xlu0 %3564 }
0x526c   :  { %v3549_v23 = vsel %vm3548_vm7, %v3545_v20, %v3547_v22  ;;  %v3567_v28 = vmul.f32 %v3565_v27, %v4642_v63 }
0x526d   :  { %v3551_v24 = vadd.f32 %v3549_v23, %v3541_v21 }
0x526f   :  { %v3558_v56 = vmul.f32 0.01, %v3551_v24 }
0x5271   :  { %3560 = vrot.lane.b32.xlu1 %v3558_v56, %s4267_s6 }
0x5275   :  { %3569 = vrot.lane.b32.xlu1 %v3557_v26, %s4263_s12 }
0x5279   :  { %3581 = vrot.lane.b32.xlu1 %v3567_v28, %s5669_s20 }
0x52e3   :  { %v3561_v4 = vpop.permute.xlu1 %3560 }
0x52e4   :  { %v3563_v36 = vadd.f32 %v3561_v4, %v3524_v15 }
0x52e6   :  { %v3574_v37 = vmul.f32 25.0, %v3563_v36  ;;  %v3585_v38 = vmul.f32 0.01, %v3563_v36 }
0x52e7   :  { %v3570_v40 = vpop.permute.xlu1 %3569 }
0x52e8   :  { %3576 = vrot.lane.b32.xlu0 %v3574_v37, %s4265_s14  ;;  %v3572_v43 = vsub.f32 %v4621_v42, %v3570_v40 }
0x52ea   :  { %v3573_v45 = vmul.f32 156.25, %v3572_v43 }
0x52eb   :  { %v3582_v49 = vpop.permute.xlu1 %3581 }
0x52ec   :  { %3587 = vrot.lane.b32.xlu0 %v3585_v38, %s4264_s13 }
0x52f0   :  { %3597 = vrot.lane.b32.xlu0 %v4624_v44, %s5670_s21  ;;  %s5693_s21 = smov 11  }
0x535a   :  { %v3577_v47 = vpop.permute.xlu0 %3576 }
0x535b   :  { %v3579_v48 = vsub.f32 %v3573_v45, %v3577_v47 }
0x535d   :  { %v3584_v52 = vadd.f32 %v3582_v49, %v3579_v48 }
0x535e   :  { %v3588_v53 = vpop.permute.xlu0 %3587 }
0x535f   :  { %v3591_v54 = vmul.f32 0.01, %v3584_v52  ;;  %v3590_v55 = vadd.f32 %v3588_v53, %v3557_v26 }
0x5361   :  { %3593 = vrot.lane.b32.xlu1 %v3591_v54, %s4267_s6 }
0x5362   :  { %v3598_v58 = vpop.permute.xlu0 %3597 }
0x5363   :  { %v3600_v59 = vmul.f32 %v3598_v58, %v4642_v63 }
0x5365   :  { %3602 = vrot.lane.b32.xlu1 %v3590_v55, %s4263_s12 }
0x5369   :  { %3614 = vrot.lane.b32.xlu1 %v3600_v59, %s4264_s13 }
0x53d3   :  { %v3594_v60 = vpop.permute.xlu1 %3593 }
0x53d4   :  { %v3596_v46 = vadd.f32 %v3594_v60, %v3563_v36 }
0x53d6   :  { %v3607_v61 = vmul.f32 25.0, %v3596_v46  ;;  %v3618_v62 = vmul.f32 0.01, %v3596_v46 }
0x53d7   :  { %v3603_v0 = vpop.permute.xlu1 %3602 }
0x53d8   :  { %3609 = vrot.lane.b32.xlu0 %v3607_v61, %s4265_s14  ;;  %v3605_v1 = vsub.f32 %v4621_v42, %v3603_v0 }
0x53da   :  { %v3606_v2 = vmul.f32 156.25, %v3605_v1 }
0x53db   :  { %v3615_v5 = vpop.permute.xlu1 %3614 }
0x53dc   :  { %3620 = vrot.lane.b32.xlu0 %v3618_v62, %s4264_s13 }
0x53e0   :  { %3630 = vrot.lane.b32.xlu0 %v4624_v44, %s5671_s22  ;;  %s5694_s22 = smov 29  }
0x544a   :  { %v3610_v3 = vpop.permute.xlu0 %3609 }
0x544b   :  { %v3612_v50 = vsub.f32 %v3606_v2, %v3610_v3 }
0x544d   :  { %v3617_v6 = vadd.f32 %v3615_v5, %v3612_v50 }
0x544e   :  { %v3621_v7 = vpop.permute.xlu0 %3620 }
0x544f   :  { %v3624_v41 = vmul.f32 0.01, %v3617_v6  ;;  %v3623_v9 = vadd.f32 %v3621_v7, %v3590_v55 }
0x5451   :  { %3626 = vrot.lane.b32.xlu1 %v3624_v41, %s4267_s6 }
0x5452   :  { %v3631_v10 = vpop.permute.xlu0 %3630 }
0x5453   :  { %v3633_v11 = vmul.f32 %v3631_v10, %v4642_v63 }
0x5455   :  { %3635 = vrot.lane.b32.xlu1 %v3623_v9, %s4263_s12 }
0x5459   :  { %3647 = vrot.lane.b32.xlu1 %v3633_v11, %s5672_s4 }
0x54c3   :  { %v3627_v12 = vpop.permute.xlu1 %3626 }
0x54c4   :  { %v3629_v13 = vadd.f32 %v3627_v12, %v3596_v46 }
0x54c6   :  { %v3640_v14 = vmul.f32 25.0, %v3629_v13  ;;  %v3651_v15 = vmul.f32 0.01, %v3629_v13 }
0x54c7   :  { %v3636_v51 = vpop.permute.xlu1 %3635 }
0x54c8   :  { %3642 = vrot.lane.b32.xlu0 %v3640_v14, %s4265_s14  ;;  %v3638_v16 = vsub.f32 %v4621_v42, %v3636_v51 }
0x54ca   :  { %v3639_v17 = vmul.f32 156.25, %v3638_v16 }
0x54cb   :  { %v3648_v18 = vpop.permute.xlu1 %3647 }
0x54cc   :  { %3653 = vrot.lane.b32.xlu0 %v3651_v15, %s4264_s13 }
0x54d0   :  { %3663 = vrot.lane.b32.xlu0 %v4624_v44, %s5673_s25  ;;  %s5697_s25 = smov 2  }
0x553a   :  { %v3643_v8 = vpop.permute.xlu0 %3642 }
0x553b   :  { %v3645_v57 = vsub.f32 %v3639_v17, %v3643_v8 }
0x553d   :  { %v3650_v19 = vadd.f32 %v3648_v18, %v3645_v57 }
0x553e   :  { %v3654_v20 = vpop.permute.xlu0 %3653 }
0x553f   :  { %v3657_v21 = vmul.f32 0.01, %v3650_v19  ;;  %v3656_v22 = vadd.f32 %v3654_v20, %v3623_v9 }
0x5541   :  { %3659 = vrot.lane.b32.xlu1 %v3657_v21, %s4267_s6 }
0x5542   :  { %v3664_v23 = vpop.permute.xlu0 %3663 }
0x5543   :  { %v3666_v24 = vmul.f32 %v3664_v23, %v4642_v63 }
0x5545   :  { %3668 = vrot.lane.b32.xlu1 %v3656_v22, %s4263_s12 }
0x5549   :  { %3680 = vrot.lane.b32.xlu1 %v3666_v24, %s5674_s27  ;;  %s5698_s27 = smov 20  }
0x55b3   :  { %v3660_v25 = vpop.permute.xlu1 %3659 }
0x55b4   :  { %v3662_v56 = vadd.f32 %v3660_v25, %v3629_v13 }
0x55b6   :  { %v3673_v26 = vmul.f32 25.0, %v3662_v56  ;;  %v3684_v27 = vmul.f32 0.01, %v3662_v56 }
0x55b7   :  { %v3669_v28 = vpop.permute.xlu1 %3668 }
0x55b8   :  { %3675 = vrot.lane.b32.xlu0 %v3673_v26, %s4265_s14  ;;  %v3671_v4 = vsub.f32 %v4621_v42, %v3669_v28 }
0x55ba   :  { %v3672_v36 = vmul.f32 156.25, %v3671_v4 }
0x55bb   :  { %v3681_v40 = vpop.permute.xlu1 %3680 }
0x55bc   :  { %3686 = vrot.lane.b32.xlu0 %v3684_v27, %s4264_s13 }
0x55c0   :  { %3703 = vrot.lane.b32.xlu0 %v4624_v44, %s5675_s23  ;;  %s5699_s23 = smov 38  }
0x562a   :  { %v3676_v37 = vpop.permute.xlu0 %3675 }
0x562b   :  { %v3678_v38 = vsub.f32 %v3672_v36, %v3676_v37 }
0x562d   :  { %v3683_v43 = vadd.f32 %v3681_v40, %v3678_v38 }
0x562e   :  { %v3687_v45 = vpop.permute.xlu0 %3686 }
0x562f   :  { %v3690_v47 = vmul.f32 0.01, %v3683_v43  ;;  %v5442_v48 = vadd.f32 %v3687_v45, %v3656_v22 }
0x5631   :  { %3692 = vrot.lane.b32.xlu1 %v3690_v47, %s4267_s6 }
0x5632   :  { %v3704_v49 = vpop.permute.xlu0 %3703 }
0x5633   :  { %v3706_v52 = vmul.f32 %v3704_v49, %v4642_v63 }
0x5635   :  { %3708 = vrot.lane.b32.xlu1 %v5442_v48, %s4263_s12 }
0x5639   :  { %3720 = vrot.lane.b32.xlu1 %v3706_v52, %s5676_s24 }
0x56a3   :  { %v3693_v53 = vpop.permute.xlu1 %3692 }
0x56a4   :  { %v3695_v54 = vadd.f32 %v3693_v53, %v3662_v56 }
0x56a6   :  { %v3713_v55 = vmul.f32 25.0, %v3695_v54  ;;  %v3724_v58 = vmul.f32 0.01, %v3695_v54 }
0x56a7   :  { %v3709_v59 = vpop.permute.xlu1 %3708 }
0x56a8   :  { %3715 = vrot.lane.b32.xlu0 %v3713_v55, %s4265_s14  ;;  %v3711_v60 = vsub.f32 %v4621_v42, %v3709_v59 }
0x56aa   :  { %v3712_v46 = vmul.f32 156.25, %v3711_v60 }
0x56ab   :  { %v3721_v0 = vpop.permute.xlu1 %3720 }
0x56ac   :  { %3726 = vrot.lane.b32.xlu0 %v3724_v58, %s4264_s13 }
0x56b0   :  { %3736 = vrot.lane.b32.xlu0 %v4624_v44, %s5677_s26  ;;  %s5701_s26 = smov 74  }
0x571a   :  { %v3716_v61 = vpop.permute.xlu0 %3715 }
0x571b   :  { %v3718_v62 = vsub.f32 %v3712_v46, %v3716_v61 }
0x571d   :  { %v3723_v1 = vadd.f32 %v3721_v0, %v3718_v62 }
0x571e   :  { %v3727_v2 = vpop.permute.xlu0 %3726 }
0x571f   :  { %v3730_v3 = vmul.f32 0.01, %v3723_v1  ;;  %v3729_v50 = vadd.f32 %v3727_v2, %v5442_v48 }
0x5721   :  { %3732 = vrot.lane.b32.xlu1 %v3730_v3, %s4267_s6 }
0x5722   :  { %v3737_v5 = vpop.permute.xlu0 %3736 }
0x5723   :  { %v3739_v6 = vmul.f32 %v3737_v5, %v4642_v63 }
0x5725   :  { %3741 = vrot.lane.b32.xlu1 %v3729_v50, %s4263_s12 }
0x5729   :  { %3753 = vrot.lane.b32.xlu1 %v3739_v6, %s5678_s28 }
0x5793   :  { %v3733_v7 = vpop.permute.xlu1 %3732 }
0x5794   :  { %v3735_v41 = vadd.f32 %v3733_v7, %v3695_v54 }
0x5796   :  { %v3746_v9 = vmul.f32 25.0, %v3735_v41  ;;  %v3757_v10 = vmul.f32 0.01, %v3735_v41 }
0x5797   :  { %v3742_v11 = vpop.permute.xlu1 %3741 }
0x5798   :  { %3748 = vrot.lane.b32.xlu0 %v3746_v9, %s4265_s14  ;;  %v3744_v12 = vsub.f32 %v4621_v42, %v3742_v11 }
0x579a   :  { %v3745_v13 = vmul.f32 156.25, %v3744_v12 }
0x579b   :  { %v3754_v51 = vpop.permute.xlu1 %3753 }
0x579c   :  { %3759 = vrot.lane.b32.xlu0 %v3757_v10, %s4264_s13 }
0x57a0   :  { %3769 = vrot.lane.b32.xlu0 %v4624_v44, %s5679_s29 }
0x580a   :  { %v3749_v14 = vpop.permute.xlu0 %3748 }
0x580b   :  { %v3751_v15 = vsub.f32 %v3745_v13, %v3749_v14 }
0x580d   :  { %v3756_v16 = vadd.f32 %v3754_v51, %v3751_v15 }
0x580e   :  { %v3760_v17 = vpop.permute.xlu0 %3759 }
0x580f   :  { %v3763_v8 = vmul.f32 0.01, %v3756_v16  ;;  %v3762_v57 = vadd.f32 %v3760_v17, %v3729_v50 }
0x5811   :  { %3765 = vrot.lane.b32.xlu1 %v3763_v8, %s4267_s6 }
0x5812   :  { %v3770_v18 = vpop.permute.xlu0 %3769 }
0x5813   :  { %v3772_v19 = vmul.f32 %v3770_v18, %v4642_v63 }
0x5815   :  { %3774 = vrot.lane.b32.xlu1 %v3762_v57, %s4263_s12 }
0x5819   :  { %3786 = vrot.lane.b32.xlu1 %v3772_v19, %s5680_s5 }
0x5883   :  { %v3766_v20 = vpop.permute.xlu1 %3765 }
0x5884   :  { %v3768_v21 = vadd.f32 %v3766_v20, %v3735_v41 }
0x5886   :  { %v3779_v22 = vmul.f32 25.0, %v3768_v21  ;;  %v3790_v23 = vmul.f32 0.01, %v3768_v21 }
0x5887   :  { %v3775_v24 = vpop.permute.xlu1 %3774 }
0x5888   :  { %3781 = vrot.lane.b32.xlu0 %v3779_v22, %s4265_s14  ;;  %v3777_v25 = vsub.f32 %v4621_v42, %v3775_v24 }
0x588a   :  { %v3778_v56 = vmul.f32 156.25, %v3777_v25 }
0x588b   :  { %v3787_v28 = vpop.permute.xlu1 %3786 }
0x588c   :  { %3792 = vrot.lane.b32.xlu0 %v3790_v23, %s4264_s13 }
0x5890   :  { %3802 = vrot.lane.b32.xlu0 %v4624_v44, %s5681_s7 }
0x58fa   :  { %v3782_v26 = vpop.permute.xlu0 %3781 }
0x58fb   :  { %v3784_v27 = vsub.f32 %v3778_v56, %v3782_v26 }
0x58fd   :  { %v3789_v4 = vadd.f32 %v3787_v28, %v3784_v27 }
0x58fe   :  { %v3793_v36 = vpop.permute.xlu0 %3792 }
0x58ff   :  { %v3796_v37 = vmul.f32 0.01, %v3789_v4  ;;  %v3795_v38 = vadd.f32 %v3793_v36, %v3762_v57 }
0x5901   :  { %3798 = vrot.lane.b32.xlu1 %v3796_v37, %s4267_s6 }
0x5902   :  { %v3803_v40 = vpop.permute.xlu0 %3802 }
0x5903   :  { %v3805_v43 = vmul.f32 %v3803_v40, %v4642_v63 }
0x5905   :  { %3807 = vrot.lane.b32.xlu1 %v3795_v38, %s4263_s12 }
0x5909   :  { %3819 = vrot.lane.b32.xlu1 %v3805_v43, %s5682_s8 }
0x5973   :  { %v3799_v45 = vpop.permute.xlu1 %3798 }
0x5974   :  { %v3801_v47 = vadd.f32 %v3799_v45, %v3768_v21 }
0x5976   :  { %v3812_v49 = vmul.f32 25.0, %v3801_v47  ;;  %v3823_v52 = vmul.f32 0.01, %v3801_v47 }
0x5977   :  { %v3808_v53 = vpop.permute.xlu1 %3807 }
0x5978   :  { %3814 = vrot.lane.b32.xlu0 %v3812_v49, %s4265_s14  ;;  %v3810_v54 = vsub.f32 %v4621_v42, %v3808_v53 }
0x597a   :  { %v3811_v55 = vmul.f32 156.25, %v3810_v54 }
0x597b   :  { %v3820_v60 = vpop.permute.xlu1 %3819 }
0x597c   :  { %3825 = vrot.lane.b32.xlu0 %v3823_v52, %s4264_s13 }
0x5980   :  { %3835 = vrot.lane.b32.xlu0 %v4624_v44, %s5683_s15 }
0x59ea   :  { %v3815_v58 = vpop.permute.xlu0 %3814 }
0x59eb   :  { %v3817_v59 = vsub.f32 %v3811_v55, %v3815_v58 }
0x59ed   :  { %v3822_v46 = vadd.f32 %v3820_v60, %v3817_v59 }
0x59ee   :  { %v3826_v61 = vpop.permute.xlu0 %3825 }
0x59ef   :  { %v3829_v62 = vmul.f32 0.01, %v3822_v46  ;;  %v3828_v0 = vadd.f32 %v3826_v61, %v3795_v38 }
0x59f1   :  { %3831 = vrot.lane.b32.xlu1 %v3829_v62, %s4267_s6 }
0x59f2   :  { %v3836_v1 = vpop.permute.xlu0 %3835 }
0x59f3   :  { %v3838_v2 = vmul.f32 %v3836_v1, %v4642_v63 }
0x59f5   :  { %3840 = vrot.lane.b32.xlu1 %v3828_v0, %s4263_s12 }
0x59f9   :  { %3852 = vrot.lane.b32.xlu1 %v3838_v2, %s5684_s3 }
0x5a63   :  { %v3832_v3 = vpop.permute.xlu1 %3831 }
0x5a64   :  { %v3834_v50 = vadd.f32 %v3832_v3, %v3801_v47 }
0x5a66   :  { %v3845_v5 = vmul.f32 25.0, %v3834_v50  ;;  %v3856_v6 = vmul.f32 0.01, %v3834_v50 }
0x5a67   :  { %v3841_v7 = vpop.permute.xlu1 %3840 }
0x5a68   :  { %3847 = vrot.lane.b32.xlu0 %v3845_v5, %s4265_s14  ;;  %v3843_v41 = vsub.f32 %v4621_v42, %v3841_v7 }
0x5a6a   :  { %v3844_v9 = vmul.f32 156.25, %v3843_v41 }
0x5a6b   :  { %v3853_v12 = vpop.permute.xlu1 %3852 }
0x5a6c   :  { %3858 = vrot.lane.b32.xlu0 %v3856_v6, %s4264_s13 }
0x5a70   :  { %3868 = vrot.lane.b32.xlu0 %v4624_v44, %s5685_s30 }
0x5ada   :  { %v3848_v10 = vpop.permute.xlu0 %3847 }
0x5adb   :  { %v3850_v11 = vsub.f32 %v3844_v9, %v3848_v10 }
0x5add   :  { %v3855_v13 = vadd.f32 %v3853_v12, %v3850_v11 }
0x5ade   :  { %v3859_v14 = vpop.permute.xlu0 %3858 }
0x5adf   :  { %v3862_v15 = vmul.f32 0.01, %v3855_v13  ;;  %v3861_v51 = vadd.f32 %v3859_v14, %v3828_v0 }
0x5ae1   :  { %3864 = vrot.lane.b32.xlu1 %v3862_v15, %s4267_s6 }
0x5ae2   :  { %v3869_v16 = vpop.permute.xlu0 %3868 }
0x5ae3   :  { %v3871_v17 = vmul.f32 %v3869_v16, %v4642_v63 }
0x5ae5   :  { %3873 = vrot.lane.b32.xlu1 %v3861_v51, %s4263_s12 }
0x5ae9   :  { %3885 = vrot.lane.b32.xlu1 %v3871_v17, %s5686_s10  ;;  %v4259_v17 = vld [vmem:[%s5588_s0] sm:$0x3]  ;;  %s5696_s0 = smov 65  }
0x5b53   :  { %v3865_v8 = vpop.permute.xlu1 %3864 }
0x5b54   :  { %v3867_v57 = vadd.f32 %v3865_v8, %v3834_v50  ;;  %v964_v8 = vsub.f32 %v4712_v34, %v4259_v17 }
0x5b56   :  { %v3878_v18 = vmul.f32 25.0, %v3867_v57  ;;  %v3889_v19 = vmul.f32 0.01, %v3867_v57 }
0x5b57   :  { %v3874_v20 = vpop.permute.xlu1 %3873 }
0x5b58   :  { %3880 = vrot.lane.b32.xlu0 %v3878_v18, %s4265_s14  ;;  %v3876_v21 = vsub.f32 %v4621_v42, %v3874_v20  ;;  %v3010_v18 = vsub.f32 %v5250_v35, %v5158_v33 }
0x5b5a   :  { %v3877_v22 = vmul.f32 156.25, %v3876_v21 }
0x5b5b   :  { %v3886_v25 = vpop.permute.xlu1 %3885 }
0x5b5c   :  { %3891 = vrot.lane.b32.xlu0 %v3889_v19, %s4264_s13  ;;  %v3696_v19 = vsub.f32 %v5442_v48, %v5346_v39 }
0x5b60   :  { %3901 = vrot.lane.b32.xlu0 %v4624_v44, %s5687_s2 }
0x5bca   :  { %v3881_v23 = vpop.permute.xlu0 %3880 }
0x5bcb   :  { %v3883_v24 = vsub.f32 %v3877_v22, %v3881_v23 }
0x5bcd   :  { %v3888_v56 = vadd.f32 %v3886_v25, %v3883_v24 }
0x5bce   :  { %v3892_v26 = vpop.permute.xlu0 %3891 }
0x5bcf   :  { %v3895_v27 = vmul.f32 0.01, %v3888_v56  ;;  %v3894_v28 = vadd.f32 %v3892_v26, %v3861_v51 }
0x5bd1   :  { %3897 = vrot.lane.b32.xlu1 %v3895_v27, %s4267_s6 }
0x5bd2   :  { %v3902_v4 = vpop.permute.xlu0 %3901 }
0x5bd3   :  { %v3904_v36 = vmul.f32 %v3902_v4, %v4642_v63 }
0x5bd5   :  { %3906 = vrot.lane.b32.xlu1 %v3894_v28, %s4263_s12 }
0x5bd9   :  { %3918 = vrot.lane.b32.xlu1 %v3904_v36, %s5688_s11 }
0x5c43   :  { %v3898_v37 = vpop.permute.xlu1 %3897 }
0x5c44   :  { %v3900_v38 = vadd.f32 %v3898_v37, %v3867_v57  ;;  %v2330_v57 = vsub.f32 %v5062_v30, %v4966_v29 }
0x5c46   :  { %v3911_v40 = vmul.f32 25.0, %v3900_v38  ;;  %v3922_v43 = vmul.f32 0.01, %v3900_v38 }
0x5c47   :  { %v3907_v45 = vpop.permute.xlu1 %3906 }
0x5c48   :  { %3913 = vrot.lane.b32.xlu0 %v3911_v40, %s4265_s14  ;;  %v3909_v47 = vsub.f32 %v4621_v42, %v3907_v45  ;;  %v2673_v40 = vsub.f32 %v5158_v33, %v5062_v30 }
0x5c4a   :  { %v3910_v49 = vmul.f32 156.25, %v3909_v47 }
0x5c4b   :  { %v3919_v54 = vpop.permute.xlu1 %3918 }
0x5c4c   :  { %3924 = vrot.lane.b32.xlu0 %v3922_v43, %s4264_s13  ;;  %v3353_v43 = vsub.f32 %v5346_v39, %v5250_v35 }
0x5c50   :  { %3934 = vrot.lane.b32.xlu0 %v4624_v44, %s5689_s16 }
0x5cba   :  { %v3914_v52 = vpop.permute.xlu0 %3913 }
0x5cbb   :  { %v3916_v53 = vsub.f32 %v3910_v49, %v3914_v52 }
0x5cbd   :  { %v3921_v55 = vadd.f32 %v3919_v54, %v3916_v53 }
0x5cbe   :  { %v3925_v58 = vpop.permute.xlu0 %3924 }
0x5cbf   :  { %v3928_v59 = vmul.f32 0.01, %v3921_v55  ;;  %v3927_v60 = vadd.f32 %v3925_v58, %v3894_v28 }
0x5cc1   :  { %3930 = vrot.lane.b32.xlu1 %v3928_v59, %s4267_s6 }
0x5cc2   :  { %v3935_v46 = vpop.permute.xlu0 %3934 }
0x5cc3   :  { %v3937_v61 = vmul.f32 %v3935_v46, %v4642_v63 }
0x5cc5   :  { %3939 = vrot.lane.b32.xlu1 %v3927_v60, %s4263_s12 }
0x5cc9   :  { %3951 = vrot.lane.b32.xlu1 %v3937_v61, %s5690_s17 }
0x5d33   :  { %v3931_v62 = vpop.permute.xlu1 %3930 }
0x5d34   :  { %v3933_v0 = vadd.f32 %v3931_v62, %v3900_v38  ;;  %v1987_v38 = vsub.f32 %v4966_v29, %v4872_v31 }
0x5d36   :  { %v3944_v1 = vmul.f32 25.0, %v3933_v0  ;;  %v3955_v2 = vmul.f32 0.01, %v3933_v0 }
0x5d37   :  { %v3940_v3 = vpop.permute.xlu1 %3939 }
0x5d38   :  { %3946 = vrot.lane.b32.xlu0 %v3944_v1, %s4265_s14  ;;  %v3942_v50 = vsub.f32 %v4621_v42, %v3940_v3 }
0x5d3a   :  { %v3943_v5 = vmul.f32 156.25, %v3942_v50 }
0x5d3b   :  { %v3952_v41 = vpop.permute.xlu1 %3951 }
0x5d3c   :  { %3957 = vrot.lane.b32.xlu0 %v3955_v2, %s4264_s13 }
0x5d40   :  { %3967 = vrot.lane.b32.xlu0 %v4624_v44, %s5691_s18 }
0x5daa   :  { %v3947_v6 = vpop.permute.xlu0 %3946 }
0x5dab   :  { %v3949_v7 = vsub.f32 %v3943_v5, %v3947_v6 }
0x5dad   :  { %v3954_v9 = vadd.f32 %v3952_v41, %v3949_v7 }
0x5dae   :  { %v3958_v10 = vpop.permute.xlu0 %3957 }
0x5daf   :  { %v3961_v11 = vmul.f32 0.01, %v3954_v9  ;;  %v3960_v12 = vadd.f32 %v3958_v10, %v3927_v60 }
0x5db1   :  { %3963 = vrot.lane.b32.xlu1 %v3961_v11, %s4267_s6 }
0x5db2   :  { %v3968_v13 = vpop.permute.xlu0 %3967 }
0x5db3   :  { %v3970_v14 = vmul.f32 %v3968_v13, %v4642_v63  ;;  %v1650_v63 = vsub.f32 %v4872_v31, %v4794_v32 }
0x5db5   :  { %3972 = vrot.lane.b32.xlu1 %v3960_v12, %s4263_s12 }
0x5db9   :  { %3984 = vrot.lane.b32.xlu1 %v3970_v14, %s5692_s1 }
0x5e23   :  { %v3964_v44 = vpop.permute.xlu1 %3963 }
0x5e24   :  { %v3966_v15 = vadd.f32 %v3964_v44, %v3933_v0 }
0x5e26   :  { %v3977_v51 = vmul.f32 25.0, %v3966_v15  ;;  %v3988_v16 = vmul.f32 0.01, %v3966_v15 }
0x5e27   :  { %v3973_v20 = vpop.permute.xlu1 %3972 }
0x5e28   :  { %3990 = vrot.lane.b32.xlu1 %v3988_v16, %s4264_s13  ;;  %3979 = vrot.lane.b32.xlu0 %v3977_v51, %s4265_s14  ;;  %s5695_s14 = smov 47   ;;  %v3975_v21 = vsub.f32 %v4621_v42, %v3973_v20  ;;  %v1307_v42 = vsub.f32 %v4794_v32, %v4712_v34 }
0x5e2a   :  { %v3976_v23 = vmul.f32 156.25, %v3975_v21 }
0x5e2b   :  { %v3985_v22 = vpop.permute.xlu1 %3984 }
0x5e2c   :  { %966 = vrot.lane.b32.xlu1 %v964_v8, %s4263_s12 }
0x5e30   :  { %1652 = vrot.lane.b32.xlu1 %v1650_v63, %s5693_s21 }
0x5e34   :  { %2332 = vrot.lane.b32.xlu1 %v2330_v57, %s5694_s22 }
0x5e38   :  { %3012 = vrot.lane.b32.xlu1 %v3010_v18, %s5695_s14 }
0x5e3c   :  { %3698 = vrot.lane.b32.xlu1 %v3696_v19, %s5696_s0 }
0x5e9a   :  { %v3980_v24 = vpop.permute.xlu0 %3979  ;;  %v3991_v25 = vpop.permute.xlu1 %3990 }
0x5e9b   :  { %v3982_v56 = vsub.f32 %v3976_v23, %v3980_v24  ;;  %v3993_v45 = vadd.f32 %v3991_v25, %v3960_v12 }
0x5e9d   :  { %v3987_v26 = vadd.f32 %v3985_v22, %v3982_v56 }
0x5e9e   :  { %v967_v27 = vpop.permute.xlu1 %966 }
0x5e9f   :  { %v3994_v28 = vmul.f32 0.01, %v3987_v26  ;;  %970 = vst.msk [vmem:[%s5596_s9] sm:$0x3] %vm969_vm8, %v967_v27 }
0x5ea1   :  { %3996 = vrot.lane.b32.xlu0 %v3994_v28, %s4267_s6  ;;  %s5700_s6 = smov 56  }
0x5ea2   :  { %v1653_v47 = vpop.permute.xlu1 %1652 }
0x5ea6   :  { %v2333_v29 = vpop.permute.xlu1 %2332 }
0x5eaa   :  { %v3013_v33 = vpop.permute.xlu1 %3012 }
0x5f13   :  { %v3997_v4 = vpop.permute.xlu0 %3996 }
0x5f14   :  { %v3999_v36 = vadd.f32 %v3997_v4, %v3966_v15 }
0x5f16   :  { %v4000_v37 = vmul.f32 0.01, %v3999_v36 }
0x5f18   :  { %4002 = vrot.lane.b32.xlu0 %v4000_v37, %s4264_s13 }
0x5f1c   :  { %1309 = vrot.lane.b32.xlu0 %v1307_v42, %s5697_s25 }
0x5f20   :  { %1989 = vrot.lane.b32.xlu0 %v1987_v38, %s5698_s27 }
0x5f24   :  { %2675 = vrot.lane.b32.xlu0 %v2673_v40, %s5699_s23 }
0x5f28   :  { %3355 = vrot.lane.b32.xlu0 %v3353_v43, %s5700_s6 }
0x5f8a   :  { %v4003_v34 = vpop.permute.xlu0 %4002 }
0x5f8b   :  { %v4005_v32 = vadd.f32 %v4003_v34, %v3993_v45 }
0x5f8d   :  { %v4006_v49 = vsub.f32 %v4005_v32, %v5442_v48  ;;  %v3699_v48 = vpop.permute.xlu1 %3698 }
0x5f8e   :  { %v1310_v31 = vpop.permute.xlu0 %1309 }
0x5f8f   :  { %1313 = vst.msk [vmem:[%s5596_s9] sm:$0x3] %vm1312_vm9, %v1310_v31  ;;  %4008 = vrot.lane.b32.xlu0 %v4006_v49, %s5701_s26 }
0x5f90   :  { %1656 = vst.msk [vmem:[%s5596_s9] sm:$0x3] %vm1655_vm10, %v1653_v47 }
0x5f92   :  { %v1990_v30 = vpop.permute.xlu0 %1989 }
0x5f93   :  { %1993 = vst.msk [vmem:[%s5596_s9] sm:$0x3] %vm1992_vm11, %v1990_v30 }
0x5f94   :  { %2336 = vst.msk [vmem:[%s5596_s9] sm:$0x3] %vm2335_vm12, %v2333_v29 }
0x5f96   :  { %v2676_v35 = vpop.permute.xlu0 %2675 }
0x5f97   :  { %2679 = vst.msk [vmem:[%s5596_s9] sm:$0x3] %vm2678_vm13, %v2676_v35 }
0x5f98   :  { %3016 = vst.msk [vmem:[%s5596_s9] sm:$0x3] %vm3015_vm14, %v3013_v33 }
0x5f9a   :  { %v3356_v39 = vpop.permute.xlu0 %3355 }
0x5f9b   :  { %3359 = vst.msk [vmem:[%s5596_s9] sm:$0x3] %vm3358_vm15, %v3356_v39 }
0x5f9c   :  { %3702 = vst.msk [vmem:[%s5596_s9] sm:$0x3] %vm3701_vm0, %v3699_v48 }
0x6001   :  { %v4009_v52 = vpop.permute.xlu0 %4008 }
0x6002   :  { %4012 = vst.msk [vmem:[%s5596_s9] sm:$0x3] %vm4011_vm1, %v4009_v52 }

</bundles_post_ra>
